<compile_context>
chip_gen: v7x
topology: tpu7x:2x2x1
jax: 0.10.0
libtpu: 0.0.40
codegen_flags: <defaults>
</compile_context>

<pallas_src>
import functools

import jax
import jax.numpy as jnp
from jax.experimental import pallas as pl
from jax.experimental.pallas import tpu as pltpu


# ---------------------------------------------------------------------------
# Pallas kernel: the whole hyper-network / mixing hot path for a tile of N.
# ---------------------------------------------------------------------------
def qmix_kernel(hep, ep,
                s_ref, q_ref,
                wcat_ref, bcat_ref,          # fused first layer (D, 2*HEp+2*Ep)
                w1b_ref, b1b_ref,            # hyper_w_1 layer 2 (HEp, K*E) dense
                expand_ref,                  # (K, K*E) block "broadcast" matrix
                red_ref,                     # (K*E, Ep) block "reduce" matrix
                wfb_ref, bfb_ref,            # hyper_w_final layer 2 (HEp, Ep)
                wvb_ref, bvb_ref,            # V layer 2 as a row (1, Ep), (1, 1)
                out_ref):
    HEp, Ep = hep, ep
    f32, bf16 = jnp.float32, jnp.bfloat16

    s = s_ref[...]                      # (TN, D)  bf16 — fed straight to MXU
    q = q_ref[...]                      # (TN, K)  bf16

    # ---- single fused first-layer matmul over s (bf16 x bf16 -> f32 acc) ----
    h = jnp.dot(s, wcat_ref[...], preferred_element_type=f32) + bcat_ref[...]
    h1 = jnp.maximum(h[:, 0:HEp], 0.0)                     # hyper_w_1 hidden
    h2 = jnp.maximum(h[:, HEp:2 * HEp], 0.0)               # hyper_w_final hidden
    hv = jnp.maximum(h[:, 2 * HEp:2 * HEp + Ep], 0.0)      # V hidden
    b1 = h[:, 2 * HEp + Ep:2 * HEp + 2 * Ep]               # hyper_b_1 (no ReLU)

    # ---- hyper_w_1 second layer, abs -> (TN, K*E) (dense, no E padding) ----
    w1 = jnp.abs(jnp.dot(h1.astype(bf16), w1b_ref[...],
                         preferred_element_type=f32) + b1b_ref[...])

    # ---- bmm(agent_qs (TN,1,K), w1 (TN,K,E)) + b1 -> (TN, Ep) ----
    # Broadcast each agent q across its E-lane chunk with one MXU pass
    # (q @ expand, exact 0/1 weights), one VPU multiply, then reduce the K
    # chunks back to Ep lanes with a second 0/1 MXU matmul (R).
    q_exp = jnp.dot(q, expand_ref[...], preferred_element_type=f32)   # (TN, K*E)
    p = (q_exp * w1).astype(bf16)                                     # (TN, K*E)
    hp = jnp.dot(p, red_ref[...], preferred_element_type=f32) + b1    # (TN, Ep)

    # ELU (alpha = 1), exp argument clamped so the unselected branch is finite.
    hidden = jnp.where(hp > 0.0, hp, jnp.exp(jnp.minimum(hp, 0.0)) - 1.0)

    # ---- hyper_w_final second layer, abs -> (TN, Ep) ----
    wf = jnp.abs(jnp.dot(h2.astype(bf16), wfb_ref[...],
                         preferred_element_type=f32) + bfb_ref[...])

    # ---- y = sum_e hidden*wf + (V second layer as lane reduce) + bvb ----
    # No width-1 MXU matmul; the reduce is done in a lane-dense row layout:
    # transpose the well-tiled (TN, Ep) product once (XLU) and reduce sublanes.
    z = hidden * wf + hv * wvb_ref[...]                    # (TN, Ep) f32
    y_row = jnp.sum(jnp.transpose(z), axis=0, keepdims=True) + bvb_ref[...]
    out_ref[...] = y_row.reshape(1, 1, -1).astype(out_ref.dtype)


# ---------------------------------------------------------------------------
# Weight packing: fuse / pad / align the hyper-net weights once.
# ---------------------------------------------------------------------------
def _round_up(x, m):
    return (x + m - 1) // m * m


def pack_mixer_weights(params, *, n_agents, action_shape, embed_dim,
                       hypernet_embed):
    K = n_agents * action_shape
    E, HE = embed_dim, hypernet_embed
    Ep, HEp = _round_up(E, 128), _round_up(HE, 128)
    f32, bf16 = jnp.float32, jnp.bfloat16

    def pad_cols(w, cols):
        return jnp.pad(w.astype(f32), ((0, 0), (0, cols - w.shape[1])))

    def pad_rows_cols(w, rows, cols):
        return jnp.pad(w.astype(f32),
                       ((0, rows - w.shape[0]), (0, cols - w.shape[1])))

    # Fused first layer: [hyper_w_1 L1 | hyper_w_final L1 | V L1 | hyper_b_1]
    # Weights in bf16 (MXU-native); biases stay f32 and are added post-matmul.
    wcat = jnp.concatenate([pad_cols(params["w1a"], HEp),
                            pad_cols(params["wfa"], HEp),
                            pad_cols(params["wva"], Ep),
                            pad_cols(params["wb1"], Ep)], axis=1).astype(bf16)
    bcat = jnp.concatenate([pad_cols(params["b1a"], HEp),
                            pad_cols(params["bfa"], HEp),
                            pad_cols(params["bva"], Ep),
                            pad_cols(params["bb1"], Ep)], axis=1)        # f32

    # hyper_w_1 L2: rows padded HE -> HEp, K*E kept DENSE (already 128-aligned
    # for these shapes; correctness does not depend on that).
    w1b = jnp.pad(params["w1b"].astype(f32),
                  ((0, HEp - HE), (0, 0))).astype(bf16)                  # (HEp, K*E)
    b1b = params["b1b"].astype(f32).reshape(1, K * E)                    # f32

    wfb = pad_rows_cols(params["wfb"], HEp, Ep).astype(bf16)             # (HEp, Ep)
    bfb = pad_cols(params["bfb"], Ep)                                    # (1, Ep) f32

    wvb = pad_cols(params["wvb"].astype(f32).T, Ep)                      # (1, Ep) f32
    bvb = params["bvb"].astype(f32)                                      # (1, 1)  f32

    # q (N,K) @ expand -> (N, K*E): agent k broadcast across its E lanes.
    expand = jnp.kron(jnp.eye(K, dtype=f32),
                      jnp.ones((1, E), f32)).astype(bf16)                # (K, K*E)
    # (q_exp*w1) (N,K*E) @ red -> (N, Ep): sum over agents per embed lane.
    red = jnp.kron(jnp.ones((K, 1), f32), jnp.eye(E, dtype=f32))
    red = jnp.pad(red, ((0, 0), (0, Ep - E))).astype(bf16)               # (K*E, Ep)

    return dict(wcat=wcat, bcat=bcat, w1b=w1b, b1b=b1b, expand=expand, red=red,
                wfb=wfb, bfb=bfb, wvb=wvb, bvb=bvb,
                K=K, E=E, Ep=Ep, HEp=HEp)


# ---------------------------------------------------------------------------
# Wrapper: pallas_call with N tiled, weights as full (resident) VMEM blocks.
# ---------------------------------------------------------------------------
def qmix_mix(states_feat, agent_qs_flat, packed, *, tile_n, min_tiles=1):
    N, D = states_feat.shape
    K = agent_qs_flat.shape[1]
    HEp, Ep = packed["HEp"], packed["Ep"]

    # Pad N up to a tile multiple.  min_tiles=2 is recommended on v7x so the
    # "parallel" grid axis shards across both TensorCores.
    num_tiles = max(min_tiles, pl.cdiv(N, tile_n))
    pad = num_tiles * tile_n - N
    if pad:
        states_feat = jnp.pad(states_feat, ((0, pad), (0, 0)))
        agent_qs_flat = jnp.pad(agent_qs_flat, ((0, pad), (0, 0)))

    # Stream the only N-scaling inputs in bf16 (halves DMA, MXU-native).
    s_bf = states_feat.astype(jnp.bfloat16)
    q_bf = agent_qs_flat.astype(jnp.bfloat16)

    weight_keys = ["wcat", "bcat", "w1b", "b1b", "expand", "red",
                   "wfb", "bfb", "wvb", "bvb"]
    weights = [packed[k] for k in weight_keys]

    def full_spec(a):
        nd = a.ndim
        return pl.BlockSpec(a.shape, lambda i: (0,) * nd)

    in_specs = [
        pl.BlockSpec((tile_n, D), lambda i: (i, 0)),   # state features (bf16)
        pl.BlockSpec((tile_n, K), lambda i: (i, 0)),   # agent q values (bf16)
    ] + [full_spec(w) for w in weights]

    # Lane-dense output: one (1, 1, tile_n) row block per grid step.
    out_spec = pl.BlockSpec((1, 1, tile_n), lambda i: (i, 0, 0))

    kernel = functools.partial(qmix_kernel, HEp, Ep)

    y = pl.pallas_call(
        kernel,
        out_shape=jax.ShapeDtypeStruct((num_tiles, 1, tile_n), jnp.float32),
        grid=(num_tiles,),
        in_specs=in_specs,
        out_specs=out_spec,
        compiler_params=pltpu.CompilerParams(
            dimension_semantics=("parallel",),
            # Clears v5e's 16 MiB default scoped limit; safe on v6e/v7x.
            # (For tile_n=1024 on v6e, raise toward 64-96 MiB.)
            vmem_limit_bytes=32 * 1024 * 1024),
    )(s_bf, q_bf, *weights)

    return y.reshape(-1)[:N].reshape(N, 1)


# ---------------------------------------------------------------------------
# JAX glue: CNN feature extractor stand-in + full forward.
# ---------------------------------------------------------------------------
def cnn_feature_extractor(states_nchw, conv_w, conv_b, fc_w, fc_b):
    # states_nchw: (N, C, H, W)  ->  features (N, state_dim)
    x = jnp.transpose(states_nchw, (0, 2, 3, 1))            # NCHW -> NHWC
    y = jax.lax.conv_general_dilated(
        x, conv_w, window_strides=(2, 2), padding="SAME",
        dimension_numbers=("NHWC", "HWIO", "NHWC"))
    y = jnp.maximum(y + conv_b, 0.0)
    y = y.reshape(y.shape[0], -1)
    return y @ fc_w + fc_b                                   # (N, state_dim)


def qmix_forward(agent_qs, states, params, cfg):
    """agent_qs: (bs, T, n_agents, action_shape); states: (bs, T, C, H, W)."""
    bs = agent_qs.shape[0]
    K = cfg["n_agents"] * cfg["action_shape"]

    states_flat = states.reshape((-1,) + states.shape[2:])   # (N, C, H, W)
    feats = cnn_feature_extractor(states_flat, params["conv_w"], params["conv_b"],
                                  params["fc_w"], params["fc_b"])
    feats = feats.reshape(-1, cfg["state_dim"])
    qs_flat = agent_qs.reshape(-1, K)

    packed = pack_mixer_weights(
        params, n_agents=cfg["n_agents"], action_shape=cfg["action_shape"],
        embed_dim=cfg["embed_dim"], hypernet_embed=cfg["hypernet_embed"])

    y = qmix_mix(feats, qs_flat, packed,
                 tile_n=cfg["tile_n"], min_tiles=cfg.get("min_tiles", 1))
    return y.reshape(bs, -1, 1)                              # q_tot: (bs, T, 1)


# Pure-JAX reference — same math and same matmul precision policy as the
# kernel (bf16 operands, f32 accumulation, f32 elementwise), no Pallas.
def qmix_forward_ref(agent_qs, states, params, cfg):
    bs = agent_qs.shape[0]
    K, E = cfg["n_agents"] * cfg["action_shape"], cfg["embed_dim"]
    f32, bf16 = jnp.float32, jnp.bfloat16

    def mm(a, b):
        return jnp.dot(a.astype(bf16), b.astype(bf16), preferred_element_type=f32)

    states_flat = states.reshape((-1,) + states.shape[2:])
    s = cnn_feature_extractor(states_flat, params["conv_w"], params["conv_b"],
                              params["fc_w"], params["fc_b"]).reshape(-1, cfg["state_dim"])
    s = s.astype(bf16)
    q = agent_qs.reshape(-1, K).astype(bf16).astype(f32)              # (N, K)

    h1 = jnp.maximum(mm(s, params["w1a"]) + params["b1a"], 0.0)
    w1 = jnp.abs(mm(h1, params["w1b"]) + params["b1b"]).reshape(-1, K, E)
    b1 = mm(s, params["wb1"]) + params["bb1"]                         # (N, E)
    p = (q[:, :, None] * w1).astype(bf16).astype(f32)                 # kernel rounding
    hp = p.sum(axis=1) + b1                                           # (N, E)
    hidden = jnp.where(hp > 0.0, hp, jnp.exp(jnp.minimum(hp, 0.0)) - 1.0)
    h2 = jnp.maximum(mm(s, params["wfa"]) + params["bfa"], 0.0)
    wf = jnp.abs(mm(h2, params["wfb"]) + params["bfb"])               # (N, E)
    hv = jnp.maximum(mm(s, params["wva"]) + params["bva"], 0.0)       # (N, E)
    v = hv @ params["wvb"] + params["bvb"]                            # (N, 1)
    y = (hidden * wf).sum(axis=1, keepdims=True) + v
    return y.reshape(bs, -1, 1)


# ---------------------------------------------------------------------------
# Main
# ---------------------------------------------------------------------------
if __name__ == "__main__":
    # Small, forward-consistent shapes (N = bs*T is padded to one 512-row tile).
    cfg = dict(state_dim=128, n_agents=4, action_shape=2,
               embed_dim=64, hypernet_embed=128, tile_n=512, min_tiles=1)
    bs, T = 2, 8
    C, H, W = 5, 16, 16
    D, HE, E = cfg["state_dim"], cfg["hypernet_embed"], cfg["embed_dim"]
    K = cfg["n_agents"] * cfg["action_shape"]

    key = jax.random.PRNGKey(0)
    ks = jax.random.split(key, 20)

    def init(k, shape, scale=0.05):
        return (scale * jax.random.normal(k, shape)).astype(jnp.float32)

    conv_out = 8
    flat = (H // 2) * (W // 2) * conv_out
    params = {
        # CNN feature-extractor stand-in
        "conv_w": init(ks[0], (3, 3, C, conv_out)),
        "conv_b": init(ks[1], (conv_out,)),
        "fc_w":   init(ks[2], (flat, D)),
        "fc_b":   init(ks[3], (1, D)),
        # hyper_w_1: D -> HE -> K*E
        "w1a": init(ks[4], (D, HE)),  "b1a": init(ks[5], (1, HE)),
        "w1b": init(ks[6], (HE, K * E)), "b1b": init(ks[7], (1, K * E)),
        # hyper_b_1: D -> E
        "wb1": init(ks[8], (D, E)),   "bb1": init(ks[9], (1, E)),
        # hyper_w_final: D -> HE -> E
        "wfa": init(ks[10], (D, HE)), "bfa": init(ks[11], (1, HE)),
        "wfb": init(ks[12], (HE, E)), "bfb": init(ks[13], (1, E)),
        # V: D -> E -> 1
        "wva": init(ks[14], (D, E)),  "bva": init(ks[15], (1, E)),
        "wvb": init(ks[16], (E, 1)),  "bvb": init(ks[17], (1, 1)),
    }

    agent_qs = jax.random.normal(ks[18], (bs, T, cfg["n_agents"], cfg["action_shape"]),
                                 dtype=jnp.float32)
    states = jax.random.normal(ks[19], (bs, T, C, H, W), dtype=jnp.float32)

    q_tot = qmix_forward(agent_qs, states, params, cfg)
    q_tot = jax.block_until_ready(q_tot)

    q_ref = qmix_forward_ref(agent_qs, states, params, cfg)
    assert q_tot.shape == (bs, T, 1)
    assert jnp.allclose(q_tot, q_ref, atol=1e-3, rtol=1e-3), "mismatch vs reference"

    print("KERNEL_OK")
</pallas_src>

<mosaic_0001>
module attributes {stable_mosaic.version = 11 : i64} {
  func.func @qmix_kernel(%arg0: i32, %arg1: memref<512x128xbf16, #tpu.memory_space<vmem>>, %arg2: memref<512x8xbf16, #tpu.memory_space<vmem>>, %arg3: memref<128x512xbf16, #tpu.memory_space<vmem>>, %arg4: memref<1x512xf32, #tpu.memory_space<vmem>>, %arg5: memref<128x512xbf16, #tpu.memory_space<vmem>>, %arg6: memref<1x512xf32, #tpu.memory_space<vmem>>, %arg7: memref<8x512xbf16, #tpu.memory_space<vmem>>, %arg8: memref<512x128xbf16, #tpu.memory_space<vmem>>, %arg9: memref<128x128xbf16, #tpu.memory_space<vmem>>, %arg10: memref<1x128xf32, #tpu.memory_space<vmem>>, %arg11: memref<1x128xf32, #tpu.memory_space<vmem>>, %arg12: memref<1x1xf32, #tpu.memory_space<vmem>>, %arg13: memref<1x1x512xf32, #tpu.memory_space<vmem>>) attributes {dimension_semantics = [#tpu.dimension_semantics<parallel>], iteration_bounds = array<i64: 1>, scalar_prefetch = 0 : i64, scratch_operands = 0 : i64, tpu.core_type = #tpu.core_type<tc>, window_params = [{transform_indices = @transform_0, window_bounds = array<i64: 512, 128>}, {transform_indices = @transform_1, window_bounds = array<i64: 512, 8>}, {pipeline_mode = #tpu.pipeline_mode<synchronous>, transform_indices = @transform_2, window_bounds = array<i64: 128, 512>}, {pipeline_mode = #tpu.pipeline_mode<synchronous>, transform_indices = @transform_3, window_bounds = array<i64: 1, 512>}, {pipeline_mode = #tpu.pipeline_mode<synchronous>, transform_indices = @transform_4, window_bounds = array<i64: 128, 512>}, {pipeline_mode = #tpu.pipeline_mode<synchronous>, transform_indices = @transform_5, window_bounds = array<i64: 1, 512>}, {pipeline_mode = #tpu.pipeline_mode<synchronous>, transform_indices = @transform_6, window_bounds = array<i64: 8, 512>}, {pipeline_mode = #tpu.pipeline_mode<synchronous>, transform_indices = @transform_7, window_bounds = array<i64: 512, 128>}, {pipeline_mode = #tpu.pipeline_mode<synchronous>, transform_indices = @transform_8, window_bounds = array<i64: 128, 128>}, {pipeline_mode = #tpu.pipeline_mode<synchronous>, transform_indices = @transform_9, window_bounds = array<i64: 1, 128>}, {pipeline_mode = #tpu.pipeline_mode<synchronous>, transform_indices = @transform_10, window_bounds = array<i64: 1, 128>}, {pipeline_mode = #tpu.pipeline_mode<synchronous>, transform_indices = @transform_11, window_bounds = array<i64: 1, 1>}, {transform_indices = @transform_12, window_bounds = array<i64: 1, 1, 512>}]} {
    %c0 = arith.constant 0 : index
    %c0_0 = arith.constant 0 : index
    %0 = vector.load %arg1[%c0, %c0_0] : memref<512x128xbf16, #tpu.memory_space<vmem>>, vector<512x128xbf16>
    %c0_1 = arith.constant 0 : index
    %c0_2 = arith.constant 0 : index
    %1 = vector.load %arg2[%c0_1, %c0_2] : memref<512x8xbf16, #tpu.memory_space<vmem>>, vector<512x8xbf16>
    %c0_3 = arith.constant 0 : index
    %c0_4 = arith.constant 0 : index
    %2 = vector.load %arg3[%c0_3, %c0_4] : memref<128x512xbf16, #tpu.memory_space<vmem>>, vector<128x512xbf16>
    %cst = arith.constant dense<0.000000e+00> : vector<512x512xf32>
    %3 = tpu.matmul %0, %2, %cst {dimension_numbers = #tpu.dot_dimension_numbers<[1], [0], [0], [1], [0, 0, 1, 1], [], []>} : vector<512x128xbf16>, vector<128x512xbf16>, vector<512x512xf32> -> vector<512x512xf32>
    %c0_5 = arith.constant 0 : index
    %c0_6 = arith.constant 0 : index
    %4 = vector.load %arg4[%c0_5, %c0_6] : memref<1x512xf32, #tpu.memory_space<vmem>>, vector<1x512xf32>
    %5 = vector.broadcast %4 : vector<1x512xf32> to vector<512x512xf32>
    %6 = arith.addf %3, %5 : vector<512x512xf32>
    %7 = vector.extract_strided_slice %6 {offsets = [0, 0], sizes = [512, 128], strides = [1, 1]} : vector<512x512xf32> to vector<512x128xf32>
    %cst_7 = arith.constant 0.000000e+00 : f32
    %8 = vector.broadcast %cst_7 : f32 to vector<512x128xf32>
    %9 = arith.maximumf %7, %8 : vector<512x128xf32>
    %10 = vector.extract_strided_slice %6 {offsets = [0, 128], sizes = [512, 128], strides = [1, 1]} : vector<512x512xf32> to vector<512x128xf32>
    %cst_8 = arith.constant 0.000000e+00 : f32
    %11 = vector.broadcast %cst_8 : f32 to vector<512x128xf32>
    %12 = arith.maximumf %10, %11 : vector<512x128xf32>
    %13 = vector.extract_strided_slice %6 {offsets = [0, 256], sizes = [512, 128], strides = [1, 1]} : vector<512x512xf32> to vector<512x128xf32>
    %cst_9 = arith.constant 0.000000e+00 : f32
    %14 = vector.broadcast %cst_9 : f32 to vector<512x128xf32>
    %15 = arith.maximumf %13, %14 : vector<512x128xf32>
    %16 = vector.extract_strided_slice %6 {offsets = [0, 384], sizes = [512, 128], strides = [1, 1]} : vector<512x512xf32> to vector<512x128xf32>
    %17 = arith.truncf %9 : vector<512x128xf32> to vector<512x128xbf16>
    %c0_10 = arith.constant 0 : index
    %c0_11 = arith.constant 0 : index
    %18 = vector.load %arg5[%c0_10, %c0_11] : memref<128x512xbf16, #tpu.memory_space<vmem>>, vector<128x512xbf16>
    %cst_12 = arith.constant dense<0.000000e+00> : vector<512x512xf32>
    %19 = tpu.matmul %17, %18, %cst_12 {dimension_numbers = #tpu.dot_dimension_numbers<[1], [0], [0], [1], [0, 0, 1, 1], [], []>} : vector<512x128xbf16>, vector<128x512xbf16>, vector<512x512xf32> -> vector<512x512xf32>
    %c0_13 = arith.constant 0 : index
    %c0_14 = arith.constant 0 : index
    %20 = vector.load %arg6[%c0_13, %c0_14] : memref<1x512xf32, #tpu.memory_space<vmem>>, vector<1x512xf32>
    %21 = vector.broadcast %20 : vector<1x512xf32> to vector<512x512xf32>
    %22 = arith.addf %19, %21 : vector<512x512xf32>
    %23 = math.absf %22 : vector<512x512xf32>
    %c0_15 = arith.constant 0 : index
    %c0_16 = arith.constant 0 : index
    %24 = vector.load %arg7[%c0_15, %c0_16] : memref<8x512xbf16, #tpu.memory_space<vmem>>, vector<8x512xbf16>
    %cst_17 = arith.constant dense<0.000000e+00> : vector<512x512xf32>
    %25 = tpu.matmul %1, %24, %cst_17 {dimension_numbers = #tpu.dot_dimension_numbers<[1], [0], [0], [1], [0, 0, 1, 1], [], []>} : vector<512x8xbf16>, vector<8x512xbf16>, vector<512x512xf32> -> vector<512x512xf32>
    %26 = arith.mulf %25, %23 : vector<512x512xf32>
    %27 = arith.truncf %26 : vector<512x512xf32> to vector<512x512xbf16>
    %c0_18 = arith.constant 0 : index
    %c0_19 = arith.constant 0 : index
    %28 = vector.load %arg8[%c0_18, %c0_19] : memref<512x128xbf16, #tpu.memory_space<vmem>>, vector<512x128xbf16>
    %cst_20 = arith.constant dense<0.000000e+00> : vector<512x128xf32>
    %29 = tpu.matmul %27, %28, %cst_20 {dimension_numbers = #tpu.dot_dimension_numbers<[1], [0], [0], [1], [0, 0, 1, 1], [], []>} : vector<512x512xbf16>, vector<512x128xbf16>, vector<512x128xf32> -> vector<512x128xf32>
    %30 = arith.addf %29, %16 : vector<512x128xf32>
    %cst_21 = arith.constant 0.000000e+00 : f32
    %31 = vector.broadcast %cst_21 : f32 to vector<512x128xf32>
    %32 = arith.cmpf ogt, %30, %31 : vector<512x128xf32>
    %cst_22 = arith.constant 0.000000e+00 : f32
    %33 = vector.broadcast %cst_22 : f32 to vector<512x128xf32>
    %34 = arith.minimumf %30, %33 : vector<512x128xf32>
    %35 = math.exp %34 : vector<512x128xf32>
    %cst_23 = arith.constant 1.000000e+00 : f32
    %36 = vector.broadcast %cst_23 : f32 to vector<512x128xf32>
    %37 = arith.subf %35, %36 : vector<512x128xf32>
    %38 = arith.select %32, %30, %37 : vector<512x128xi1>, vector<512x128xf32>
    %39 = arith.truncf %12 : vector<512x128xf32> to vector<512x128xbf16>
    %c0_24 = arith.constant 0 : index
    %c0_25 = arith.constant 0 : index
    %40 = vector.load %arg9[%c0_24, %c0_25] : memref<128x128xbf16, #tpu.memory_space<vmem>>, vector<128x128xbf16>
    %cst_26 = arith.constant dense<0.000000e+00> : vector<512x128xf32>
    %41 = tpu.matmul %39, %40, %cst_26 {dimension_numbers = #tpu.dot_dimension_numbers<[1], [0], [0], [1], [0, 0, 1, 1], [], []>} : vector<512x128xbf16>, vector<128x128xbf16>, vector<512x128xf32> -> vector<512x128xf32>
    %c0_27 = arith.constant 0 : index
    %c0_28 = arith.constant 0 : index
    %42 = vector.load %arg10[%c0_27, %c0_28] : memref<1x128xf32, #tpu.memory_space<vmem>>, vector<1x128xf32>
    %43 = vector.broadcast %42 : vector<1x128xf32> to vector<512x128xf32>
    %44 = arith.addf %41, %43 : vector<512x128xf32>
    %45 = math.absf %44 : vector<512x128xf32>
    %46 = arith.mulf %38, %45 : vector<512x128xf32>
    %c0_29 = arith.constant 0 : index
    %c0_30 = arith.constant 0 : index
    %47 = vector.load %arg11[%c0_29, %c0_30] : memref<1x128xf32, #tpu.memory_space<vmem>>, vector<1x128xf32>
    %48 = vector.broadcast %47 : vector<1x128xf32> to vector<512x128xf32>
    %49 = arith.mulf %15, %48 : vector<512x128xf32>
    %50 = arith.addf %46, %49 : vector<512x128xf32>
    %51 = tpu.transpose %50, [1, 0] : vector<512x128xf32> -> vector<128x512xf32>
    %cst_31 = arith.constant dense<0.000000e+00> : vector<512xf32>
    %52 = vector.multi_reduction <add>, %51, %cst_31 [0] : vector<128x512xf32> to vector<512xf32>
    %53 = vector.shape_cast %52 : vector<512xf32> to vector<1x512xf32>
    %c0_32 = arith.constant 0 : index
    %c0_33 = arith.constant 0 : index
    %54 = vector.load %arg12[%c0_32, %c0_33] : memref<1x1xf32, #tpu.memory_space<vmem>>, vector<1x1xf32>
    %55 = vector.broadcast %54 : vector<1x1xf32> to vector<1x512xf32>
    %56 = arith.addf %53, %55 : vector<1x512xf32>
    %57 = vector.shape_cast %56 : vector<1x512xf32> to vector<1x1x512xf32>
    %c0_34 = arith.constant 0 : index
    %c0_35 = arith.constant 0 : index
    %c0_36 = arith.constant 0 : index
    %58 = vector.load %arg13[%c0_34, %c0_35, %c0_36] : memref<1x1x512xf32, #tpu.memory_space<vmem>>, vector<1x1x512xf32>
    tpu.vector_store %arg13[%c0_34, %c0_35, %c0_36], %57 {strides = array<i32>} : memref<1x1x512xf32, #tpu.memory_space<vmem>>, vector<1x1x512xf32>,
    return
  }
  func.func @transform_0(%arg0: i32) -> (i32, i32) {
    %c0_i32 = arith.constant 0 : i32
    %c0_i32_0 = arith.constant 0 : i32
    return %arg0, %c0_i32 : i32, i32
  }
  func.func @transform_1(%arg0: i32) -> (i32, i32) {
    %c0_i32 = arith.constant 0 : i32
    %c0_i32_0 = arith.constant 0 : i32
    return %arg0, %c0_i32 : i32, i32
  }
  func.func @transform_2(%arg0: i32) -> (i32, i32) {
    %c0_i32 = arith.constant 0 : i32
    %c0_i32_0 = arith.constant 0 : i32
    %c0_i32_1 = arith.constant 0 : i32
    return %c0_i32, %c0_i32_0 : i32, i32
  }
  func.func @transform_3(%arg0: i32) -> (i32, i32) {
    %c0_i32 = arith.constant 0 : i32
    %c0_i32_0 = arith.constant 0 : i32
    %c0_i32_1 = arith.constant 0 : i32
    return %c0_i32, %c0_i32_0 : i32, i32
  }
  func.func @transform_4(%arg0: i32) -> (i32, i32) {
    %c0_i32 = arith.constant 0 : i32
    %c0_i32_0 = arith.constant 0 : i32
    %c0_i32_1 = arith.constant 0 : i32
    return %c0_i32, %c0_i32_0 : i32, i32
  }
  func.func @transform_5(%arg0: i32) -> (i32, i32) {
    %c0_i32 = arith.constant 0 : i32
    %c0_i32_0 = arith.constant 0 : i32
    %c0_i32_1 = arith.constant 0 : i32
    return %c0_i32, %c0_i32_0 : i32, i32
  }
  func.func @transform_6(%arg0: i32) -> (i32, i32) {
    %c0_i32 = arith.constant 0 : i32
    %c0_i32_0 = arith.constant 0 : i32
    %c0_i32_1 = arith.constant 0 : i32
    return %c0_i32, %c0_i32_0 : i32, i32
  }
  func.func @transform_7(%arg0: i32) -> (i32, i32) {
    %c0_i32 = arith.constant 0 : i32
    %c0_i32_0 = arith.constant 0 : i32
    %c0_i32_1 = arith.constant 0 : i32
    return %c0_i32, %c0_i32_0 : i32, i32
  }
  func.func @transform_8(%arg0: i32) -> (i32, i32) {
    %c0_i32 = arith.constant 0 : i32
    %c0_i32_0 = arith.constant 0 : i32
    %c0_i32_1 = arith.constant 0 : i32
    return %c0_i32, %c0_i32_0 : i32, i32
  }
  func.func @transform_9(%arg0: i32) -> (i32, i32) {
    %c0_i32 = arith.constant 0 : i32
    %c0_i32_0 = arith.constant 0 : i32
    %c0_i32_1 = arith.constant 0 : i32
    return %c0_i32, %c0_i32_0 : i32, i32
  }
  func.func @transform_10(%arg0: i32) -> (i32, i32) {
    %c0_i32 = arith.constant 0 : i32
    %c0_i32_0 = arith.constant 0 : i32
    %c0_i32_1 = arith.constant 0 : i32
    return %c0_i32, %c0_i32_0 : i32, i32
  }
  func.func @transform_11(%arg0: i32) -> (i32, i32) {
    %c0_i32 = arith.constant 0 : i32
    %c0_i32_0 = arith.constant 0 : i32
    %c0_i32_1 = arith.constant 0 : i32
    return %c0_i32, %c0_i32_0 : i32, i32
  }
  func.func @transform_12(%arg0: i32) -> (i32, i32, i32) {
    %c0_i32 = arith.constant 0 : i32
    %c0_i32_0 = arith.constant 0 : i32
    %c0_i32_1 = arith.constant 0 : i32
    return %arg0, %c0_i32, %c0_i32_0 : i32, i32, i32
  }
}

</mosaic_0001>

<bundles_post_ra>
// kernel: tpu_custom_call.1
= control target key start
LH: loop header
LB: loop body
LE: loop exit
PB: predicated region body
PF: predicated region fallthrough
CT: control target
= control target key end

     0   :  { %s12370_s0 = inlined_call_operand.vmem [shape: bf16[512,128], index: 0, kind: input, shape index: {}]   ;;  %s12371_s1 = inlined_call_operand.vmem [shape: bf16[512,8], index: 1, kind: input, shape index: {}]   ;;  %s12372_s2 = inlined_call_operand.hbm [shape: bf16[128,512], index: 2, kind: input, shape index: {}]   ;;  %s12373_s3 = inlined_call_operand.vmem [shape: f32[1,512], index: 3, kind: input, shape index: {}]   ;;  %s12374_s4 = inlined_call_operand.hbm [shape: bf16[128,512], index: 4, kind: input, shape index: {}]   ;;  %s12375_s5 = inlined_call_operand.vmem [shape: f32[1,512], index: 5, kind: input, shape index: {}]   ;;  %s12376_s6 = inlined_call_operand.vmem [shape: bf16[8,512], index: 6, kind: input, shape index: {}]   ;;  %s12377_s7 = inlined_call_operand.hbm [shape: bf16[512,128], index: 7, kind: input, shape index: {}]   ;;  %s12378_s8 = inlined_call_operand.hbm [shape: bf16[128,128], index: 8, kind: input, shape index: {}]   ;;  %s12379_s9 = inlined_call_operand.vmem [shape: f32[1,128], index: 9, kind: input, shape index: {}]   ;;  %s12380_s10 = inlined_call_operand.vmem [shape: f32[1,128], index: 10, kind: input, shape index: {}]   ;;  %s12381_s11 = inlined_call_operand.<no memory space> [shape: f32[1,1], index: 11, kind: input, shape index: {}]   ;;  %s12382_s12 = inlined_call_operand.hbm [shape: f32[1,1,512], index: 12, kind: output, shape index: {}]  }
   0x1   :  { %v17_v0 = vstv %s12381_s11 }
   0x2   :  { %18 = vst [vmem:[#allocation2] sm:$0x1] %v17_v0 }
   0x3   :  { %19 = vsyncpa [#allocation4], 0 }
   0x4   :  { %20 = vsyncpa [#allocation7], 0 }
   0x5   :  { %21 = vsyncpa [#allocation10], 0 }
   0x6   :  { %22 = vsyncpa [#allocation5], 0  ;;  %s7175_s23 = smov [#allocation6]   ;;  %s7176_s25 = smov [#allocation3]  }
   0x7   :  { %s46_s24 = sshll.u32 %s7175_s23, 4  ;;  %s32_s26 = sshll.u32 %s7176_s25, 4  ;;  %s47_s24 = int_to_ptr.vmem [resolvable:$true] %s46_s24  ;;  %s7254_s26 = int_to_ptr.vmem [resolvable:$true] %s32_s26 }
   0x8   :  { %s7057_s29 = scalar_lea.hbm %s12374_s4, 4096 }
   0x9   :  { %p7058_p0 = scmp.ne.s32.totalorder %s12374_s4, %s7057_s29  ;;  %p7061_p1 = scmp.lt.u32.totalorder %s7057_s29, %s12374_s4 }
   0xb   :  { %p7063_p2 = pnand %p7061_p1, %p7058_p0 }
   0xd   :  { %7066 = shalt.err (!%p7063_p2)
}
   0xe   :  { %s7067_s15 = scalar_lea.vmem %s47_s24, 4096  ;;  %p7072_p4 = scmp.lt.s32.totalorder %s47_s24, %s47_s24 }
   0xf   :  { %p7068_p3 = scmp.ne.s32.totalorder %s47_s24, %s7067_s15  ;;  %p7073_p5 = scmp.lt.s32.totalorder %s7067_s15, %s7067_s15 }
  0x11   :  { %p7074_p6 = por %p7073_p5, %p7072_p4 }
  0x13   :  { %p7075_p7 = pnand %p7074_p6, %p7068_p3 }
  0x15   :  { %7078 = shalt.err (!%p7075_p7)
}
  0x16   :  { %s7177_s16 = smov 256   ;;  %s7178_s17 = smov 16  }
  0x17   :  { %52 = dma.hbm_to_vmem [thread:$0]  %s12374_s4, 4096, %s47_s24, [#allocation7], %s7177_s16, %s7177_s16, %s7178_s17  }
  0x18   :  { %s7079_s22 = scalar_lea.hbm %s12372_s2, 4096 }
  0x19   :  { %p7080_p8 = scmp.ne.s32.totalorder %s12372_s2, %s7079_s22  ;;  %p7083_p9 = scmp.lt.u32.totalorder %s7079_s22, %s12372_s2 }
  0x1b   :  { %p7085_p10 = pnand %p7083_p9, %p7080_p8 }
  0x1d   :  { %7088 = shalt.err (!%p7085_p10)
}
  0x1e   :  { %s7089_s29 = scalar_lea.vmem %s7254_s26, 4096  ;;  %p7094_p12 = scmp.lt.s32.totalorder %s7254_s26, %s7254_s26 }
  0x1f   :  { %p7090_p11 = scmp.ne.s32.totalorder %s7254_s26, %s7089_s29  ;;  %p7095_p13 = scmp.lt.s32.totalorder %s7089_s29, %s7089_s29 }
  0x21   :  { %p7096_p0 = por %p7095_p13, %p7094_p12 }
  0x23   :  { %p7097_p1 = pnand %p7096_p0, %p7090_p11 }
  0x25   :  { %7100 = shalt.err (!%p7097_p1)
}
  0x26   :  { %38 = dma.hbm_to_vmem [thread:$0]  %s12372_s2, 4096, %s7254_s26, [#allocation4], %s7177_s16, %s7177_s16, %s7178_s17  }
  0x27   :  { %s7179_s30 = smov [#allocation8]   ;;  %s7101_s15 = scalar_lea.hbm %s12377_s7, 4096 }
  0x28   :  { %s62_s13 = sshll.u32 %s7179_s30, 4  ;;  %p7102_p2 = scmp.ne.s32.totalorder %s12377_s7, %s7101_s15  ;;  %s63_s13 = int_to_ptr.vmem [resolvable:$true] %s62_s13 }
  0x29   :  { %p7105_p3 = scmp.lt.u32.totalorder %s7101_s15, %s12377_s7 }
  0x2b   :  { %p7107_p4 = pnand %p7105_p3, %p7102_p2 }
  0x2d   :  { %7110 = shalt.err (!%p7107_p4)
}
  0x2e   :  { %s7111_s22 = scalar_lea.vmem %s63_s13, 4096  ;;  %p7116_p6 = scmp.lt.s32.totalorder %s63_s13, %s63_s13 }
  0x2f   :  { %p7112_p5 = scmp.ne.s32.totalorder %s63_s13, %s7111_s22  ;;  %p7117_p7 = scmp.lt.s32.totalorder %s7111_s22, %s7111_s22 }
  0x31   :  { %p7118_p8 = por %p7117_p7, %p7116_p6 }
  0x33   :  { %p7119_p9 = pnand %p7118_p8, %p7112_p5 }
  0x35   :  { %7122 = shalt.err (!%p7119_p9)
}
  0x36   :  { %s7180_s2 = smov 64   ;;  %s7181_s26 = smov 4  }
  0x37   :  { %68 = dma.hbm_to_vmem [thread:$0]  %s12377_s7, 4096, %s63_s13, [#allocation7], %s7180_s2, %s7180_s2, %s7181_s26  }
  0x38   :  { %s7182_s23 = smov [#allocation9]   ;;  %s7123_s29 = scalar_lea.hbm %s12378_s8, 1024 }
  0x39   :  { %s74_s25 = sshll.u32 %s7182_s23, 4  ;;  %p7124_p10 = scmp.ne.s32.totalorder %s12378_s8, %s7123_s29  ;;  %s75_s25 = int_to_ptr.vmem [resolvable:$true] %s74_s25 }
  0x3a   :  { %p7127_p11 = scmp.lt.u32.totalorder %s7123_s29, %s12378_s8 }
  0x3c   :  { %p7129_p12 = pnand %p7127_p11, %p7124_p10 }
  0x3e   :  { %7132 = shalt.err (!%p7129_p12)
}
  0x3f   :  { %s7133_s14 = scalar_lea.vmem %s75_s25, 1024  ;;  %p7138_p0 = scmp.lt.s32.totalorder %s75_s25, %s75_s25 }
  0x40   :  { %p7134_p13 = scmp.ne.s32.totalorder %s75_s25, %s7133_s14  ;;  %p7139_p1 = scmp.lt.s32.totalorder %s7133_s14, %s7133_s14 }
  0x42   :  { %p7140_p2 = por %p7139_p1, %p7138_p0 }
  0x44   :  { %p7141_p3 = pnand %p7140_p2, %p7134_p13 }
  0x46   :  { %7144 = shalt.err (!%p7141_p3)
}
  0x47   :  { %80 = dma.hbm_to_vmem [thread:$0]  %s12378_s8, 1024, %s75_s25, [#allocation10], %s7180_s2, %s7180_s2, %s7181_s26  }
  0x48   :  { %7167 = dma.done.wait [#allocation4], 4096  }
  0x49   :  { %7168 = vsyncadd [#allocation4], 4294963200 }
  0x4a   :  { %7169 = dma.done.wait [#allocation7], 8192  }
  0x4b   :  { %7170 = vsyncadd [#allocation7], 4294959104 }
  0x4c   :  { %7171 = dma.done.wait [#allocation10], 1024  }
  0x4d   :  { %7172 = vsyncadd [#allocation10], 4294966272  ;;  %v12385_v1 = vmov 0   ;;  %v6714_v2 = vld [vmem:[#allocation3 + $0x4] ss:$16 sps:$4 sm:$0xff]   ;;  %vm3009_vm0 = vcmask 1043456  }
  0x4e   :  { %666 = vmatprep.mubr.bf16.mxu0 %v12385_v1  ;;  %906 = vmatprep.mubr.bf16.mxu1 %v12385_v1  ;;  %v6716_v3 = vld [vmem:[#allocation3] ss:$16 sps:$4 sm:$0xff]   ;;  %v6717_v4 = vld [vmem:[#allocation3 + $0x24] ss:$16 sps:$4 sm:$0xff]   ;;  %v6753_v19 = vld [vmem:[#allocation3 + $0xc] ss:$16 sps:$4 sm:$0xff]  }
  0x4f   :  { %634 = vmatprep.subr.bf16.mxu0 %v6714_v2  ;;  %6686 = vmatprep.subr.bf16.mxu1 %v6714_v2  ;;  %v6719_v5 = vld [vmem:[#allocation3 + $0x20] ss:$16 sps:$4 sm:$0xff]   ;;  %v6720_v6 = vld [vmem:[#allocation3 + $0x44] ss:$16 sps:$4 sm:$0xff]   ;;  %v6751_v23 = vld [vmem:[#allocation3 + $0x8] ss:$16 sps:$4 sm:$0xff]  }
  0x50   :  { %635 = vmatpush1.bf16.msra.mxu0 %v6716_v3  ;;  %6694 = vmatpush1.bf16.msra.mxu1 %v6716_v3  ;;  %v6722_v7 = vld [vmem:[#allocation3 + $0x40] ss:$16 sps:$4 sm:$0xff]   ;;  %v6723_v8 = vld [vmem:[#allocation3 + $0x64] ss:$16 sps:$4 sm:$0xff]   ;;  %v6756_v24 = vld [vmem:[#allocation3 + $0x2c] ss:$16 sps:$4 sm:$0xff]  }
  0x51   :  { %636 = vmatprep.subr.bf16.mxu0 %v6717_v4  ;;  %6687 = vmatprep.subr.bf16.mxu1 %v6717_v4  ;;  %v6725_v9 = vld [vmem:[#allocation3 + $0x60] ss:$16 sps:$4 sm:$0xff]   ;;  %v6726_v10 = vld [vmem:[#allocation3 + $0x84] ss:$16 sps:$4 sm:$0xff]   ;;  %v6754_v26 = vld [vmem:[#allocation3 + $0x28] ss:$16 sps:$4 sm:$0xff]  }
  0x52   :  { %v6728_v11 = vld [vmem:[#allocation3 + $0x80] ss:$16 sps:$4 sm:$0xff]   ;;  %v6729_v12 = vld [vmem:[#allocation3 + $0xa4] ss:$16 sps:$4 sm:$0xff]   ;;  %v6761_v28 = vld [vmem:[#allocation3 + $0x4c] ss:$16 sps:$4 sm:$0xff]  }
  0x53   :  { %v6731_v13 = vld [vmem:[#allocation3 + $0xa0] ss:$16 sps:$4 sm:$0xff]   ;;  %v6732_v14 = vld [vmem:[#allocation3 + $0xc4] ss:$16 sps:$4 sm:$0xff]   ;;  %v6759_v31 = vld [vmem:[#allocation3 + $0x48] ss:$16 sps:$4 sm:$0xff]  }
  0x54   :  { %637 = vmatpush1.bf16.msra.mxu0 %v6719_v5  ;;  %6695 = vmatpush1.bf16.msra.mxu1 %v6719_v5  ;;  %v6734_v15 = vld [vmem:[#allocation3 + $0xc0] ss:$16 sps:$4 sm:$0xff]   ;;  %v6735_v16 = vld [vmem:[#allocation3 + $0xe4] ss:$16 sps:$4 sm:$0xff]   ;;  %v6764_v32 = vld [vmem:[#allocation3 + $0x6c] ss:$16 sps:$4 sm:$0xff]  }
  0x55   :  { %638 = vmatprep.subr.bf16.mxu0 %v6720_v6  ;;  %6688 = vmatprep.subr.bf16.mxu1 %v6720_v6  ;;  %v6737_v17 = vld [vmem:[#allocation3 + $0xe0] ss:$16 sps:$4 sm:$0xff]   ;;  %v6748_v18 = vld [vmem:[#allocation6 + $0x4] ss:$16 sps:$4 sm:$0xff]   ;;  %v6762_v36 = vld [vmem:[#allocation3 + $0x68] ss:$16 sps:$4 sm:$0xff]  }
  0x56   :  { %v7314_v20 = vld [vmem:[%s12370_s0] sm:$0xff]   ;;  %v7325_v29 = vld [vmem:[%s12370_s0 + $0x8] sm:$0xff]   ;;  %v7336_v35 = vld [vmem:[%s12370_s0 + $0x10] sm:$0xff]   ;;  %vm2912_vm1 = vcmask 64512  }
  0x57   :  { %v6739_v21 = vld [vmem:[%s12370_s0 + $0xc0] sm:$0xff]   ;;  %v6741_v30 = vld [vmem:[%s12370_s0 + $0xc8] sm:$0xff]   ;;  %v6743_v38 = vld [vmem:[%s12370_s0 + $0xd0] sm:$0xff]  }
  0x58   :  { %639 = vmatpush1.bf16.msra.mxu0 %v6722_v7  ;;  %6696 = vmatpush1.bf16.msra.mxu1 %v6722_v7  ;;  %v6746_v22 = vld [vmem:[#allocation6] ss:$16 sps:$4 sm:$0xff]   ;;  %v6772_v25 = vld [vmem:[#allocation6 + $0x24] ss:$16 sps:$4 sm:$0xff]   ;;  %v6769_v37 = vld [vmem:[#allocation3 + $0x8c] ss:$16 sps:$4 sm:$0xff]  }
  0x59   :  { %640 = vmatprep.subr.bf16.mxu0 %v6723_v8  ;;  %6689 = vmatprep.subr.bf16.mxu1 %v6723_v8  ;;  %v6770_v27 = vld [vmem:[#allocation6 + $0x20] ss:$16 sps:$4 sm:$0xff]   ;;  %v6788_v34 = vld [vmem:[#allocation6 + $0x44] ss:$16 sps:$4 sm:$0xff]   ;;  %v6767_v39 = vld [vmem:[#allocation3 + $0x88] ss:$16 sps:$4 sm:$0xff]  }
  0x5a   :  { %v6786_v33 = vld [vmem:[#allocation6 + $0x40] ss:$16 sps:$4 sm:$0xff]   ;;  %v6794_v40 = vld [vmem:[#allocation6 + $0x64] ss:$16 sps:$4 sm:$0xff]   ;;  %v6775_v42 = vld [vmem:[#allocation3 + $0xac] ss:$16 sps:$4 sm:$0xff]  }
  0x5b   :  { %v6792_v41 = vld [vmem:[#allocation6 + $0x60] ss:$16 sps:$4 sm:$0xff]   ;;  %v6773_v43 = vld [vmem:[#allocation3 + $0xa8] ss:$16 sps:$4 sm:$0xff]   ;;  %v6780_v44 = vld [vmem:[#allocation3 + $0xcc] ss:$16 sps:$4 sm:$0xff]  }
  0x5c   :  { %641 = vmatpush1.bf16.msra.mxu0 %v6725_v9  ;;  %6697 = vmatpush1.bf16.msra.mxu1 %v6725_v9  ;;  %v7347_v45 = vld [vmem:[%s12370_s0 + $0x18] sm:$0xff]   ;;  %v6801_v46 = vld [vmem:[#allocation6 + $0x80] ss:$16 sps:$4 sm:$0xff]   ;;  %v7369_v57 = vld [vmem:[%s12370_s0 + $0x28] sm:$0xff]  }
  0x5d   :  { %642 = vmatprep.subr.bf16.mxu0 %v6726_v10  ;;  %6690 = vmatprep.subr.bf16.mxu1 %v6726_v10  ;;  %v6803_v47 = vld [vmem:[#allocation6 + $0x84] ss:$16 sps:$4 sm:$0xff]   ;;  %v6778_v49 = vld [vmem:[#allocation3 + $0xc8] ss:$16 sps:$4 sm:$0xff]   ;;  %v6783_v50 = vld [vmem:[#allocation3 + $0xec] ss:$16 sps:$4 sm:$0xff]  }
  0x5e   :  { %v6745_v48 = vld [vmem:[%s12370_s0 + $0xd8] sm:$0xff]   ;;  %v6810_v51 = vld [vmem:[#allocation6 + $0xa0] ss:$16 sps:$4 sm:$0xff]   ;;  %v6758_v58 = vld [vmem:[%s12370_s0 + $0xe8] sm:$0xff]  }
  0x5f   :  { %v6812_v52 = vld [vmem:[#allocation6 + $0xa4] ss:$16 sps:$4 sm:$0xff]   ;;  %v6781_v53 = vld [vmem:[#allocation3 + $0xe8] ss:$16 sps:$4 sm:$0xff]   ;;  %v6798_v56 = vld [vmem:[#allocation6 + $0xc] ss:$16 sps:$4 sm:$0xff]  }
  0x60   :  { %643 = vmatpush1.bf16.msra.mxu0 %v6728_v11  ;;  %6698 = vmatpush1.bf16.msra.mxu1 %v6728_v11  ;;  %v7358_v54 = vld [vmem:[%s12370_s0 + $0x20] sm:$0xff]   ;;  %v7380_v61 = vld [vmem:[%s12370_s0 + $0x30] sm:$0xff]   ;;  %v7391_v63 = vld [vmem:[%s12370_s0 + $0x38] sm:$0xff]  }
  0x61   :  { %644 = vmatprep.subr.bf16.mxu0 %v6729_v12  ;;  %6691 = vmatprep.subr.bf16.mxu1 %v6729_v12  ;;  %v6750_v55 = vld [vmem:[%s12370_s0 + $0xe0] sm:$0xff]   ;;  %v6766_v62 = vld [vmem:[%s12370_s0 + $0xf0] sm:$0xff]   ;;  %v6777_v0 = vld [vmem:[%s12370_s0 + $0xf8] sm:$0xff]  }
  0x62   :  { %v6816_v59 = vld [vmem:[#allocation6 + $0xc0] ss:$16 sps:$4 sm:$0xff]   ;;  %v6818_v60 = vld [vmem:[#allocation6 + $0xc4] ss:$16 sps:$4 sm:$0xff]   ;;  %v6796_v3 = vld [vmem:[#allocation6 + $0x8] ss:$16 sps:$4 sm:$0xff]  }
  0x63   :  { %v7402_v2 = vld [vmem:[%s12370_s0 + $0x40] sm:$0xff]   ;;  %v6806_v5 = vld [vmem:[#allocation6 + $0x28] ss:$16 sps:$4 sm:$0xff]  }
  0x64   :  { %645 = vmatpush1.bf16.msra.mxu0 %v6731_v13  ;;  %6699 = vmatpush1.bf16.msra.mxu1 %v6731_v13  ;;  %v6808_v4 = vld [vmem:[#allocation6 + $0x2c] ss:$16 sps:$4 sm:$0xff]   ;;  %v6824_v6 = vld [vmem:[#allocation6 + $0xe0] ss:$16 sps:$4 sm:$0xff]   ;;  %v6826_v7 = vld [vmem:[#allocation6 + $0xe4] ss:$16 sps:$4 sm:$0xff]  }
  0x65   :  { %646 = vmatprep.subr.bf16.mxu0 %v6732_v14  ;;  %6692 = vmatprep.subr.bf16.mxu1 %v6732_v14  ;;  %v6821_v8 = vld [vmem:[#allocation6 + $0x4c] ss:$16 sps:$4 sm:$0xff]   ;;  %v6819_v10 = vld [vmem:[#allocation6 + $0x48] ss:$16 sps:$4 sm:$0xff]  }
  0x66   :  { %v6785_v9 = vld [vmem:[%s12370_s0 + $0x48] sm:$0xff]   ;;  %v6789_v13 = vld [vmem:[%s12370_s0 + $0x50] sm:$0xff]   ;;  %v6790_v14 = vld [vmem:[%s12370_s0 + $0x58] sm:$0xff]  }
  0x67   :  { %v6827_v11 = vld [vmem:[#allocation6 + $0x68] ss:$16 sps:$4 sm:$0xff]   ;;  %v6829_v12 = vld [vmem:[#allocation6 + $0x6c] ss:$16 sps:$4 sm:$0xff]  }
  0x68   :  { %647 = vmatpush1.bf16.msra.mxu0 %v6734_v15  ;;  %6700 = vmatpush1.bf16.msra.mxu1 %v6734_v15  ;;  %v6791_v15 = vld [vmem:[%s12370_s0 + $0x60] sm:$0xff]  }
  0x69   :  { %648 = vmatprep.subr.bf16.mxu0 %v6735_v16  ;;  %6693 = vmatprep.subr.bf16.mxu1 %v6735_v16  ;;  %v7432_v16 = vld [vmem:[%s12376_s6] sm:$0xff] }
  0x6c   :  { %649 = vmatpush1.bf16.msra.mxu0 %v6737_v17  ;;  %6701 = vmatpush1.bf16.msra.mxu1 %v6737_v17  ;;  %v6391_v17 = vcombine.high %v7432_v16, %v7432_v16 }
  0x6d   :  { %1778 = vmatprep.subr.bf16.mxu0 %v6748_v18  ;;  %987 = vmatprep.subr.bf16.mxu1 %v6753_v19  ;;  %v6795_v18 = vld [vmem:[%s12370_s0 + $0x68] sm:$0xff]   ;;  %v6799_v19 = vld [vmem:[%s12370_s0 + $0x70] sm:$0xff]  }
  0x6f   :  { %667 = vmatmul.mubr.bf16.vlgmr.msra.gmra.mrb[0].mxu0 %v7314_v20  ;;  %907 = vmatmul.mubr.bf16.vlgmr.msra.gmra.mrb[0].mxu1 %v6739_v21  ;;  %v6834_v21 = vld [vmem:[#allocation6 + $0x8c] ss:$16 sps:$4 sm:$0xff]  }
  0x70   :  { %676 = vmatprep.mubr.bf16.mxu0 %v12385_v1  ;;  %916 = vmatprep.mubr.bf16.mxu1 %v12385_v1 }
  0x71   :  { %1779 = vmatpush1.bf16.msra.mxu0 %v6746_v22  ;;  %988 = vmatpush1.bf16.msra.mxu1 %v6751_v23  ;;  %v6800_v22 = vld [vmem:[%s12370_s0 + $0x78] sm:$0xff]   ;;  %v6804_v23 = vld [vmem:[%s12370_s0 + $0x80] sm:$0xff]  }
  0x72   :  { %989 = vmatprep.subr.bf16.mxu1 %v6756_v24  ;;  %1780 = vmatprep.subr.bf16.mxu0 %v6772_v25  ;;  %v6805_v24 = vld [vmem:[%s12370_s0 + $0x88] sm:$0xff]   ;;  %v6809_v25 = vld [vmem:[%s12370_s0 + $0x90] sm:$0xff]  }
  0x75   :  { %990 = vmatpush1.bf16.msra.mxu1 %v6754_v26  ;;  %1781 = vmatpush1.bf16.msra.mxu0 %v6770_v27  ;;  %v6835_v26 = vld [vmem:[#allocation6 + $0xa8] ss:$16 sps:$4 sm:$0xff]   ;;  %v6837_v27 = vld [vmem:[#allocation6 + $0xac] ss:$16 sps:$4 sm:$0xff]  }
  0x76   :  { %991 = vmatprep.subr.bf16.mxu1 %v6761_v28  ;;  %1782 = vmatprep.subr.bf16.mxu0 %v6788_v34  ;;  %v7477_v28 = vld [vmem:[%s12370_s0 + $0x98] sm:$0xff]  }
  0x77   :  { %677 = vmatmul.mubr.bf16.gmra.mrb[4].mxu0 %v7325_v29  ;;  %917 = vmatmul.mubr.bf16.gmra.mrb[4].mxu1 %v6741_v30  ;;  %v7493_v30 = vld [vmem:[%s12370_s0 + $0xa8] sm:$0xff]   ;;  %v7509_v34 = vld [vmem:[%s12370_s0 + $0xb8] sm:$0xff]  }
  0x78   :  { %686 = vmatprep.mubr.bf16.mxu0 %v12385_v1  ;;  %926 = vmatprep.mubr.bf16.mxu1 %v12385_v1 }
  0x79   :  { %992 = vmatpush1.bf16.msra.mxu1 %v6759_v31  ;;  %1783 = vmatpush1.bf16.msra.mxu0 %v6786_v33  ;;  %v7501_v31 = vld [vmem:[%s12370_s0 + $0xb0] sm:$0xff]  }
  0x7a   :  { %993 = vmatprep.subr.bf16.mxu1 %v6764_v32  ;;  %1784 = vmatprep.subr.bf16.mxu0 %v6794_v40  ;;  %v6838_v32 = vld [vmem:[#allocation6 + $0xc8] ss:$16 sps:$4 sm:$0xff]   ;;  %v6840_v33 = vld [vmem:[#allocation6 + $0xcc] ss:$16 sps:$4 sm:$0xff]  }
  0x7b   :  { %v260_v40 = vld [vmem:[%s12373_s3] sm:$0xf] }
  0x7d   :  { %994 = vmatpush1.bf16.msra.mxu1 %v6762_v36  ;;  %1785 = vmatpush1.bf16.msra.mxu0 %v6792_v41  ;;  %v6841_v36 = vld [vmem:[#allocation6 + $0xe8] ss:$16 sps:$4 sm:$0xff]  }
  0x7e   :  { %995 = vmatprep.subr.bf16.mxu1 %v6769_v37  ;;  %1786 = vmatprep.subr.bf16.mxu0 %v6803_v47  ;;  %v12383_v37 = vlaneseq }
  0x7f   :  { %687 = vmatmul.mubr.bf16.gmra.mrb[8].mxu0 %v7336_v35  ;;  %927 = vmatmul.mubr.bf16.gmra.mrb[8].mxu1 %v6743_v38 }
  0x80   :  { %696 = vmatprep.mubr.bf16.mxu0 %v12385_v1  ;;  %936 = vmatprep.mubr.bf16.mxu1 %v12385_v1  ;;  %v7516_v38 = vshrl.u32 %v12383_v37, 7 }
  0x81   :  { %996 = vmatpush1.bf16.msra.mxu1 %v6767_v39  ;;  %1787 = vmatpush1.bf16.msra.mxu0 %v6801_v46 }
  0x82   :  { %997 = vmatprep.subr.bf16.mxu1 %v6775_v42  ;;  %1788 = vmatprep.subr.bf16.mxu0 %v6812_v52  ;;  %12404 = vst [vmem:[#allocation16_spill] sm:$0xff] %v7516_v38  ;;  %v7520_v39 = vsub.s32 0, %v7516_v38  ;;  %v12384_v41 = vsub.s32 1, %v7516_v38 }
  0x84   :  { %12405 = vst [vmem:[#allocation17_spill] sm:$0xff] %v7520_v39  ;;  %v7527_v42 = vrot.slane %v260_v40, %v7520_v39 }
  0x85   :  { %998 = vmatpush1.bf16.msra.mxu1 %v6773_v43  ;;  %1789 = vmatpush1.bf16.msra.mxu0 %v6810_v51  ;;  %v7531_v43 = vrot.slane %v260_v40, %v12384_v41  ;;  %v7051_v41 = vld [vmem:[%s12370_s0 + $0xe8] sm:$0xff]  }
  0x86   :  { %999 = vmatprep.subr.bf16.mxu1 %v6780_v44  ;;  %1790 = vmatprep.subr.bf16.mxu0 %v6818_v60 }
  0x87   :  { %697 = vmatmul.mubr.bf16.gmra.mrb[12].mxu0 %v7347_v45  ;;  %937 = vmatmul.mubr.bf16.gmra.mrb[12].mxu1 %v6745_v48 }
  0x88   :  { %706 = vmatprep.mubr.bf16.mxu0 %v12385_v1  ;;  %946 = vmatprep.mubr.bf16.mxu1 %v12385_v1 }
  0x89   :  { %1000 = vmatpush1.bf16.msra.mxu1 %v6778_v49  ;;  %1791 = vmatpush1.bf16.msra.mxu0 %v6816_v59 }
  0x8a   :  { %1001 = vmatprep.subr.bf16.mxu1 %v6783_v50  ;;  %1792 = vmatprep.subr.bf16.mxu0 %v6826_v7 }
  0x8d   :  { %1002 = vmatpush1.bf16.msra.mxu1 %v6781_v53  ;;  %1793 = vmatpush1.bf16.msra.mxu0 %v6824_v6 }
  0x8e   :  { %2131 = vmatprep.subr.bf16.mxu1 %v6798_v56  ;;  %6394 = vmatprep.subr.msk.bf16.mxu0 %vm3009_vm0, %v6391_v17  ;;  %v6390_v56 = vcombine.low %v7432_v16, %v7432_v16 }
  0x8f   :  { %707 = vmatmul.mubr.bf16.gmra.mrb[16].mxu0 %v7358_v54  ;;  %947 = vmatmul.mubr.bf16.gmra.mrb[16].mxu1 %v6750_v55 }
  0x90   :  { %716 = vmatprep.mubr.bf16.mxu0 %v12385_v1  ;;  %956 = vmatprep.mubr.bf16.mxu1 %v12385_v1  ;;  %v3011_v7 = vsel %vm3009_vm0, %v6390_v56, 0 }
  0x97   :  { %717 = vmatmul.mubr.bf16.gmra.mrb[20].mxu0 %v7369_v57  ;;  %957 = vmatmul.mubr.bf16.gmra.mrb[20].mxu1 %v6758_v58 }
  0x98   :  { %726 = vmatprep.mubr.bf16.mxu0 %v12385_v1  ;;  %966 = vmatprep.mubr.bf16.mxu1 %v12385_v1 }
  0x9f   :  { %727 = vmatmul.mubr.bf16.gmra.mrb[24].mxu0 %v7380_v61  ;;  %967 = vmatmul.mubr.bf16.gmra.mrb[24].mxu1 %v6766_v62 }
  0xa0   :  { %736 = vmatprep.mubr.bf16.mxu0 %v12385_v1  ;;  %976 = vmatprep.mubr.bf16.mxu1 %v12385_v1 }
  0xa7   :  { %737 = vmatmul.mubr.bf16.gmra.mrb[28].mxu0 %v7391_v63  ;;  %977 = vmatmul.mubr.bf16.gmra.mrb[28].mxu1 %v6777_v0 }
  0xa8   :  { %746 = vmatprep.mubr.bf16.mxu0 %v12385_v1  ;;  %1019 = vmatprep.mubr.bf16.mxu1 %v12385_v1 }
  0xaf   :  { %747 = vmatmul.mubr.bf16.gmra.mrb[32].mxu0 %v7402_v2  ;;  %1020 = vmatmul.mubr.bf16.vlgmr.msra.gmra.mrb[32].mxu1 %v7314_v20  ;;  %v6832_v20 = vld [vmem:[#allocation6 + $0x88] ss:$16 sps:$4 sm:$0xff]  }
  0xb0   :  { %756 = vmatprep.mubr.bf16.mxu0 %v12385_v1  ;;  %1029 = vmatprep.mubr.bf16.mxu1 %v12385_v1 }
  0xb1   :  { %2132 = vmatpush1.bf16.msra.mxu1 %v6796_v3 }
  0xb2   :  { %2133 = vmatprep.subr.bf16.mxu1 %v6808_v4 }
  0xb5   :  { %2134 = vmatpush1.bf16.msra.mxu1 %v6806_v5 }
  0xb6   :  { %2135 = vmatprep.subr.bf16.mxu1 %v6821_v8 }
  0xb7   :  { %757 = vmatmul.mubr.bf16.gmra.mrb[36].mxu0 %v6785_v9  ;;  %1030 = vmatmul.mubr.bf16.gmra.mrb[36].mxu1 %v7325_v29  ;;  %v7485_v29 = vld [vmem:[%s12370_s0 + $0xa0] sm:$0xff]  }
  0xb8   :  { %766 = vmatprep.mubr.bf16.mxu0 %v12385_v1  ;;  %1039 = vmatprep.mubr.bf16.mxu1 %v12385_v1 }
  0xb9   :  { %2136 = vmatpush1.bf16.msra.mxu1 %v6819_v10 }
  0xba   :  { %2137 = vmatprep.subr.bf16.mxu1 %v6829_v12 }
  0xbd   :  { %2138 = vmatpush1.bf16.msra.mxu1 %v6827_v11 }
  0xbe   :  { %2139 = vmatprep.subr.bf16.mxu1 %v6834_v21 }
  0xbf   :  { %767 = vmatmul.mubr.bf16.gmra.mrb[40].mxu0 %v6789_v13  ;;  %1040 = vmatmul.mubr.bf16.gmra.mrb[40].mxu1 %v7336_v35  ;;  %v6843_v35 = vld [vmem:[#allocation6 + $0xec] ss:$16 sps:$4 sm:$0xff]  }
  0xc0   :  { %776 = vmatprep.mubr.bf16.mxu0 %v12385_v1  ;;  %1049 = vmatprep.mubr.bf16.mxu1 %v12385_v1 }
  0xc1   :  { %2140 = vmatpush1.bf16.msra.mxu1 %v6832_v20 }
  0xc2   :  { %2141 = vmatprep.subr.bf16.mxu1 %v6837_v27 }
  0xc5   :  { %2142 = vmatpush1.bf16.msra.mxu1 %v6835_v26 }
  0xc6   :  { %2143 = vmatprep.subr.bf16.mxu1 %v6840_v33 }
  0xc7   :  { %777 = vmatmul.mubr.bf16.gmra.mrb[44].mxu0 %v6790_v14  ;;  %1050 = vmatmul.mubr.bf16.gmra.mrb[44].mxu1 %v7347_v45 }
  0xc8   :  { %786 = vmatprep.mubr.bf16.mxu0 %v12385_v1  ;;  %1059 = vmatprep.mubr.bf16.mxu1 %v12385_v1 }
  0xc9   :  { %2144 = vmatpush1.bf16.msra.mxu1 %v6838_v32 }
  0xca   :  { %2145 = vmatprep.subr.bf16.mxu1 %v6843_v35 }
  0xcd   :  { %2146 = vmatpush1.bf16.msra.mxu1 %v6841_v36 }
  0xcf   :  { %787 = vmatmul.mubr.bf16.gmra.mrb[48].mxu0 %v6791_v15  ;;  %1060 = vmatmul.mubr.bf16.gmra.mrb[48].mxu1 %v7358_v54 }
  0xd0   :  { %796 = vmatprep.mubr.bf16.mxu0 %v12385_v1  ;;  %1069 = vmatprep.mubr.bf16.mxu1 %v12385_v1 }
  0xd7   :  { %797 = vmatmul.mubr.bf16.gmra.mrb[52].mxu0 %v6795_v18  ;;  %1070 = vmatmul.mubr.bf16.gmra.mrb[52].mxu1 %v7369_v57 }
  0xd8   :  { %806 = vmatprep.mubr.bf16.mxu0 %v12385_v1  ;;  %1079 = vmatprep.mubr.bf16.mxu1 %v12385_v1 }
  0xdf   :  { %807 = vmatmul.mubr.bf16.gmra.mrb[56].mxu0 %v6799_v19  ;;  %1080 = vmatmul.mubr.bf16.gmra.mrb[56].mxu1 %v7380_v61 }
  0xe0   :  { %816 = vmatprep.mubr.bf16.mxu0 %v12385_v1  ;;  %1089 = vmatprep.mubr.bf16.mxu1 %v12385_v1 }
  0xe7   :  { %817 = vmatmul.mubr.bf16.gmra.mrb[60].mxu0 %v6800_v22  ;;  %1090 = vmatmul.mubr.bf16.gmra.mrb[60].mxu1 %v7391_v63 }
  0xe8   :  { %826 = vmatprep.mubr.bf16.mxu0 %v12385_v1  ;;  %1099 = vmatprep.mubr.bf16.mxu1 %v12385_v1 }
  0xef   :  { %827 = vmatmul.mubr.bf16.gmra.mrb[64].mxu0 %v6804_v23  ;;  %1100 = vmatmul.mubr.bf16.gmra.mrb[64].mxu1 %v7402_v2 }
  0xf0   :  { %836 = vmatprep.mubr.bf16.mxu0 %v12385_v1  ;;  %1109 = vmatprep.mubr.bf16.mxu1 %v12385_v1 }
  0xf7   :  { %837 = vmatmul.mubr.bf16.gmra.mrb[68].mxu0 %v6805_v24  ;;  %1110 = vmatmul.mubr.bf16.gmra.mrb[68].mxu1 %v6785_v9 }
  0xf8   :  { %846 = vmatprep.mubr.bf16.mxu0 %v12385_v1  ;;  %1119 = vmatprep.mubr.bf16.mxu1 %v12385_v1 }
  0xff   :  { %847 = vmatmul.mubr.bf16.gmra.mrb[72].mxu0 %v6809_v25  ;;  %1120 = vmatmul.mubr.bf16.gmra.mrb[72].mxu1 %v6789_v13 }
 0x100   :  { %856 = vmatprep.mubr.bf16.mxu0 %v12385_v1  ;;  %1129 = vmatprep.mubr.bf16.mxu1 %v12385_v1 }
 0x107   :  { %857 = vmatmul.mubr.bf16.gmra.mrb[76].mxu0 %v7477_v28  ;;  %1130 = vmatmul.mubr.bf16.gmra.mrb[76].mxu1 %v6790_v14 }
 0x108   :  { %866 = vmatprep.mubr.bf16.mxu0 %v12385_v1  ;;  %1139 = vmatprep.mubr.bf16.mxu1 %v12385_v1 }
 0x10f   :  { %867 = vmatmul.mubr.bf16.gmra.mrb[80].mxu0 %v7485_v29  ;;  %1140 = vmatmul.mubr.bf16.gmra.mrb[80].mxu1 %v6791_v15 }
 0x110   :  { %876 = vmatprep.mubr.bf16.mxu0 %v12385_v1  ;;  %1149 = vmatprep.mubr.bf16.mxu1 %v12385_v1 }
 0x117   :  { %877 = vmatmul.mubr.bf16.gmra.mrb[84].mxu0 %v7493_v30  ;;  %1150 = vmatmul.mubr.bf16.gmra.mrb[84].mxu1 %v6795_v18 }
 0x118   :  { %886 = vmatprep.mubr.bf16.mxu0 %v12385_v1  ;;  %1159 = vmatprep.mubr.bf16.mxu1 %v12385_v1 }
 0x11f   :  { %887 = vmatmul.mubr.bf16.gmra.mrb[88].mxu0 %v7501_v31  ;;  %1160 = vmatmul.mubr.bf16.gmra.mrb[88].mxu1 %v6799_v19 }
 0x120   :  { %896 = vmatprep.mubr.bf16.mxu0 %v12385_v1  ;;  %1169 = vmatprep.mubr.bf16.mxu1 %v12385_v1 }
 0x127   :  { %897 = vmatmul.mubr.bf16.gmra.mrb[92].mxu0 %v7509_v34  ;;  %1170 = vmatmul.mubr.bf16.gmra.mrb[92].mxu1 %v6800_v22 }
 0x128   :  { %1179 = vmatprep.mubr.bf16.mxu1 %v12385_v1  ;;  %1810 = vmatprep.mubr.bf16.mxu0 %v12385_v1 }
 0x12f   :  { %1180 = vmatmul.mubr.bf16.gmra.mrb[96].mxu1 %v6804_v23 }
 0x130   :  { %1189 = vmatprep.mubr.bf16.mxu1 %v12385_v1 }
 0x137   :  { %1190 = vmatmul.mubr.bf16.gmra.mrb[100].mxu1 %v6805_v24 }
 0x138   :  { %1199 = vmatprep.mubr.bf16.mxu1 %v12385_v1 }
 0x13f   :  { %1200 = vmatmul.mubr.bf16.gmra.mrb[104].mxu1 %v6809_v25 }
 0x140   :  { %1209 = vmatprep.mubr.bf16.mxu1 %v12385_v1 }
 0x142   :  { %v668_v44 = vpop.f32.mrb[0].mxu0  ;;  %v908_v45 = vpop.f32.mrb[0].mxu1 }
 0x143   :  { %v669_v46 = vadd.f32 %v668_v44, %v7527_v42  ;;  %v670_v47 = vpop.f32.mrb[1].mxu0  ;;  %v909_v48 = vadd.f32 %v908_v45, %v7527_v42  ;;  %v910_v49 = vpop.f32.mrb[1].mxu1 }
 0x144   :  { %v671_v50 = vadd.f32 %v670_v47, %v7531_v43  ;;  %v672_v51 = vpop.f32.mrb[2].mxu0  ;;  %v911_v52 = vadd.f32 %v910_v49, %v7531_v43  ;;  %v912_v53 = vpop.f32.mrb[2].mxu1 }
 0x145   :  { %v673_v54 = vadd.f32 %v672_v51, %v7527_v42  ;;  %v674_v55 = vpop.f32.mrb[3].mxu0  ;;  %v1388_v57 = vmax.f32 %v909_v48, 0.0  ;;  %v913_v58 = vadd.f32 %v912_v53, %v7527_v42  ;;  %v914_v59 = vpop.f32.mrb[3].mxu1  ;;  %v1340_v63 = vmax.f32 %v669_v46, 0.0 }
 0x146   :  { %v675_v60 = vadd.f32 %v674_v55, %v7531_v43  ;;  %v1452_v61 = vmax.f32 %v911_v52, 0.0  ;;  %v915_v62 = vadd.f32 %v914_v59, %v7531_v43  ;;  %v1404_v3 = vmax.f32 %v671_v50, 0.0 }
 0x147   :  { %v1341_v0 = vmax.f32 %v673_v54, 0.0  ;;  %1210 = vmatmul.mubr.bf16.gmra.mrb[108].mxu1 %v7477_v28  ;;  %v1389_v2 = vmax.f32 %v913_v58, 0.0 }
 0x148   :  { %v1405_v4 = vmax.f32 %v675_v60, 0.0  ;;  %1219 = vmatprep.mubr.bf16.mxu1 %v12385_v1  ;;  %v1453_v5 = vmax.f32 %v915_v62, 0.0 }
 0x149   :  { %v7546_v6 = vpack.c.bf16 %v1341_v0, %v1340_v63  ;;  %v7549_v8 = vpack.c.bf16 %v1389_v2, %v1388_v57 }
 0x14a   :  { %v678_v9 = vpop.f32.mrb[4].mxu0  ;;  %v918_v10 = vpop.f32.mrb[4].mxu1  ;;  %v7551_v11 = vpack.c.bf16 %v1405_v4, %v1404_v3  ;;  %v7553_v12 = vpack.c.bf16 %v1453_v5, %v1452_v61 }
 0x14b   :  { %v679_v13 = vadd.f32 %v678_v9, %v7527_v42  ;;  %v680_v14 = vpop.f32.mrb[5].mxu0  ;;  %1811 = vmatmul.mubr.bf16.vlgmr.msra.gmra.mrb[96].mxu0 %v7546_v6  ;;  %v919_v15 = vadd.f32 %v918_v10, %v7527_v42  ;;  %v920_v16 = vpop.f32.mrb[5].mxu1 }
 0x14c   :  { %12406 = vst [vmem:[#allocation18_spill] sm:$0xff] %v7551_v11  ;;  %12407 = vst [vmem:[#allocation19_spill] sm:$0xff] %v7553_v12  ;;  %v681_v17 = vadd.f32 %v680_v14, %v7531_v43  ;;  %3023 = vmatpush1.bf16.msra.mxu0 %v3011_v7  ;;  %v682_v18 = vpop.f32.mrb[6].mxu0  ;;  %1820 = vmatprep.mubr.bf16.mxu0 %v12385_v1  ;;  %v921_v19 = vadd.f32 %v920_v16, %v7531_v43  ;;  %v922_v20 = vpop.f32.mrb[6].mxu1  ;;  %v6862_v11 = vld [vmem:[#allocation8 + $0x28] sm:$0xff]  }
 0x14d   :  { %v683_v21 = vadd.f32 %v682_v18, %v7527_v42  ;;  %v684_v22 = vpop.f32.mrb[7].mxu0  ;;  %v1390_v23 = vmax.f32 %v919_v15, 0.0  ;;  %v923_v24 = vadd.f32 %v922_v20, %v7527_v42  ;;  %v924_v25 = vpop.f32.mrb[7].mxu1  ;;  %4368 = vmatprep.subr.bf16.mxu0 %v12385_v1  ;;  %v1342_v32 = vmax.f32 %v679_v13, 0.0 }
 0x14e   :  { %v685_v26 = vadd.f32 %v684_v22, %v7531_v43  ;;  %v1454_v27 = vmax.f32 %v921_v19, 0.0  ;;  %v925_v28 = vadd.f32 %v924_v25, %v7531_v43  ;;  %v1406_v36 = vmax.f32 %v681_v17, 0.0 }
 0x14f   :  { %v1343_v33 = vmax.f32 %v683_v21, 0.0  ;;  %1220 = vmatmul.mubr.bf16.gmra.mrb[112].mxu1 %v7485_v29  ;;  %v1391_v35 = vmax.f32 %v923_v24, 0.0 }
 0x150   :  { %v1407_v40 = vmax.f32 %v685_v26, 0.0  ;;  %1229 = vmatprep.mubr.bf16.mxu1 %v12385_v1  ;;  %v1455_v44 = vmax.f32 %v925_v28, 0.0 }
 0x151   :  { %v7568_v45 = vpack.c.bf16 %v1343_v33, %v1342_v32  ;;  %v7570_v46 = vpack.c.bf16 %v1391_v35, %v1390_v23 }
 0x152   :  { %v7572_v47 = vpack.c.bf16 %v1407_v40, %v1406_v36  ;;  %v688_v48 = vpop.f32.mrb[8].mxu0  ;;  %v7574_v49 = vpack.c.bf16 %v1455_v44, %v1454_v27  ;;  %v928_v50 = vpop.f32.mrb[8].mxu1  ;;  %v7609_v44 = vld [vmem:[%s12376_s6 + $0x8] sm:$0xff] }
 0x153   :  { %v689_v51 = vadd.f32 %v688_v48, %v7527_v42  ;;  %v690_v52 = vpop.f32.mrb[9].mxu0  ;;  %1821 = vmatmul.mubr.bf16.gmra.mrb[100].mxu0 %v7568_v45  ;;  %v929_v29 = vadd.f32 %v928_v50, %v7527_v42  ;;  %v930_v53 = vpop.f32.mrb[9].mxu1 }
 0x154   :  { %12408 = vst [vmem:[#allocation20_spill] sm:$0xff] %v7572_v47  ;;  %12409 = vst [vmem:[#allocation21_spill] sm:$0xff] %v7574_v49  ;;  %v691_v54 = vadd.f32 %v690_v52, %v7531_v43  ;;  %v692_v55 = vpop.f32.mrb[10].mxu0  ;;  %1830 = vmatprep.mubr.bf16.mxu0 %v12385_v1  ;;  %v931_v56 = vadd.f32 %v930_v53, %v7531_v43  ;;  %v932_v57 = vpop.f32.mrb[10].mxu1  ;;  %v6393_v52 = vcombine.high %v7609_v44, %v7609_v44 }
 0x155   :  { %v693_v58 = vadd.f32 %v692_v55, %v7527_v42  ;;  %v694_v59 = vpop.f32.mrb[11].mxu0  ;;  %v1392_v60 = vmax.f32 %v929_v29, 0.0  ;;  %v933_v61 = vadd.f32 %v932_v57, %v7527_v42  ;;  %v934_v62 = vpop.f32.mrb[11].mxu1  ;;  %v1344_v3 = vmax.f32 %v689_v51, 0.0 }
 0x156   :  { %v695_v63 = vadd.f32 %v694_v59, %v7531_v43  ;;  %v1456_v0 = vmax.f32 %v931_v56, 0.0  ;;  %v935_v2 = vadd.f32 %v934_v62, %v7531_v43  ;;  %v1408_v7 = vmax.f32 %v691_v54, 0.0  ;;  %6427 = vmatprep.subr.msk.bf16.mxu1 %vm3009_vm0, %v6393_v52 }
 0x157   :  { %v1345_v4 = vmax.f32 %v693_v58, 0.0  ;;  %1230 = vmatmul.mubr.bf16.gmra.mrb[116].mxu1 %v7493_v30  ;;  %v1393_v5 = vmax.f32 %v933_v61, 0.0 }
 0x158   :  { %v1409_v9 = vmax.f32 %v695_v63, 0.0  ;;  %1239 = vmatprep.mubr.bf16.mxu1 %v12385_v1  ;;  %v1457_v10 = vmax.f32 %v935_v2, 0.0 }
 0x159   :  { %v7588_v13 = vpack.c.bf16 %v1345_v4, %v1344_v3  ;;  %v7590_v14 = vpack.c.bf16 %v1393_v5, %v1392_v60 }
 0x15a   :  { %v698_v15 = vpop.f32.mrb[12].mxu0  ;;  %v938_v16 = vpop.f32.mrb[12].mxu1  ;;  %v7592_v17 = vpack.c.bf16 %v1409_v9, %v1408_v7  ;;  %v7594_v18 = vpack.c.bf16 %v1457_v10, %v1456_v0 }
 0x15b   :  { %v699_v19 = vadd.f32 %v698_v15, %v7527_v42  ;;  %v700_v20 = vpop.f32.mrb[13].mxu0  ;;  %1831 = vmatmul.mubr.bf16.gmra.mrb[104].mxu0 %v7588_v13  ;;  %v939_v30 = vadd.f32 %v938_v16, %v7527_v42  ;;  %v940_v21 = vpop.f32.mrb[13].mxu1 }
 0x15c   :  { %12410 = vst [vmem:[#allocation22_spill] sm:$0xff] %v7592_v17  ;;  %12411 = vst [vmem:[#allocation23_spill] sm:$0xff] %v7594_v18  ;;  %v701_v22 = vadd.f32 %v700_v20, %v7531_v43  ;;  %v702_v23 = vpop.f32.mrb[14].mxu0  ;;  %1840 = vmatprep.mubr.bf16.mxu0 %v12385_v1  ;;  %v941_v24 = vadd.f32 %v940_v21, %v7531_v43  ;;  %v942_v25 = vpop.f32.mrb[14].mxu1  ;;  %v6856_v17 = vld [vmem:[#allocation8 + $0x18] sm:$0xff]  }
 0x15d   :  { %v703_v26 = vadd.f32 %v702_v23, %v7527_v42  ;;  %v704_v27 = vpop.f32.mrb[15].mxu0  ;;  %v1394_v28 = vmax.f32 %v939_v30, 0.0  ;;  %v943_v32 = vadd.f32 %v942_v25, %v7527_v42  ;;  %v944_v33 = vpop.f32.mrb[15].mxu1  ;;  %v1346_v48 = vmax.f32 %v699_v19, 0.0 }
 0x15e   :  { %v705_v35 = vadd.f32 %v704_v27, %v7531_v43  ;;  %v1458_v36 = vmax.f32 %v941_v24, 0.0  ;;  %v945_v40 = vadd.f32 %v944_v33, %v7531_v43  ;;  %v1410_v29 = vmax.f32 %v701_v22, 0.0 }
 0x15f   :  { %v1347_v50 = vmax.f32 %v703_v26, 0.0  ;;  %1240 = vmatmul.mubr.bf16.gmra.mrb[120].mxu1 %v7501_v31  ;;  %v1395_v51 = vmax.f32 %v943_v32, 0.0 }
 0x160   :  { %v1411_v53 = vmax.f32 %v705_v35, 0.0  ;;  %1249 = vmatprep.mubr.bf16.mxu1 %v12385_v1  ;;  %v1459_v54 = vmax.f32 %v945_v40, 0.0 }
 0x161   :  { %v7615_v55 = vpack.c.bf16 %v1347_v50, %v1346_v48  ;;  %v7618_v56 = vpack.c.bf16 %v1395_v51, %v1394_v28 }
 0x162   :  { %v7620_v57 = vpack.c.bf16 %v1411_v53, %v1410_v29  ;;  %v708_v58 = vpop.f32.mrb[16].mxu0  ;;  %v7622_v59 = vpack.c.bf16 %v1459_v54, %v1458_v36  ;;  %v948_v31 = vpop.f32.mrb[16].mxu1 }
 0x163   :  { %v709_v60 = vadd.f32 %v708_v58, %v7527_v42  ;;  %v710_v61 = vpop.f32.mrb[17].mxu0  ;;  %1841 = vmatmul.mubr.bf16.gmra.mrb[108].mxu0 %v7615_v55  ;;  %v949_v62 = vadd.f32 %v948_v31, %v7527_v42  ;;  %v950_v63 = vpop.f32.mrb[17].mxu1 }
 0x164   :  { %12412 = vst [vmem:[#allocation24_spill] sm:$0xff] %v7620_v57  ;;  %12413 = vst [vmem:[#allocation25_spill] sm:$0xff] %v7622_v59  ;;  %v711_v0 = vadd.f32 %v710_v61, %v7531_v43  ;;  %v712_v2 = vpop.f32.mrb[18].mxu0  ;;  %1850 = vmatprep.mubr.bf16.mxu0 %v12385_v1  ;;  %v951_v3 = vadd.f32 %v950_v63, %v7531_v43  ;;  %v952_v4 = vpop.f32.mrb[18].mxu1 }
 0x165   :  { %v713_v5 = vadd.f32 %v712_v2, %v7527_v42  ;;  %v714_v7 = vpop.f32.mrb[19].mxu0  ;;  %v1396_v9 = vmax.f32 %v949_v62, 0.0  ;;  %v953_v10 = vadd.f32 %v952_v4, %v7527_v42  ;;  %v954_v15 = vpop.f32.mrb[19].mxu1  ;;  %v1348_v30 = vmax.f32 %v709_v60, 0.0 }
 0x166   :  { %v715_v16 = vadd.f32 %v714_v7, %v7531_v43  ;;  %v1460_v19 = vmax.f32 %v951_v3, 0.0  ;;  %v955_v20 = vadd.f32 %v954_v15, %v7531_v43  ;;  %v1412_v23 = vmax.f32 %v711_v0, 0.0  ;;  %v7046_v3 = vld [vmem:[%s12370_s0 + $0xc0] sm:$0xff]  }
 0x167   :  { %v1349_v21 = vmax.f32 %v713_v5, 0.0  ;;  %1250 = vmatmul.mubr.bf16.gmra.mrb[124].mxu1 %v7509_v34  ;;  %v1397_v22 = vmax.f32 %v953_v10, 0.0 }
 0x168   :  { %v1413_v24 = vmax.f32 %v715_v16, 0.0  ;;  %1259 = vmatprep.mubr.bf16.mxu1 %v12385_v1  ;;  %v1461_v25 = vmax.f32 %v955_v20, 0.0 }
 0x169   :  { %v7636_v26 = vpack.c.bf16 %v1349_v21, %v1348_v30  ;;  %v7638_v27 = vpack.c.bf16 %v1397_v22, %v1396_v9 }
 0x16a   :  { %v718_v28 = vpop.f32.mrb[20].mxu0  ;;  %v958_v32 = vpop.f32.mrb[20].mxu1  ;;  %v7640_v33 = vpack.c.bf16 %v1413_v24, %v1412_v23  ;;  %v7642_v35 = vpack.c.bf16 %v1461_v25, %v1460_v19 }
 0x16b   :  { %v719_v36 = vadd.f32 %v718_v28, %v7527_v42  ;;  %v720_v40 = vpop.f32.mrb[21].mxu0  ;;  %1851 = vmatmul.mubr.bf16.gmra.mrb[112].mxu0 %v7636_v26  ;;  %v959_v34 = vadd.f32 %v958_v32, %v7527_v42  ;;  %v960_v48 = vpop.f32.mrb[21].mxu1 }
 0x16c   :  { %12414 = vst [vmem:[#allocation26_spill] sm:$0xff] %v7640_v33  ;;  %12415 = vst [vmem:[#allocation27_spill] sm:$0xff] %v7642_v35  ;;  %v721_v50 = vadd.f32 %v720_v40, %v7531_v43  ;;  %v722_v51 = vpop.f32.mrb[22].mxu0  ;;  %1860 = vmatprep.mubr.bf16.mxu0 %v12385_v1  ;;  %v961_v52 = vadd.f32 %v960_v48, %v7531_v43  ;;  %v962_v29 = vpop.f32.mrb[22].mxu1 }
 0x16d   :  { %v723_v53 = vadd.f32 %v722_v51, %v7527_v42  ;;  %v724_v54 = vpop.f32.mrb[23].mxu0  ;;  %v1398_v58 = vmax.f32 %v959_v34, 0.0  ;;  %v963_v31 = vadd.f32 %v962_v29, %v7527_v42  ;;  %v964_v60 = vpop.f32.mrb[23].mxu1  ;;  %v1350_v0 = vmax.f32 %v719_v36, 0.0 }
 0x16e   :  { %v725_v61 = vadd.f32 %v724_v54, %v7531_v43  ;;  %v1462_v62 = vmax.f32 %v961_v52, 0.0  ;;  %v965_v63 = vadd.f32 %v964_v60, %v7531_v43  ;;  %v1414_v5 = vmax.f32 %v721_v50, 0.0 }
 0x16f   :  { %v1351_v2 = vmax.f32 %v723_v53, 0.0  ;;  %1260 = vmatmul.mubr.bf16.gmra.mrb[128].mxu1 %v7046_v3  ;;  %v1399_v4 = vmax.f32 %v963_v31, 0.0  ;;  %v7047_v31 = vld [vmem:[%s12370_s0 + $0xc8] sm:$0xff]  }
 0x170   :  { %v1415_v7 = vmax.f32 %v725_v61, 0.0  ;;  %1269 = vmatprep.mubr.bf16.mxu1 %v12385_v1  ;;  %v1463_v9 = vmax.f32 %v965_v63, 0.0 }
 0x171   :  { %v7658_v10 = vpack.c.bf16 %v1351_v2, %v1350_v0  ;;  %v7660_v15 = vpack.c.bf16 %v1399_v4, %v1398_v58 }
 0x172   :  { %v7662_v16 = vpack.c.bf16 %v1415_v7, %v1414_v5  ;;  %v728_v19 = vpop.f32.mrb[24].mxu0  ;;  %v7664_v20 = vpack.c.bf16 %v1463_v9, %v1462_v62  ;;  %v968_v30 = vpop.f32.mrb[24].mxu1 }
 0x173   :  { %v729_v21 = vadd.f32 %v728_v19, %v7527_v42  ;;  %v730_v22 = vpop.f32.mrb[25].mxu0  ;;  %1861 = vmatmul.mubr.bf16.gmra.mrb[116].mxu0 %v7658_v10  ;;  %v969_v23 = vadd.f32 %v968_v30, %v7527_v42  ;;  %v970_v24 = vpop.f32.mrb[25].mxu1 }
 0x174   :  { %12416 = vst [vmem:[#allocation28_spill] sm:$0xff] %v7662_v16  ;;  %12417 = vst [vmem:[#allocation29_spill] sm:$0xff] %v7664_v20  ;;  %v731_v25 = vadd.f32 %v730_v22, %v7531_v43  ;;  %v732_v28 = vpop.f32.mrb[26].mxu0  ;;  %1870 = vmatprep.mubr.bf16.mxu0 %v12385_v1  ;;  %v971_v32 = vadd.f32 %v970_v24, %v7531_v43  ;;  %v972_v36 = vpop.f32.mrb[26].mxu1  ;;  %v7053_v20 = vld [vmem:[%s12370_s0 + $0xf8] sm:$0xff]  }
 0x175   :  { %v733_v40 = vadd.f32 %v732_v28, %v7527_v42  ;;  %v734_v34 = vpop.f32.mrb[27].mxu0  ;;  %v1400_v48 = vmax.f32 %v969_v23, 0.0  ;;  %v973_v50 = vadd.f32 %v972_v36, %v7527_v42  ;;  %v974_v51 = vpop.f32.mrb[27].mxu1  ;;  %v1352_v54 = vmax.f32 %v729_v21, 0.0 }
 0x176   :  { %v735_v52 = vadd.f32 %v734_v34, %v7531_v43  ;;  %v1464_v29 = vmax.f32 %v971_v32, 0.0  ;;  %v975_v53 = vadd.f32 %v974_v51, %v7531_v43  ;;  %v1416_v61 = vmax.f32 %v731_v25, 0.0 }
 0x177   :  { %v1353_v58 = vmax.f32 %v733_v40, 0.0  ;;  %1270 = vmatmul.mubr.bf16.gmra.mrb[132].mxu1 %v7047_v31  ;;  %v1401_v60 = vmax.f32 %v973_v50, 0.0 }
 0x178   :  { %v1417_v62 = vmax.f32 %v735_v52, 0.0  ;;  %1279 = vmatprep.mubr.bf16.mxu1 %v12385_v1  ;;  %v1465_v63 = vmax.f32 %v975_v53, 0.0  ;;  %v7048_v53 = vld [vmem:[%s12370_s0 + $0xd0] sm:$0xff]  }
 0x179   :  { %v7680_v0 = vpack.c.bf16 %v1353_v58, %v1352_v54  ;;  %v7682_v2 = vpack.c.bf16 %v1401_v60, %v1400_v48 }
 0x17a   :  { %v738_v3 = vpop.f32.mrb[28].mxu0  ;;  %v978_v4 = vpop.f32.mrb[28].mxu1  ;;  %v7684_v5 = vpack.c.bf16 %v1417_v62, %v1416_v61  ;;  %v7686_v7 = vpack.c.bf16 %v1465_v63, %v1464_v29 }
 0x17b   :  { %v739_v9 = vadd.f32 %v738_v3, %v7527_v42  ;;  %v740_v19 = vpop.f32.mrb[29].mxu0  ;;  %1871 = vmatmul.mubr.bf16.gmra.mrb[120].mxu0 %v7680_v0  ;;  %v979_v30 = vadd.f32 %v978_v4, %v7527_v42  ;;  %v980_v21 = vpop.f32.mrb[29].mxu1 }
 0x17c   :  { %12418 = vst [vmem:[#allocation30_spill] sm:$0xff] %v7684_v5  ;;  %12419 = vst [vmem:[#allocation31_spill] sm:$0xff] %v7686_v7  ;;  %v741_v22 = vadd.f32 %v740_v19, %v7531_v43  ;;  %v742_v23 = vpop.f32.mrb[30].mxu0  ;;  %1880 = vmatprep.mubr.bf16.mxu0 %v12385_v1  ;;  %v981_v24 = vadd.f32 %v980_v21, %v7531_v43  ;;  %v982_v25 = vpop.f32.mrb[30].mxu1 }
 0x17d   :  { %v743_v28 = vadd.f32 %v742_v23, %v7527_v42  ;;  %v744_v32 = vpop.f32.mrb[31].mxu0  ;;  %v1402_v36 = vmax.f32 %v979_v30, 0.0  ;;  %v983_v40 = vadd.f32 %v982_v25, %v7527_v42  ;;  %v984_v34 = vpop.f32.mrb[31].mxu1  ;;  %v1354_v52 = vmax.f32 %v739_v9, 0.0 }
 0x17e   :  { %v745_v48 = vadd.f32 %v744_v32, %v7531_v43  ;;  %v1466_v50 = vmax.f32 %v981_v24, 0.0  ;;  %v985_v51 = vadd.f32 %v984_v34, %v7531_v43  ;;  %v1418_v58 = vmax.f32 %v741_v22, 0.0 }
 0x17f   :  { %v1355_v29 = vmax.f32 %v743_v28, 0.0  ;;  %1280 = vmatmul.mubr.bf16.gmra.mrb[136].mxu1 %v7048_v53  ;;  %v1403_v54 = vmax.f32 %v983_v40, 0.0 }
 0x180   :  { %v1419_v31 = vmax.f32 %v745_v48, 0.0  ;;  %1289 = vmatprep.mubr.bf16.mxu1 %v12385_v1  ;;  %v1467_v60 = vmax.f32 %v985_v51, 0.0  ;;  %v7049_v48 = vld [vmem:[%s12370_s0 + $0xd8] sm:$0xff]  }
 0x181   :  { %v7702_v61 = vpack.c.bf16 %v1355_v29, %v1354_v52  ;;  %v7704_v62 = vpack.c.bf16 %v1403_v54, %v1402_v36 }
 0x182   :  { %v7706_v63 = vpack.c.bf16 %v1419_v31, %v1418_v58  ;;  %v748_v3 = vpop.f32.mrb[32].mxu0  ;;  %v7708_v4 = vpack.c.bf16 %v1467_v60, %v1466_v50  ;;  %v7710_v9 = vpop.f32.mrb[32].mxu1 }
 0x183   :  { %12422 = vst [vmem:[#allocation34_spill] sm:$0xff] %v7710_v9  ;;  %v749_v19 = vadd.f32 %v748_v3, %v7527_v42  ;;  %v750_v30 = vpop.f32.mrb[33].mxu0  ;;  %1881 = vmatmul.mubr.bf16.gmra.mrb[124].mxu0 %v7702_v61  ;;  %v7714_v21 = vpop.f32.mrb[33].mxu1 }
 0x184   :  { %12420 = vst [vmem:[#allocation32_spill] sm:$0xff] %v7706_v63  ;;  %12421 = vst [vmem:[#allocation33_spill] sm:$0xff] %v7708_v4  ;;  %v751_v22 = vadd.f32 %v750_v30, %v7531_v43  ;;  %v752_v23 = vpop.f32.mrb[34].mxu0  ;;  %1890 = vmatprep.mubr.bf16.mxu0 %v12385_v1  ;;  %v7718_v24 = vpop.f32.mrb[34].mxu1 }
 0x185   :  { %12423 = vst [vmem:[#allocation35_spill] sm:$0xff] %v7714_v21  ;;  %12424 = vst [vmem:[#allocation36_spill] sm:$0xff] %v7718_v24  ;;  %v753_v25 = vadd.f32 %v752_v23, %v7527_v42  ;;  %v754_v28 = vpop.f32.mrb[35].mxu0  ;;  %v7721_v32 = vpop.f32.mrb[35].mxu1  ;;  %v1356_v40 = vmax.f32 %v749_v19, 0.0 }
 0x186   :  { %12425 = vst [vmem:[#allocation37_spill] sm:$0xff] %v7721_v32  ;;  %v755_v36 = vadd.f32 %v754_v28, %v7531_v43  ;;  %v1420_v50 = vmax.f32 %v751_v22, 0.0 }
 0x187   :  { %v1357_v34 = vmax.f32 %v753_v25, 0.0  ;;  %1290 = vmatmul.mubr.bf16.gmra.mrb[140].mxu1 %v7049_v48 }
 0x188   :  { %v1421_v51 = vmax.f32 %v755_v36, 0.0  ;;  %1299 = vmatprep.mubr.bf16.mxu1 %v12385_v1 }
 0x189   :  { %v7728_v52 = vpack.c.bf16 %v1357_v34, %v1356_v40  ;;  %v7050_v34 = vld [vmem:[%s12370_s0 + $0xe0] sm:$0xff]  }
 0x18a   :  { %v758_v29 = vpop.f32.mrb[36].mxu0  ;;  %v7730_v53 = vpop.f32.mrb[36].mxu1  ;;  %v7732_v54 = vpack.c.bf16 %v1421_v51, %v1420_v50 }
 0x18b   :  { %12426 = vst [vmem:[#allocation38_spill] sm:$0xff] %v7730_v53  ;;  %v759_v58 = vadd.f32 %v758_v29, %v7527_v42  ;;  %v760_v31 = vpop.f32.mrb[37].mxu0  ;;  %1891 = vmatmul.mubr.bf16.gmra.mrb[128].mxu0 %v7728_v52  ;;  %v7736_v60 = vpop.f32.mrb[37].mxu1  ;;  %v7052_v53 = vld [vmem:[%s12370_s0 + $0xf0] sm:$0xff]  }
 0x18c   :  { %12427 = vst [vmem:[#allocation39_spill] sm:$0xff] %v7732_v54  ;;  %12428 = vst [vmem:[#allocation40_spill] sm:$0xff] %v7736_v60  ;;  %v761_v3 = vadd.f32 %v760_v31, %v7531_v43  ;;  %v762_v19 = vpop.f32.mrb[38].mxu0  ;;  %1900 = vmatprep.mubr.bf16.mxu0 %v12385_v1  ;;  %v7740_v30 = vpop.f32.mrb[38].mxu1  ;;  %v6874_v60 = vld [vmem:[#allocation8 + $0x48] sm:$0xff]  }
 0x18d   :  { %12429 = vst [vmem:[#allocation41_spill] sm:$0xff] %v7740_v30  ;;  %v763_v22 = vadd.f32 %v762_v19, %v7527_v42  ;;  %v764_v23 = vpop.f32.mrb[39].mxu0  ;;  %v7743_v25 = vpop.f32.mrb[39].mxu1  ;;  %v1358_v36 = vmax.f32 %v759_v58, 0.0 }
 0x18e   :  { %12430 = vst [vmem:[#allocation42_spill] sm:$0xff] %v7743_v25  ;;  %v765_v28 = vadd.f32 %v764_v23, %v7531_v43  ;;  %v1422_v48 = vmax.f32 %v761_v3, 0.0 }
 0x18f   :  { %v1359_v40 = vmax.f32 %v763_v22, 0.0  ;;  %1300 = vmatmul.mubr.bf16.gmra.mrb[144].mxu1 %v7050_v34 }
 0x190   :  { %v1423_v50 = vmax.f32 %v765_v28, 0.0  ;;  %1309 = vmatprep.mubr.bf16.mxu1 %v12385_v1 }
 0x191   :  { %v7750_v51 = vpack.c.bf16 %v1359_v40, %v1358_v36 }
 0x192   :  { %v7752_v29 = vpack.c.bf16 %v1423_v50, %v1422_v48  ;;  %v768_v31 = vpop.f32.mrb[40].mxu0  ;;  %v7754_v19 = vpop.f32.mrb[40].mxu1 }
 0x193   :  { %12432 = vst [vmem:[#allocation44_spill] sm:$0xff] %v7754_v19  ;;  %v769_v23 = vadd.f32 %v768_v31, %v7527_v42  ;;  %v770_v58 = vpop.f32.mrb[41].mxu0  ;;  %1901 = vmatmul.mubr.bf16.gmra.mrb[132].mxu0 %v7750_v51  ;;  %v7758_v22 = vpop.f32.mrb[41].mxu1 }
 0x194   :  { %12431 = vst [vmem:[#allocation43_spill] sm:$0xff] %v7752_v29  ;;  %12433 = vst [vmem:[#allocation45_spill] sm:$0xff] %v7758_v22  ;;  %v771_v34 = vadd.f32 %v770_v58, %v7531_v43  ;;  %v772_v3 = vpop.f32.mrb[42].mxu0  ;;  %1910 = vmatprep.mubr.bf16.mxu0 %v12385_v1  ;;  %v7762_v28 = vpop.f32.mrb[42].mxu1 }
 0x195   :  { %12434 = vst [vmem:[#allocation46_spill] sm:$0xff] %v7762_v28  ;;  %v773_v36 = vadd.f32 %v772_v3, %v7527_v42  ;;  %v774_v40 = vpop.f32.mrb[43].mxu0  ;;  %v7765_v48 = vpop.f32.mrb[43].mxu1  ;;  %v1360_v31 = vmax.f32 %v769_v23, 0.0 }
 0x196   :  { %12435 = vst [vmem:[#allocation47_spill] sm:$0xff] %v7765_v48  ;;  %v775_v50 = vadd.f32 %v774_v40, %v7531_v43  ;;  %v1424_v58 = vmax.f32 %v771_v34, 0.0 }
 0x197   :  { %v1361_v37 = vmax.f32 %v773_v36, 0.0  ;;  %1310 = vmatmul.mubr.bf16.gmra.mrb[148].mxu1 %v7051_v41 }
 0x198   :  { %v1425_v4 = vmax.f32 %v775_v50, 0.0  ;;  %1319 = vmatprep.mubr.bf16.mxu1 %v12385_v1 }
 0x199   :  { %v7772_v19 = vpack.c.bf16 %v1361_v37, %v1360_v31 }
 0x19a   :  { %v778_v28 = vpop.f32.mrb[44].mxu0  ;;  %v7774_v3 = vpop.f32.mrb[44].mxu1  ;;  %v7776_v30 = vpack.c.bf16 %v1425_v4, %v1424_v58 }
 0x19b   :  { %12436 = vst [vmem:[#allocation48_spill] sm:$0xff] %v7774_v3  ;;  %v779_v40 = vadd.f32 %v778_v28, %v7527_v42  ;;  %v780_v23 = vpop.f32.mrb[45].mxu0  ;;  %1911 = vmatmul.mubr.bf16.gmra.mrb[136].mxu0 %v7772_v19  ;;  %v7780_v36 = vpop.f32.mrb[45].mxu1 }
 0x19c   :  { %12437 = vst [vmem:[#allocation49_spill] sm:$0xff] %v7776_v30  ;;  %12438 = vst [vmem:[#allocation50_spill] sm:$0xff] %v7780_v36  ;;  %v781_v41 = vadd.f32 %v780_v23, %v7531_v43  ;;  %v782_v34 = vpop.f32.mrb[46].mxu0  ;;  %1920 = vmatprep.mubr.bf16.mxu0 %v12385_v1  ;;  %v7784_v50 = vpop.f32.mrb[46].mxu1  ;;  %v6868_v36 = vld [vmem:[#allocation8 + $0x38] sm:$0xff]  }
 0x19d   :  { %12439 = vst [vmem:[#allocation51_spill] sm:$0xff] %v7784_v50  ;;  %v783_v37 = vadd.f32 %v782_v34, %v7527_v42  ;;  %v784_v31 = vpop.f32.mrb[47].mxu0  ;;  %v7787_v3 = vpop.f32.mrb[47].mxu1  ;;  %v1362_v28 = vmax.f32 %v779_v40, 0.0 }
 0x19e   :  { %12440 = vst [vmem:[#allocation52_spill] sm:$0xff] %v7787_v3  ;;  %v785_v4 = vadd.f32 %v784_v31, %v7531_v43  ;;  %v1426_v23 = vmax.f32 %v781_v41, 0.0 }
 0x19f   :  { %v1363_v58 = vmax.f32 %v783_v37, 0.0  ;;  %1320 = vmatmul.mubr.bf16.gmra.mrb[152].mxu1 %v7052_v53 }
 0x1a0   :  { %v1427_v7 = vmax.f32 %v785_v4, 0.0  ;;  %1329 = vmatprep.mubr.bf16.mxu1 %v12385_v1 }
 0x1a1   :  { %v7794_v24 = vpack.c.bf16 %v1363_v58, %v1362_v28 }
 0x1a2   :  { %v7796_v50 = vpack.c.bf16 %v1427_v7, %v1426_v23  ;;  %v788_v34 = vpop.f32.mrb[48].mxu0  ;;  %v7798_v9 = vpop.f32.mrb[48].mxu1 }
 0x1a3   :  { %12442 = vst [vmem:[#allocation54_spill] sm:$0xff] %v7798_v9  ;;  %v789_v31 = vadd.f32 %v788_v34, %v7527_v42  ;;  %v790_v40 = vpop.f32.mrb[49].mxu0  ;;  %1921 = vmatmul.mubr.bf16.gmra.mrb[140].mxu0 %v7794_v24  ;;  %v7802_v37 = vpop.f32.mrb[49].mxu1 }
 0x1a4   :  { %12441 = vst [vmem:[#allocation53_spill] sm:$0xff] %v7796_v50  ;;  %12443 = vst [vmem:[#allocation55_spill] sm:$0xff] %v7802_v37  ;;  %v791_v53 = vadd.f32 %v790_v40, %v7531_v43  ;;  %v792_v41 = vpop.f32.mrb[50].mxu0  ;;  %1930 = vmatprep.mubr.bf16.mxu0 %v12385_v1  ;;  %v7806_v4 = vpop.f32.mrb[50].mxu1 }
 0x1a5   :  { %12444 = vst [vmem:[#allocation56_spill] sm:$0xff] %v7806_v4  ;;  %v793_v7 = vadd.f32 %v792_v41, %v7527_v42  ;;  %v794_v28 = vpop.f32.mrb[51].mxu0  ;;  %v7809_v58 = vpop.f32.mrb[51].mxu1  ;;  %v1364_v34 = vmax.f32 %v789_v31, 0.0  ;;  %v6392_v41 = vcombine.low %v7609_v44, %v7609_v44 }
 0x1a6   :  { %12445 = vst [vmem:[#allocation57_spill] sm:$0xff] %v7809_v58  ;;  %v795_v23 = vadd.f32 %v794_v28, %v7531_v43  ;;  %v1428_v40 = vmax.f32 %v791_v53, 0.0 }
 0x1a7   :  { %v1365_v9 = vmax.f32 %v793_v7, 0.0  ;;  %1330 = vmatmul.mubr.bf16.gmra.mrb[156].mxu1 %v7053_v20 }
 0x1a8   :  { %v1429_v35 = vmax.f32 %v795_v23, 0.0  ;;  %2163 = vmatprep.mubr.bf16.mxu1 %v12385_v1 }
 0x1a9   :  { %v7816_v59 = vpack.c.bf16 %v1365_v9, %v1364_v34 }
 0x1aa   :  { %v798_v4 = vpop.f32.mrb[52].mxu0  ;;  %v7820_v18 = vpop.f32.mrb[52].mxu1  ;;  %v7822_v28 = vpack.c.bf16 %v1429_v35, %v1428_v40  ;;  %v3017_v35 = vsel %vm3009_vm0, %v6392_v41, 0 }
 0x1ab   :  { %12446 = vst [vmem:[#allocation58_spill] sm:$0xff] %v7820_v18  ;;  %v799_v31 = vadd.f32 %v798_v4, %v7527_v42  ;;  %v800_v7 = vpop.f32.mrb[53].mxu0  ;;  %1931 = vmatmul.mubr.bf16.gmra.mrb[144].mxu0 %v7816_v59  ;;  %v7826_v20 = vpop.f32.mrb[53].mxu1 }
 0x1ac   :  { %12447 = vst [vmem:[#allocation59_spill] sm:$0xff] %v7822_v28  ;;  %12448 = vst [vmem:[#allocation60_spill] sm:$0xff] %v7826_v20  ;;  %v801_v53 = vadd.f32 %v800_v7, %v7531_v43  ;;  %v802_v23 = vpop.f32.mrb[54].mxu0  ;;  %1940 = vmatprep.mubr.bf16.mxu0 %v12385_v1  ;;  %v7830_v9 = vpop.f32.mrb[54].mxu1 }
 0x1ad   :  { %12449 = vst [vmem:[#allocation61_spill] sm:$0xff] %v7830_v9  ;;  %v803_v44 = vadd.f32 %v802_v23, %v7527_v42  ;;  %v804_v34 = vpop.f32.mrb[55].mxu0  ;;  %v7833_v18 = vpop.f32.mrb[55].mxu1  ;;  %v1366_v40 = vmax.f32 %v799_v31, 0.0 }
 0x1ae   :  { %12450 = vst [vmem:[#allocation62_spill] sm:$0xff] %v7833_v18  ;;  %v805_v4 = vadd.f32 %v804_v34, %v7531_v43  ;;  %v1430_v12 = vmax.f32 %v801_v53, 0.0 }
 0x1af   :  { %v1367_v49 = vmax.f32 %v803_v44, 0.0  ;;  %2164 = vmatmul.mubr.bf16.vlgmr.msra.gmra.mrb[160].mxu1 %v7546_v6 }
 0x1b0   :  { %v1431_v7 = vmax.f32 %v805_v4, 0.0  ;;  %2173 = vmatprep.mubr.bf16.mxu1 %v12385_v1  ;;  %3376 = vmatpush1.bf16.msra.mxu1 %v3017_v35 }
 0x1b1   :  { %v7839_v28 = vpack.c.bf16 %v1367_v49, %v1366_v40  ;;  %4657 = vmatprep.subr.bf16.mxu1 %v12385_v1 }
 0x1b2   :  { %v7842_v23 = vpack.c.bf16 %v1431_v7, %v1430_v12  ;;  %v808_v9 = vpop.f32.mrb[56].mxu0  ;;  %v7844_v50 = vpop.f32.mrb[56].mxu1 }
 0x1b3   :  { %12452 = vst [vmem:[#allocation64_spill] sm:$0xff] %v7844_v50  ;;  %v809_v41 = vadd.f32 %v808_v9, %v7527_v42  ;;  %v810_v31 = vpop.f32.mrb[57].mxu0  ;;  %1941 = vmatmul.mubr.bf16.gmra.mrb[148].mxu0 %v7839_v28  ;;  %v7848_v6 = vpop.f32.mrb[57].mxu1 }
 0x1b4   :  { %12451 = vst [vmem:[#allocation63_spill] sm:$0xff] %v7842_v23  ;;  %12453 = vst [vmem:[#allocation65_spill] sm:$0xff] %v7848_v6  ;;  %v811_v53 = vadd.f32 %v810_v31, %v7531_v43  ;;  %v812_v44 = vpop.f32.mrb[58].mxu0  ;;  %1950 = vmatprep.mubr.bf16.mxu0 %v12385_v1  ;;  %v7852_v49 = vpop.f32.mrb[58].mxu1 }
 0x1b5   :  { %12454 = vst [vmem:[#allocation66_spill] sm:$0xff] %v7852_v49  ;;  %v813_v12 = vadd.f32 %v812_v44, %v7527_v42  ;;  %v814_v34 = vpop.f32.mrb[59].mxu0  ;;  %v7855_v35 = vpop.f32.mrb[59].mxu1  ;;  %v1368_v9 = vmax.f32 %v809_v41, 0.0 }
 0x1b6   :  { %12455 = vst [vmem:[#allocation67_spill] sm:$0xff] %v7855_v35  ;;  %v815_v4 = vadd.f32 %v814_v34, %v7531_v43  ;;  %v1432_v7 = vmax.f32 %v811_v53, 0.0 }
 0x1b7   :  { %v1369_v40 = vmax.f32 %v813_v12, 0.0  ;;  %2174 = vmatmul.mubr.bf16.gmra.mrb[164].mxu1 %v7568_v45 }
 0x1b8   :  { %v1433_v50 = vmax.f32 %v815_v4, 0.0  ;;  %2183 = vmatprep.mubr.bf16.mxu1 %v12385_v1 }
 0x1b9   :  { %v7860_v31 = vpack.c.bf16 %v1369_v40, %v1368_v9 }
 0x1ba   :  { %v818_v23 = vpop.f32.mrb[60].mxu0  ;;  %v7862_v30 = vpop.f32.mrb[60].mxu1  ;;  %v7864_v49 = vpack.c.bf16 %v1433_v50, %v1432_v7 }
 0x1bb   :  { %12456 = vst [vmem:[#allocation68_spill] sm:$0xff] %v7862_v30  ;;  %v819_v44 = vadd.f32 %v818_v23, %v7527_v42  ;;  %v820_v29 = vpop.f32.mrb[61].mxu0  ;;  %1951 = vmatmul.mubr.bf16.gmra.mrb[152].mxu0 %v7860_v31  ;;  %v7868_v41 = vpop.f32.mrb[61].mxu1 }
 0x1bc   :  { %12457 = vst [vmem:[#allocation69_spill] sm:$0xff] %v7864_v49  ;;  %12458 = vst [vmem:[#allocation70_spill] sm:$0xff] %v7868_v41  ;;  %v821_v45 = vadd.f32 %v820_v29, %v7531_v43  ;;  %v822_v53 = vpop.f32.mrb[62].mxu0  ;;  %1960 = vmatprep.mubr.bf16.mxu0 %v12385_v1  ;;  %v7872_v12 = vpop.f32.mrb[62].mxu1 }
 0x1bd   :  { %12459 = vst [vmem:[#allocation71_spill] sm:$0xff] %v7872_v12  ;;  %v823_v34 = vadd.f32 %v822_v53, %v7527_v42  ;;  %v824_v4 = vpop.f32.mrb[63].mxu0  ;;  %v7875_v9 = vpop.f32.mrb[63].mxu1  ;;  %v1370_v23 = vmax.f32 %v819_v44, 0.0 }
 0x1be   :  { %12460 = vst [vmem:[#allocation72_spill] sm:$0xff] %v7875_v9  ;;  %v825_v50 = vadd.f32 %v824_v4, %v7531_v43  ;;  %v1434_v7 = vmax.f32 %v821_v45, 0.0 }
 0x1bf   :  { %v1371_v40 = vmax.f32 %v823_v34, 0.0  ;;  %2184 = vmatmul.mubr.bf16.gmra.mrb[168].mxu1 %v7588_v13 }
 0x1c0   :  { %v1435_v30 = vmax.f32 %v825_v50, 0.0  ;;  %2193 = vmatprep.mubr.bf16.mxu1 %v12385_v1 }
 0x1c1   :  { %v7880_v29 = vpack.c.bf16 %v1371_v40, %v1370_v23 }
 0x1c2   :  { %v7882_v49 = vpack.c.bf16 %v1435_v30, %v1434_v7  ;;  %v828_v12 = vpop.f32.mrb[64].mxu0  ;;  %v7884_v54 = vpop.f32.mrb[64].mxu1 }
 0x1c3   :  { %12462 = vst [vmem:[#allocation74_spill] sm:$0xff] %v7884_v54  ;;  %v829_v53 = vadd.f32 %v828_v12, %v7527_v42  ;;  %v830_v63 = vpop.f32.mrb[65].mxu0  ;;  %1961 = vmatmul.mubr.bf16.gmra.mrb[156].mxu0 %v7880_v29  ;;  %v7888_v44 = vpop.f32.mrb[65].mxu1 }
 0x1c4   :  { %12461 = vst [vmem:[#allocation73_spill] sm:$0xff] %v7882_v49  ;;  %12463 = vst [vmem:[#allocation75_spill] sm:$0xff] %v7888_v44  ;;  %v831_v13 = vadd.f32 %v830_v63, %v7531_v43  ;;  %v832_v45 = vpop.f32.mrb[66].mxu0  ;;  %1970 = vmatprep.mubr.bf16.mxu0 %v12385_v1  ;;  %v7892_v34 = vpop.f32.mrb[66].mxu1 }
 0x1c5   :  { %12464 = vst [vmem:[#allocation76_spill] sm:$0xff] %v7892_v34  ;;  %v833_v30 = vadd.f32 %v832_v45, %v7527_v42  ;;  %v834_v4 = vpop.f32.mrb[67].mxu0  ;;  %v7895_v50 = vpop.f32.mrb[67].mxu1  ;;  %v1372_v12 = vmax.f32 %v829_v53, 0.0 }
 0x1c6   :  { %12465 = vst [vmem:[#allocation77_spill] sm:$0xff] %v7895_v50  ;;  %v835_v23 = vadd.f32 %v834_v4, %v7531_v43  ;;  %v1436_v7 = vmax.f32 %v831_v13, 0.0 }
 0x1c7   :  { %v1373_v40 = vmax.f32 %v833_v30, 0.0  ;;  %2194 = vmatmul.mubr.bf16.gmra.mrb[172].mxu1 %v7615_v55 }
 0x1c8   :  { %v1437_v54 = vmax.f32 %v835_v23, 0.0  ;;  %2203 = vmatprep.mubr.bf16.mxu1 %v12385_v1 }
 0x1c9   :  { %v7900_v63 = vpack.c.bf16 %v1373_v40, %v1372_v12 }
 0x1ca   :  { %v838_v49 = vpop.f32.mrb[68].mxu0  ;;  %v7902_v44 = vpop.f32.mrb[68].mxu1  ;;  %v7904_v34 = vpack.c.bf16 %v1437_v54, %v1436_v7 }
 0x1cb   :  { %12466 = vst [vmem:[#allocation78_spill] sm:$0xff] %v7902_v44  ;;  %v839_v45 = vadd.f32 %v838_v49, %v7527_v42  ;;  %v840_v50 = vpop.f32.mrb[69].mxu0  ;;  %1971 = vmatmul.mubr.bf16.gmra.mrb[160].mxu0 %v7900_v63  ;;  %v7908_v53 = vpop.f32.mrb[69].mxu1 }
 0x1cc   :  { %12467 = vst [vmem:[#allocation79_spill] sm:$0xff] %v7904_v34  ;;  %12468 = vst [vmem:[#allocation80_spill] sm:$0xff] %v7908_v53  ;;  %v841_v55 = vadd.f32 %v840_v50, %v7531_v43  ;;  %v842_v13 = vpop.f32.mrb[70].mxu0  ;;  %1980 = vmatprep.mubr.bf16.mxu0 %v12385_v1  ;;  %v7912_v30 = vpop.f32.mrb[70].mxu1 }
 0x1cd   :  { %12469 = vst [vmem:[#allocation81_spill] sm:$0xff] %v7912_v30  ;;  %v843_v4 = vadd.f32 %v842_v13, %v7527_v42  ;;  %v844_v23 = vpop.f32.mrb[71].mxu0  ;;  %v7915_v12 = vpop.f32.mrb[71].mxu1  ;;  %v1374_v49 = vmax.f32 %v839_v45, 0.0 }
 0x1ce   :  { %12470 = vst [vmem:[#allocation82_spill] sm:$0xff] %v7915_v12  ;;  %v845_v54 = vadd.f32 %v844_v23, %v7531_v43  ;;  %v1438_v7 = vmax.f32 %v841_v55, 0.0 }
 0x1cf   :  { %v1375_v40 = vmax.f32 %v843_v4, 0.0  ;;  %2204 = vmatmul.mubr.bf16.gmra.mrb[176].mxu1 %v7636_v26 }
 0x1d0   :  { %v1439_v44 = vmax.f32 %v845_v54, 0.0  ;;  %2213 = vmatprep.mubr.bf16.mxu1 %v12385_v1 }
 0x1d1   :  { %v7920_v50 = vpack.c.bf16 %v1375_v40, %v1374_v49 }
 0x1d2   :  { %v7922_v34 = vpack.c.bf16 %v1439_v44, %v1438_v7  ;;  %v848_v30 = vpop.f32.mrb[72].mxu0  ;;  %v7924_v53 = vpop.f32.mrb[72].mxu1 }
 0x1d3   :  { %12472 = vst [vmem:[#allocation84_spill] sm:$0xff] %v7924_v53  ;;  %v849_v13 = vadd.f32 %v848_v30, %v7527_v42  ;;  %v850_v12 = vpop.f32.mrb[73].mxu0  ;;  %1981 = vmatmul.mubr.bf16.gmra.mrb[164].mxu0 %v7920_v50  ;;  %v7928_v45 = vpop.f32.mrb[73].mxu1 }
 0x1d4   :  { %12471 = vst [vmem:[#allocation83_spill] sm:$0xff] %v7922_v34  ;;  %12473 = vst [vmem:[#allocation85_spill] sm:$0xff] %v7928_v45  ;;  %v851_v26 = vadd.f32 %v850_v12, %v7531_v43  ;;  %v852_v55 = vpop.f32.mrb[74].mxu0  ;;  %1990 = vmatprep.mubr.bf16.mxu0 %v12385_v1  ;;  %v7932_v4 = vpop.f32.mrb[74].mxu1 }
 0x1d5   :  { %12474 = vst [vmem:[#allocation86_spill] sm:$0xff] %v7932_v4  ;;  %v853_v44 = vadd.f32 %v852_v55, %v7527_v42  ;;  %v854_v23 = vpop.f32.mrb[75].mxu0  ;;  %v7935_v54 = vpop.f32.mrb[75].mxu1  ;;  %v1376_v30 = vmax.f32 %v849_v13, 0.0 }
 0x1d6   :  { %12475 = vst [vmem:[#allocation87_spill] sm:$0xff] %v7935_v54  ;;  %v855_v49 = vadd.f32 %v854_v23, %v7531_v43  ;;  %v1440_v7 = vmax.f32 %v851_v26, 0.0 }
 0x1d7   :  { %v1377_v40 = vmax.f32 %v853_v44, 0.0  ;;  %2214 = vmatmul.mubr.bf16.gmra.mrb[180].mxu1 %v7658_v10 }
 0x1d8   :  { %v1441_v53 = vmax.f32 %v855_v49, 0.0  ;;  %2223 = vmatprep.mubr.bf16.mxu1 %v12385_v1 }
 0x1d9   :  { %v7940_v12 = vpack.c.bf16 %v1377_v40, %v1376_v30 }
 0x1da   :  { %v858_v34 = vpop.f32.mrb[76].mxu0  ;;  %v7942_v45 = vpop.f32.mrb[76].mxu1  ;;  %v7944_v4 = vpack.c.bf16 %v1441_v53, %v1440_v7 }
 0x1db   :  { %12476 = vst [vmem:[#allocation88_spill] sm:$0xff] %v7942_v45  ;;  %v859_v55 = vadd.f32 %v858_v34, %v7527_v42  ;;  %v860_v54 = vpop.f32.mrb[77].mxu0  ;;  %1991 = vmatmul.mubr.bf16.gmra.mrb[168].mxu0 %v7940_v12  ;;  %v7948_v13 = vpop.f32.mrb[77].mxu1 }
 0x1dc   :  { %12477 = vst [vmem:[#allocation89_spill] sm:$0xff] %v7944_v4  ;;  %12478 = vst [vmem:[#allocation90_spill] sm:$0xff] %v7948_v13  ;;  %v861_v10 = vadd.f32 %v860_v54, %v7531_v43  ;;  %v862_v26 = vpop.f32.mrb[78].mxu0  ;;  %2000 = vmatprep.mubr.bf16.mxu0 %v12385_v1  ;;  %v7952_v44 = vpop.f32.mrb[78].mxu1 }
 0x1dd   :  { %12479 = vst [vmem:[#allocation91_spill] sm:$0xff] %v7952_v44  ;;  %v863_v23 = vadd.f32 %v862_v26, %v7527_v42  ;;  %v864_v49 = vpop.f32.mrb[79].mxu0  ;;  %v7955_v30 = vpop.f32.mrb[79].mxu1  ;;  %v1378_v34 = vmax.f32 %v859_v55, 0.0 }
 0x1de   :  { %12480 = vst [vmem:[#allocation92_spill] sm:$0xff] %v7955_v30  ;;  %v865_v53 = vadd.f32 %v864_v49, %v7531_v43  ;;  %v1442_v7 = vmax.f32 %v861_v10, 0.0 }
 0x1df   :  { %v1379_v40 = vmax.f32 %v863_v23, 0.0  ;;  %2224 = vmatmul.mubr.bf16.gmra.mrb[184].mxu1 %v7680_v0 }
 0x1e0   :  { %v1443_v45 = vmax.f32 %v865_v53, 0.0  ;;  %2233 = vmatprep.mubr.bf16.mxu1 %v12385_v1 }
 0x1e1   :  { %v7960_v54 = vpack.c.bf16 %v1379_v40, %v1378_v34 }
 0x1e2   :  { %v7962_v4 = vpack.c.bf16 %v1443_v45, %v1442_v7  ;;  %v868_v44 = vpop.f32.mrb[80].mxu0  ;;  %v7964_v13 = vpop.f32.mrb[80].mxu1 }
 0x1e3   :  { %12482 = vst [vmem:[#allocation94_spill] sm:$0xff] %v7964_v13  ;;  %v869_v26 = vadd.f32 %v868_v44, %v7527_v42  ;;  %v870_v30 = vpop.f32.mrb[81].mxu0  ;;  %2001 = vmatmul.mubr.bf16.gmra.mrb[172].mxu0 %v7960_v54  ;;  %v7968_v55 = vpop.f32.mrb[81].mxu1 }
 0x1e4   :  { %12481 = vst [vmem:[#allocation93_spill] sm:$0xff] %v7962_v4  ;;  %12483 = vst [vmem:[#allocation95_spill] sm:$0xff] %v7968_v55  ;;  %v871_v0 = vadd.f32 %v870_v30, %v7531_v43  ;;  %v872_v10 = vpop.f32.mrb[82].mxu0  ;;  %2010 = vmatprep.mubr.bf16.mxu0 %v12385_v1  ;;  %v7972_v23 = vpop.f32.mrb[82].mxu1 }
 0x1e5   :  { %12484 = vst [vmem:[#allocation96_spill] sm:$0xff] %v7972_v23  ;;  %v873_v45 = vadd.f32 %v872_v10, %v7527_v42  ;;  %v874_v49 = vpop.f32.mrb[83].mxu0  ;;  %v7975_v53 = vpop.f32.mrb[83].mxu1  ;;  %v1380_v44 = vmax.f32 %v869_v26, 0.0 }
 0x1e6   :  { %12485 = vst [vmem:[#allocation97_spill] sm:$0xff] %v7975_v53  ;;  %v875_v34 = vadd.f32 %v874_v49, %v7531_v43  ;;  %v1444_v7 = vmax.f32 %v871_v0, 0.0 }
 0x1e7   :  { %v1381_v40 = vmax.f32 %v873_v45, 0.0  ;;  %2234 = vmatmul.mubr.bf16.gmra.mrb[188].mxu1 %v7702_v61 }
 0x1e8   :  { %v1445_v13 = vmax.f32 %v875_v34, 0.0  ;;  %2243 = vmatprep.mubr.bf16.mxu1 %v12385_v1 }
 0x1e9   :  { %v7980_v30 = vpack.c.bf16 %v1381_v40, %v1380_v44 }
 0x1ea   :  { %v878_v4 = vpop.f32.mrb[84].mxu0  ;;  %v7982_v55 = vpop.f32.mrb[84].mxu1  ;;  %v7984_v23 = vpack.c.bf16 %v1445_v13, %v1444_v7 }
 0x1eb   :  { %12486 = vst [vmem:[#allocation98_spill] sm:$0xff] %v7982_v55  ;;  %v879_v10 = vadd.f32 %v878_v4, %v7527_v42  ;;  %v880_v53 = vpop.f32.mrb[85].mxu0  ;;  %2011 = vmatmul.mubr.bf16.gmra.mrb[176].mxu0 %v7980_v30  ;;  %v7988_v26 = vpop.f32.mrb[85].mxu1 }
 0x1ec   :  { %12487 = vst [vmem:[#allocation99_spill] sm:$0xff] %v7984_v23  ;;  %12488 = vst [vmem:[#allocation100_spill] sm:$0xff] %v7988_v26  ;;  %v881_v61 = vadd.f32 %v880_v53, %v7531_v43  ;;  %v882_v0 = vpop.f32.mrb[86].mxu0  ;;  %2020 = vmatprep.mubr.bf16.mxu0 %v12385_v1  ;;  %v7992_v45 = vpop.f32.mrb[86].mxu1 }
 0x1ed   :  { %12489 = vst [vmem:[#allocation101_spill] sm:$0xff] %v7992_v45  ;;  %v883_v49 = vadd.f32 %v882_v0, %v7527_v42  ;;  %v884_v34 = vpop.f32.mrb[87].mxu0  ;;  %v7995_v44 = vpop.f32.mrb[87].mxu1  ;;  %v1382_v4 = vmax.f32 %v879_v10, 0.0 }
 0x1ee   :  { %12490 = vst [vmem:[#allocation102_spill] sm:$0xff] %v7995_v44  ;;  %v885_v13 = vadd.f32 %v884_v34, %v7531_v43  ;;  %v1446_v7 = vmax.f32 %v881_v61, 0.0 }
 0x1ef   :  { %v1383_v40 = vmax.f32 %v883_v49, 0.0  ;;  %2244 = vmatmul.mubr.bf16.gmra.mrb[192].mxu1 %v7728_v52 }
 0x1f0   :  { %v1447_v55 = vmax.f32 %v885_v13, 0.0  ;;  %2253 = vmatprep.mubr.bf16.mxu1 %v12385_v1 }
 0x1f1   :  { %v8000_v53 = vpack.c.bf16 %v1383_v40, %v1382_v4 }
 0x1f2   :  { %v8002_v23 = vpack.c.bf16 %v1447_v55, %v1446_v7  ;;  %v888_v45 = vpop.f32.mrb[88].mxu0  ;;  %v8004_v26 = vpop.f32.mrb[88].mxu1 }
 0x1f3   :  { %12492 = vst [vmem:[#allocation104_spill] sm:$0xff] %v8004_v26  ;;  %v889_v0 = vadd.f32 %v888_v45, %v7527_v42  ;;  %v890_v44 = vpop.f32.mrb[89].mxu0  ;;  %2021 = vmatmul.mubr.bf16.gmra.mrb[180].mxu0 %v8000_v53  ;;  %v8008_v10 = vpop.f32.mrb[89].mxu1 }
 0x1f4   :  { %12491 = vst [vmem:[#allocation103_spill] sm:$0xff] %v8002_v23  ;;  %12493 = vst [vmem:[#allocation105_spill] sm:$0xff] %v8008_v10  ;;  %v891_v52 = vadd.f32 %v890_v44, %v7531_v43  ;;  %v892_v61 = vpop.f32.mrb[90].mxu0  ;;  %2030 = vmatprep.mubr.bf16.mxu0 %v12385_v1  ;;  %v8012_v49 = vpop.f32.mrb[90].mxu1 }
 0x1f5   :  { %12494 = vst [vmem:[#allocation106_spill] sm:$0xff] %v8012_v49  ;;  %v893_v55 = vadd.f32 %v892_v61, %v7527_v42  ;;  %v894_v34 = vpop.f32.mrb[91].mxu0  ;;  %v8015_v13 = vpop.f32.mrb[91].mxu1  ;;  %v1384_v45 = vmax.f32 %v889_v0, 0.0 }
 0x1f6   :  { %12495 = vst [vmem:[#allocation107_spill] sm:$0xff] %v8015_v13  ;;  %v895_v4 = vadd.f32 %v894_v34, %v7531_v43  ;;  %v1448_v7 = vmax.f32 %v891_v52, 0.0 }
 0x1f7   :  { %v1385_v40 = vmax.f32 %v893_v55, 0.0  ;;  %2254 = vmatmul.mubr.bf16.gmra.mrb[196].mxu1 %v7750_v51 }
 0x1f8   :  { %v1449_v26 = vmax.f32 %v895_v4, 0.0  ;;  %2263 = vmatprep.mubr.bf16.mxu1 %v12385_v1 }
 0x1f9   :  { %v8020_v44 = vpack.c.bf16 %v1385_v40, %v1384_v45 }
 0x1fa   :  { %v898_v23 = vpop.f32.mrb[92].mxu0  ;;  %v8022_v10 = vpop.f32.mrb[92].mxu1  ;;  %v8024_v49 = vpack.c.bf16 %v1449_v26, %v1448_v7 }
 0x1fb   :  { %12496 = vst [vmem:[#allocation108_spill] sm:$0xff] %v8022_v10  ;;  %v899_v61 = vadd.f32 %v898_v23, %v7527_v42  ;;  %v900_v13 = vpop.f32.mrb[93].mxu0  ;;  %2031 = vmatmul.mubr.bf16.gmra.mrb[184].mxu0 %v8020_v44  ;;  %v8028_v0 = vpop.f32.mrb[93].mxu1 }
 0x1fc   :  { %12497 = vst [vmem:[#allocation109_spill] sm:$0xff] %v8024_v49  ;;  %12498 = vst [vmem:[#allocation110_spill] sm:$0xff] %v8028_v0  ;;  %v901_v51 = vadd.f32 %v900_v13, %v7531_v43  ;;  %v902_v52 = vpop.f32.mrb[94].mxu0  ;;  %2040 = vmatprep.mubr.bf16.mxu0 %v12385_v1  ;;  %v8032_v55 = vpop.f32.mrb[94].mxu1 }
 0x1fd   :  { %12499 = vst [vmem:[#allocation111_spill] sm:$0xff] %v8032_v55  ;;  %v903_v34 = vadd.f32 %v902_v52, %v7527_v42  ;;  %v904_v4 = vpop.f32.mrb[95].mxu0  ;;  %v8035_v45 = vpop.f32.mrb[95].mxu1  ;;  %v1386_v23 = vmax.f32 %v899_v61, 0.0 }
 0x1fe   :  { %12500 = vst [vmem:[#allocation112_spill] sm:$0xff] %v8035_v45  ;;  %v905_v26 = vadd.f32 %v904_v4, %v7531_v43  ;;  %v1450_v7 = vmax.f32 %v901_v51, 0.0 }
 0x1ff   :  { %v1387_v40 = vmax.f32 %v903_v34, 0.0  ;;  %2264 = vmatmul.mubr.bf16.gmra.mrb[200].mxu1 %v7772_v19 }
 0x200   :  { %v1451_v10 = vmax.f32 %v905_v26, 0.0  ;;  %2273 = vmatprep.mubr.bf16.mxu1 %v12385_v1 }
 0x201   :  { %v8040_v13 = vpack.c.bf16 %v1387_v40, %v1386_v23 }
 0x202   :  { %v8042_v49 = vpack.c.bf16 %v1451_v10, %v1450_v7  ;;  %v8044_v55 = vpop.f32.mrb[96].mxu1 }
 0x203   :  { %12502 = vst [vmem:[#allocation114_spill] sm:$0xff] %v8044_v55  ;;  %2041 = vmatmul.mubr.bf16.gmra.mrb[188].mxu0 %v8040_v13  ;;  %v8047_v42 = vpop.f32.mrb[97].mxu1 }
 0x204   :  { %12501 = vst [vmem:[#allocation113_spill] sm:$0xff] %v8042_v49  ;;  %12503 = vst [vmem:[#allocation115_spill] sm:$0xff] %v8047_v42  ;;  %2050 = vmatprep.mubr.bf16.mxu0 %v12385_v1  ;;  %v8050_v43 = vpop.f32.mrb[98].mxu1 }
 0x205   :  { %12504 = vst [vmem:[#allocation116_spill] sm:$0xff] %v8050_v43  ;;  %v8052_v61 = vpop.f32.mrb[99].mxu1 }
 0x206   :  { %12505 = vst [vmem:[#allocation117_spill] sm:$0xff] %v8052_v61 }
 0x207   :  { %2274 = vmatmul.mubr.bf16.gmra.mrb[204].mxu1 %v7794_v24 }
 0x208   :  { %2283 = vmatprep.mubr.bf16.mxu1 %v12385_v1 }
 0x20a   :  { %v8056_v19 = vpop.f32.mrb[100].mxu1 }
 0x20b   :  { %12506 = vst [vmem:[#allocation118_spill] sm:$0xff] %v8056_v19  ;;  %2051 = vmatmul.mubr.bf16.gmra.mrb[192].mxu0 %v7549_v8  ;;  %v8059_v10 = vpop.f32.mrb[101].mxu1 }
 0x20c   :  { %12507 = vst [vmem:[#allocation119_spill] sm:$0xff] %v8059_v10  ;;  %2060 = vmatprep.mubr.bf16.mxu0 %v12385_v1  ;;  %v8062_v51 = vpop.f32.mrb[102].mxu1 }
 0x20d   :  { %12508 = vst [vmem:[#allocation120_spill] sm:$0xff] %v8062_v51  ;;  %v8064_v52 = vpop.f32.mrb[103].mxu1 }
 0x20e   :  { %12509 = vst [vmem:[#allocation121_spill] sm:$0xff] %v8064_v52 }
 0x20f   :  { %2284 = vmatmul.mubr.bf16.gmra.mrb[208].mxu1 %v7816_v59 }
 0x210   :  { %2293 = vmatprep.mubr.bf16.mxu1 %v12385_v1 }
 0x212   :  { %v8068_v34 = vpop.f32.mrb[104].mxu1 }
 0x213   :  { %12510 = vst [vmem:[#allocation122_spill] sm:$0xff] %v8068_v34  ;;  %2061 = vmatmul.mubr.bf16.gmra.mrb[196].mxu0 %v7570_v46  ;;  %v8071_v24 = vpop.f32.mrb[105].mxu1 }
 0x214   :  { %12511 = vst [vmem:[#allocation123_spill] sm:$0xff] %v8071_v24  ;;  %2070 = vmatprep.mubr.bf16.mxu0 %v12385_v1  ;;  %v8074_v4 = vpop.f32.mrb[106].mxu1 }
 0x215   :  { %12512 = vst [vmem:[#allocation124_spill] sm:$0xff] %v8074_v4  ;;  %v8076_v26 = vpop.f32.mrb[107].mxu1 }
 0x216   :  { %12513 = vst [vmem:[#allocation125_spill] sm:$0xff] %v8076_v26 }
 0x217   :  { %2294 = vmatmul.mubr.bf16.gmra.mrb[212].mxu1 %v7839_v28 }
 0x218   :  { %2303 = vmatprep.mubr.bf16.mxu1 %v12385_v1 }
 0x21a   :  { %v8080_v23 = vpop.f32.mrb[108].mxu1 }
 0x21b   :  { %12514 = vst [vmem:[#allocation126_spill] sm:$0xff] %v8080_v23  ;;  %2071 = vmatmul.mubr.bf16.gmra.mrb[200].mxu0 %v7590_v14  ;;  %v8083_v59 = vpop.f32.mrb[109].mxu1 }
 0x21c   :  { %12515 = vst [vmem:[#allocation127_spill] sm:$0xff] %v8083_v59  ;;  %2080 = vmatprep.mubr.bf16.mxu0 %v12385_v1  ;;  %v8086_v40 = vpop.f32.mrb[110].mxu1 }
 0x21d   :  { %12516 = vst [vmem:[#allocation128_spill] sm:$0xff] %v8086_v40  ;;  %v8088_v7 = vpop.f32.mrb[111].mxu1 }
 0x21e   :  { %12517 = vst [vmem:[#allocation129_spill] sm:$0xff] %v8088_v7  ;;  %v8090_v34 = vpop.f32.mrb[96].mxu0 }
 0x21f   :  { %v8092_v4 = vpop.f32.mrb[97].mxu0  ;;  %2304 = vmatmul.mubr.bf16.gmra.mrb[216].mxu1 %v7860_v31 }
 0x220   :  { %v8095_v28 = vpop.f32.mrb[98].mxu0  ;;  %2313 = vmatprep.mubr.bf16.mxu1 %v12385_v1 }
 0x221   :  { %v8098_v23 = vpop.f32.mrb[99].mxu0 }
 0x222   :  { %v8100_v51 = vpop.f32.mrb[112].mxu1 }
 0x223   :  { %12518 = vst [vmem:[#allocation130_spill] sm:$0xff] %v8100_v51  ;;  %2081 = vmatmul.mubr.bf16.gmra.mrb[204].mxu0 %v7618_v56  ;;  %v8103_v19 = vpop.f32.mrb[113].mxu1 }
 0x224   :  { %12519 = vst [vmem:[#allocation131_spill] sm:$0xff] %v8103_v19  ;;  %2090 = vmatprep.mubr.bf16.mxu0 %v12385_v1  ;;  %v8106_v40 = vpop.f32.mrb[114].mxu1 }
 0x225   :  { %12520 = vst [vmem:[#allocation132_spill] sm:$0xff] %v8106_v40  ;;  %v8108_v43 = vpop.f32.mrb[115].mxu1 }
 0x226   :  { %12521 = vst [vmem:[#allocation133_spill] sm:$0xff] %v8108_v43  ;;  %v8110_v55 = vpop.f32.mrb[100].mxu0 }
 0x227   :  { %v8112_v31 = vpop.f32.mrb[101].mxu0  ;;  %2314 = vmatmul.mubr.bf16.gmra.mrb[220].mxu1 %v7880_v29 }
 0x228   :  { %v8115_v7 = vpop.f32.mrb[102].mxu0  ;;  %2323 = vmatprep.mubr.bf16.mxu1 %v12385_v1 }
 0x229   :  { %v8118_v51 = vpop.f32.mrb[103].mxu0 }
 0x22a   :  { %v8120_v59 = vpop.f32.mrb[116].mxu1 }
 0x22b   :  { %12522 = vst [vmem:[#allocation134_spill] sm:$0xff] %v8120_v59  ;;  %2091 = vmatmul.mubr.bf16.gmra.mrb[208].mxu0 %v7638_v27  ;;  %v8123_v19 = vpop.f32.mrb[117].mxu1 }
 0x22c   :  { %12523 = vst [vmem:[#allocation135_spill] sm:$0xff] %v8123_v19  ;;  %2100 = vmatprep.mubr.bf16.mxu0 %v12385_v1  ;;  %v8126_v40 = vpop.f32.mrb[118].mxu1 }
 0x22d   :  { %12524 = vst [vmem:[#allocation136_spill] sm:$0xff] %v8126_v40  ;;  %v8128_v43 = vpop.f32.mrb[119].mxu1 }
 0x22e   :  { %12525 = vst [vmem:[#allocation137_spill] sm:$0xff] %v8128_v43  ;;  %v8130_v26 = vpop.f32.mrb[104].mxu0 }
 0x22f   :  { %v8132_v29 = vpop.f32.mrb[105].mxu0  ;;  %2324 = vmatmul.mubr.bf16.gmra.mrb[224].mxu1 %v7900_v63 }
 0x230   :  { %v8135_v24 = vpop.f32.mrb[106].mxu0  ;;  %2333 = vmatprep.mubr.bf16.mxu1 %v12385_v1 }
 0x231   :  { %v8138_v59 = vpop.f32.mrb[107].mxu0 }
 0x232   :  { %v8140_v52 = vpop.f32.mrb[120].mxu1 }
 0x233   :  { %12526 = vst [vmem:[#allocation138_spill] sm:$0xff] %v8140_v52  ;;  %2101 = vmatmul.mubr.bf16.gmra.mrb[212].mxu0 %v7660_v15  ;;  %v8143_v19 = vpop.f32.mrb[121].mxu1 }
 0x234   :  { %12527 = vst [vmem:[#allocation139_spill] sm:$0xff] %v8143_v19  ;;  %2110 = vmatprep.mubr.bf16.mxu0 %v12385_v1  ;;  %v8146_v40 = vpop.f32.mrb[122].mxu1 }
 0x235   :  { %12528 = vst [vmem:[#allocation140_spill] sm:$0xff] %v8146_v40  ;;  %v8148_v43 = vpop.f32.mrb[123].mxu1 }
 0x236   :  { %12529 = vst [vmem:[#allocation141_spill] sm:$0xff] %v8148_v43  ;;  %v8150_v10 = vpop.f32.mrb[108].mxu0 }
 0x237   :  { %v8152_v63 = vpop.f32.mrb[109].mxu0  ;;  %2334 = vmatmul.mubr.bf16.gmra.mrb[228].mxu1 %v7920_v50 }
 0x238   :  { %v8155_v49 = vpop.f32.mrb[110].mxu0  ;;  %2343 = vmatprep.mubr.bf16.mxu1 %v12385_v1 }
 0x239   :  { %v8158_v52 = vpop.f32.mrb[111].mxu0 }
 0x23a   :  { %v8160_v61 = vpop.f32.mrb[124].mxu1 }
 0x23b   :  { %12530 = vst [vmem:[#allocation142_spill] sm:$0xff] %v8160_v61  ;;  %2111 = vmatmul.mubr.bf16.gmra.mrb[216].mxu0 %v7682_v2  ;;  %v8163_v19 = vpop.f32.mrb[125].mxu1 }
 0x23c   :  { %12531 = vst [vmem:[#allocation143_spill] sm:$0xff] %v8163_v19  ;;  %2120 = vmatprep.mubr.bf16.mxu0 %v12385_v1  ;;  %v8166_v40 = vpop.f32.mrb[126].mxu1 }
 0x23d   :  { %12532 = vst [vmem:[#allocation144_spill] sm:$0xff] %v8166_v40  ;;  %v8168_v43 = vpop.f32.mrb[127].mxu1 }
 0x23e   :  { %12533 = vst [vmem:[#allocation145_spill] sm:$0xff] %v8168_v43  ;;  %v8170_v42 = vpop.f32.mrb[112].mxu0 }
 0x23f   :  { %v8172_v50 = vpop.f32.mrb[113].mxu0  ;;  %2344 = vmatmul.mubr.bf16.gmra.mrb[232].mxu1 %v7940_v12 }
 0x240   :  { %v8175_v45 = vpop.f32.mrb[114].mxu0  ;;  %2353 = vmatprep.mubr.bf16.mxu1 %v12385_v1 }
 0x241   :  { %v8178_v61 = vpop.f32.mrb[115].mxu0 }
 0x242   :  { %v8180_v0 = vpop.f32.mrb[128].mxu1 }
 0x243   :  { %12534 = vst [vmem:[#allocation146_spill] sm:$0xff] %v8180_v0  ;;  %2121 = vmatmul.mubr.bf16.gmra.mrb[220].mxu0 %v7704_v62  ;;  %v8183_v19 = vpop.f32.mrb[129].mxu1  ;;  %v8198_v0 = vld [vmem:[%s12371_s1] sm:$0xff]  }
 0x244   :  { %12535 = vst [vmem:[#allocation147_spill] sm:$0xff] %v8183_v19  ;;  %3054 = vmatprep.mubr.bf16.mxu0 %v12385_v1  ;;  %v8186_v40 = vpop.f32.mrb[130].mxu1  ;;  %v6847_v19 = vld [vmem:[#allocation8] sm:$0xff]  }
 0x245   :  { %12536 = vst [vmem:[#allocation148_spill] sm:$0xff] %v8186_v40  ;;  %v8188_v43 = vpop.f32.mrb[131].mxu1 }
 0x246   :  { %12537 = vst [vmem:[#allocation149_spill] sm:$0xff] %v8188_v43  ;;  %v8190_v5 = vpop.f32.mrb[116].mxu0 }
 0x247   :  { %v8192_v12 = vpop.f32.mrb[117].mxu0  ;;  %2354 = vmatmul.mubr.bf16.gmra.mrb[236].mxu1 %v7960_v54  ;;  %v6850_v54 = vld [vmem:[#allocation8 + $0x8] sm:$0xff]  }
 0x248   :  { %v8200_v16 = vpop.f32.mrb[118].mxu0  ;;  %2363 = vmatprep.mubr.bf16.mxu1 %v12385_v1 }
 0x249   :  { %v8203_v40 = vpop.f32.mrb[119].mxu0 }
 0x24a   :  { %v8205_v43 = vpop.f32.mrb[132].mxu1 }
 0x24b   :  { %12538 = vst [vmem:[#allocation150_spill] sm:$0xff] %v8205_v43  ;;  %6395 = vmatmul.mubr.msk.bf16.vlgmr.msra.gmra.mrb[224].mxu0 %vm2912_vm1, %v8198_v0  ;;  %v8209_v9 = vpop.f32.mrb[133].mxu1  ;;  %v8225_v43 = vld [vmem:[%s12371_s1 + $0x8] sm:$0xff]  }
 0x24c   :  { %12539 = vst [vmem:[#allocation151_spill] sm:$0xff] %v8209_v9  ;;  %4369 = vmatpush1.bf16.msra.mxu0 %v6847_v19  ;;  %3064 = vmatprep.mubr.bf16.mxu0 %v12385_v1  ;;  %v8212_v41 = vpop.f32.mrb[134].mxu1 }
 0x24d   :  { %12540 = vst [vmem:[#allocation152_spill] sm:$0xff] %v8212_v41  ;;  %4370 = vmatprep.subr.bf16.mxu0 %v12385_v1  ;;  %v8215_v33 = vpop.f32.mrb[135].mxu1  ;;  %v6853_v41 = vld [vmem:[#allocation8 + $0x10] sm:$0xff]  }
 0x24e   :  { %12541 = vst [vmem:[#allocation153_spill] sm:$0xff] %v8215_v33  ;;  %v8217_v57 = vpop.f32.mrb[120].mxu0 }
 0x24f   :  { %v8219_v35 = vpop.f32.mrb[121].mxu0  ;;  %2364 = vmatmul.mubr.bf16.gmra.mrb[240].mxu1 %v7980_v30 }
 0x250   :  { %v8227_v19 = vpop.f32.mrb[122].mxu0  ;;  %2373 = vmatprep.mubr.bf16.mxu1 %v12385_v1  ;;  %4371 = vmatpush1.bf16.msra.mxu0 %v6850_v54 }
 0x251   :  { %v8230_v9 = vpop.f32.mrb[123].mxu0  ;;  %4372 = vmatprep.subr.bf16.mxu0 %v12385_v1 }
 0x252   :  { %v8233_v33 = vpop.f32.mrb[136].mxu1 }
 0x253   :  { %12542 = vst [vmem:[#allocation154_spill] sm:$0xff] %v8233_v33  ;;  %6396 = vmatmul.mubr.msk.bf16.gmra.mrb[228].mxu0 %vm2912_vm1, %v8225_v43  ;;  %v8237_v30 = vpop.f32.mrb[137].mxu1 }
 0x254   :  { %12543 = vst [vmem:[#allocation155_spill] sm:$0xff] %v8237_v30  ;;  %3074 = vmatprep.mubr.bf16.mxu0 %v12385_v1  ;;  %4373 = vmatpush1.bf16.msra.mxu0 %v6853_v41  ;;  %v8240_v6 = vpop.f32.mrb[138].mxu1  ;;  %v8253_v30 = vld [vmem:[%s12371_s1 + $0x10] sm:$0xff]   ;;  %v6859_v41 = vld [vmem:[#allocation8 + $0x20] sm:$0xff]  }
 0x255   :  { %12544 = vst [vmem:[#allocation156_spill] sm:$0xff] %v8240_v6  ;;  %v8242_v47 = vpop.f32.mrb[139].mxu1  ;;  %4374 = vmatprep.subr.bf16.mxu0 %v12385_v1 }
 0x256   :  { %12545 = vst [vmem:[#allocation157_spill] sm:$0xff] %v8242_v47  ;;  %v8245_v54 = vpop.f32.mrb[124].mxu0 }
 0x257   :  { %v8247_v18 = vpop.f32.mrb[125].mxu0  ;;  %2374 = vmatmul.mubr.bf16.gmra.mrb[244].mxu1 %v8000_v53 }
 0x258   :  { %v8255_v33 = vpop.f32.mrb[126].mxu0  ;;  %2383 = vmatprep.mubr.bf16.mxu1 %v12385_v1  ;;  %4375 = vmatpush1.bf16.msra.mxu0 %v6856_v17 }
 0x259   :  { %v8258_v47 = vpop.f32.mrb[127].mxu0  ;;  %4376 = vmatprep.subr.bf16.mxu0 %v12385_v1 }
 0x25a   :  { %v8261_v6 = vpop.f32.mrb[140].mxu1 }
 0x25b   :  { %12546 = vst [vmem:[#allocation158_spill] sm:$0xff] %v8261_v6  ;;  %6397 = vmatmul.mubr.msk.bf16.gmra.mrb[232].mxu0 %vm2912_vm1, %v8253_v30  ;;  %v8265_v53 = vpop.f32.mrb[141].mxu1 }
 0x25c   :  { %12547 = vst [vmem:[#allocation159_spill] sm:$0xff] %v8265_v53  ;;  %3084 = vmatprep.mubr.bf16.mxu0 %v12385_v1  ;;  %v8268_v20 = vpop.f32.mrb[142].mxu1  ;;  %4377 = vmatpush1.bf16.msra.mxu0 %v6859_v41  ;;  %v8281_v53 = vld [vmem:[%s12371_s1 + $0x18] sm:$0xff]  }
 0x25d   :  { %12548 = vst [vmem:[#allocation160_spill] sm:$0xff] %v8268_v20  ;;  %v8270_v58 = vpop.f32.mrb[143].mxu1  ;;  %4378 = vmatprep.subr.bf16.mxu0 %v12385_v1  ;;  %v6865_v41 = vld [vmem:[#allocation8 + $0x30] sm:$0xff]  }
 0x25e   :  { %12549 = vst [vmem:[#allocation161_spill] sm:$0xff] %v8270_v58  ;;  %v8273_v17 = vpop.f32.mrb[128].mxu0 }
 0x25f   :  { %v8275_v37 = vpop.f32.mrb[129].mxu0  ;;  %2384 = vmatmul.mubr.bf16.gmra.mrb[248].mxu1 %v8020_v44 }
 0x260   :  { %v8283_v6 = vpop.f32.mrb[130].mxu0  ;;  %2393 = vmatprep.mubr.bf16.mxu1 %v12385_v1  ;;  %4379 = vmatpush1.bf16.msra.mxu0 %v6862_v11 }
 0x261   :  { %v8286_v58 = vpop.f32.mrb[131].mxu0  ;;  %4380 = vmatprep.subr.bf16.mxu0 %v12385_v1 }
 0x262   :  { %v8289_v20 = vpop.f32.mrb[144].mxu1 }
 0x263   :  { %12550 = vst [vmem:[#allocation162_spill] sm:$0xff] %v8289_v20  ;;  %6398 = vmatmul.mubr.msk.bf16.gmra.mrb[236].mxu0 %vm2912_vm1, %v8281_v53  ;;  %v8293_v44 = vpop.f32.mrb[145].mxu1 }
 0x264   :  { %12551 = vst [vmem:[#allocation163_spill] sm:$0xff] %v8293_v44  ;;  %3094 = vmatprep.mubr.bf16.mxu0 %v12385_v1  ;;  %v8296_v3 = vpop.f32.mrb[146].mxu1  ;;  %4381 = vmatpush1.bf16.msra.mxu0 %v6865_v41  ;;  %v8309_v44 = vld [vmem:[%s12371_s1 + $0x20] sm:$0xff]  }
 0x265   :  { %12552 = vst [vmem:[#allocation164_spill] sm:$0xff] %v8296_v3  ;;  %v8298_v48 = vpop.f32.mrb[147].mxu1  ;;  %4382 = vmatprep.subr.bf16.mxu0 %v12385_v1  ;;  %v6871_v41 = vld [vmem:[#allocation8 + $0x40] sm:$0xff]  }
 0x266   :  { %12553 = vst [vmem:[#allocation165_spill] sm:$0xff] %v8298_v48  ;;  %v8301_v11 = vpop.f32.mrb[132].mxu0 }
 0x267   :  { %v8303_v22 = vpop.f32.mrb[133].mxu0  ;;  %2394 = vmatmul.mubr.bf16.gmra.mrb[252].mxu1 %v8040_v13 }
 0x268   :  { %v8311_v20 = vpop.f32.mrb[134].mxu0  ;;  %2403 = vmatprep.mubr.bf16.mxu1 %v12385_v1  ;;  %4383 = vmatpush1.bf16.msra.mxu0 %v6868_v36 }
 0x269   :  { %v8314_v48 = vpop.f32.mrb[135].mxu0  ;;  %4384 = vmatprep.subr.bf16.mxu0 %v12385_v1 }
 0x26a   :  { %12554 = vst [vmem:[#allocation166_spill] sm:$0xff] %v8314_v48  ;;  %v8317_v3 = vpop.f32.mrb[148].mxu1 }
 0x26b   :  { %12555 = vst [vmem:[#allocation167_spill] sm:$0xff] %v8317_v3  ;;  %6399 = vmatmul.mubr.msk.bf16.gmra.mrb[240].mxu0 %vm2912_vm1, %v8309_v44  ;;  %v8321_v13 = vpop.f32.mrb[149].mxu1 }
 0x26c   :  { %12556 = vst [vmem:[#allocation168_spill] sm:$0xff] %v8321_v13  ;;  %3104 = vmatprep.mubr.bf16.mxu0 %v12385_v1  ;;  %v8324_v25 = vpop.f32.mrb[150].mxu1  ;;  %4385 = vmatpush1.bf16.msra.mxu0 %v6871_v41  ;;  %v8337_v13 = vld [vmem:[%s12371_s1 + $0x28] sm:$0xff]   ;;  %v6878_v41 = vld [vmem:[#allocation8 + $0x50] sm:$0xff]  }
 0x26d   :  { %12557 = vst [vmem:[#allocation169_spill] sm:$0xff] %v8324_v25  ;;  %v8326_v32 = vpop.f32.mrb[151].mxu1  ;;  %4386 = vmatprep.subr.bf16.mxu0 %v12385_v1 }
 0x26e   :  { %12558 = vst [vmem:[#allocation170_spill] sm:$0xff] %v8326_v32  ;;  %v8329_v36 = vpop.f32.mrb[136].mxu0 }
 0x26f   :  { %12559 = vst [vmem:[#allocation171_spill] sm:$0xff] %v8329_v36  ;;  %v8331_v21 = vpop.f32.mrb[137].mxu0  ;;  %2404 = vmatmul.mubr.bf16.gmra.mrb[0].mxu1 %v7549_v8 }
 0x270   :  { %12560 = vst [vmem:[#allocation172_spill] sm:$0xff] %v8331_v21  ;;  %v8339_v3 = vpop.f32.mrb[138].mxu0  ;;  %2413 = vmatprep.mubr.bf16.mxu1 %v12385_v1  ;;  %4387 = vmatpush1.bf16.msra.mxu0 %v6874_v60 }
 0x271   :  { %12561 = vst [vmem:[#allocation173_spill] sm:$0xff] %v8339_v3  ;;  %v8342_v32 = vpop.f32.mrb[139].mxu0  ;;  %4388 = vmatprep.subr.bf16.mxu0 %v12385_v1 }
 0x272   :  { %12562 = vst [vmem:[#allocation174_spill] sm:$0xff] %v8342_v32  ;;  %v8345_v25 = vpop.f32.mrb[152].mxu1 }
 0x273   :  { %12563 = vst [vmem:[#allocation175_spill] sm:$0xff] %v8345_v25  ;;  %6400 = vmatmul.mubr.msk.bf16.gmra.mrb[244].mxu0 %vm2912_vm1, %v8337_v13  ;;  %v8349_v8 = vpop.f32.mrb[153].mxu1  ;;  %v8365_v25 = vld [vmem:[%s12371_s1 + $0x30] sm:$0xff]  }
 0x274   :  { %12564 = vst [vmem:[#allocation176_spill] sm:$0xff] %v8349_v8  ;;  %3114 = vmatprep.mubr.bf16.mxu0 %v12385_v1  ;;  %v8352_v21 = vpop.f32.mrb[154].mxu1  ;;  %4389 = vmatpush1.bf16.msra.mxu0 %v6878_v41 }
 0x275   :  { %12565 = vst [vmem:[#allocation177_spill] sm:$0xff] %v8352_v21  ;;  %v8354_v3 = vpop.f32.mrb[155].mxu1  ;;  %4390 = vmatprep.subr.bf16.mxu0 %v12385_v1 }
 0x276   :  { %12566 = vst [vmem:[#allocation178_spill] sm:$0xff] %v8354_v3  ;;  %v8357_v60 = vpop.f32.mrb[140].mxu0 }
 0x277   :  { %12567 = vst [vmem:[#allocation179_spill] sm:$0xff] %v8357_v60  ;;  %v8359_v32 = vpop.f32.mrb[141].mxu0  ;;  %2414 = vmatmul.mubr.bf16.gmra.mrb[4].mxu1 %v7570_v46 }
 0x278   :  { %12568 = vst [vmem:[#allocation180_spill] sm:$0xff] %v8359_v32  ;;  %v8367_v8 = vpop.f32.mrb[142].mxu0  ;;  %2423 = vmatprep.mubr.bf16.mxu1 %v12385_v1  ;;  %v6882_v32 = vld [vmem:[#allocation8 + $0x58] sm:$0xff]  }
 0x279   :  { %12569 = vst [vmem:[#allocation181_spill] sm:$0xff] %v8367_v8  ;;  %v8370_v41 = vpop.f32.mrb[143].mxu0  ;;  %4391 = vmatpush1.bf16.msra.mxu0 %v6882_v32 }
 0x27a   :  { %12570 = vst [vmem:[#allocation182_spill] sm:$0xff] %v8370_v41  ;;  %v8372_v21 = vpop.f32.mrb[156].mxu1  ;;  %4392 = vmatprep.subr.bf16.mxu0 %v12385_v1 }
 0x27b   :  { %12571 = vst [vmem:[#allocation183_spill] sm:$0xff] %v8372_v21  ;;  %6401 = vmatmul.mubr.msk.bf16.gmra.mrb[248].mxu0 %vm2912_vm1, %v8365_v25  ;;  %v8376_v3 = vpop.f32.mrb[157].mxu1 }
 0x27c   :  { %12572 = vst [vmem:[#allocation184_spill] sm:$0xff] %v8376_v3  ;;  %v8378_v46 = vpop.f32.mrb[158].mxu1  ;;  %3124 = vmatprep.mubr.bf16.mxu0 %v12385_v1  ;;  %v8392_v3 = vld [vmem:[%s12371_s1 + $0x38] sm:$0xff]  }
 0x27d   :  { %12573 = vst [vmem:[#allocation185_spill] sm:$0xff] %v8378_v46  ;;  %v8381_v60 = vpop.f32.mrb[159].mxu1 }
 0x27e   :  { %12574 = vst [vmem:[#allocation186_spill] sm:$0xff] %v8381_v60  ;;  %v8383_v8 = vpop.f32.mrb[144].mxu0 }
 0x27f   :  { %12575 = vst [vmem:[#allocation187_spill] sm:$0xff] %v8383_v8  ;;  %v8386_v41 = vpop.f32.mrb[145].mxu0  ;;  %2424 = vmatmul.mubr.bf16.gmra.mrb[8].mxu1 %v7590_v14 }
 0x280   :  { %12576 = vst [vmem:[#allocation188_spill] sm:$0xff] %v8386_v41  ;;  %v8394_v21 = vpop.f32.mrb[146].mxu0  ;;  %2433 = vmatprep.mubr.bf16.mxu1 %v12385_v1 }
 0x281   :  { %12577 = vst [vmem:[#allocation189_spill] sm:$0xff] %v8394_v21  ;;  %v8397_v46 = vpop.f32.mrb[147].mxu0 }
 0x282   :  { %12578 = vst [vmem:[#allocation190_spill] sm:$0xff] %v8397_v46  ;;  %v8399_v32 = vpop.f32.mrb[160].mxu1 }
 0x283   :  { %12579 = vst [vmem:[#allocation191_spill] sm:$0xff] %v8399_v32  ;;  %v8401_v60 = vpop.f32.mrb[161].mxu1  ;;  %6402 = vmatmul.mubr.msk.bf16.gmra.mrb[252].mxu0 %vm2912_vm1, %v8392_v3  ;;  %v8418_v32 = vld [vmem:[%s12371_s1 + $0x40] sm:$0xff]  }
 0x284   :  { %12580 = vst [vmem:[#allocation192_spill] sm:$0xff] %v8401_v60  ;;  %v8405_v41 = vpop.f32.mrb[162].mxu1  ;;  %3134 = vmatprep.mubr.bf16.mxu0 %v12385_v1 }
 0x285   :  { %12581 = vst [vmem:[#allocation193_spill] sm:$0xff] %v8405_v41  ;;  %v8408_v14 = vpop.f32.mrb[163].mxu1 }
 0x286   :  { %12582 = vst [vmem:[#allocation194_spill] sm:$0xff] %v8408_v14  ;;  %v8410_v8 = vpop.f32.mrb[148].mxu0 }
 0x287   :  { %12583 = vst [vmem:[#allocation195_spill] sm:$0xff] %v8410_v8  ;;  %v8412_v21 = vpop.f32.mrb[149].mxu0  ;;  %2434 = vmatmul.mubr.bf16.gmra.mrb[12].mxu1 %v7618_v56 }
 0x288   :  { %12584 = vst [vmem:[#allocation196_spill] sm:$0xff] %v8412_v21  ;;  %v8420_v60 = vpop.f32.mrb[150].mxu0  ;;  %2443 = vmatprep.mubr.bf16.mxu1 %v12385_v1  ;;  %v6886_v21 = vld [vmem:[#allocation8 + $0x60] sm:$0xff]  }
 0x289   :  { %12585 = vst [vmem:[#allocation197_spill] sm:$0xff] %v8420_v60  ;;  %v8423_v41 = vpop.f32.mrb[151].mxu0  ;;  %4393 = vmatpush1.bf16.msra.mxu0 %v6886_v21 }
 0x28a   :  { %12586 = vst [vmem:[#allocation198_spill] sm:$0xff] %v8423_v41  ;;  %v8425_v46 = vpop.f32.mrb[164].mxu1  ;;  %4394 = vmatprep.subr.bf16.mxu0 %v12385_v1 }
 0x28b   :  { %12587 = vst [vmem:[#allocation199_spill] sm:$0xff] %v8425_v46  ;;  %v8427_v14 = vpop.f32.mrb[165].mxu1  ;;  %6403 = vmatmul.mubr.msk.bf16.gmra.mrb[0].mxu0 %vm2912_vm1, %v8418_v32 }
 0x28c   :  { %12588 = vst [vmem:[#allocation200_spill] sm:$0xff] %v8427_v14  ;;  %v8431_v56 = vpop.f32.mrb[166].mxu1  ;;  %3144 = vmatprep.mubr.bf16.mxu0 %v12385_v1  ;;  %v8445_v14 = vld [vmem:[%s12371_s1 + $0x48] sm:$0xff]  }
 0x28d   :  { %12589 = vst [vmem:[#allocation201_spill] sm:$0xff] %v8431_v56  ;;  %v8434_v8 = vpop.f32.mrb[167].mxu1 }
 0x28e   :  { %12590 = vst [vmem:[#allocation202_spill] sm:$0xff] %v8434_v8  ;;  %v8436_v60 = vpop.f32.mrb[152].mxu0 }
 0x28f   :  { %12591 = vst [vmem:[#allocation203_spill] sm:$0xff] %v8436_v60  ;;  %v8439_v41 = vpop.f32.mrb[153].mxu0  ;;  %2444 = vmatmul.mubr.bf16.gmra.mrb[16].mxu1 %v7638_v27 }
 0x290   :  { %12592 = vst [vmem:[#allocation204_spill] sm:$0xff] %v8439_v41  ;;  %v8447_v46 = vpop.f32.mrb[154].mxu0  ;;  %2453 = vmatprep.mubr.bf16.mxu1 %v12385_v1 }
 0x291   :  { %12593 = vst [vmem:[#allocation205_spill] sm:$0xff] %v8447_v46  ;;  %v8450_v56 = vpop.f32.mrb[155].mxu0 }
 0x292   :  { %12594 = vst [vmem:[#allocation206_spill] sm:$0xff] %v8450_v56  ;;  %v8452_v21 = vpop.f32.mrb[168].mxu1 }
 0x293   :  { %12595 = vst [vmem:[#allocation207_spill] sm:$0xff] %v8452_v21  ;;  %v8454_v60 = vpop.f32.mrb[169].mxu1  ;;  %6404 = vmatmul.mubr.msk.bf16.gmra.mrb[4].mxu0 %vm2912_vm1, %v8445_v14  ;;  %v8471_v21 = vld [vmem:[%s12371_s1 + $0x50] sm:$0xff]  }
 0x294   :  { %12596 = vst [vmem:[#allocation208_spill] sm:$0xff] %v8454_v60  ;;  %v8458_v41 = vpop.f32.mrb[170].mxu1  ;;  %3154 = vmatprep.mubr.bf16.mxu0 %v12385_v1 }
 0x295   :  { %12597 = vst [vmem:[#allocation209_spill] sm:$0xff] %v8458_v41  ;;  %v8461_v27 = vpop.f32.mrb[171].mxu1 }
 0x296   :  { %12598 = vst [vmem:[#allocation210_spill] sm:$0xff] %v8461_v27  ;;  %v8463_v8 = vpop.f32.mrb[156].mxu0 }
 0x297   :  { %12599 = vst [vmem:[#allocation211_spill] sm:$0xff] %v8463_v8  ;;  %v8465_v46 = vpop.f32.mrb[157].mxu0  ;;  %2454 = vmatmul.mubr.bf16.gmra.mrb[20].mxu1 %v7660_v15 }
 0x298   :  { %12600 = vst [vmem:[#allocation212_spill] sm:$0xff] %v8465_v46  ;;  %v8473_v60 = vpop.f32.mrb[158].mxu0  ;;  %2463 = vmatprep.mubr.bf16.mxu1 %v12385_v1  ;;  %v6890_v46 = vld [vmem:[#allocation8 + $0x68] sm:$0xff]  }
 0x299   :  { %12601 = vst [vmem:[#allocation213_spill] sm:$0xff] %v8473_v60  ;;  %v8476_v41 = vpop.f32.mrb[159].mxu0  ;;  %4395 = vmatpush1.bf16.msra.mxu0 %v6890_v46 }
 0x29a   :  { %12602 = vst [vmem:[#allocation214_spill] sm:$0xff] %v8476_v41  ;;  %v8478_v56 = vpop.f32.mrb[172].mxu1  ;;  %4396 = vmatprep.subr.bf16.mxu0 %v12385_v1 }
 0x29b   :  { %12603 = vst [vmem:[#allocation215_spill] sm:$0xff] %v8478_v56  ;;  %v8480_v27 = vpop.f32.mrb[173].mxu1  ;;  %6405 = vmatmul.mubr.msk.bf16.gmra.mrb[8].mxu0 %vm2912_vm1, %v8471_v21 }
 0x29c   :  { %12604 = vst [vmem:[#allocation216_spill] sm:$0xff] %v8480_v27  ;;  %v8484_v15 = vpop.f32.mrb[174].mxu1  ;;  %3164 = vmatprep.mubr.bf16.mxu0 %v12385_v1  ;;  %v8498_v27 = vld [vmem:[%s12371_s1 + $0x58] sm:$0xff]  }
 0x29d   :  { %12605 = vst [vmem:[#allocation217_spill] sm:$0xff] %v8484_v15  ;;  %v8487_v8 = vpop.f32.mrb[175].mxu1 }
 0x29e   :  { %12606 = vst [vmem:[#allocation218_spill] sm:$0xff] %v8487_v8  ;;  %v8489_v60 = vpop.f32.mrb[160].mxu0 }
 0x29f   :  { %12607 = vst [vmem:[#allocation219_spill] sm:$0xff] %v8489_v60  ;;  %v8492_v41 = vpop.f32.mrb[161].mxu0  ;;  %2464 = vmatmul.mubr.bf16.gmra.mrb[24].mxu1 %v7682_v2 }
 0x2a0   :  { %12608 = vst [vmem:[#allocation220_spill] sm:$0xff] %v8492_v41  ;;  %v8500_v56 = vpop.f32.mrb[162].mxu0  ;;  %2473 = vmatprep.mubr.bf16.mxu1 %v12385_v1 }
 0x2a1   :  { %12609 = vst [vmem:[#allocation221_spill] sm:$0xff] %v8500_v56  ;;  %v8503_v15 = vpop.f32.mrb[163].mxu0 }
 0x2a2   :  { %12610 = vst [vmem:[#allocation222_spill] sm:$0xff] %v8503_v15  ;;  %v8505_v46 = vpop.f32.mrb[176].mxu1 }
 0x2a3   :  { %12611 = vst [vmem:[#allocation223_spill] sm:$0xff] %v8505_v46  ;;  %v8507_v60 = vpop.f32.mrb[177].mxu1  ;;  %6406 = vmatmul.mubr.msk.bf16.gmra.mrb[12].mxu0 %vm2912_vm1, %v8498_v27  ;;  %v8524_v46 = vld [vmem:[%s12371_s1 + $0x60] sm:$0xff]  }
 0x2a4   :  { %12612 = vst [vmem:[#allocation224_spill] sm:$0xff] %v8507_v60  ;;  %v8511_v41 = vpop.f32.mrb[178].mxu1  ;;  %3174 = vmatprep.mubr.bf16.mxu0 %v12385_v1 }
 0x2a5   :  { %12613 = vst [vmem:[#allocation225_spill] sm:$0xff] %v8511_v41  ;;  %v8514_v2 = vpop.f32.mrb[179].mxu1 }
 0x2a6   :  { %12614 = vst [vmem:[#allocation226_spill] sm:$0xff] %v8514_v2  ;;  %v8516_v8 = vpop.f32.mrb[164].mxu0 }
 0x2a7   :  { %12615 = vst [vmem:[#allocation227_spill] sm:$0xff] %v8516_v8  ;;  %v8518_v56 = vpop.f32.mrb[165].mxu0  ;;  %2474 = vmatmul.mubr.bf16.gmra.mrb[28].mxu1 %v7704_v62  ;;  %v6875_v8 = vld [vmem:[#allocation8 + $0x80] sm:$0xff]  }
 0x2a8   :  { %12616 = vst [vmem:[#allocation228_spill] sm:$0xff] %v8518_v56  ;;  %v8526_v60 = vpop.f32.mrb[166].mxu0  ;;  %3407 = vmatprep.mubr.bf16.mxu1 %v12385_v1  ;;  %v6894_v56 = vld [vmem:[#allocation8 + $0x70] sm:$0xff]  }
 0x2a9   :  { %12617 = vst [vmem:[#allocation229_spill] sm:$0xff] %v8526_v60  ;;  %v8529_v41 = vpop.f32.mrb[167].mxu0  ;;  %4397 = vmatpush1.bf16.msra.mxu0 %v6894_v56  ;;  %v6879_v56 = vld [vmem:[#allocation8 + $0x88] sm:$0xff]  }
 0x2aa   :  { %12618 = vst [vmem:[#allocation230_spill] sm:$0xff] %v8529_v41  ;;  %v8531_v15 = vpop.f32.mrb[180].mxu1  ;;  %4398 = vmatprep.subr.bf16.mxu0 %v12385_v1 }
 0x2ab   :  { %12619 = vst [vmem:[#allocation231_spill] sm:$0xff] %v8531_v15  ;;  %v8533_v2 = vpop.f32.mrb[181].mxu1  ;;  %6407 = vmatmul.mubr.msk.bf16.gmra.mrb[16].mxu0 %vm2912_vm1, %v8524_v46 }
 0x2ac   :  { %12620 = vst [vmem:[#allocation232_spill] sm:$0xff] %v8533_v2  ;;  %v8537_v62 = vpop.f32.mrb[182].mxu1  ;;  %3184 = vmatprep.mubr.bf16.mxu0 %v12385_v1  ;;  %v8552_v2 = vld [vmem:[%s12371_s1 + $0x68] sm:$0xff]  }
 0x2ad   :  { %12621 = vst [vmem:[#allocation233_spill] sm:$0xff] %v8537_v62  ;;  %v8540_v36 = vpop.f32.mrb[183].mxu1 }
 0x2ae   :  { %12622 = vst [vmem:[#allocation234_spill] sm:$0xff] %v8540_v36  ;;  %v8542_v60 = vpop.f32.mrb[168].mxu0 }
 0x2af   :  { %12623 = vst [vmem:[#allocation235_spill] sm:$0xff] %v8542_v60  ;;  %v8545_v41 = vpop.f32.mrb[169].mxu0  ;;  %6428 = vmatmul.mubr.msk.bf16.vlgmr.msra.gmra.mrb[32].mxu1 %vm2912_vm1, %v8198_v0 }
 0x2b0   :  { %12624 = vst [vmem:[#allocation236_spill] sm:$0xff] %v8545_v41  ;;  %v8554_v62 = vpop.f32.mrb[170].mxu0  ;;  %3417 = vmatprep.mubr.bf16.mxu1 %v12385_v1  ;;  %4658 = vmatpush1.bf16.msra.mxu1 %v6875_v8 }
 0x2b1   :  { %12625 = vst [vmem:[#allocation237_spill] sm:$0xff] %v8554_v62  ;;  %v8557_v36 = vpop.f32.mrb[171].mxu0  ;;  %4659 = vmatprep.subr.bf16.mxu1 %v12385_v1  ;;  %v6883_v62 = vld [vmem:[#allocation8 + $0x90] sm:$0xff]  }
 0x2b2   :  { %12626 = vst [vmem:[#allocation238_spill] sm:$0xff] %v8557_v36  ;;  %v8560_v60 = vpop.f32.mrb[184].mxu1 }
 0x2b3   :  { %12627 = vst [vmem:[#allocation239_spill] sm:$0xff] %v8560_v60  ;;  %v8562_v41 = vpop.f32.mrb[185].mxu1  ;;  %6408 = vmatmul.mubr.msk.bf16.gmra.mrb[20].mxu0 %vm2912_vm1, %v8552_v2 }
 0x2b4   :  { %12628 = vst [vmem:[#allocation240_spill] sm:$0xff] %v8562_v41  ;;  %v8566_v0 = vpop.f32.mrb[186].mxu1  ;;  %3194 = vmatprep.mubr.bf16.mxu0 %v12385_v1  ;;  %4660 = vmatpush1.bf16.msra.mxu1 %v6879_v56  ;;  %v8581_v41 = vld [vmem:[%s12371_s1 + $0x70] sm:$0xff]   ;;  %v6887_v56 = vld [vmem:[#allocation8 + $0x98] sm:$0xff]  }
 0x2b5   :  { %12629 = vst [vmem:[#allocation241_spill] sm:$0xff] %v8566_v0  ;;  %v8569_v15 = vpop.f32.mrb[187].mxu1  ;;  %4661 = vmatprep.subr.bf16.mxu1 %v12385_v1 }
 0x2b6   :  { %12630 = vst [vmem:[#allocation242_spill] sm:$0xff] %v8569_v15  ;;  %v8572_v8 = vpop.f32.mrb[172].mxu0 }
 0x2b7   :  { %12631 = vst [vmem:[#allocation243_spill] sm:$0xff] %v8572_v8  ;;  %v8574_v36 = vpop.f32.mrb[173].mxu0  ;;  %6429 = vmatmul.mubr.msk.bf16.gmra.mrb[36].mxu1 %vm2912_vm1, %v8225_v43  ;;  %v6898_v43 = vld [vmem:[#allocation8 + $0x78] sm:$0xff]  }
 0x2b8   :  { %12632 = vst [vmem:[#allocation244_spill] sm:$0xff] %v8574_v36  ;;  %v8583_v0 = vpop.f32.mrb[174].mxu0  ;;  %3427 = vmatprep.mubr.bf16.mxu1 %v12385_v1  ;;  %4662 = vmatpush1.bf16.msra.mxu1 %v6883_v62 }
 0x2b9   :  { %12633 = vst [vmem:[#allocation245_spill] sm:$0xff] %v8583_v0  ;;  %v8586_v15 = vpop.f32.mrb[175].mxu0  ;;  %4663 = vmatprep.subr.bf16.mxu1 %v12385_v1  ;;  %v6891_v0 = vld [vmem:[#allocation8 + $0xa0] sm:$0xff]   ;;  %4399 = vmatpush1.bf16.msra.mxu0 %v6898_v43 }
 0x2ba   :  { %12634 = vst [vmem:[#allocation246_spill] sm:$0xff] %v8586_v15  ;;  %v8589_v8 = vpop.f32.mrb[188].mxu1 }
 0x2bb   :  { %12635 = vst [vmem:[#allocation247_spill] sm:$0xff] %v8589_v8  ;;  %v8591_v36 = vpop.f32.mrb[189].mxu1  ;;  %6409 = vmatmul.mubr.msk.bf16.gmra.mrb[24].mxu0 %vm2912_vm1, %v8581_v41 }
 0x2bc   :  { %12636 = vst [vmem:[#allocation248_spill] sm:$0xff] %v8591_v36  ;;  %v8595_v60 = vpop.f32.mrb[190].mxu1  ;;  %3204 = vmatprep.mubr.bf16.mxu0 %v12385_v1  ;;  %4664 = vmatpush1.bf16.msra.mxu1 %v6887_v56  ;;  %v6895_v56 = vld [vmem:[#allocation8 + $0xa8] sm:$0xff]  }
 0x2bd   :  { %12637 = vst [vmem:[#allocation249_spill] sm:$0xff] %v8595_v60  ;;  %v8598_v62 = vpop.f32.mrb[191].mxu1  ;;  %4665 = vmatprep.subr.bf16.mxu1 %v12385_v1  ;;  %v8610_v60 = vld [vmem:[%s12371_s1 + $0x78] sm:$0xff]  }
 0x2be   :  { %12638 = vst [vmem:[#allocation250_spill] sm:$0xff] %v8598_v62  ;;  %v8601_v15 = vpop.f32.mrb[176].mxu0 }
 0x2bf   :  { %12639 = vst [vmem:[#allocation251_spill] sm:$0xff] %v8601_v15  ;;  %v8603_v8 = vpop.f32.mrb[177].mxu0  ;;  %6430 = vmatmul.mubr.msk.bf16.gmra.mrb[40].mxu1 %vm2912_vm1, %v8253_v30 }
 0x2c0   :  { %12640 = vst [vmem:[#allocation252_spill] sm:$0xff] %v8603_v8  ;;  %v8612_v36 = vpop.f32.mrb[178].mxu0  ;;  %3437 = vmatprep.mubr.bf16.mxu1 %v12385_v1  ;;  %4666 = vmatpush1.bf16.msra.mxu1 %v6891_v0 }
 0x2c1   :  { %12641 = vst [vmem:[#allocation253_spill] sm:$0xff] %v8612_v36  ;;  %v8615_v62 = vpop.f32.mrb[179].mxu0  ;;  %4667 = vmatprep.subr.bf16.mxu1 %v12385_v1  ;;  %v6899_v36 = vld [vmem:[#allocation8 + $0xb0] sm:$0xff]  }
 0x2c2   :  { %12642 = vst [vmem:[#allocation254_spill] sm:$0xff] %v8615_v62  ;;  %v8618_v43 = vpop.f32.mrb[192].mxu1 }
 0x2c3   :  { %12643 = vst [vmem:[#allocation255_spill] sm:$0xff] %v8618_v43  ;;  %v8620_v8 = vpop.f32.mrb[193].mxu1  ;;  %6410 = vmatmul.mubr.msk.bf16.gmra.mrb[28].mxu0 %vm2912_vm1, %v8610_v60 }
 0x2c4   :  { %12644 = vst [vmem:[#allocation256_spill] sm:$0xff] %v8620_v8  ;;  %v8624_v30 = vpop.f32.mrb[194].mxu1  ;;  %3214 = vmatprep.mubr.bf16.mxu0 %v12385_v1  ;;  %4668 = vmatpush1.bf16.msra.mxu1 %v6895_v56  ;;  %v8639_v8 = vld [vmem:[%s12371_s1 + $0x80] sm:$0xff]  }
 0x2c5   :  { %12645 = vst [vmem:[#allocation257_spill] sm:$0xff] %v8624_v30  ;;  %v8627_v15 = vpop.f32.mrb[195].mxu1  ;;  %4669 = vmatprep.subr.bf16.mxu1 %v12385_v1 }
 0x2c6   :  { %12646 = vst [vmem:[#allocation258_spill] sm:$0xff] %v8627_v15  ;;  %v8630_v0 = vpop.f32.mrb[180].mxu0 }
 0x2c7   :  { %12647 = vst [vmem:[#allocation259_spill] sm:$0xff] %v8630_v0  ;;  %v8632_v62 = vpop.f32.mrb[181].mxu0  ;;  %6431 = vmatmul.mubr.msk.bf16.gmra.mrb[44].mxu1 %vm2912_vm1, %v8281_v53  ;;  %v8653_v53 = vld [vmem:[#allocation9] sm:$0xff]  }
 0x2c8   :  { %12648 = vst [vmem:[#allocation260_spill] sm:$0xff] %v8632_v62  ;;  %v8641_v30 = vpop.f32.mrb[182].mxu0  ;;  %3447 = vmatprep.mubr.bf16.mxu1 %v12385_v1  ;;  %4670 = vmatpush1.bf16.msra.mxu1 %v6899_v36 }
 0x2c9   :  { %12649 = vst [vmem:[#allocation261_spill] sm:$0xff] %v8641_v30  ;;  %v8644_v56 = vpop.f32.mrb[183].mxu0  ;;  %4671 = vmatprep.subr.bf16.mxu1 %v12385_v1  ;;  %v6902_v30 = vld [vmem:[#allocation8 + $0xb8] sm:$0xff]   ;;  %6606 = vmatprep.subr.bf16.mxu0 %v8653_v53 }
 0x2ca   :  { %12650 = vst [vmem:[#allocation262_spill] sm:$0xff] %v8644_v56  ;;  %v8647_v0 = vpop.f32.mrb[196].mxu1 }
 0x2cb   :  { %12651 = vst [vmem:[#allocation263_spill] sm:$0xff] %v8647_v0  ;;  %v8649_v62 = vpop.f32.mrb[197].mxu1  ;;  %6411 = vmatmul.mubr.msk.bf16.gmra.mrb[32].mxu0 %vm2912_vm1, %v8639_v8 }
 0x2cc   :  { %12652 = vst [vmem:[#allocation264_spill] sm:$0xff] %v8649_v62  ;;  %v8655_v15 = vpop.f32.mrb[198].mxu1  ;;  %3224 = vmatprep.mubr.bf16.mxu0 %v12385_v1  ;;  %4672 = vmatpush1.bf16.msra.mxu1 %v6902_v30  ;;  %v8670_v62 = vld [vmem:[%s12371_s1 + $0x88] sm:$0xff]  }
 0x2cd   :  { %12653 = vst [vmem:[#allocation265_spill] sm:$0xff] %v8655_v15  ;;  %v8658_v43 = vpop.f32.mrb[199].mxu1  ;;  %4673 = vmatprep.subr.bf16.mxu1 %v12385_v1 }
 0x2ce   :  { %12654 = vst [vmem:[#allocation266_spill] sm:$0xff] %v8658_v43  ;;  %v8661_v36 = vpop.f32.mrb[184].mxu0 }
 0x2cf   :  { %12655 = vst [vmem:[#allocation267_spill] sm:$0xff] %v8661_v36  ;;  %v8663_v0 = vpop.f32.mrb[185].mxu0  ;;  %6432 = vmatmul.mubr.msk.bf16.gmra.mrb[48].mxu1 %vm2912_vm1, %v8309_v44 }
 0x2d0   :  { %12656 = vst [vmem:[#allocation268_spill] sm:$0xff] %v8663_v0  ;;  %v8673_v15 = vpop.f32.mrb[186].mxu0  ;;  %3457 = vmatprep.mubr.bf16.mxu1 %v12385_v1 }
 0x2d1   :  { %12657 = vst [vmem:[#allocation269_spill] sm:$0xff] %v8673_v15  ;;  %v8676_v43 = vpop.f32.mrb[187].mxu0 }
 0x2d2   :  { %12658 = vst [vmem:[#allocation270_spill] sm:$0xff] %v8676_v43  ;;  %v8678_v36 = vpop.f32.mrb[200].mxu1 }
 0x2d3   :  { %12659 = vst [vmem:[#allocation271_spill] sm:$0xff] %v8678_v36  ;;  %v8680_v30 = vpop.f32.mrb[201].mxu1  ;;  %6412 = vmatmul.mubr.msk.bf16.gmra.mrb[36].mxu0 %vm2912_vm1, %v8670_v62 }
 0x2d4   :  { %12660 = vst [vmem:[#allocation272_spill] sm:$0xff] %v8680_v30  ;;  %v8684_v44 = vpop.f32.mrb[202].mxu1  ;;  %3234 = vmatprep.mubr.bf16.mxu0 %v12385_v1  ;;  %v8698_v30 = vld [vmem:[%s12371_s1 + $0x90] sm:$0xff]  }
 0x2d5   :  { %12661 = vst [vmem:[#allocation273_spill] sm:$0xff] %v8684_v44  ;;  %v8687_v0 = vpop.f32.mrb[203].mxu1 }
 0x2d6   :  { %12662 = vst [vmem:[#allocation274_spill] sm:$0xff] %v8687_v0  ;;  %v8689_v56 = vpop.f32.mrb[188].mxu0 }
 0x2d7   :  { %12663 = vst [vmem:[#allocation275_spill] sm:$0xff] %v8689_v56  ;;  %v8691_v15 = vpop.f32.mrb[189].mxu0  ;;  %6433 = vmatmul.mubr.msk.bf16.gmra.mrb[52].mxu1 %vm2912_vm1, %v8337_v13  ;;  %v6903_v13 = vld [vmem:[#allocation8 + $0xc0] sm:$0xff]  }
 0x2d8   :  { %12664 = vst [vmem:[#allocation276_spill] sm:$0xff] %v8691_v15  ;;  %v8700_v36 = vpop.f32.mrb[190].mxu0  ;;  %3467 = vmatprep.mubr.bf16.mxu1 %v12385_v1  ;;  %4674 = vmatpush1.bf16.msra.mxu1 %v6903_v13 }
 0x2d9   :  { %12665 = vst [vmem:[#allocation277_spill] sm:$0xff] %v8700_v36  ;;  %v8703_v44 = vpop.f32.mrb[191].mxu0  ;;  %4675 = vmatprep.subr.bf16.mxu1 %v12385_v1 }
 0x2da   :  { %12666 = vst [vmem:[#allocation278_spill] sm:$0xff] %v8703_v44  ;;  %v8705_v43 = vpop.f32.mrb[204].mxu1 }
 0x2db   :  { %12667 = vst [vmem:[#allocation279_spill] sm:$0xff] %v8705_v43  ;;  %v8707_v0 = vpop.f32.mrb[205].mxu1  ;;  %6413 = vmatmul.mubr.msk.bf16.gmra.mrb[40].mxu0 %vm2912_vm1, %v8698_v30 }
 0x2dc   :  { %12668 = vst [vmem:[#allocation280_spill] sm:$0xff] %v8707_v0  ;;  %v8711_v15 = vpop.f32.mrb[206].mxu1  ;;  %3244 = vmatprep.mubr.bf16.mxu0 %v12385_v1  ;;  %v8725_v0 = vld [vmem:[%s12371_s1 + $0x98] sm:$0xff]  }
 0x2dd   :  { %12669 = vst [vmem:[#allocation281_spill] sm:$0xff] %v8711_v15  ;;  %v8714_v56 = vpop.f32.mrb[207].mxu1 }
 0x2de   :  { %12670 = vst [vmem:[#allocation282_spill] sm:$0xff] %v8714_v56  ;;  %v8716_v48 = vpop.f32.mrb[192].mxu0 }
 0x2df   :  { %12671 = vst [vmem:[#allocation283_spill] sm:$0xff] %v8716_v48  ;;  %v8718_v36 = vpop.f32.mrb[193].mxu0  ;;  %6434 = vmatmul.mubr.msk.bf16.gmra.mrb[56].mxu1 %vm2912_vm1, %v8365_v25 }
 0x2e0   :  { %12672 = vst [vmem:[#allocation284_spill] sm:$0xff] %v8718_v36  ;;  %v8728_v15 = vpop.f32.mrb[194].mxu0  ;;  %3477 = vmatprep.mubr.bf16.mxu1 %v12385_v1 }
 0x2e1   :  { %12673 = vst [vmem:[#allocation285_spill] sm:$0xff] %v8728_v15  ;;  %v8731_v56 = vpop.f32.mrb[195].mxu0 }
 0x2e2   :  { %12674 = vst [vmem:[#allocation286_spill] sm:$0xff] %v8731_v56  ;;  %v8733_v48 = vpop.f32.mrb[208].mxu1 }
 0x2e3   :  { %12675 = vst [vmem:[#allocation287_spill] sm:$0xff] %v8733_v48  ;;  %v8735_v13 = vpop.f32.mrb[209].mxu1  ;;  %6414 = vmatmul.mubr.msk.bf16.gmra.mrb[44].mxu0 %vm2912_vm1, %v8725_v0 }
 0x2e4   :  { %12676 = vst [vmem:[#allocation288_spill] sm:$0xff] %v8735_v13  ;;  %v8739_v25 = vpop.f32.mrb[210].mxu1  ;;  %3254 = vmatprep.mubr.bf16.mxu0 %v12385_v1  ;;  %v8753_v13 = vld [vmem:[%s12371_s1 + $0xa0] sm:$0xff]  }
 0x2e5   :  { %12677 = vst [vmem:[#allocation289_spill] sm:$0xff] %v8739_v25  ;;  %v8742_v36 = vpop.f32.mrb[211].mxu1 }
 0x2e6   :  { %12678 = vst [vmem:[#allocation290_spill] sm:$0xff] %v8742_v36  ;;  %v8744_v43 = vpop.f32.mrb[196].mxu0 }
 0x2e7   :  { %12679 = vst [vmem:[#allocation291_spill] sm:$0xff] %v8744_v43  ;;  %v8746_v15 = vpop.f32.mrb[197].mxu0  ;;  %6435 = vmatmul.mubr.msk.bf16.gmra.mrb[60].mxu1 %vm2912_vm1, %v8392_v3  ;;  %v6905_v3 = vld [vmem:[#allocation8 + $0xc8] sm:$0xff]  }
 0x2e8   :  { %12680 = vst [vmem:[#allocation292_spill] sm:$0xff] %v8746_v15  ;;  %v8755_v48 = vpop.f32.mrb[198].mxu0  ;;  %3487 = vmatprep.mubr.bf16.mxu1 %v12385_v1  ;;  %4676 = vmatpush1.bf16.msra.mxu1 %v6905_v3 }
 0x2e9   :  { %12681 = vst [vmem:[#allocation293_spill] sm:$0xff] %v8755_v48  ;;  %v8758_v25 = vpop.f32.mrb[199].mxu0  ;;  %4677 = vmatprep.subr.bf16.mxu1 %v12385_v1 }
 0x2ea   :  { %12682 = vst [vmem:[#allocation294_spill] sm:$0xff] %v8758_v25  ;;  %v8760_v56 = vpop.f32.mrb[212].mxu1 }
 0x2eb   :  { %12683 = vst [vmem:[#allocation295_spill] sm:$0xff] %v8760_v56  ;;  %v8762_v36 = vpop.f32.mrb[213].mxu1  ;;  %6415 = vmatmul.mubr.msk.bf16.gmra.mrb[48].mxu0 %vm2912_vm1, %v8753_v13 }
 0x2ec   :  { %12684 = vst [vmem:[#allocation296_spill] sm:$0xff] %v8762_v36  ;;  %v8766_v15 = vpop.f32.mrb[214].mxu1  ;;  %3264 = vmatprep.mubr.bf16.mxu0 %v12385_v1  ;;  %v8780_v36 = vld [vmem:[%s12371_s1 + $0xa8] sm:$0xff]  }
 0x2ed   :  { %12685 = vst [vmem:[#allocation297_spill] sm:$0xff] %v8766_v15  ;;  %v8769_v43 = vpop.f32.mrb[215].mxu1 }
 0x2ee   :  { %12686 = vst [vmem:[#allocation298_spill] sm:$0xff] %v8769_v43  ;;  %v8771_v44 = vpop.f32.mrb[200].mxu0 }
 0x2ef   :  { %12687 = vst [vmem:[#allocation299_spill] sm:$0xff] %v8771_v44  ;;  %v8773_v48 = vpop.f32.mrb[201].mxu0  ;;  %6436 = vmatmul.mubr.msk.bf16.gmra.mrb[64].mxu1 %vm2912_vm1, %v8418_v32 }
 0x2f0   :  { %12688 = vst [vmem:[#allocation300_spill] sm:$0xff] %v8773_v48  ;;  %v8783_v15 = vpop.f32.mrb[202].mxu0  ;;  %3497 = vmatprep.mubr.bf16.mxu1 %v12385_v1 }
 0x2f1   :  { %12689 = vst [vmem:[#allocation301_spill] sm:$0xff] %v8783_v15  ;;  %v8786_v43 = vpop.f32.mrb[203].mxu0 }
 0x2f2   :  { %12690 = vst [vmem:[#allocation302_spill] sm:$0xff] %v8786_v43  ;;  %v8788_v44 = vpop.f32.mrb[216].mxu1 }
 0x2f3   :  { %12691 = vst [vmem:[#allocation303_spill] sm:$0xff] %v8788_v44  ;;  %v8790_v3 = vpop.f32.mrb[217].mxu1  ;;  %6416 = vmatmul.mubr.msk.bf16.gmra.mrb[52].mxu0 %vm2912_vm1, %v8780_v36 }
 0x2f4   :  { %12692 = vst [vmem:[#allocation304_spill] sm:$0xff] %v8790_v3  ;;  %v8794_v32 = vpop.f32.mrb[218].mxu1  ;;  %3274 = vmatprep.mubr.bf16.mxu0 %v12385_v1  ;;  %v8808_v3 = vld [vmem:[%s12371_s1 + $0xb0] sm:$0xff]  }
 0x2f5   :  { %12693 = vst [vmem:[#allocation305_spill] sm:$0xff] %v8794_v32  ;;  %v8797_v48 = vpop.f32.mrb[219].mxu1 }
 0x2f6   :  { %12694 = vst [vmem:[#allocation306_spill] sm:$0xff] %v8797_v48  ;;  %v8799_v56 = vpop.f32.mrb[204].mxu0 }
 0x2f7   :  { %12695 = vst [vmem:[#allocation307_spill] sm:$0xff] %v8799_v56  ;;  %v8801_v15 = vpop.f32.mrb[205].mxu0  ;;  %6437 = vmatmul.mubr.msk.bf16.gmra.mrb[68].mxu1 %vm2912_vm1, %v8445_v14  ;;  %v6906_v14 = vld [vmem:[#allocation8 + $0xd0] sm:$0xff]  }
 0x2f8   :  { %12696 = vst [vmem:[#allocation308_spill] sm:$0xff] %v8801_v15  ;;  %v8810_v44 = vpop.f32.mrb[206].mxu0  ;;  %3507 = vmatprep.mubr.bf16.mxu1 %v12385_v1  ;;  %4678 = vmatpush1.bf16.msra.mxu1 %v6906_v14 }
 0x2f9   :  { %12697 = vst [vmem:[#allocation309_spill] sm:$0xff] %v8810_v44  ;;  %v8813_v32 = vpop.f32.mrb[207].mxu0  ;;  %4679 = vmatprep.subr.bf16.mxu1 %v12385_v1 }
 0x2fa   :  { %12698 = vst [vmem:[#allocation310_spill] sm:$0xff] %v8813_v32  ;;  %v8815_v43 = vpop.f32.mrb[220].mxu1 }
 0x2fb   :  { %12699 = vst [vmem:[#allocation311_spill] sm:$0xff] %v8815_v43  ;;  %v8817_v48 = vpop.f32.mrb[221].mxu1  ;;  %6417 = vmatmul.mubr.msk.bf16.gmra.mrb[56].mxu0 %vm2912_vm1, %v8808_v3 }
 0x2fc   :  { %12700 = vst [vmem:[#allocation312_spill] sm:$0xff] %v8817_v48  ;;  %v8821_v15 = vpop.f32.mrb[222].mxu1  ;;  %3284 = vmatprep.mubr.bf16.mxu0 %v12385_v1  ;;  %v8835_v48 = vld [vmem:[%s12371_s1 + $0xb8] sm:$0xff]  }
 0x2fd   :  { %12701 = vst [vmem:[#allocation313_spill] sm:$0xff] %v8821_v15  ;;  %v8824_v56 = vpop.f32.mrb[223].mxu1 }
 0x2fe   :  { %12702 = vst [vmem:[#allocation314_spill] sm:$0xff] %v8824_v56  ;;  %v8826_v25 = vpop.f32.mrb[208].mxu0 }
 0x2ff   :  { %12703 = vst [vmem:[#allocation315_spill] sm:$0xff] %v8826_v25  ;;  %v8828_v44 = vpop.f32.mrb[209].mxu0  ;;  %6438 = vmatmul.mubr.msk.bf16.gmra.mrb[72].mxu1 %vm2912_vm1, %v8471_v21 }
 0x300   :  { %12704 = vst [vmem:[#allocation316_spill] sm:$0xff] %v8828_v44  ;;  %v8838_v15 = vpop.f32.mrb[210].mxu0  ;;  %3517 = vmatprep.mubr.bf16.mxu1 %v12385_v1 }
 0x301   :  { %12705 = vst [vmem:[#allocation317_spill] sm:$0xff] %v8838_v15  ;;  %v8841_v56 = vpop.f32.mrb[211].mxu0 }
 0x302   :  { %12706 = vst [vmem:[#allocation318_spill] sm:$0xff] %v8841_v56  ;;  %v8843_v25 = vpop.f32.mrb[224].mxu1 }
 0x303   :  { %12707 = vst [vmem:[#allocation319_spill] sm:$0xff] %v8843_v25  ;;  %v8845_v14 = vpop.f32.mrb[225].mxu1  ;;  %6418 = vmatmul.mubr.msk.bf16.gmra.mrb[60].mxu0 %vm2912_vm1, %v8835_v48 }
 0x304   :  { %12708 = vst [vmem:[#allocation320_spill] sm:$0xff] %v8845_v14  ;;  %v8849_v21 = vpop.f32.mrb[226].mxu1  ;;  %3294 = vmatprep.mubr.bf16.mxu0 %v12385_v1  ;;  %v8863_v14 = vld [vmem:[%s12371_s1 + $0xc0] sm:$0xff]  }
 0x305   :  { %12709 = vst [vmem:[#allocation321_spill] sm:$0xff] %v8849_v21  ;;  %v8852_v44 = vpop.f32.mrb[227].mxu1  ;;  %12713 = vst [vmem:[#allocation325_spill] sm:$0xff] %v8863_v14 }
 0x306   :  { %12710 = vst [vmem:[#allocation322_spill] sm:$0xff] %v8852_v44  ;;  %v8854_v43 = vpop.f32.mrb[212].mxu0 }
 0x307   :  { %12711 = vst [vmem:[#allocation323_spill] sm:$0xff] %v8854_v43  ;;  %v8856_v15 = vpop.f32.mrb[213].mxu0  ;;  %6439 = vmatmul.mubr.msk.bf16.gmra.mrb[76].mxu1 %vm2912_vm1, %v8498_v27 }
 0x308   :  { %12712 = vst [vmem:[#allocation324_spill] sm:$0xff] %v8856_v15  ;;  %v8865_v25 = vpop.f32.mrb[214].mxu0  ;;  %3527 = vmatprep.mubr.bf16.mxu1 %v12385_v1 }
 0x309   :  { %12714 = vst [vmem:[#allocation326_spill] sm:$0xff] %v8865_v25  ;;  %v8868_v21 = vpop.f32.mrb[215].mxu0 }
 0x30a   :  { %12715 = vst [vmem:[#allocation327_spill] sm:$0xff] %v8868_v21  ;;  %v8870_v56 = vpop.f32.mrb[228].mxu1 }
 0x30b   :  { %12716 = vst [vmem:[#allocation328_spill] sm:$0xff] %v8870_v56  ;;  %v8872_v44 = vpop.f32.mrb[229].mxu1  ;;  %6419 = vmatmul.mubr.msk.bf16.gmra.mrb[64].mxu0 %vm2912_vm1, %v8863_v14  ;;  %v6908_v56 = vld [vmem:[#allocation8 + $0xd8] sm:$0xff]  }
 0x30c   :  { %12717 = vst [vmem:[#allocation329_spill] sm:$0xff] %v8872_v44  ;;  %v8876_v15 = vpop.f32.mrb[230].mxu1  ;;  %3304 = vmatprep.mubr.bf16.mxu0 %v12385_v1  ;;  %v8890_v44 = vld [vmem:[%s12371_s1 + $0xc8] sm:$0xff]   ;;  %4680 = vmatpush1.bf16.msra.mxu1 %v6908_v56 }
 0x30d   :  { %12718 = vst [vmem:[#allocation330_spill] sm:$0xff] %v8876_v15  ;;  %v8879_v27 = vpop.f32.mrb[231].mxu1  ;;  %12722 = vst [vmem:[#allocation334_spill] sm:$0xff] %v8890_v44  ;;  %4681 = vmatprep.subr.bf16.mxu1 %v12385_v1 }
 0x30e   :  { %12719 = vst [vmem:[#allocation331_spill] sm:$0xff] %v8879_v27  ;;  %v8881_v43 = vpop.f32.mrb[216].mxu0  ;;  %v12730_v27 = vsub.s32 1, %v7516_v38  ;;  %v6909_v38 = vld [vmem:[#allocation8 + $0xe0] sm:$0xff]  }
 0x30f   :  { %12720 = vst [vmem:[#allocation332_spill] sm:$0xff] %v8881_v43  ;;  %v8883_v25 = vpop.f32.mrb[217].mxu0  ;;  %6440 = vmatmul.mubr.msk.bf16.gmra.mrb[80].mxu1 %vm2912_vm1, %v8524_v46 }
 0x310   :  { %12721 = vst [vmem:[#allocation333_spill] sm:$0xff] %v8883_v25  ;;  %v8892_v21 = vpop.f32.mrb[218].mxu0  ;;  %3537 = vmatprep.mubr.bf16.mxu1 %v12385_v1  ;;  %v8900_v25 = vld [vmem:[%s12375_s5] sm:$0xf]  ;;  %4682 = vmatpush1.bf16.msra.mxu1 %v6909_v38 }
 0x311   :  { %12723 = vst [vmem:[#allocation335_spill] sm:$0xff] %v8892_v21  ;;  %v8895_v15 = vpop.f32.mrb[219].mxu0  ;;  %12725 = vst [vmem:[#allocation337_spill] sm:$0xff] %v8900_v25  ;;  %v8914_v56 = vrot.slane %v8900_v25, %v7520_v39 }
 0x312   :  { %12724 = vst [vmem:[#allocation336_spill] sm:$0xff] %v8895_v15  ;;  %v8902_v43 = vpop.f32.mrb[232].mxu1 }
 0x313   :  { %12726 = vst [vmem:[#allocation338_spill] sm:$0xff] %v8902_v43  ;;  %v8905_v46 = vpop.f32.mrb[233].mxu1  ;;  %6420 = vmatmul.mubr.msk.bf16.gmra.mrb[68].mxu0 %vm2912_vm1, %v8890_v44  ;;  %v8921_v43 = vrot.slane %v8900_v25, %v12730_v27  ;;  %v1813_v27 = vadd.f32 %v8090_v34, %v8914_v56 }
 0x314   :  { %12727 = vst [vmem:[#allocation339_spill] sm:$0xff] %v8905_v46  ;;  %v8909_v21 = vpop.f32.mrb[234].mxu1  ;;  %3314 = vmatprep.mubr.bf16.mxu0 %v12385_v1  ;;  %v8932_v1 = vld [vmem:[%s12371_s1 + $0xd0] sm:$0xff]  }
 0x315   :  { %12728 = vst [vmem:[#allocation340_spill] sm:$0xff] %v8909_v21  ;;  %v8916_v15 = vpop.f32.mrb[235].mxu1  ;;  %12733 = vst [vmem:[#allocation344_spill] sm:$0xff] %v8932_v1  ;;  %v2484_v34 = vand.u32 2147483647, %v1813_v27 }
 0x316   :  { %12729 = vst [vmem:[#allocation341_spill] sm:$0xff] %v8916_v15  ;;  %v8923_v32 = vpop.f32.mrb[220].mxu0  ;;  %v12735_v15 = vmov 0  }
 0x317   :  { %12731 = vst [vmem:[#allocation342_spill] sm:$0xff] %v8923_v32  ;;  %v8925_v46 = vpop.f32.mrb[221].mxu0  ;;  %6441 = vmatmul.mubr.msk.bf16.gmra.mrb[84].mxu1 %vm2912_vm1, %v8552_v2  ;;  %v1817_v2 = vadd.f32 %v8095_v28, %v8914_v56  ;;  %4683 = vmatprep.subr.bf16.mxu1 %v12735_v15 }
 0x318   :  { %12732 = vst [vmem:[#allocation343_spill] sm:$0xff] %v8925_v46  ;;  %v8934_v39 = vpop.f32.mrb[222].mxu0  ;;  %3547 = vmatprep.mubr.bf16.mxu1 %v12735_v15  ;;  %v1815_v46 = vadd.f32 %v8092_v4, %v8921_v43 }
 0x319   :  { %12734 = vst [vmem:[#allocation345_spill] sm:$0xff] %v8934_v39  ;;  %v8939_v21 = vpop.f32.mrb[223].mxu0  ;;  %v1819_v39 = vadd.f32 %v8098_v23, %v8921_v43  ;;  %v2488_v14 = vand.u32 2147483647, %v1817_v2  ;;  %v8965_v23 = vld [vmem:[%s12371_s1 + $0xd8] sm:$0xff]  }
 0x31a   :  { %12736 = vst [vmem:[#allocation346_spill] sm:$0xff] %v8939_v21  ;;  %v8943_v32 = vpop.f32.mrb[236].mxu1  ;;  %v2485_v4 = vand.u32 2147483647, %v1815_v46 }
 0x31b   :  { %12737 = vst [vmem:[#allocation347_spill] sm:$0xff] %v8943_v32  ;;  %v8947_v25 = vpop.f32.mrb[237].mxu1  ;;  %6421 = vmatmul.mubr.msk.bf16.gmra.mrb[72].mxu0 %vm2912_vm1, %v8932_v1 }
 0x31c   :  { %12738 = vst [vmem:[#allocation348_spill] sm:$0xff] %v8947_v25  ;;  %v8953_v44 = vpop.f32.mrb[238].mxu1  ;;  %3324 = vmatprep.mubr.bf16.mxu0 %v12735_v15 }
 0x31d   :  { %12739 = vst [vmem:[#allocation349_spill] sm:$0xff] %v8953_v44  ;;  %v8956_v21 = vpop.f32.mrb[239].mxu1  ;;  %v2489_v44 = vand.u32 2147483647, %v1819_v39 }
 0x31e   :  { %12740 = vst [vmem:[#allocation350_spill] sm:$0xff] %v8956_v21  ;;  %v3056_v32 = vpop.f32.mrb[224].mxu0 }
 0x31f   :  { %v8958_v28 = vmul.f32 %v3056_v32, %v2484_v34  ;;  %v3058_v25 = vpop.f32.mrb[225].mxu0  ;;  %6442 = vmatmul.mubr.msk.bf16.gmra.mrb[88].mxu1 %vm2912_vm1, %v8581_v41  ;;  %v1823_v32 = vadd.f32 %v8110_v55, %v8914_v56  ;;  %v1825_v41 = vadd.f32 %v8112_v31, %v8921_v43 }
 0x320   :  { %v8967_v1 = vmul.f32 %v3058_v25, %v2485_v4  ;;  %v3060_v27 = vpop.f32.mrb[226].mxu0  ;;  %3557 = vmatprep.mubr.bf16.mxu1 %v12735_v15  ;;  %v6910_v25 = vld [vmem:[#allocation8 + $0xe8] sm:$0xff]   ;;  %v1827_v4 = vadd.f32 %v8115_v7, %v8914_v56 }
 0x321   :  { %v8972_v46 = vmul.f32 %v3060_v27, %v2488_v14  ;;  %v3062_v2 = vpop.f32.mrb[227].mxu0  ;;  %v1829_v14 = vadd.f32 %v8118_v51, %v8921_v43  ;;  %4684 = vmatpush1.bf16.msra.mxu1 %v6910_v25  ;;  %v2492_v7 = vand.u32 2147483647, %v1823_v32 }
 0x322   :  { %v8977_v34 = vmul.f32 %v3062_v2, %v2489_v44  ;;  %v8979_v39 = vpop.f32.mrb[240].mxu1  ;;  %4685 = vmatprep.subr.bf16.mxu1 %v12735_v15  ;;  %v2493_v2 = vand.u32 2147483647, %v1825_v41  ;;  %v9006_v44 = vld [vmem:[%s12371_s1 + $0xe0] sm:$0xff]   ;;  %v1833_v41 = vadd.f32 %v8130_v26, %v8914_v56 }
 0x323   :  { %12741 = vst [vmem:[#allocation351_spill] sm:$0xff] %v8979_v39  ;;  %v8985_v55 = vpop.f32.mrb[241].mxu1  ;;  %6422 = vmatmul.mubr.msk.bf16.gmra.mrb[76].mxu0 %vm2912_vm1, %v8965_v23  ;;  %v2496_v39 = vand.u32 2147483647, %v1827_v4  ;;  %v2497_v32 = vand.u32 2147483647, %v1829_v14 }
 0x324   :  { %12742 = vst [vmem:[#allocation352_spill] sm:$0xff] %v8985_v55  ;;  %v8991_v31 = vpop.f32.mrb[242].mxu1  ;;  %3334 = vmatprep.mubr.bf16.mxu0 %v12735_v15  ;;  %v6911_v55 = vld [vmem:[#allocation8 + $0xf0] sm:$0xff]  }
 0x325   :  { %12743 = vst [vmem:[#allocation353_spill] sm:$0xff] %v8991_v31  ;;  %v8996_v27 = vpop.f32.mrb[243].mxu1  ;;  %4686 = vmatpush1.bf16.msra.mxu1 %v6911_v55 }
 0x326   :  { %12744 = vst [vmem:[#allocation354_spill] sm:$0xff] %v8996_v27  ;;  %v3066_v38 = vpop.f32.mrb[228].mxu0  ;;  %4687 = vmatprep.subr.bf16.mxu1 %v12735_v15 }
 0x327   :  { %v8999_v21 = vmul.f32 %v3066_v38, %v2492_v7  ;;  %v3068_v51 = vpop.f32.mrb[229].mxu0  ;;  %6443 = vmatmul.mubr.msk.bf16.gmra.mrb[92].mxu1 %vm2912_vm1, %v8610_v60  ;;  %v1835_v60 = vadd.f32 %v8132_v29, %v8921_v43 }
 0x328   :  { %v9008_v25 = vmul.f32 %v3068_v51, %v2493_v2  ;;  %v3070_v27 = vpop.f32.mrb[230].mxu0  ;;  %3567 = vmatprep.mubr.bf16.mxu1 %v12735_v15  ;;  %v6913_v2 = vld [vmem:[#allocation8 + $0xf8] sm:$0xff]   ;;  %v1837_v51 = vadd.f32 %v8135_v24, %v8914_v56  ;;  %v2500_v24 = vand.u32 2147483647, %v1833_v41 }
 0x329   :  { %v9013_v4 = vmul.f32 %v3070_v27, %v2496_v39  ;;  %v3072_v38 = vpop.f32.mrb[231].mxu0  ;;  %v1839_v39 = vadd.f32 %v8138_v59, %v8921_v43  ;;  %4688 = vmatpush1.bf16.msra.mxu1 %v6913_v2  ;;  %v9046_v59 = vld [vmem:[%s12371_s1 + $0xe8] sm:$0xff]  }
 0x32a   :  { %v9018_v7 = vmul.f32 %v3072_v38, %v2497_v32  ;;  %v9020_v14 = vpop.f32.mrb[244].mxu1  ;;  %v2501_v38 = vand.u32 2147483647, %v1835_v60  ;;  %v1843_v60 = vadd.f32 %v8150_v10, %v8914_v56  ;;  %v1849_v10 = vadd.f32 %v8158_v52, %v8921_v43  ;;  %v9085_v52 = vld [vmem:[%s12371_s1 + $0xf0] sm:$0xff]  }
 0x32b   :  { %12745 = vst [vmem:[#allocation355_spill] sm:$0xff] %v9020_v14  ;;  %v9026_v26 = vpop.f32.mrb[245].mxu1  ;;  %6423 = vmatmul.mubr.msk.bf16.gmra.mrb[80].mxu0 %vm2912_vm1, %v9006_v44 }
 0x32c   :  { %12746 = vst [vmem:[#allocation356_spill] sm:$0xff] %v9026_v26  ;;  %v9032_v29 = vpop.f32.mrb[246].mxu1  ;;  %3344 = vmatprep.mubr.bf16.mxu0 %v12735_v15  ;;  %v2504_v26 = vand.u32 2147483647, %v1837_v51 }
 0x32d   :  { %12747 = vst [vmem:[#allocation357_spill] sm:$0xff] %v9032_v29  ;;  %v9037_v32 = vpop.f32.mrb[247].mxu1  ;;  %v2505_v29 = vand.u32 2147483647, %v1839_v39 }
 0x32e   :  { %12748 = vst [vmem:[#allocation358_spill] sm:$0xff] %v9037_v32  ;;  %v3076_v55 = vpop.f32.mrb[232].mxu0 }
 0x32f   :  { %v9039_v14 = vmul.f32 %v3076_v55, %v2500_v24  ;;  %v3078_v31 = vpop.f32.mrb[233].mxu0  ;;  %6444 = vmatmul.mubr.msk.bf16.gmra.mrb[96].mxu1 %vm2912_vm1, %v8639_v8  ;;  %v1845_v8 = vadd.f32 %v8152_v63, %v8921_v43 }
 0x330   :  { %v9048_v27 = vmul.f32 %v3078_v31, %v2501_v38  ;;  %v3080_v41 = vpop.f32.mrb[234].mxu0  ;;  %3577 = vmatprep.mubr.bf16.mxu1 %v12735_v15  ;;  %v1847_v31 = vadd.f32 %v8155_v49, %v8914_v56 }
 0x331   :  { %v9053_v2 = vmul.f32 %v3080_v41, %v2504_v26  ;;  %v3082_v51 = vpop.f32.mrb[235].mxu0  ;;  %v2509_v41 = vand.u32 2147483647, %v1845_v8  ;;  %v1853_v8 = vadd.f32 %v8170_v42, %v8914_v56  ;;  %v1859_v42 = vadd.f32 %v8178_v61, %v8921_v43  ;;  %v9124_v61 = vld [vmem:[%s12371_s1 + $0xf8] sm:$0xff]  }
 0x332   :  { %v9057_v55 = vmul.f32 %v3082_v51, %v2505_v29  ;;  %v9059_v24 = vpop.f32.mrb[248].mxu1  ;;  %v2508_v29 = vand.u32 2147483647, %v1843_v60  ;;  %v2512_v39 = vand.u32 2147483647, %v1847_v31 }
 0x333   :  { %12749 = vst [vmem:[#allocation359_spill] sm:$0xff] %v9059_v24  ;;  %v9065_v38 = vpop.f32.mrb[249].mxu1  ;;  %6424 = vmatmul.mubr.msk.bf16.gmra.mrb[84].mxu0 %vm2912_vm1, %v9046_v59 }
 0x334   :  { %12750 = vst [vmem:[#allocation360_spill] sm:$0xff] %v9065_v38  ;;  %v9071_v26 = vpop.f32.mrb[250].mxu1  ;;  %3354 = vmatprep.mubr.bf16.mxu0 %v12735_v15 }
 0x335   :  { %12751 = vst [vmem:[#allocation361_spill] sm:$0xff] %v9071_v26  ;;  %v9076_v49 = vpop.f32.mrb[251].mxu1  ;;  %v2513_v26 = vand.u32 2147483647, %v1849_v10 }
 0x336   :  { %12752 = vst [vmem:[#allocation362_spill] sm:$0xff] %v9076_v49  ;;  %v3086_v51 = vpop.f32.mrb[236].mxu0 }
 0x337   :  { %v9078_v38 = vmul.f32 %v3086_v51, %v2508_v29  ;;  %v3088_v24 = vpop.f32.mrb[237].mxu0  ;;  %6445 = vmatmul.mubr.msk.bf16.gmra.mrb[100].mxu1 %vm2912_vm1, %v8670_v62  ;;  %v1855_v62 = vadd.f32 %v8172_v50, %v8921_v43 }
 0x338   :  { %v9087_v32 = vmul.f32 %v3088_v24, %v2509_v41  ;;  %v3090_v60 = vpop.f32.mrb[238].mxu0  ;;  %3587 = vmatprep.mubr.bf16.mxu1 %v12735_v15  ;;  %v1857_v24 = vadd.f32 %v8175_v45, %v8914_v56 }
 0x339   :  { %v9092_v31 = vmul.f32 %v3090_v60, %v2512_v39  ;;  %v3092_v29 = vpop.f32.mrb[239].mxu0  ;;  %v2517_v60 = vand.u32 2147483647, %v1855_v62  ;;  %v1863_v62 = vadd.f32 %v8190_v5, %v8914_v56  ;;  %v1869_v5 = vadd.f32 %v8203_v40, %v8921_v43 }
 0x33a   :  { %v9096_v51 = vmul.f32 %v3092_v29, %v2513_v26  ;;  %v9098_v63 = vpop.f32.mrb[252].mxu1  ;;  %v2516_v26 = vand.u32 2147483647, %v1853_v8  ;;  %v2520_v10 = vand.u32 2147483647, %v1857_v24 }
 0x33b   :  { %12753 = vst [vmem:[#allocation363_spill] sm:$0xff] %v9098_v63  ;;  %v9104_v41 = vpop.f32.mrb[253].mxu1  ;;  %6425 = vmatmul.mubr.msk.bf16.gmra.mrb[88].mxu0 %vm2912_vm1, %v9085_v52  ;;  %v2529_v40 = vand.u32 2147483647, %v1869_v5 }
 0x33c   :  { %12754 = vst [vmem:[#allocation364_spill] sm:$0xff] %v9104_v41  ;;  %v9110_v39 = vpop.f32.mrb[254].mxu1  ;;  %3364 = vmatprep.mubr.bf16.mxu0 %v12735_v15 }
 0x33d   :  { %12755 = vst [vmem:[#allocation365_spill] sm:$0xff] %v9110_v39  ;;  %v9115_v45 = vpop.f32.mrb[255].mxu1  ;;  %v2521_v39 = vand.u32 2147483647, %v1859_v42 }
 0x33e   :  { %12756 = vst [vmem:[#allocation366_spill] sm:$0xff] %v9115_v45  ;;  %v3096_v29 = vpop.f32.mrb[240].mxu0 }
 0x33f   :  { %v9117_v41 = vmul.f32 %v3096_v29, %v2516_v26  ;;  %v3098_v63 = vpop.f32.mrb[241].mxu0  ;;  %6446 = vmatmul.mubr.msk.bf16.gmra.mrb[104].mxu1 %vm2912_vm1, %v8698_v30  ;;  %v1865_v30 = vadd.f32 %v8192_v12, %v8921_v43  ;;  %v12760_v12 = vpack.c.bf16 %v8977_v34, %v8967_v1  ;;  %v1873_v34 = vadd.f32 %v8217_v57, %v8914_v56 }
 0x340   :  { %v9126_v49 = vmul.f32 %v3098_v63, %v2517_v60  ;;  %v3100_v8 = vpop.f32.mrb[242].mxu0  ;;  %3597 = vmatprep.mubr.bf16.mxu1 %v12735_v15  ;;  %v1867_v63 = vadd.f32 %v8200_v16, %v8914_v56  ;;  %v12764_v57 = vpack.c.bf16 %v8972_v46, %v8958_v28  ;;  %v6907_v28 = vld [vmem:[#allocation9 + $0x10] sm:$0xff]  }
 0x341   :  { %v9131_v24 = vmul.f32 %v3100_v8, %v2520_v10  ;;  %v3102_v26 = vpop.f32.mrb[243].mxu0 }
 0x342   :  { %v9135_v29 = vmul.f32 %v3102_v26, %v2521_v39  ;;  %v9137_v50 = vpop.f32.mrb[0].mxu1  ;;  %v2524_v39 = vand.u32 2147483647, %v1863_v62  ;;  %v2525_v26 = vand.u32 2147483647, %v1865_v30 }
 0x343   :  { %12757 = vst [vmem:[#allocation367_spill] sm:$0xff] %v9137_v50  ;;  %v9143_v60 = vpop.f32.mrb[1].mxu1  ;;  %6426 = vmatmul.mubr.msk.bf16.gmra.mrb[92].mxu0 %vm2912_vm1, %v9124_v61 }
 0x344   :  { %12758 = vst [vmem:[#allocation368_spill] sm:$0xff] %v9143_v60  ;;  %v9149_v10 = vpop.f32.mrb[2].mxu1  ;;  %4400 = vmatprep.mubr.bf16.mxu0 %v12760_v12  ;;  %v4001_v16 = vpack.c.bf16 %v9135_v29, %v9126_v49  ;;  %v2528_v60 = vand.u32 2147483647, %v1867_v63  ;;  %v6904_v12 = vld [vmem:[#allocation9 + $0x8] sm:$0xff]   ;;  %v1875_v63 = vadd.f32 %v8219_v35, %v8921_v43  ;;  %v12786_v29 = vld [vmem:[#allocation171_spill] sm:$0xff] }
 0x345   :  { %12759 = vst [vmem:[#allocation369_spill] sm:$0xff] %v9149_v10  ;;  %v9156_v8 = vpop.f32.mrb[3].mxu1 }
 0x346   :  { %12761 = vst [vmem:[#allocation370_spill] sm:$0xff] %v9156_v8  ;;  %v3106_v42 = vpop.f32.mrb[244].mxu0  ;;  %v2533_v46 = vand.u32 2147483647, %v1875_v63 }
 0x347   :  { %v9158_v50 = vmul.f32 %v3106_v42, %v2524_v39  ;;  %v3108_v45 = vpop.f32.mrb[245].mxu0  ;;  %6447 = vmatmul.mubr.msk.bf16.gmra.mrb[108].mxu1 %vm2912_vm1, %v8725_v0  ;;  %v1877_v0 = vadd.f32 %v8227_v19, %v8914_v56 }
 0x348   :  { %v9162_v10 = vmul.f32 %v3108_v45, %v2525_v26  ;;  %v3110_v1 = vpop.f32.mrb[246].mxu0  ;;  %3607 = vmatprep.mubr.bf16.mxu1 %v12735_v15  ;;  %v12766_v26 = vpack.c.bf16 %v9018_v7, %v9008_v25 }
 0x349   :  { %v9167_v62 = vmul.f32 %v3110_v1, %v2528_v60  ;;  %v3112_v30 = vpop.f32.mrb[247].mxu0  ;;  %v1879_v60 = vadd.f32 %v8230_v9, %v8921_v43 }
 0x34a   :  { %v9171_v42 = vmul.f32 %v3112_v30, %v2529_v40  ;;  %v9173_v39 = vpop.f32.mrb[4].mxu1  ;;  %v2532_v40 = vand.u32 2147483647, %v1873_v34  ;;  %v1883_v34 = vadd.f32 %v8245_v54, %v8914_v56  ;;  %v12770_v54 = vpack.c.bf16 %v9013_v4, %v8999_v21 }
 0x34b   :  { %12762 = vst [vmem:[#allocation371_spill] sm:$0xff] %v9173_v39  ;;  %v9179_v5 = vpop.f32.mrb[5].mxu1  ;;  %4401 = vmatmul.mubr.bf16.vlgmr.msra.gmra.mrb[96].mxu0 %v12764_v57  ;;  %v2536_v57 = vand.u32 2147483647, %v1877_v0  ;;  %v2537_v45 = vand.u32 2147483647, %v1879_v60  ;;  %v1887_v60 = vadd.f32 %v8255_v33, %v8914_v56 }
 0x34c   :  { %12763 = vst [vmem:[#allocation372_spill] sm:$0xff] %v9179_v5  ;;  %6607 = vmatpush3.bf16.msra.mxu0 %v8653_v53  ;;  %v9187_v35 = vpop.f32.mrb[6].mxu1  ;;  %4408 = vmatprep.mubr.bf16.mxu0 %v12766_v26  ;;  %v4005_v19 = vpack.c.bf16 %v9171_v42, %v9162_v10  ;;  %v6912_v0 = vld [vmem:[#allocation9 + $0x18] sm:$0xff]  }
 0x34d   :  { %12765 = vst [vmem:[#allocation373_spill] sm:$0xff] %v9187_v35  ;;  %v9194_v1 = vpop.f32.mrb[7].mxu1  ;;  %6608 = vmatprep.subr.bf16.mxu0 %v6904_v12 }
 0x34e   :  { %12767 = vst [vmem:[#allocation374_spill] sm:$0xff] %v9194_v1  ;;  %v3116_v30 = vpop.f32.mrb[248].mxu0 }
 0x34f   :  { %v9196_v9 = vmul.f32 %v3116_v30, %v2532_v40  ;;  %v3118_v53 = vpop.f32.mrb[249].mxu0  ;;  %6448 = vmatmul.mubr.msk.bf16.gmra.mrb[112].mxu1 %vm2912_vm1, %v8753_v13  ;;  %v1885_v40 = vadd.f32 %v8247_v18, %v8921_v43 }
 0x350   :  { %v9200_v25 = vmul.f32 %v3118_v53, %v2533_v46  ;;  %v3120_v7 = vpop.f32.mrb[250].mxu0  ;;  %3617 = vmatprep.mubr.bf16.mxu1 %v12735_v15  ;;  %6609 = vmatpush3.bf16.msra.mxu0 %v6904_v12  ;;  %v2540_v53 = vand.u32 2147483647, %v1883_v34 }
 0x351   :  { %v9205_v26 = vmul.f32 %v3120_v7, %v2536_v57  ;;  %v3122_v63 = vpop.f32.mrb[251].mxu0  ;;  %6610 = vmatprep.subr.bf16.mxu0 %v6907_v28  ;;  %v1889_v57 = vadd.f32 %v8258_v47, %v8921_v43  ;;  %v2541_v21 = vand.u32 2147483647, %v1885_v40 }
 0x352   :  { %v9209_v30 = vmul.f32 %v3122_v63, %v2537_v45  ;;  %v9211_v13 = vpop.f32.mrb[8].mxu1  ;;  %v12772_v45 = vpack.c.bf16 %v9057_v55, %v9048_v27  ;;  %v6914_v63 = vld [vmem:[#allocation9 + $0x20] sm:$0xff]  }
 0x353   :  { %12768 = vst [vmem:[#allocation375_spill] sm:$0xff] %v9211_v13  ;;  %v9217_v46 = vpop.f32.mrb[9].mxu1  ;;  %4409 = vmatmul.mubr.bf16.gmra.mrb[100].mxu0 %v12770_v54  ;;  %v2544_v54 = vand.u32 2147483647, %v1887_v60  ;;  %v2545_v27 = vand.u32 2147483647, %v1889_v57  ;;  %v1895_v60 = vadd.f32 %v8275_v37, %v8921_v43  ;;  %v1897_v57 = vadd.f32 %v8283_v6, %v8914_v56 }
 0x354   :  { %12769 = vst [vmem:[#allocation376_spill] sm:$0xff] %v9217_v46  ;;  %v9224_v18 = vpop.f32.mrb[10].mxu1  ;;  %4416 = vmatprep.mubr.bf16.mxu0 %v12772_v45  ;;  %6611 = vmatpush3.bf16.msra.mxu0 %v6907_v28  ;;  %v1893_v28 = vadd.f32 %v8273_v17, %v8914_v56  ;;  %v12776_v17 = vpack.c.bf16 %v9053_v2, %v9039_v14 }
 0x355   :  { %12771 = vst [vmem:[#allocation377_spill] sm:$0xff] %v9224_v18  ;;  %v9231_v7 = vpop.f32.mrb[11].mxu1  ;;  %6612 = vmatprep.subr.bf16.mxu0 %v6912_v0  ;;  %v2552_v14 = vand.u32 2147483647, %v1897_v57 }
 0x356   :  { %12773 = vst [vmem:[#allocation378_spill] sm:$0xff] %v9231_v7  ;;  %v3126_v4 = vpop.f32.mrb[252].mxu0 }
 0x357   :  { %v9233_v12 = vmul.f32 %v3126_v4, %v2540_v53  ;;  %v3128_v47 = vpop.f32.mrb[253].mxu0  ;;  %6449 = vmatmul.mubr.msk.bf16.gmra.mrb[116].mxu1 %vm2912_vm1, %v8780_v36  ;;  %v1899_v4 = vadd.f32 %v8286_v58, %v8921_v43 }
 0x358   :  { %v9237_v55 = vmul.f32 %v3128_v47, %v2541_v21  ;;  %v3130_v45 = vpop.f32.mrb[254].mxu0  ;;  %3627 = vmatprep.mubr.bf16.mxu1 %v12735_v15  ;;  %6613 = vmatpush3.bf16.msra.mxu0 %v6912_v0  ;;  %v2548_v47 = vand.u32 2147483647, %v1893_v28 }
 0x359   :  { %v9242_v34 = vmul.f32 %v3130_v45, %v2544_v54  ;;  %v3132_v40 = vpop.f32.mrb[255].mxu0  ;;  %6614 = vmatprep.subr.bf16.mxu0 %v6914_v63  ;;  %v12778_v54 = vpack.c.bf16 %v9096_v51, %v9087_v32  ;;  %v2549_v45 = vand.u32 2147483647, %v1895_v60  ;;  %v2553_v58 = vand.u32 2147483647, %v1899_v4 }
 0x35a   :  { %v9246_v53 = vmul.f32 %v3132_v40, %v2545_v27  ;;  %v9248_v36 = vpop.f32.mrb[12].mxu1  ;;  %v1903_v51 = vadd.f32 %v8301_v11, %v8914_v56  ;;  %v1905_v60 = vadd.f32 %v8303_v22, %v8921_v43  ;;  %v12782_v11 = vpack.c.bf16 %v9092_v31, %v9078_v38 }
 0x35b   :  { %12774 = vst [vmem:[#allocation379_spill] sm:$0xff] %v9248_v36  ;;  %v9254_v21 = vpop.f32.mrb[13].mxu1  ;;  %4417 = vmatmul.mubr.bf16.gmra.mrb[104].mxu0 %v12776_v17 }
 0x35c   :  { %12775 = vst [vmem:[#allocation380_spill] sm:$0xff] %v9254_v21  ;;  %v9261_v37 = vpop.f32.mrb[14].mxu1  ;;  %4424 = vmatprep.mubr.bf16.mxu0 %v12778_v54  ;;  %6615 = vmatpush3.bf16.msra.mxu0 %v6914_v63 }
 0x35d   :  { %12777 = vst [vmem:[#allocation381_spill] sm:$0xff] %v9261_v37  ;;  %v9268_v27 = vpop.f32.mrb[15].mxu1 }
 0x35e   :  { %12779 = vst [vmem:[#allocation382_spill] sm:$0xff] %v9268_v27  ;;  %v3136_v40 = vpop.f32.mrb[0].mxu0 }
 0x35f   :  { %v9270_v2 = vmul.f32 %v3136_v40, %v2548_v47  ;;  %v3138_v17 = vpop.f32.mrb[1].mxu0  ;;  %6450 = vmatmul.mubr.msk.bf16.gmra.mrb[120].mxu1 %vm2912_vm1, %v8808_v3  ;;  %v1907_v3 = vadd.f32 %v8311_v20, %v8914_v56 }
 0x360   :  { %v9274_v0 = vmul.f32 %v3138_v17, %v2549_v45  ;;  %v3140_v32 = vpop.f32.mrb[2].mxu0  ;;  %3637 = vmatprep.mubr.bf16.mxu1 %v12735_v15  ;;  %v12783_v45 = vld [vmem:[#allocation166_spill] sm:$0xff] }
 0x361   :  { %v9279_v63 = vmul.f32 %v3140_v32, %v2552_v14  ;;  %v3142_v28 = vpop.f32.mrb[3].mxu0  ;;  %v1909_v40 = vadd.f32 %v12783_v45, %v8921_v43  ;;  %v2556_v14 = vand.u32 2147483647, %v1903_v51 }
 0x362   :  { %v9283_v57 = vmul.f32 %v3142_v28, %v2553_v58  ;;  %v9285_v54 = vpop.f32.mrb[16].mxu1  ;;  %v2557_v58 = vand.u32 2147483647, %v1905_v60  ;;  %v2560_v28 = vand.u32 2147483647, %v1907_v3  ;;  %v12787_v3 = vld [vmem:[#allocation172_spill] sm:$0xff] }
 0x363   :  { %12780 = vst [vmem:[#allocation383_spill] sm:$0xff] %v9285_v54  ;;  %v9291_v47 = vpop.f32.mrb[17].mxu1  ;;  %4425 = vmatmul.mubr.bf16.gmra.mrb[108].mxu0 %v12782_v11  ;;  %v2561_v11 = vand.u32 2147483647, %v1909_v40 }
 0x364   :  { %12781 = vst [vmem:[#allocation384_spill] sm:$0xff] %v9291_v47  ;;  %v9298_v22 = vpop.f32.mrb[18].mxu1  ;;  %4432 = vmatprep.mubr.bf16.mxu0 %v4001_v16  ;;  %v1913_v16 = vadd.f32 %v12786_v29, %v8914_v56 }
 0x365   :  { %12784 = vst [vmem:[#allocation166_spill] sm:$0xff] %v9298_v22  ;;  %v9305_v17 = vpop.f32.mrb[19].mxu1 }
 0x366   :  { %12785 = vst [vmem:[#allocation385_spill] sm:$0xff] %v9305_v17  ;;  %v3146_v32 = vpop.f32.mrb[4].mxu0 }
 0x367   :  { %v9307_v38 = vmul.f32 %v3146_v32, %v2556_v14  ;;  %v3148_v31 = vpop.f32.mrb[5].mxu0  ;;  %6451 = vmatmul.mubr.msk.bf16.gmra.mrb[124].mxu1 %vm2912_vm1, %v8835_v48  ;;  %v1915_v14 = vadd.f32 %v12787_v3, %v8921_v43  ;;  %v12789_v48 = vld [vmem:[#allocation173_spill] sm:$0xff] }
 0x368   :  { %v9311_v45 = vmul.f32 %v3148_v31, %v2557_v58  ;;  %v3150_v49 = vpop.f32.mrb[6].mxu0  ;;  %3647 = vmatprep.mubr.bf16.mxu1 %v12735_v15  ;;  %v1917_v40 = vadd.f32 %v12789_v48, %v8914_v56  ;;  %v2564_v48 = vand.u32 2147483647, %v1913_v16  ;;  %v12796_v16 = vld [vmem:[#allocation179_spill] sm:$0xff] }
 0x369   :  { %v9316_v51 = vmul.f32 %v3150_v49, %v2560_v28  ;;  %v3152_v60 = vpop.f32.mrb[7].mxu0  ;;  %v12791_v28 = vpack.c.bf16 %v9131_v24, %v9117_v41  ;;  %v12792_v49 = vld [vmem:[#allocation174_spill] sm:$0xff]  ;;  %v2565_v20 = vand.u32 2147483647, %v1915_v14 }
 0x36a   :  { %v9320_v32 = vmul.f32 %v3152_v60, %v2561_v11  ;;  %v9322_v4 = vpop.f32.mrb[20].mxu1  ;;  %v1919_v29 = vadd.f32 %v12792_v49, %v8921_v43  ;;  %v6915_v60 = vld [vmem:[#allocation9 + $0x28] sm:$0xff]   ;;  %v2568_v41 = vand.u32 2147483647, %v1917_v40  ;;  %v1923_v11 = vadd.f32 %v12796_v16, %v8914_v56 }
 0x36b   :  { %12788 = vst [vmem:[#allocation171_spill] sm:$0xff] %v9322_v4  ;;  %v9328_v31 = vpop.f32.mrb[21].mxu1  ;;  %4433 = vmatmul.mubr.bf16.gmra.mrb[112].mxu0 %v12791_v28  ;;  %6616 = vmatprep.subr.bf16.mxu0 %v6915_v60  ;;  %v12795_v49 = vld [vmem:[#allocation325_spill] sm:$0xff] }
 0x36c   :  { %12790 = vst [vmem:[#allocation172_spill] sm:$0xff] %v9328_v31  ;;  %v9335_v3 = vpop.f32.mrb[22].mxu1  ;;  %4440 = vmatprep.mubr.bf16.mxu0 %v4005_v19  ;;  %6617 = vmatpush3.bf16.msra.mxu0 %v6915_v60  ;;  %v2569_v10 = vand.u32 2147483647, %v1919_v29  ;;  %v12799_v29 = vld [vmem:[#allocation181_spill] sm:$0xff] }
 0x36d   :  { %12793 = vst [vmem:[#allocation173_spill] sm:$0xff] %v9335_v3  ;;  %v9342_v58 = vpop.f32.mrb[23].mxu1  ;;  %v12807_v3 = vld [vmem:[#allocation334_spill] sm:$0xff] }
 0x36e   :  { %12794 = vst [vmem:[#allocation174_spill] sm:$0xff] %v9342_v58  ;;  %v3156_v6 = vpop.f32.mrb[8].mxu0 }
 0x36f   :  { %v9344_v24 = vmul.f32 %v3156_v6, %v2564_v48  ;;  %v3158_v28 = vpop.f32.mrb[9].mxu0  ;;  %6452 = vmatmul.mubr.msk.bf16.gmra.mrb[128].mxu1 %vm2912_vm1, %v12795_v49  ;;  %v12797_v6 = vld [vmem:[#allocation180_spill] sm:$0xff]  ;;  %v12802_v49 = vld [vmem:[#allocation182_spill] sm:$0xff] }
 0x370   :  { %v9348_v42 = vmul.f32 %v3158_v28, %v2565_v20  ;;  %v3160_v19 = vpop.f32.mrb[10].mxu0  ;;  %3657 = vmatprep.mubr.bf16.mxu1 %v12735_v15  ;;  %v1925_v40 = vadd.f32 %v12797_v6, %v8921_v43  ;;  %v1927_v20 = vadd.f32 %v12799_v29, %v8914_v56  ;;  %v2572_v6 = vand.u32 2147483647, %v1923_v11 }
 0x371   :  { %v9353_v14 = vmul.f32 %v3160_v19, %v2568_v41  ;;  %v3162_v33 = vpop.f32.mrb[11].mxu0  ;;  %v12801_v41 = vpack.c.bf16 %v9167_v62, %v9158_v50  ;;  %v1929_v19 = vadd.f32 %v12802_v49, %v8921_v43 }
 0x372   :  { %v9357_v48 = vmul.f32 %v3162_v33, %v2569_v10  ;;  %v9359_v58 = vpop.f32.mrb[24].mxu1  ;;  %v12804_v33 = vpack.c.bf16 %v9209_v30, %v9200_v25  ;;  %v2573_v60 = vand.u32 2147483647, %v1925_v40  ;;  %v2576_v62 = vand.u32 2147483647, %v1927_v20  ;;  %v12808_v40 = vld [vmem:[#allocation187_spill] sm:$0xff] }
 0x373   :  { %12798 = vst [vmem:[#allocation325_spill] sm:$0xff] %v9359_v58  ;;  %v9365_v28 = vpop.f32.mrb[25].mxu1  ;;  %4441 = vmatmul.mubr.bf16.gmra.mrb[116].mxu0 %v12801_v41  ;;  %v12806_v58 = vld [vmem:[#allocation16_spill] sm:$0xff] }
 0x374   :  { %12800 = vst [vmem:[#allocation179_spill] sm:$0xff] %v9365_v28  ;;  %v9372_v16 = vpop.f32.mrb[26].mxu1  ;;  %4448 = vmatprep.mubr.bf16.mxu0 %v12804_v33  ;;  %v12395_v50 = vsub.s32 2, %v12806_v58  ;;  %v12396_v11 = vsub.s32 3, %v12806_v58  ;;  %v1933_v33 = vadd.f32 %v12808_v40, %v8914_v56 }
 0x375   :  { %12803 = vst [vmem:[#allocation180_spill] sm:$0xff] %v9372_v16  ;;  %v9379_v29 = vpop.f32.mrb[27].mxu1  ;;  %v2577_v16 = vand.u32 2147483647, %v1929_v19 }
 0x376   :  { %12805 = vst [vmem:[#allocation181_spill] sm:$0xff] %v9379_v29  ;;  %v3166_v28 = vpop.f32.mrb[12].mxu0 }
 0x377   :  { %v9382_v41 = vmul.f32 %v3166_v28, %v2572_v6  ;;  %v3168_v49 = vpop.f32.mrb[13].mxu0  ;;  %6453 = vmatmul.mubr.msk.bf16.gmra.mrb[132].mxu1 %vm2912_vm1, %v12807_v3  ;;  %v12809_v28 = vld [vmem:[#allocation337_spill] sm:$0xff]  ;;  %v12810_v3 = vld [vmem:[#allocation188_spill] sm:$0xff] }
 0x378   :  { %v9386_v25 = vmul.f32 %v3168_v49, %v2573_v60  ;;  %v3170_v30 = vpop.f32.mrb[14].mxu0  ;;  %3667 = vmatprep.mubr.bf16.mxu1 %v12735_v15  ;;  %v9397_v6 = vrot.slane %v12809_v28, %v12395_v50  ;;  %v1935_v60 = vadd.f32 %v12810_v3, %v8921_v43  ;;  %v9408_v29 = vrot.slane %v12809_v28, %v12396_v11 }
 0x379   :  { %v9392_v10 = vmul.f32 %v3170_v30, %v2576_v62  ;;  %v3172_v20 = vpop.f32.mrb[15].mxu0  ;;  %v12812_v62 = vld [vmem:[#allocation189_spill] sm:$0xff]  ;;  %v12814_v3 = vpack.c.bf16 %v9205_v26, %v9196_v9  ;;  %v12817_v28 = vpack.c.bf16 %v9246_v53, %v9237_v55  ;;  %v2580_v11 = vand.u32 2147483647, %v1933_v33  ;;  %v12821_v55 = vld [vmem:[#allocation344_spill] sm:$0xff] }
 0x37a   :  { %v9401_v19 = vmul.f32 %v3172_v20, %v2577_v16  ;;  %v9403_v49 = vpop.f32.mrb[28].mxu1  ;;  %v1937_v30 = vadd.f32 %v12812_v62, %v8914_v56  ;;  %v12815_v16 = vld [vmem:[#allocation190_spill] sm:$0xff]  ;;  %v2581_v9 = vand.u32 2147483647, %v1935_v60  ;;  %v12822_v53 = vld [vmem:[#allocation193_spill] sm:$0xff] }
 0x37b   :  { %12811 = vst [vmem:[#allocation182_spill] sm:$0xff] %v9403_v49  ;;  %v9414_v50 = vpop.f32.mrb[29].mxu1  ;;  %4449 = vmatmul.mubr.bf16.gmra.mrb[120].mxu0 %v12814_v3  ;;  %v1939_v20 = vadd.f32 %v12815_v16, %v8921_v43  ;;  %v12820_v3 = vld [vmem:[#allocation192_spill] sm:$0xff]  ;;  %v2170_v33 = vadd.f32 %v12822_v53, %v9397_v6 }
 0x37c   :  { %12813 = vst [vmem:[#allocation334_spill] sm:$0xff] %v9414_v50  ;;  %v9421_v49 = vpop.f32.mrb[30].mxu1  ;;  %4456 = vmatprep.mubr.bf16.mxu0 %v12817_v28  ;;  %v12819_v50 = vld [vmem:[#allocation191_spill] sm:$0xff]  ;;  %v2168_v16 = vadd.f32 %v12820_v3, %v9408_v29  ;;  %v2584_v4 = vand.u32 2147483647, %v1937_v30 }
 0x37d   :  { %12816 = vst [vmem:[#allocation187_spill] sm:$0xff] %v9421_v49  ;;  %v9428_v40 = vpop.f32.mrb[31].mxu1  ;;  %v2166_v31 = vadd.f32 %v12819_v50, %v9397_v6  ;;  %v2585_v28 = vand.u32 2147483647, %v1939_v20  ;;  %v12823_v50 = vld [vmem:[#allocation194_spill] sm:$0xff]  ;;  %v12824_v30 = vld [vmem:[#allocation195_spill] sm:$0xff] }
 0x37e   :  { %12818 = vst [vmem:[#allocation337_spill] sm:$0xff] %v9428_v40  ;;  %v3176_v26 = vpop.f32.mrb[16].mxu0  ;;  %v2172_v60 = vadd.f32 %v12823_v50, %v9408_v29  ;;  %v2487_v20 = vand.u32 2147483647, %v2168_v16 }
 0x37f   :  { %v9434_v49 = vmul.f32 %v3176_v26, %v2580_v11  ;;  %v3178_v17 = vpop.f32.mrb[17].mxu0  ;;  %6454 = vmatmul.mubr.msk.bf16.gmra.mrb[136].mxu1 %vm2912_vm1, %v12821_v55  ;;  %v1943_v11 = vadd.f32 %v12824_v30, %v8914_v56  ;;  %v2486_v22 = vand.u32 2147483647, %v2166_v31  ;;  %v12825_v55 = vld [vmem:[#allocation196_spill] sm:$0xff]  ;;  %v2490_v31 = vand.u32 2147483647, %v2170_v33 }
 0x380   :  { %v9440_v62 = vmul.f32 %v3178_v17, %v2581_v9  ;;  %v3180_v40 = vpop.f32.mrb[18].mxu0  ;;  %3677 = vmatprep.mubr.bf16.mxu1 %v12735_v15  ;;  %v1945_v47 = vadd.f32 %v12825_v55, %v8921_v43  ;;  %v12826_v9 = vld [vmem:[#allocation197_spill] sm:$0xff]  ;;  %v12829_v55 = vpack.c.bf16 %v9283_v57, %v9274_v0 }
 0x381   :  { %v9447_v26 = vmul.f32 %v3180_v40, %v2584_v4  ;;  %v3182_v3 = vpop.f32.mrb[19].mxu0  ;;  %v1947_v54 = vadd.f32 %v12826_v9, %v8914_v56  ;;  %v12827_v4 = vpack.c.bf16 %v9242_v34, %v9233_v12  ;;  %v12828_v40 = vld [vmem:[#allocation198_spill] sm:$0xff]  ;;  %v2491_v9 = vand.u32 2147483647, %v2172_v60  ;;  %v12830_v34 = vld [vmem:[#allocation199_spill] sm:$0xff] }
 0x382   :  { %v9451_v53 = vmul.f32 %v3182_v3, %v2585_v28  ;;  %v3409_v17 = vpop.f32.mrb[32].mxu1  ;;  %v1949_v28 = vadd.f32 %v12828_v40, %v8921_v43  ;;  %v2176_v33 = vadd.f32 %v12830_v34, %v9397_v6 }
 0x383   :  { %v9457_v27 = vmul.f32 %v3409_v17, %v2486_v22  ;;  %v3411_v30 = vpop.f32.mrb[33].mxu1  ;;  %4457 = vmatmul.mubr.bf16.gmra.mrb[124].mxu0 %v12827_v4  ;;  %v2588_v17 = vand.u32 2147483647, %v1943_v11  ;;  %v2589_v4 = vand.u32 2147483647, %v1945_v47 }
 0x384   :  { %v9464_v3 = vmul.f32 %v3411_v30, %v2487_v20  ;;  %v3413_v16 = vpop.f32.mrb[34].mxu1  ;;  %4464 = vmatprep.mubr.bf16.mxu0 %v12829_v55  ;;  %v12831_v30 = vld [vmem:[#allocation200_spill] sm:$0xff]  ;;  %v2592_v0 = vand.u32 2147483647, %v1947_v54  ;;  %v2593_v47 = vand.u32 2147483647, %v1949_v28 }
 0x385   :  { %v9471_v50 = vmul.f32 %v3413_v16, %v2490_v31  ;;  %v3415_v12 = vpop.f32.mrb[35].mxu1  ;;  %v2178_v37 = vadd.f32 %v12831_v30, %v9408_v29  ;;  %v12832_v31 = vld [vmem:[#allocation201_spill] sm:$0xff]  ;;  %v12833_v54 = vld [vmem:[#allocation202_spill] sm:$0xff]  ;;  %v2494_v57 = vand.u32 2147483647, %v2176_v33  ;;  %v12835_v28 = vld [vmem:[#allocation204_spill] sm:$0xff] }
 0x386   :  { %v9475_v40 = vmul.f32 %v3415_v12, %v2491_v9  ;;  %v3186_v20 = vpop.f32.mrb[20].mxu0  ;;  %v2180_v16 = vadd.f32 %v12832_v31, %v9397_v6  ;;  %v2182_v34 = vadd.f32 %v12833_v54, %v9408_v29  ;;  %v1955_v31 = vadd.f32 %v12835_v28, %v8921_v43  ;;  %v12836_v55 = vld [vmem:[#allocation205_spill] sm:$0xff] }
 0x387   :  { %v9481_v60 = vmul.f32 %v3186_v20, %v2588_v17  ;;  %v3188_v11 = vpop.f32.mrb[21].mxu0  ;;  %6455 = vmatmul.mubr.msk.bf16.gmra.mrb[140].mxu1 %vm2912_vm1, %v8965_v23  ;;  %v12834_v17 = vld [vmem:[#allocation203_spill] sm:$0xff]  ;;  %v1957_v21 = vadd.f32 %v12836_v55, %v8914_v56  ;;  %v12839_v55 = vpack.c.bf16 %v9320_v32, %v9311_v45 }
 0x388   :  { %v9489_v9 = vmul.f32 %v3188_v11, %v2589_v4  ;;  %v3190_v12 = vpop.f32.mrb[22].mxu0  ;;  %3687 = vmatprep.mubr.bf16.mxu1 %v12735_v15  ;;  %v1953_v20 = vadd.f32 %v12834_v17, %v8914_v56  ;;  %v2495_v11 = vand.u32 2147483647, %v2178_v37  ;;  %v2498_v33 = vand.u32 2147483647, %v2180_v16 }
 0x389   :  { %v9496_v30 = vmul.f32 %v3190_v12, %v2592_v0  ;;  %v3192_v23 = vpop.f32.mrb[23].mxu0  ;;  %v12837_v0 = vpack.c.bf16 %v9279_v63, %v9270_v2  ;;  %v12838_v12 = vld [vmem:[#allocation206_spill] sm:$0xff]  ;;  %v2499_v28 = vand.u32 2147483647, %v2182_v34  ;;  %v12840_v63 = vld [vmem:[#allocation207_spill] sm:$0xff] }
 0x38a   :  { %v9500_v22 = vmul.f32 %v3192_v23, %v2593_v47  ;;  %v3419_v4 = vpop.f32.mrb[36].mxu1  ;;  %v1959_v47 = vadd.f32 %v12838_v12, %v8921_v43  ;;  %v2596_v54 = vand.u32 2147483647, %v1953_v20  ;;  %v2186_v16 = vadd.f32 %v12840_v63, %v9397_v6  ;;  %v12841_v12 = vld [vmem:[#allocation208_spill] sm:$0xff]  ;;  %v12843_v63 = vld [vmem:[#allocation210_spill] sm:$0xff] }
 0x38b   :  { %v9506_v36 = vmul.f32 %v3419_v4, %v2494_v57  ;;  %v3421_v17 = vpop.f32.mrb[37].mxu1  ;;  %4465 = vmatmul.mubr.bf16.gmra.mrb[128].mxu0 %v12837_v0  ;;  %v6916_v4 = vld [vmem:[#allocation9 + $0x30] sm:$0xff]   ;;  %v2597_v0 = vand.u32 2147483647, %v1955_v31  ;;  %v2188_v45 = vadd.f32 %v12841_v12, %v9408_v29  ;;  %v2600_v32 = vand.u32 2147483647, %v1957_v21 }
 0x38c   :  { %v9513_v23 = vmul.f32 %v3421_v17, %v2495_v11  ;;  %v3423_v37 = vpop.f32.mrb[38].mxu1  ;;  %4472 = vmatprep.mubr.bf16.mxu0 %v12839_v55  ;;  %6618 = vmatprep.subr.bf16.mxu0 %v6916_v4  ;;  %v2192_v12 = vadd.f32 %v12843_v63, %v9408_v29 }
 0x38d   :  { %v9520_v7 = vmul.f32 %v3423_v37, %v2498_v33  ;;  %v3425_v2 = vpop.f32.mrb[39].mxu1  ;;  %v12842_v33 = vld [vmem:[#allocation209_spill] sm:$0xff]  ;;  %6619 = vmatpush3.bf16.msra.mxu0 %v6916_v4  ;;  %v2601_v37 = vand.u32 2147483647, %v1959_v47  ;;  %v12845_v47 = vld [vmem:[#allocation212_spill] sm:$0xff] }
 0x38e   :  { %v9524_v11 = vmul.f32 %v3425_v2, %v2499_v28  ;;  %v3196_v17 = vpop.f32.mrb[24].mxu0  ;;  %v2190_v31 = vadd.f32 %v12842_v33, %v9397_v6  ;;  %v2502_v33 = vand.u32 2147483647, %v2186_v16  ;;  %v1965_v4 = vadd.f32 %v12845_v47, %v8921_v43  ;;  %v12846_v28 = vld [vmem:[#allocation213_spill] sm:$0xff] }
 0x38f   :  { %v9530_v55 = vmul.f32 %v3196_v17, %v2596_v54  ;;  %v3198_v20 = vpop.f32.mrb[25].mxu0  ;;  %6456 = vmatmul.mubr.msk.bf16.gmra.mrb[144].mxu1 %vm2912_vm1, %v9006_v44  ;;  %v12844_v54 = vld [vmem:[#allocation211_spill] sm:$0xff]  ;;  %v1967_v18 = vadd.f32 %v12846_v28, %v8914_v56  ;;  %v12849_v28 = vpack.c.bf16 %v9357_v48, %v9348_v42  ;;  %v2507_v47 = vand.u32 2147483647, %v2192_v12 }
 0x390   :  { %v9538_v2 = vmul.f32 %v3198_v20, %v2597_v0  ;;  %v3200_v21 = vpop.f32.mrb[26].mxu0  ;;  %3697 = vmatprep.mubr.bf16.mxu1 %v12735_v15  ;;  %v1963_v17 = vadd.f32 %v12844_v54, %v8914_v56  ;;  %v2503_v20 = vand.u32 2147483647, %v2188_v45  ;;  %v2506_v16 = vand.u32 2147483647, %v2190_v31 }
 0x391   :  { %v9545_v44 = vmul.f32 %v3200_v21, %v2600_v32  ;;  %v3202_v34 = vpop.f32.mrb[27].mxu0  ;;  %v12847_v32 = vpack.c.bf16 %v9316_v51, %v9307_v38  ;;  %v12848_v21 = vld [vmem:[#allocation214_spill] sm:$0xff]  ;;  %v12850_v51 = vld [vmem:[#allocation215_spill] sm:$0xff]  ;;  %v2608_v42 = vand.u32 2147483647, %v1967_v18 }
 0x392   :  { %v9549_v57 = vmul.f32 %v3202_v34, %v2601_v37  ;;  %v3429_v0 = vpop.f32.mrb[40].mxu1  ;;  %v1969_v34 = vadd.f32 %v12848_v21, %v8921_v43  ;;  %v2196_v31 = vadd.f32 %v12850_v51, %v9397_v6  ;;  %v12853_v18 = vld [vmem:[#allocation218_spill] sm:$0xff] }
 0x393   :  { %v9555_v46 = vmul.f32 %v3429_v0, %v2502_v33  ;;  %v3431_v54 = vpop.f32.mrb[41].mxu1  ;;  %4473 = vmatmul.mubr.bf16.gmra.mrb[132].mxu0 %v12847_v32  ;;  %v2604_v0 = vand.u32 2147483647, %v1963_v17  ;;  %v2605_v32 = vand.u32 2147483647, %v1965_v4  ;;  %v2202_v51 = vadd.f32 %v12853_v18, %v9408_v29 }
 0x394   :  { %v9562_v37 = vmul.f32 %v3431_v54, %v2503_v20  ;;  %v3433_v45 = vpop.f32.mrb[42].mxu1  ;;  %4480 = vmatprep.mubr.bf16.mxu0 %v12849_v28  ;;  %v12851_v54 = vld [vmem:[#allocation216_spill] sm:$0xff]  ;;  %v2609_v4 = vand.u32 2147483647, %v1969_v34 }
 0x395   :  { %v9569_v63 = vmul.f32 %v3433_v45, %v2506_v16  ;;  %v3435_v38 = vpop.f32.mrb[43].mxu1  ;;  %v2198_v13 = vadd.f32 %v12851_v54, %v9408_v29  ;;  %v12852_v16 = vld [vmem:[#allocation217_spill] sm:$0xff]  ;;  %v2510_v54 = vand.u32 2147483647, %v2196_v31 }
 0x396   :  { %v9573_v21 = vmul.f32 %v3435_v38, %v2507_v47  ;;  %v3206_v20 = vpop.f32.mrb[28].mxu0  ;;  %v2200_v45 = vadd.f32 %v12852_v16, %v9397_v6 }
 0x397   :  { %v9579_v12 = vmul.f32 %v3206_v20, %v2604_v0  ;;  %v3208_v17 = vpop.f32.mrb[29].mxu0  ;;  %6457 = vmatmul.mubr.msk.bf16.gmra.mrb[148].mxu1 %vm2912_vm1, %v9046_v59  ;;  %v12854_v59 = vld [vmem:[#allocation219_spill] sm:$0xff]  ;;  %v2511_v33 = vand.u32 2147483647, %v2198_v13 }
 0x398   :  { %v9587_v47 = vmul.f32 %v3208_v17, %v2605_v32  ;;  %v3210_v38 = vpop.f32.mrb[30].mxu0  ;;  %3707 = vmatprep.mubr.bf16.mxu1 %v12735_v15  ;;  %v1973_v48 = vadd.f32 %v12854_v59, %v8914_v56  ;;  %v12855_v32 = vld [vmem:[#allocation220_spill] sm:$0xff]  ;;  %v2514_v31 = vand.u32 2147483647, %v2200_v45  ;;  %v12858_v59 = vpack.c.bf16 %v9401_v19, %v9386_v25 }
 0x399   :  { %v9592_v0 = vmul.f32 %v3210_v38, %v2608_v42  ;;  %v3212_v20 = vpop.f32.mrb[31].mxu0  ;;  %v1975_v17 = vadd.f32 %v12855_v32, %v8921_v43  ;;  %v12856_v42 = vpack.c.bf16 %v9353_v14, %v9344_v24  ;;  %v12857_v38 = vld [vmem:[#allocation221_spill] sm:$0xff]  ;;  %v2515_v32 = vand.u32 2147483647, %v2202_v51  ;;  %v12861_v25 = vld [vmem:[#allocation224_spill] sm:$0xff] }
 0x39a   :  { %v9596_v16 = vmul.f32 %v3212_v20, %v2609_v4  ;;  %v3439_v34 = vpop.f32.mrb[44].mxu1  ;;  %v1977_v4 = vadd.f32 %v12857_v38, %v8914_v56  ;;  %v2612_v45 = vand.u32 2147483647, %v1973_v48  ;;  %v2208_v19 = vadd.f32 %v12861_v25, %v9408_v29  ;;  %v12863_v25 = vld [vmem:[#allocation226_spill] sm:$0xff] }
 0x39b   :  { %v9602_v18 = vmul.f32 %v3439_v34, %v2510_v54  ;;  %v3441_v1 = vpop.f32.mrb[45].mxu1  ;;  %4481 = vmatmul.mubr.bf16.gmra.mrb[136].mxu0 %v12856_v42  ;;  %v12859_v54 = vld [vmem:[#allocation222_spill] sm:$0xff]  ;;  %v12860_v42 = vld [vmem:[#allocation223_spill] sm:$0xff]  ;;  %v2613_v35 = vand.u32 2147483647, %v1975_v17  ;;  %v2212_v51 = vadd.f32 %v12863_v25, %v9408_v29 }
 0x39c   :  { %v9609_v20 = vmul.f32 %v3441_v1, %v2511_v33  ;;  %v3443_v13 = vpop.f32.mrb[46].mxu1  ;;  %4488 = vmatprep.mubr.bf16.mxu0 %v12858_v59  ;;  %v1979_v34 = vadd.f32 %v12859_v54, %v8921_v43  ;;  %v2206_v1 = vadd.f32 %v12860_v42, %v9397_v6  ;;  %v2616_v48 = vand.u32 2147483647, %v1977_v4  ;;  %v12864_v4 = vld [vmem:[#allocation227_spill] sm:$0xff] }
 0x39d   :  { %v9618_v24 = vmul.f32 %v3443_v13, %v2514_v31  ;;  %v3445_v14 = vpop.f32.mrb[47].mxu1  ;;  %v12862_v31 = vld [vmem:[#allocation225_spill] sm:$0xff]  ;;  %v1983_v28 = vadd.f32 %v12864_v4, %v8914_v56 }
 0x39e   :  { %v9622_v33 = vmul.f32 %v3445_v14, %v2515_v32  ;;  %v3216_v38 = vpop.f32.mrb[32].mxu0  ;;  %v2210_v13 = vadd.f32 %v12862_v31, %v9397_v6  ;;  %v2617_v42 = vand.u32 2147483647, %v1979_v34  ;;  %v2519_v32 = vand.u32 2147483647, %v2208_v19  ;;  %v12871_v19 = vld [vmem:[#allocation232_spill] sm:$0xff] }
 0x39f   :  { %v9628_v59 = vmul.f32 %v3216_v38, %v2612_v45  ;;  %v3218_v54 = vpop.f32.mrb[33].mxu0  ;;  %6458 = vmatmul.mubr.msk.bf16.gmra.mrb[152].mxu1 %vm2912_vm1, %v9085_v52  ;;  %v2518_v52 = vand.u32 2147483647, %v2206_v1  ;;  %v2218_v8 = vadd.f32 %v12871_v19, %v9408_v29  ;;  %v12873_v19 = vpack.c.bf16 %v9475_v40, %v9464_v3 }
 0x3a0   :  { %v9636_v17 = vmul.f32 %v3218_v54, %v2613_v35  ;;  %v3220_v14 = vpop.f32.mrb[34].mxu0  ;;  %3717 = vmatprep.mubr.bf16.mxu1 %v12735_v15  ;;  %v12865_v35 = vld [vmem:[#allocation228_spill] sm:$0xff]  ;;  %v2522_v1 = vand.u32 2147483647, %v2210_v13  ;;  %v2620_v13 = vand.u32 2147483647, %v1983_v28 }
 0x3a1   :  { %v9641_v45 = vmul.f32 %v3220_v14, %v2616_v48  ;;  %v3222_v38 = vpop.f32.mrb[35].mxu0  ;;  %v1985_v54 = vadd.f32 %v12865_v35, %v8921_v43  ;;  %v12866_v48 = vpack.c.bf16 %v9392_v10, %v9382_v41  ;;  %v12867_v14 = vld [vmem:[#allocation229_spill] sm:$0xff]  ;;  %v12868_v35 = vpack.c.bf16 %v9451_v53, %v9440_v62 }
 0x3a2   :  { %v9645_v31 = vmul.f32 %v3222_v38, %v2617_v42  ;;  %v3449_v5 = vpop.f32.mrb[48].mxu1  ;;  %v1987_v42 = vadd.f32 %v12867_v14, %v8914_v56 }
 0x3a3   :  { %v9651_v25 = vmul.f32 %v3449_v5, %v2518_v52  ;;  %v3451_v15 = vpop.f32.mrb[49].mxu1  ;;  %4489 = vmatmul.mubr.bf16.gmra.mrb[140].mxu0 %v12866_v48  ;;  %v2523_v5 = vand.u32 2147483647, %v2212_v51  ;;  %v12869_v52 = vld [vmem:[#allocation230_spill] sm:$0xff]  ;;  %v12870_v48 = vld [vmem:[#allocation231_spill] sm:$0xff] }
 0x3a4   :  { %v9660_v38 = vmul.f32 %v3451_v15, %v2519_v32  ;;  %v3453_v4 = vpop.f32.mrb[50].mxu1  ;;  %4496 = vmatprep.mubr.bf16.mxu0 %v12868_v35  ;;  %v1989_v34 = vadd.f32 %v12869_v52, %v8921_v43  ;;  %v2216_v14 = vadd.f32 %v12870_v48, %v9397_v6  ;;  %v2621_v32 = vand.u32 2147483647, %v1985_v54  ;;  %v12876_v35 = vld [vmem:[#allocation236_spill] sm:$0xff] }
 0x3a5   :  { %v9667_v10 = vmul.f32 %v3453_v4, %v2522_v1  ;;  %v3455_v41 = vpop.f32.mrb[51].mxu1  ;;  %v2624_v28 = vand.u32 2147483647, %v1987_v42  ;;  %v12872_v1 = vld [vmem:[#allocation233_spill] sm:$0xff]  ;;  %v1995_v58 = vadd.f32 %v12876_v35, %v8921_v43 }
 0x3a6   :  { %v9671_v39 = vmul.f32 %v3455_v41, %v2523_v5  ;;  %v3226_v15 = vpop.f32.mrb[36].mxu0  ;;  %v2220_v4 = vadd.f32 %v12872_v1, %v9397_v6  ;;  %v2625_v52 = vand.u32 2147483647, %v1989_v34  ;;  %v12874_v41 = vld [vmem:[#allocation234_spill] sm:$0xff]  ;;  %v2526_v42 = vand.u32 2147483647, %v2216_v14 }
 0x3a7   :  { %v9677_v53 = vmul.f32 %v3226_v15, %v2620_v13  ;;  %v3228_v51 = vpop.f32.mrb[37].mxu0  ;;  %6459 = vmatmul.mubr.msk.bf16.gmra.mrb[156].mxu1 %vm2912_vm1, %v9124_v61  ;;  %v2222_v13 = vadd.f32 %v12874_v41, %v9408_v29  ;;  %v12875_v15 = vld [vmem:[#allocation235_spill] sm:$0xff] }
 0x3a8   :  { %v9685_v54 = vmul.f32 %v3228_v51, %v2621_v32  ;;  %v3230_v5 = vpop.f32.mrb[38].mxu0  ;;  %4689 = vmatprep.mubr.bf16.mxu1 %v12873_v19  ;;  %v1993_v1 = vadd.f32 %v12875_v15, %v8914_v56  ;;  %v2527_v51 = vand.u32 2147483647, %v2218_v8  ;;  %v2530_v14 = vand.u32 2147483647, %v2220_v4  ;;  %v12880_v15 = vld [vmem:[#allocation238_spill] sm:$0xff] }
 0x3a9   :  { %v9692_v48 = vmul.f32 %v3230_v5, %v2624_v28  ;;  %v3232_v61 = vpop.f32.mrb[39].mxu0  ;;  %v12877_v28 = vpack.c.bf16 %v9447_v26, %v9434_v49  ;;  %v12878_v5 = vld [vmem:[#allocation237_spill] sm:$0xff]  ;;  %v1999_v49 = vadd.f32 %v12880_v15, %v8921_v43  ;;  %v12882_v8 = vld [vmem:[#allocation240_spill] sm:$0xff] }
 0x3aa   :  { %v9696_v62 = vmul.f32 %v3232_v61, %v2625_v52  ;;  %v3459_v32 = vpop.f32.mrb[52].mxu1  ;;  %v1997_v19 = vadd.f32 %v12878_v5, %v8914_v56  ;;  %v6917_v52 = vld [vmem:[#allocation9 + $0x38] sm:$0xff]   ;;  %v12879_v61 = vpack.c.bf16 %v9500_v22, %v9489_v9  ;;  %v2228_v22 = vadd.f32 %v12882_v8, %v9408_v29  ;;  %v12888_v9 = vld [vmem:[#allocation244_spill] sm:$0xff] }
 0x3ab   :  { %v9702_v40 = vmul.f32 %v3459_v32, %v2526_v42  ;;  %v3461_v34 = vpop.f32.mrb[53].mxu1  ;;  %4497 = vmatmul.mubr.bf16.gmra.mrb[144].mxu0 %v12877_v28  ;;  %v2531_v42 = vand.u32 2147483647, %v2222_v13  ;;  %v2628_v32 = vand.u32 2147483647, %v1993_v1  ;;  %v12881_v28 = vld [vmem:[#allocation239_spill] sm:$0xff]  ;;  %6620 = vmatprep.subr.bf16.mxu0 %v6917_v52  ;;  %v12883_v1 = vpack.c.bf16 %v9471_v50, %v9457_v27 }
 0x3ac   :  { %v9711_v41 = vmul.f32 %v3461_v34, %v2527_v51  ;;  %v3463_v35 = vpop.f32.mrb[54].mxu1  ;;  %4504 = vmatprep.mubr.bf16.mxu0 %v12879_v61  ;;  %v2226_v5 = vadd.f32 %v12881_v28, %v9397_v6  ;;  %v2629_v34 = vand.u32 2147483647, %v1995_v58  ;;  %6621 = vmatpush3.bf16.msra.mxu0 %v6917_v52  ;;  %v12884_v61 = vld [vmem:[#allocation241_spill] sm:$0xff]  ;;  %v12885_v8 = vpack.c.bf16 %v9524_v11, %v9513_v23  ;;  %v12894_v23 = vld [vmem:[#allocation248_spill] sm:$0xff] }
 0x3ad   :  { %v9718_v26 = vmul.f32 %v3463_v35, %v2530_v14  ;;  %v3465_v4 = vpop.f32.mrb[55].mxu1  ;;  %v2632_v35 = vand.u32 2147483647, %v1997_v19  ;;  %v2005_v58 = vadd.f32 %v12888_v9, %v8921_v43 }
 0x3ae   :  { %v9722_v3 = vmul.f32 %v3465_v4, %v2531_v42  ;;  %v3236_v51 = vpop.f32.mrb[40].mxu0  ;;  %v2230_v42 = vadd.f32 %v12884_v61, %v9397_v6  ;;  %v2633_v4 = vand.u32 2147483647, %v1999_v49  ;;  %v2534_v19 = vand.u32 2147483647, %v2226_v5 }
 0x3af   :  { %v9728_v13 = vmul.f32 %v3236_v51, %v2628_v32  ;;  %v3238_v14 = vpop.f32.mrb[41].mxu0  ;;  %4690 = vmatmul.mubr.bf16.vlgmr.msra.gmra.mrb[160].mxu1 %v12883_v1  ;;  %v12886_v32 = vld [vmem:[#allocation242_spill] sm:$0xff]  ;;  %v12887_v51 = vld [vmem:[#allocation243_spill] sm:$0xff] }
 0x3b0   :  { %v9737_v15 = vmul.f32 %v3238_v14, %v2629_v34  ;;  %v3240_v52 = vpop.f32.mrb[42].mxu0  ;;  %4697 = vmatprep.mubr.bf16.mxu1 %v12885_v8  ;;  %v2232_v28 = vadd.f32 %v12886_v32, %v9408_v29  ;;  %v2003_v1 = vadd.f32 %v12887_v51, %v8914_v56  ;;  %v2535_v14 = vand.u32 2147483647, %v2228_v22 }
 0x3b1   :  { %v9744_v27 = vmul.f32 %v3240_v52, %v2632_v35  ;;  %v3242_v50 = vpop.f32.mrb[43].mxu0  ;;  %v12889_v35 = vpack.c.bf16 %v9496_v30, %v9481_v60  ;;  %v2538_v5 = vand.u32 2147483647, %v2230_v42  ;;  %v12890_v52 = vld [vmem:[#allocation245_spill] sm:$0xff]  ;;  %v12891_v32 = vpack.c.bf16 %v9549_v57, %v9538_v2  ;;  %v12900_v57 = vld [vmem:[#allocation252_spill] sm:$0xff] }
 0x3b2   :  { %v9748_v61 = vmul.f32 %v3242_v50, %v2633_v4  ;;  %v3469_v34 = vpop.f32.mrb[56].mxu1  ;;  %v2007_v8 = vadd.f32 %v12890_v52, %v8914_v56  ;;  %v2539_v50 = vand.u32 2147483647, %v2232_v28  ;;  %v2636_v42 = vand.u32 2147483647, %v2003_v1 }
 0x3b3   :  { %v9754_v11 = vmul.f32 %v3469_v34, %v2534_v19  ;;  %v3471_v49 = vpop.f32.mrb[57].mxu1  ;;  %4505 = vmatmul.mubr.bf16.gmra.mrb[148].mxu0 %v12889_v35  ;;  %v12892_v19 = vld [vmem:[#allocation246_spill] sm:$0xff]  ;;  %v12893_v34 = vld [vmem:[#allocation247_spill] sm:$0xff]  ;;  %v2238_v22 = vadd.f32 %v12894_v23, %v9408_v29 }
 0x3b4   :  { %v9763_v4 = vmul.f32 %v3471_v49, %v2535_v14  ;;  %v3473_v9 = vpop.f32.mrb[58].mxu1  ;;  %4512 = vmatprep.mubr.bf16.mxu0 %v12891_v32  ;;  %v2009_v51 = vadd.f32 %v12892_v19, %v8921_v43  ;;  %v2236_v35 = vadd.f32 %v12893_v34, %v9397_v6  ;;  %v2637_v49 = vand.u32 2147483647, %v2005_v58 }
 0x3b5   :  { %v9770_v60 = vmul.f32 %v3473_v9, %v2538_v5  ;;  %v3475_v30 = vpop.f32.mrb[59].mxu1  ;;  %v12895_v5 = vpack.c.bf16 %v9520_v7, %v9506_v36  ;;  %v2640_v1 = vand.u32 2147483647, %v2007_v8  ;;  %v12896_v9 = vld [vmem:[#allocation249_spill] sm:$0xff]  ;;  %v12897_v19 = vpack.c.bf16 %v9573_v21, %v9562_v37  ;;  %v12906_v37 = vld [vmem:[#allocation256_spill] sm:$0xff] }
 0x3b6   :  { %v9774_v52 = vmul.f32 %v3475_v30, %v2539_v50  ;;  %v3246_v14 = vpop.f32.mrb[44].mxu0  ;;  %v2240_v32 = vadd.f32 %v12896_v9, %v9397_v6  ;;  %v2641_v30 = vand.u32 2147483647, %v2009_v51  ;;  %v2542_v8 = vand.u32 2147483647, %v2236_v35 }
 0x3b7   :  { %v9780_v2 = vmul.f32 %v3246_v14, %v2636_v42  ;;  %v3248_v28 = vpop.f32.mrb[45].mxu0  ;;  %4698 = vmatmul.mubr.bf16.gmra.mrb[164].mxu1 %v12895_v5  ;;  %v12898_v42 = vld [vmem:[#allocation250_spill] sm:$0xff]  ;;  %v12899_v14 = vld [vmem:[#allocation251_spill] sm:$0xff]  ;;  %v2015_v58 = vadd.f32 %v12900_v57, %v8921_v43 }
 0x3b8   :  { %v9789_v50 = vmul.f32 %v3248_v28, %v2637_v49  ;;  %v3250_v23 = vpop.f32.mrb[46].mxu0  ;;  %4705 = vmatprep.mubr.bf16.mxu1 %v12897_v19  ;;  %v2242_v34 = vadd.f32 %v12898_v42, %v9408_v29  ;;  %v2013_v5 = vadd.f32 %v12899_v14, %v8914_v56  ;;  %v2543_v28 = vand.u32 2147483647, %v2238_v22 }
 0x3b9   :  { %v9796_v7 = vmul.f32 %v3250_v23, %v2640_v1  ;;  %v3252_v36 = vpop.f32.mrb[47].mxu0  ;;  %v12901_v1 = vpack.c.bf16 %v9545_v44, %v9530_v55  ;;  %v2546_v35 = vand.u32 2147483647, %v2240_v32  ;;  %v12902_v23 = vld [vmem:[#allocation253_spill] sm:$0xff]  ;;  %v12903_v42 = vpack.c.bf16 %v9596_v16, %v9587_v47  ;;  %v12912_v47 = vld [vmem:[#allocation260_spill] sm:$0xff] }
 0x3ba   :  { %v9800_v9 = vmul.f32 %v3252_v36, %v2641_v30  ;;  %v3479_v49 = vpop.f32.mrb[60].mxu1  ;;  %v2017_v19 = vadd.f32 %v12902_v23, %v8914_v56  ;;  %v2547_v36 = vand.u32 2147483647, %v2242_v34  ;;  %v2644_v32 = vand.u32 2147483647, %v2013_v5 }
 0x3bb   :  { %v9806_v21 = vmul.f32 %v3479_v49, %v2542_v8  ;;  %v3481_v51 = vpop.f32.mrb[61].mxu1  ;;  %4513 = vmatmul.mubr.bf16.gmra.mrb[152].mxu0 %v12901_v1  ;;  %v12904_v8 = vld [vmem:[#allocation254_spill] sm:$0xff]  ;;  %v12905_v49 = vld [vmem:[#allocation255_spill] sm:$0xff]  ;;  %v2248_v22 = vadd.f32 %v12906_v37, %v9408_v29 }
 0x3bc   :  { %v9815_v30 = vmul.f32 %v3481_v51, %v2543_v28  ;;  %v3483_v57 = vpop.f32.mrb[62].mxu1  ;;  %4520 = vmatprep.mubr.bf16.mxu0 %v12903_v42  ;;  %v2019_v14 = vadd.f32 %v12904_v8, %v8921_v43  ;;  %v2246_v1 = vadd.f32 %v12905_v49, %v9397_v6  ;;  %v2645_v51 = vand.u32 2147483647, %v2015_v58 }
 0x3bd   :  { %v9822_v55 = vmul.f32 %v3483_v57, %v2546_v35  ;;  %v3485_v44 = vpop.f32.mrb[63].mxu1  ;;  %v12907_v35 = vpack.c.bf16 %v9569_v63, %v9555_v46  ;;  %v2648_v5 = vand.u32 2147483647, %v2017_v19  ;;  %v12908_v57 = vld [vmem:[#allocation257_spill] sm:$0xff]  ;;  %v12909_v8 = vpack.c.bf16 %v9622_v33, %v9609_v20  ;;  %v12918_v20 = vld [vmem:[#allocation264_spill] sm:$0xff] }
 0x3be   :  { %v9826_v23 = vmul.f32 %v3485_v44, %v2547_v36  ;;  %v3256_v28 = vpop.f32.mrb[48].mxu0  ;;  %v2250_v42 = vadd.f32 %v12908_v57, %v9397_v6  ;;  %v2649_v44 = vand.u32 2147483647, %v2019_v14  ;;  %v2550_v19 = vand.u32 2147483647, %v2246_v1 }
 0x3bf   :  { %v9832_v16 = vmul.f32 %v3256_v28, %v2644_v32  ;;  %v3258_v34 = vpop.f32.mrb[49].mxu0  ;;  %4706 = vmatmul.mubr.bf16.gmra.mrb[168].mxu1 %v12907_v35  ;;  %v12910_v32 = vld [vmem:[#allocation258_spill] sm:$0xff]  ;;  %v12911_v28 = vld [vmem:[#allocation259_spill] sm:$0xff]  ;;  %v2025_v58 = vadd.f32 %v12912_v47, %v8921_v43 }
 0x3c0   :  { %v9841_v36 = vmul.f32 %v3258_v34, %v2645_v51  ;;  %v3260_v37 = vpop.f32.mrb[50].mxu0  ;;  %4713 = vmatprep.mubr.bf16.mxu1 %v12909_v8  ;;  %v2252_v49 = vadd.f32 %v12910_v32, %v9408_v29  ;;  %v2023_v35 = vadd.f32 %v12911_v28, %v8914_v56  ;;  %v2551_v34 = vand.u32 2147483647, %v2248_v22 }
 0x3c1   :  { %v9848_v46 = vmul.f32 %v3260_v37, %v2648_v5  ;;  %v3262_v63 = vpop.f32.mrb[51].mxu0  ;;  %v12913_v5 = vpack.c.bf16 %v9592_v0, %v9579_v12  ;;  %v2554_v1 = vand.u32 2147483647, %v2250_v42  ;;  %v12914_v37 = vld [vmem:[#allocation261_spill] sm:$0xff]  ;;  %v12915_v32 = vpack.c.bf16 %v9645_v31, %v9636_v17  ;;  %v12924_v17 = vld [vmem:[#allocation268_spill] sm:$0xff] }
 0x3c2   :  { %v9852_v57 = vmul.f32 %v3262_v63, %v2649_v44  ;;  %v3489_v51 = vpop.f32.mrb[64].mxu1  ;;  %v2027_v8 = vadd.f32 %v12914_v37, %v8914_v56  ;;  %v2555_v63 = vand.u32 2147483647, %v2252_v49  ;;  %v2652_v42 = vand.u32 2147483647, %v2023_v35 }
 0x3c3   :  { %v9858_v33 = vmul.f32 %v3489_v51, %v2550_v19  ;;  %v3491_v14 = vpop.f32.mrb[65].mxu1  ;;  %4521 = vmatmul.mubr.bf16.gmra.mrb[156].mxu0 %v12913_v5  ;;  %v12916_v19 = vld [vmem:[#allocation262_spill] sm:$0xff]  ;;  %v12917_v51 = vld [vmem:[#allocation263_spill] sm:$0xff]  ;;  %v2258_v22 = vadd.f32 %v12918_v20, %v9408_v29 }
 0x3c4   :  { %v9867_v44 = vmul.f32 %v3491_v14, %v2551_v34  ;;  %v3493_v47 = vpop.f32.mrb[66].mxu1  ;;  %4528 = vmatprep.mubr.bf16.mxu0 %v12915_v32  ;;  %v2029_v28 = vadd.f32 %v12916_v19, %v8921_v43  ;;  %v2256_v5 = vadd.f32 %v12917_v51, %v9397_v6  ;;  %v2653_v14 = vand.u32 2147483647, %v2025_v58 }
 0x3c5   :  { %v9874_v12 = vmul.f32 %v3493_v47, %v2554_v1  ;;  %v3495_v0 = vpop.f32.mrb[67].mxu1  ;;  %v12919_v1 = vpack.c.bf16 %v9618_v24, %v9602_v18  ;;  %v2656_v35 = vand.u32 2147483647, %v2027_v8  ;;  %v12920_v47 = vld [vmem:[#allocation265_spill] sm:$0xff]  ;;  %v12921_v19 = vpack.c.bf16 %v9671_v39, %v9660_v38  ;;  %v12930_v39 = vld [vmem:[#allocation272_spill] sm:$0xff] }
 0x3c6   :  { %v9878_v37 = vmul.f32 %v3495_v0, %v2555_v63  ;;  %v3266_v34 = vpop.f32.mrb[52].mxu0  ;;  %v2260_v32 = vadd.f32 %v12920_v47, %v9397_v6  ;;  %v2657_v0 = vand.u32 2147483647, %v2029_v28  ;;  %v2558_v8 = vand.u32 2147483647, %v2256_v5 }
 0x3c7   :  { %v9884_v31 = vmul.f32 %v3266_v34, %v2652_v42  ;;  %v3268_v49 = vpop.f32.mrb[53].mxu0  ;;  %4714 = vmatmul.mubr.bf16.gmra.mrb[172].mxu1 %v12919_v1  ;;  %v12922_v42 = vld [vmem:[#allocation266_spill] sm:$0xff]  ;;  %v12923_v34 = vld [vmem:[#allocation267_spill] sm:$0xff]  ;;  %v2035_v58 = vadd.f32 %v12924_v17, %v8921_v43 }
 0x3c8   :  { %v9893_v63 = vmul.f32 %v3268_v49, %v2653_v14  ;;  %v3270_v20 = vpop.f32.mrb[54].mxu0  ;;  %4721 = vmatprep.mubr.bf16.mxu1 %v12921_v19  ;;  %v2262_v51 = vadd.f32 %v12922_v42, %v9408_v29  ;;  %v2033_v1 = vadd.f32 %v12923_v34, %v8914_v56  ;;  %v2559_v49 = vand.u32 2147483647, %v2258_v22 }
 0x3c9   :  { %v9900_v18 = vmul.f32 %v3270_v20, %v2656_v35  ;;  %v3272_v24 = vpop.f32.mrb[55].mxu0  ;;  %v12925_v35 = vpack.c.bf16 %v9641_v45, %v9628_v59  ;;  %v2562_v5 = vand.u32 2147483647, %v2260_v32  ;;  %v12926_v20 = vld [vmem:[#allocation269_spill] sm:$0xff]  ;;  %v12927_v42 = vpack.c.bf16 %v9696_v62, %v9685_v54  ;;  %v12936_v62 = vld [vmem:[#allocation276_spill] sm:$0xff] }
 0x3ca   :  { %v9904_v47 = vmul.f32 %v3272_v24, %v2657_v0  ;;  %v3499_v14 = vpop.f32.mrb[68].mxu1  ;;  %v2037_v19 = vadd.f32 %v12926_v20, %v8914_v56  ;;  %v2563_v24 = vand.u32 2147483647, %v2262_v51  ;;  %v2660_v32 = vand.u32 2147483647, %v2033_v1 }
 0x3cb   :  { %v9910_v38 = vmul.f32 %v3499_v14, %v2558_v8  ;;  %v3501_v28 = vpop.f32.mrb[69].mxu1  ;;  %4529 = vmatmul.mubr.bf16.gmra.mrb[160].mxu0 %v12925_v35  ;;  %v12928_v8 = vld [vmem:[#allocation270_spill] sm:$0xff]  ;;  %v12929_v14 = vld [vmem:[#allocation271_spill] sm:$0xff]  ;;  %v2268_v22 = vadd.f32 %v12930_v39, %v9408_v29 }
 0x3cc   :  { %v9919_v0 = vmul.f32 %v3501_v28, %v2559_v49  ;;  %v3503_v17 = vpop.f32.mrb[70].mxu1  ;;  %4536 = vmatprep.mubr.bf16.mxu0 %v12927_v42  ;;  %v2039_v34 = vadd.f32 %v12928_v8, %v8921_v43  ;;  %v2266_v35 = vadd.f32 %v12929_v14, %v9397_v6  ;;  %v2661_v28 = vand.u32 2147483647, %v2035_v58 }
 0x3cd   :  { %v9926_v59 = vmul.f32 %v3503_v17, %v2562_v5  ;;  %v3505_v45 = vpop.f32.mrb[71].mxu1  ;;  %v12931_v5 = vpack.c.bf16 %v9667_v10, %v9651_v25  ;;  %v2664_v1 = vand.u32 2147483647, %v2037_v19  ;;  %v12932_v17 = vld [vmem:[#allocation273_spill] sm:$0xff]  ;;  %v12933_v8 = vpack.c.bf16 %v9722_v3, %v9711_v41  ;;  %v12942_v3 = vld [vmem:[#allocation280_spill] sm:$0xff] }
 0x3ce   :  { %v9930_v20 = vmul.f32 %v3505_v45, %v2563_v24  ;;  %v3276_v49 = vpop.f32.mrb[56].mxu0  ;;  %v2270_v42 = vadd.f32 %v12932_v17, %v9397_v6  ;;  %v2665_v45 = vand.u32 2147483647, %v2039_v34  ;;  %v2566_v19 = vand.u32 2147483647, %v2266_v35 }
 0x3cf   :  { %v9936_v54 = vmul.f32 %v3276_v49, %v2660_v32  ;;  %v3278_v51 = vpop.f32.mrb[57].mxu0  ;;  %4722 = vmatmul.mubr.bf16.gmra.mrb[176].mxu1 %v12931_v5  ;;  %v12934_v32 = vld [vmem:[#allocation274_spill] sm:$0xff]  ;;  %v12935_v49 = vld [vmem:[#allocation275_spill] sm:$0xff]  ;;  %v2045_v58 = vadd.f32 %v12936_v62, %v8921_v43 }
 0x3d0   :  { %v9945_v24 = vmul.f32 %v3278_v51, %v2661_v28  ;;  %v3280_v39 = vpop.f32.mrb[58].mxu0  ;;  %4729 = vmatprep.mubr.bf16.mxu1 %v12933_v8  ;;  %v2272_v14 = vadd.f32 %v12934_v32, %v9408_v29  ;;  %v2043_v5 = vadd.f32 %v12935_v49, %v8914_v56  ;;  %v2567_v51 = vand.u32 2147483647, %v2268_v22 }
 0x3d1   :  { %v9952_v25 = vmul.f32 %v3280_v39, %v2664_v1  ;;  %v3282_v10 = vpop.f32.mrb[59].mxu0  ;;  %v12937_v1 = vpack.c.bf16 %v9692_v48, %v9677_v53  ;;  %v2570_v35 = vand.u32 2147483647, %v2270_v42  ;;  %v12938_v39 = vld [vmem:[#allocation277_spill] sm:$0xff]  ;;  %v12939_v32 = vpack.c.bf16 %v9748_v61, %v9737_v15  ;;  %v12948_v15 = vld [vmem:[#allocation284_spill] sm:$0xff] }
 0x3d2   :  { %v9956_v17 = vmul.f32 %v3282_v10, %v2665_v45  ;;  %v3509_v28 = vpop.f32.mrb[72].mxu1  ;;  %v2047_v8 = vadd.f32 %v12938_v39, %v8914_v56  ;;  %v2571_v10 = vand.u32 2147483647, %v2272_v14  ;;  %v2668_v42 = vand.u32 2147483647, %v2043_v5 }
 0x3d3   :  { %v9962_v41 = vmul.f32 %v3509_v28, %v2566_v19  ;;  %v3511_v34 = vpop.f32.mrb[73].mxu1  ;;  %4537 = vmatmul.mubr.bf16.gmra.mrb[164].mxu0 %v12937_v1  ;;  %v12940_v19 = vld [vmem:[#allocation278_spill] sm:$0xff]  ;;  %v12941_v28 = vld [vmem:[#allocation279_spill] sm:$0xff]  ;;  %v2278_v22 = vadd.f32 %v12942_v3, %v9408_v29 }
 0x3d4   :  { %v9971_v45 = vmul.f32 %v3511_v34, %v2567_v51  ;;  %v3513_v62 = vpop.f32.mrb[74].mxu1  ;;  %4544 = vmatprep.mubr.bf16.mxu0 %v12939_v32  ;;  %v2049_v49 = vadd.f32 %v12940_v19, %v8921_v43  ;;  %v2276_v1 = vadd.f32 %v12941_v28, %v9397_v6  ;;  %v2669_v34 = vand.u32 2147483647, %v2045_v58 }
 0x3d5   :  { %v9978_v53 = vmul.f32 %v3513_v62, %v2570_v35  ;;  %v3515_v48 = vpop.f32.mrb[75].mxu1  ;;  %v12943_v35 = vpack.c.bf16 %v9718_v26, %v9702_v40  ;;  %v2672_v5 = vand.u32 2147483647, %v2047_v8  ;;  %v12944_v62 = vld [vmem:[#allocation281_spill] sm:$0xff]  ;;  %v12945_v19 = vpack.c.bf16 %v9774_v52, %v9763_v4  ;;  %v12954_v4 = vld [vmem:[#allocation288_spill] sm:$0xff] }
 0x3d6   :  { %v9982_v39 = vmul.f32 %v3515_v48, %v2571_v10  ;;  %v3286_v51 = vpop.f32.mrb[60].mxu0  ;;  %v2280_v32 = vadd.f32 %v12944_v62, %v9397_v6  ;;  %v2673_v48 = vand.u32 2147483647, %v2049_v49  ;;  %v2574_v8 = vand.u32 2147483647, %v2276_v1 }
 0x3d7   :  { %v9988_v61 = vmul.f32 %v3286_v51, %v2668_v42  ;;  %v3288_v14 = vpop.f32.mrb[61].mxu0  ;;  %4730 = vmatmul.mubr.bf16.gmra.mrb[180].mxu1 %v12943_v35  ;;  %v12946_v42 = vld [vmem:[#allocation282_spill] sm:$0xff]  ;;  %v12947_v51 = vld [vmem:[#allocation283_spill] sm:$0xff]  ;;  %v2055_v58 = vadd.f32 %v12948_v15, %v8921_v43 }
 0x3d8   :  { %v9997_v10 = vmul.f32 %v3288_v14, %v2669_v34  ;;  %v3290_v3 = vpop.f32.mrb[62].mxu0  ;;  %4737 = vmatprep.mubr.bf16.mxu1 %v12945_v19  ;;  %v2282_v28 = vadd.f32 %v12946_v42, %v9408_v29  ;;  %v2053_v35 = vadd.f32 %v12947_v51, %v8914_v56  ;;  %v2575_v14 = vand.u32 2147483647, %v2278_v22 }
 0x3d9   :  { %v10004_v40 = vmul.f32 %v3290_v3, %v2672_v5  ;;  %v3292_v26 = vpop.f32.mrb[63].mxu0  ;;  %v12949_v5 = vpack.c.bf16 %v9744_v27, %v9728_v13  ;;  %v2578_v1 = vand.u32 2147483647, %v2280_v32  ;;  %v12950_v3 = vld [vmem:[#allocation285_spill] sm:$0xff]  ;;  %v12951_v42 = vpack.c.bf16 %v9800_v9, %v9789_v50  ;;  %v12960_v50 = vld [vmem:[#allocation292_spill] sm:$0xff] }
 0x3da   :  { %v10008_v62 = vmul.f32 %v3292_v26, %v2673_v48  ;;  %v3519_v34 = vpop.f32.mrb[76].mxu1  ;;  %v2057_v19 = vadd.f32 %v12950_v3, %v8914_v56  ;;  %v2579_v26 = vand.u32 2147483647, %v2282_v28  ;;  %v2676_v32 = vand.u32 2147483647, %v2053_v35 }
 0x3db   :  { %v10014_v52 = vmul.f32 %v3519_v34, %v2574_v8  ;;  %v3521_v49 = vpop.f32.mrb[77].mxu1  ;;  %4545 = vmatmul.mubr.bf16.gmra.mrb[168].mxu0 %v12949_v5  ;;  %v12952_v8 = vld [vmem:[#allocation286_spill] sm:$0xff]  ;;  %v12953_v34 = vld [vmem:[#allocation287_spill] sm:$0xff]  ;;  %v2288_v22 = vadd.f32 %v12954_v4, %v9408_v29 }
 0x3dc   :  { %v10023_v48 = vmul.f32 %v3521_v49, %v2575_v14  ;;  %v3523_v15 = vpop.f32.mrb[78].mxu1  ;;  %4552 = vmatprep.mubr.bf16.mxu0 %v12951_v42  ;;  %v2059_v51 = vadd.f32 %v12952_v8, %v8921_v43  ;;  %v2286_v5 = vadd.f32 %v12953_v34, %v9397_v6  ;;  %v2677_v49 = vand.u32 2147483647, %v2055_v58 }
 0x3dd   :  { %v10030_v13 = vmul.f32 %v3523_v15, %v2578_v1  ;;  %v3525_v27 = vpop.f32.mrb[79].mxu1  ;;  %v12955_v1 = vpack.c.bf16 %v9770_v60, %v9754_v11  ;;  %v2680_v35 = vand.u32 2147483647, %v2057_v19  ;;  %v12956_v15 = vld [vmem:[#allocation289_spill] sm:$0xff]  ;;  %v12957_v8 = vpack.c.bf16 %v9826_v23, %v9815_v30  ;;  %v12966_v30 = vld [vmem:[#allocation296_spill] sm:$0xff] }
 0x3de   :  { %v10034_v3 = vmul.f32 %v3525_v27, %v2579_v26  ;;  %v3296_v14 = vpop.f32.mrb[64].mxu0  ;;  %v2290_v42 = vadd.f32 %v12956_v15, %v9397_v6  ;;  %v2681_v27 = vand.u32 2147483647, %v2059_v51  ;;  %v2582_v19 = vand.u32 2147483647, %v2286_v5 }
 0x3df   :  { %v10040_v9 = vmul.f32 %v3296_v14, %v2676_v32  ;;  %v3298_v28 = vpop.f32.mrb[65].mxu0  ;;  %4738 = vmatmul.mubr.bf16.gmra.mrb[184].mxu1 %v12955_v1  ;;  %v12958_v32 = vld [vmem:[#allocation290_spill] sm:$0xff]  ;;  %v12959_v14 = vld [vmem:[#allocation291_spill] sm:$0xff]  ;;  %v2065_v58 = vadd.f32 %v12960_v50, %v8921_v43 }
 0x3e0   :  { %v10049_v26 = vmul.f32 %v3298_v28, %v2677_v49  ;;  %v3300_v4 = vpop.f32.mrb[66].mxu0  ;;  %4745 = vmatprep.mubr.bf16.mxu1 %v12957_v8  ;;  %v2292_v34 = vadd.f32 %v12958_v32, %v9408_v29  ;;  %v2063_v1 = vadd.f32 %v12959_v14, %v8914_v56  ;;  %v2583_v28 = vand.u32 2147483647, %v2288_v22 }
 0x3e1   :  { %v10056_v11 = vmul.f32 %v3300_v4, %v2680_v35  ;;  %v3302_v60 = vpop.f32.mrb[67].mxu0  ;;  %v12961_v35 = vpack.c.bf16 %v9796_v7, %v9780_v2  ;;  %v2586_v5 = vand.u32 2147483647, %v2290_v42  ;;  %v12962_v4 = vld [vmem:[#allocation293_spill] sm:$0xff]  ;;  %v12963_v32 = vpack.c.bf16 %v9852_v57, %v9841_v36  ;;  %v12972_v36 = vld [vmem:[#allocation300_spill] sm:$0xff] }
 0x3e2   :  { %v10060_v15 = vmul.f32 %v3302_v60, %v2681_v27  ;;  %v3529_v49 = vpop.f32.mrb[80].mxu1  ;;  %v2067_v8 = vadd.f32 %v12962_v4, %v8914_v56  ;;  %v2587_v60 = vand.u32 2147483647, %v2292_v34  ;;  %v2684_v42 = vand.u32 2147483647, %v2063_v1 }
 0x3e3   :  { %v10066_v23 = vmul.f32 %v3529_v49, %v2582_v19  ;;  %v3531_v51 = vpop.f32.mrb[81].mxu1  ;;  %4553 = vmatmul.mubr.bf16.gmra.mrb[172].mxu0 %v12961_v35  ;;  %v12964_v19 = vld [vmem:[#allocation294_spill] sm:$0xff]  ;;  %v12965_v49 = vld [vmem:[#allocation295_spill] sm:$0xff]  ;;  %v2298_v22 = vadd.f32 %v12966_v30, %v9408_v29 }
 0x3e4   :  { %v10075_v27 = vmul.f32 %v3531_v51, %v2583_v28  ;;  %v3533_v50 = vpop.f32.mrb[82].mxu1  ;;  %4560 = vmatprep.mubr.bf16.mxu0 %v12963_v32  ;;  %v2069_v14 = vadd.f32 %v12964_v19, %v8921_v43  ;;  %v2296_v35 = vadd.f32 %v12965_v49, %v9397_v6  ;;  %v2685_v51 = vand.u32 2147483647, %v2065_v58 }
 0x3e5   :  { %v10082_v2 = vmul.f32 %v3533_v50, %v2586_v5  ;;  %v3535_v7 = vpop.f32.mrb[83].mxu1  ;;  %v12967_v5 = vpack.c.bf16 %v9822_v55, %v9806_v21  ;;  %v2688_v1 = vand.u32 2147483647, %v2067_v8  ;;  %v12968_v50 = vld [vmem:[#allocation297_spill] sm:$0xff]  ;;  %v12969_v19 = vpack.c.bf16 %v9878_v37, %v9867_v44  ;;  %v12978_v44 = vld [vmem:[#allocation304_spill] sm:$0xff] }
 0x3e6   :  { %v10086_v4 = vmul.f32 %v3535_v7, %v2587_v60  ;;  %v3306_v28 = vpop.f32.mrb[68].mxu0  ;;  %v2300_v32 = vadd.f32 %v12968_v50, %v9397_v6  ;;  %v2689_v7 = vand.u32 2147483647, %v2069_v14  ;;  %v2590_v8 = vand.u32 2147483647, %v2296_v35 }
 0x3e7   :  { %v10092_v57 = vmul.f32 %v3306_v28, %v2684_v42  ;;  %v3308_v34 = vpop.f32.mrb[69].mxu0  ;;  %4746 = vmatmul.mubr.bf16.gmra.mrb[188].mxu1 %v12967_v5  ;;  %v12970_v42 = vld [vmem:[#allocation298_spill] sm:$0xff]  ;;  %v12971_v28 = vld [vmem:[#allocation299_spill] sm:$0xff]  ;;  %v2075_v58 = vadd.f32 %v12972_v36, %v8921_v43 }
 0x3e8   :  { %v10101_v60 = vmul.f32 %v3308_v34, %v2685_v51  ;;  %v3310_v30 = vpop.f32.mrb[70].mxu0  ;;  %4753 = vmatprep.mubr.bf16.mxu1 %v12969_v19  ;;  %v2302_v49 = vadd.f32 %v12970_v42, %v9408_v29  ;;  %v2073_v5 = vadd.f32 %v12971_v28, %v8914_v56  ;;  %v2591_v34 = vand.u32 2147483647, %v2298_v22 }
 0x3e9   :  { %v10108_v21 = vmul.f32 %v3310_v30, %v2688_v1  ;;  %v3312_v55 = vpop.f32.mrb[71].mxu0  ;;  %v12973_v1 = vpack.c.bf16 %v9848_v46, %v9832_v16  ;;  %v2594_v35 = vand.u32 2147483647, %v2300_v32  ;;  %v12974_v30 = vld [vmem:[#allocation301_spill] sm:$0xff]  ;;  %v12975_v42 = vpack.c.bf16 %v9904_v47, %v9893_v63  ;;  %v12984_v63 = vld [vmem:[#allocation308_spill] sm:$0xff] }
 0x3ea   :  { %v10112_v50 = vmul.f32 %v3312_v55, %v2689_v7  ;;  %v3539_v51 = vpop.f32.mrb[84].mxu1  ;;  %v2077_v19 = vadd.f32 %v12974_v30, %v8914_v56  ;;  %v2595_v55 = vand.u32 2147483647, %v2302_v49  ;;  %v2692_v32 = vand.u32 2147483647, %v2073_v5 }
 0x3eb   :  { %v10118_v37 = vmul.f32 %v3539_v51, %v2590_v8  ;;  %v3541_v14 = vpop.f32.mrb[85].mxu1  ;;  %4561 = vmatmul.mubr.bf16.gmra.mrb[176].mxu0 %v12973_v1  ;;  %v12976_v8 = vld [vmem:[#allocation302_spill] sm:$0xff]  ;;  %v12977_v51 = vld [vmem:[#allocation303_spill] sm:$0xff]  ;;  %v2308_v22 = vadd.f32 %v12978_v44, %v9408_v29 }
 0x3ec   :  { %v10127_v7 = vmul.f32 %v3541_v14, %v2591_v34  ;;  %v3543_v36 = vpop.f32.mrb[86].mxu1  ;;  %4568 = vmatprep.mubr.bf16.mxu0 %v12975_v42  ;;  %v2079_v28 = vadd.f32 %v12976_v8, %v8921_v43  ;;  %v2306_v1 = vadd.f32 %v12977_v51, %v9397_v6  ;;  %v2693_v14 = vand.u32 2147483647, %v2075_v58 }
 0x3ed   :  { %v10134_v16 = vmul.f32 %v3543_v36, %v2594_v35  ;;  %v3545_v46 = vpop.f32.mrb[87].mxu1  ;;  %v12979_v35 = vpack.c.bf16 %v9874_v12, %v9858_v33  ;;  %v2696_v5 = vand.u32 2147483647, %v2077_v19  ;;  %v12980_v36 = vld [vmem:[#allocation305_spill] sm:$0xff]  ;;  %v12981_v8 = vpack.c.bf16 %v9930_v20, %v9919_v0  ;;  %v12990_v0 = vld [vmem:[#allocation312_spill] sm:$0xff] }
 0x3ee   :  { %v10138_v30 = vmul.f32 %v3545_v46, %v2595_v55  ;;  %v3316_v34 = vpop.f32.mrb[72].mxu0  ;;  %v2310_v42 = vadd.f32 %v12980_v36, %v9397_v6  ;;  %v2697_v46 = vand.u32 2147483647, %v2079_v28  ;;  %v2598_v19 = vand.u32 2147483647, %v2306_v1 }
 0x3ef   :  { %v10144_v47 = vmul.f32 %v3316_v34, %v2692_v32  ;;  %v3318_v49 = vpop.f32.mrb[73].mxu0  ;;  %4754 = vmatmul.mubr.bf16.gmra.mrb[192].mxu1 %v12979_v35  ;;  %v12982_v32 = vld [vmem:[#allocation306_spill] sm:$0xff]  ;;  %v12983_v34 = vld [vmem:[#allocation307_spill] sm:$0xff]  ;;  %v2085_v58 = vadd.f32 %v12984_v63, %v8921_v43 }
 0x3f0   :  { %v10153_v55 = vmul.f32 %v3318_v49, %v2693_v14  ;;  %v3320_v44 = vpop.f32.mrb[74].mxu0  ;;  %4761 = vmatprep.mubr.bf16.mxu1 %v12981_v8  ;;  %v2312_v51 = vadd.f32 %v12982_v32, %v9408_v29  ;;  %v2083_v35 = vadd.f32 %v12983_v34, %v8914_v56  ;;  %v2599_v49 = vand.u32 2147483647, %v2308_v22 }
 0x3f1   :  { %v10160_v33 = vmul.f32 %v3320_v44, %v2696_v5  ;;  %v3322_v12 = vpop.f32.mrb[75].mxu0  ;;  %v12985_v5 = vpack.c.bf16 %v9900_v18, %v9884_v31  ;;  %v2602_v1 = vand.u32 2147483647, %v2310_v42  ;;  %v12986_v44 = vld [vmem:[#allocation309_spill] sm:$0xff]  ;;  %v12987_v32 = vpack.c.bf16 %v9956_v17, %v9945_v24  ;;  %v12996_v24 = vld [vmem:[#allocation316_spill] sm:$0xff] }
 0x3f2   :  { %v10164_v36 = vmul.f32 %v3322_v12, %v2697_v46  ;;  %v3549_v14 = vpop.f32.mrb[88].mxu1  ;;  %v2087_v8 = vadd.f32 %v12986_v44, %v8914_v56  ;;  %v2603_v12 = vand.u32 2147483647, %v2312_v51  ;;  %v2700_v42 = vand.u32 2147483647, %v2083_v35 }
 0x3f3   :  { %v10170_v20 = vmul.f32 %v3549_v14, %v2598_v19  ;;  %v3551_v28 = vpop.f32.mrb[89].mxu1  ;;  %4569 = vmatmul.mubr.bf16.gmra.mrb[180].mxu0 %v12985_v5  ;;  %v12988_v19 = vld [vmem:[#allocation310_spill] sm:$0xff]  ;;  %v12989_v14 = vld [vmem:[#allocation311_spill] sm:$0xff]  ;;  %v2318_v22 = vadd.f32 %v12990_v0, %v9408_v29 }
 0x3f4   :  { %v10179_v46 = vmul.f32 %v3551_v28, %v2599_v49  ;;  %v3553_v63 = vpop.f32.mrb[90].mxu1  ;;  %4576 = vmatprep.mubr.bf16.mxu0 %v12987_v32  ;;  %v2089_v34 = vadd.f32 %v12988_v19, %v8921_v43  ;;  %v2316_v5 = vadd.f32 %v12989_v14, %v9397_v6  ;;  %v2701_v28 = vand.u32 2147483647, %v2085_v58 }
 0x3f5   :  { %v10186_v31 = vmul.f32 %v3553_v63, %v2602_v1  ;;  %v3555_v18 = vpop.f32.mrb[91].mxu1  ;;  %v12991_v1 = vpack.c.bf16 %v9926_v59, %v9910_v38  ;;  %v2704_v35 = vand.u32 2147483647, %v2087_v8  ;;  %v12992_v63 = vld [vmem:[#allocation313_spill] sm:$0xff]  ;;  %v12993_v19 = vpack.c.bf16 %v9982_v39, %v9971_v45  ;;  %v13002_v45 = vld [vmem:[#allocation320_spill] sm:$0xff] }
 0x3f6   :  { %v10190_v44 = vmul.f32 %v3555_v18, %v2603_v12  ;;  %v3326_v49 = vpop.f32.mrb[76].mxu0  ;;  %v2320_v32 = vadd.f32 %v12992_v63, %v9397_v6  ;;  %v2705_v18 = vand.u32 2147483647, %v2089_v34  ;;  %v2606_v8 = vand.u32 2147483647, %v2316_v5 }
 0x3f7   :  { %v10196_v17 = vmul.f32 %v3326_v49, %v2700_v42  ;;  %v3328_v51 = vpop.f32.mrb[77].mxu0  ;;  %4762 = vmatmul.mubr.bf16.gmra.mrb[196].mxu1 %v12991_v1  ;;  %v12994_v42 = vld [vmem:[#allocation314_spill] sm:$0xff]  ;;  %v12995_v49 = vld [vmem:[#allocation315_spill] sm:$0xff]  ;;  %v2095_v58 = vadd.f32 %v12996_v24, %v8921_v43 }
 0x3f8   :  { %v10205_v12 = vmul.f32 %v3328_v51, %v2701_v28  ;;  %v3330_v0 = vpop.f32.mrb[78].mxu0  ;;  %4769 = vmatprep.mubr.bf16.mxu1 %v12993_v19  ;;  %v2322_v14 = vadd.f32 %v12994_v42, %v9408_v29  ;;  %v2093_v1 = vadd.f32 %v12995_v49, %v8914_v56  ;;  %v2607_v51 = vand.u32 2147483647, %v2318_v22 }
 0x3f9   :  { %v10212_v38 = vmul.f32 %v3330_v0, %v2704_v35  ;;  %v3332_v59 = vpop.f32.mrb[79].mxu0  ;;  %v12997_v35 = vpack.c.bf16 %v9952_v25, %v9936_v54  ;;  %v2610_v5 = vand.u32 2147483647, %v2320_v32  ;;  %v12998_v0 = vld [vmem:[#allocation317_spill] sm:$0xff]  ;;  %v12999_v42 = vpack.c.bf16 %v10008_v62, %v9997_v10  ;;  %v13008_v10 = vld [vmem:[#allocation324_spill] sm:$0xff] }
 0x3fa   :  { %v10216_v63 = vmul.f32 %v3332_v59, %v2705_v18  ;;  %v3559_v28 = vpop.f32.mrb[92].mxu1  ;;  %v2097_v19 = vadd.f32 %v12998_v0, %v8914_v56  ;;  %v2611_v59 = vand.u32 2147483647, %v2322_v14  ;;  %v2708_v32 = vand.u32 2147483647, %v2093_v1 }
 0x3fb   :  { %v10222_v39 = vmul.f32 %v3559_v28, %v2606_v8  ;;  %v3561_v34 = vpop.f32.mrb[93].mxu1  ;;  %4577 = vmatmul.mubr.bf16.gmra.mrb[184].mxu0 %v12997_v35  ;;  %v13000_v8 = vld [vmem:[#allocation318_spill] sm:$0xff]  ;;  %v13001_v28 = vld [vmem:[#allocation319_spill] sm:$0xff]  ;;  %v2328_v22 = vadd.f32 %v13002_v45, %v9408_v29 }
 0x3fc   :  { %v10231_v18 = vmul.f32 %v3561_v34, %v2607_v51  ;;  %v3563_v24 = vpop.f32.mrb[94].mxu1  ;;  %4584 = vmatprep.mubr.bf16.mxu0 %v12999_v42  ;;  %v2099_v49 = vadd.f32 %v13000_v8, %v8921_v43  ;;  %v2326_v35 = vadd.f32 %v13001_v28, %v9397_v6  ;;  %v2709_v34 = vand.u32 2147483647, %v2095_v58 }
 0x3fd   :  { %v10238_v54 = vmul.f32 %v3563_v24, %v2610_v5  ;;  %v3565_v25 = vpop.f32.mrb[95].mxu1  ;;  %v13003_v5 = vpack.c.bf16 %v9978_v53, %v9962_v41  ;;  %v2712_v1 = vand.u32 2147483647, %v2097_v19  ;;  %v13004_v24 = vld [vmem:[#allocation321_spill] sm:$0xff]  ;;  %v13005_v8 = vpack.c.bf16 %v10034_v3, %v10023_v48 }
 0x3fe   :  { %v10242_v0 = vmul.f32 %v3565_v25, %v2611_v59  ;;  %v3336_v51 = vpop.f32.mrb[80].mxu0  ;;  %v2330_v42 = vadd.f32 %v13004_v24, %v9397_v6  ;;  %v2713_v25 = vand.u32 2147483647, %v2099_v49  ;;  %v2614_v19 = vand.u32 2147483647, %v2326_v35  ;;  %v13014_v48 = vld [vmem:[#allocation329_spill] sm:$0xff] }
 0x3ff   :  { %v10248_v62 = vmul.f32 %v3336_v51, %v2708_v32  ;;  %v3338_v14 = vpop.f32.mrb[81].mxu0  ;;  %4770 = vmatmul.mubr.bf16.gmra.mrb[200].mxu1 %v13003_v5  ;;  %v13006_v32 = vld [vmem:[#allocation322_spill] sm:$0xff]  ;;  %v13007_v51 = vld [vmem:[#allocation323_spill] sm:$0xff]  ;;  %v2105_v58 = vadd.f32 %v13008_v10, %v8921_v43 }
 0x400   :  { %v10257_v59 = vmul.f32 %v3338_v14, %v2709_v34  ;;  %v3340_v45 = vpop.f32.mrb[82].mxu0  ;;  %4777 = vmatprep.mubr.bf16.mxu1 %v13005_v8  ;;  %v2332_v28 = vadd.f32 %v13006_v32, %v9408_v29  ;;  %v2103_v5 = vadd.f32 %v13007_v51, %v8914_v56  ;;  %v2615_v14 = vand.u32 2147483647, %v2328_v22 }
 0x401   :  { %v10264_v41 = vmul.f32 %v3340_v45, %v2712_v1  ;;  %v3342_v53 = vpop.f32.mrb[83].mxu0  ;;  %v13009_v1 = vpack.c.bf16 %v10004_v40, %v9988_v61  ;;  %v2618_v35 = vand.u32 2147483647, %v2330_v42  ;;  %v13010_v45 = vld [vmem:[#allocation326_spill] sm:$0xff]  ;;  %v13011_v32 = vpack.c.bf16 %v10060_v15, %v10049_v26  ;;  %v13020_v26 = vld [vmem:[#allocation333_spill] sm:$0xff] }
 0x402   :  { %v10268_v24 = vmul.f32 %v3342_v53, %v2713_v25  ;;  %v3569_v34 = vpop.f32.mrb[96].mxu1  ;;  %v2107_v8 = vadd.f32 %v13010_v45, %v8914_v56  ;;  %v2619_v53 = vand.u32 2147483647, %v2332_v28  ;;  %v2716_v42 = vand.u32 2147483647, %v2103_v5 }
 0x403   :  { %v10274_v3 = vmul.f32 %v3569_v34, %v2614_v19  ;;  %v3571_v49 = vpop.f32.mrb[97].mxu1  ;;  %4585 = vmatmul.mubr.bf16.gmra.mrb[188].mxu0 %v13009_v1  ;;  %v13012_v19 = vld [vmem:[#allocation327_spill] sm:$0xff]  ;;  %v13013_v34 = vld [vmem:[#allocation328_spill] sm:$0xff]  ;;  %v2338_v22 = vadd.f32 %v13014_v48, %v9408_v29 }
 0x404   :  { %v10283_v25 = vmul.f32 %v3571_v49, %v2615_v14  ;;  %v3573_v10 = vpop.f32.mrb[98].mxu1  ;;  %4592 = vmatprep.mubr.bf16.mxu0 %v13011_v32  ;;  %v2109_v51 = vadd.f32 %v13012_v19, %v8921_v43  ;;  %v2336_v1 = vadd.f32 %v13013_v34, %v9397_v6  ;;  %v2717_v49 = vand.u32 2147483647, %v2105_v58 }
 0x405   :  { %v10290_v61 = vmul.f32 %v3573_v10, %v2618_v35  ;;  %v3575_v40 = vpop.f32.mrb[99].mxu1  ;;  %v13015_v35 = vpack.c.bf16 %v10030_v13, %v10014_v52  ;;  %v2720_v5 = vand.u32 2147483647, %v2107_v8  ;;  %v13016_v10 = vld [vmem:[#allocation330_spill] sm:$0xff]  ;;  %v13017_v19 = vpack.c.bf16 %v10086_v4, %v10075_v27  ;;  %v13026_v27 = vld [vmem:[#allocation339_spill] sm:$0xff] }
 0x406   :  { %v10294_v45 = vmul.f32 %v3575_v40, %v2619_v53  ;;  %v3346_v14 = vpop.f32.mrb[84].mxu0  ;;  %v2340_v32 = vadd.f32 %v13016_v10, %v9397_v6  ;;  %v2721_v40 = vand.u32 2147483647, %v2109_v51  ;;  %v2622_v8 = vand.u32 2147483647, %v2336_v1 }
 0x407   :  { %v10300_v15 = vmul.f32 %v3346_v14, %v2716_v42  ;;  %v3348_v28 = vpop.f32.mrb[85].mxu0  ;;  %4778 = vmatmul.mubr.bf16.gmra.mrb[204].mxu1 %v13015_v35  ;;  %v13018_v42 = vld [vmem:[#allocation331_spill] sm:$0xff]  ;;  %v13019_v14 = vld [vmem:[#allocation332_spill] sm:$0xff]  ;;  %v2115_v58 = vadd.f32 %v13020_v26, %v8921_v43 }
 0x408   :  { %v10309_v53 = vmul.f32 %v3348_v28, %v2717_v49  ;;  %v3350_v48 = vpop.f32.mrb[86].mxu0  ;;  %4785 = vmatprep.mubr.bf16.mxu1 %v13017_v19  ;;  %v2342_v34 = vadd.f32 %v13018_v42, %v9408_v29  ;;  %v2113_v35 = vadd.f32 %v13019_v14, %v8914_v56  ;;  %v2623_v28 = vand.u32 2147483647, %v2338_v22 }
 0x409   :  { %v10316_v52 = vmul.f32 %v3350_v48, %v2720_v5  ;;  %v3352_v13 = vpop.f32.mrb[87].mxu0  ;;  %v13021_v5 = vpack.c.bf16 %v10056_v11, %v10040_v9  ;;  %v2626_v1 = vand.u32 2147483647, %v2340_v32  ;;  %v13022_v48 = vld [vmem:[#allocation335_spill] sm:$0xff]  ;;  %v13023_v42 = vpack.c.bf16 %v10112_v50, %v10101_v60 }
 0x40a   :  { %v10320_v10 = vmul.f32 %v3352_v13, %v2721_v40  ;;  %v3579_v49 = vpop.f32.mrb[100].mxu1  ;;  %v2117_v19 = vadd.f32 %v13022_v48, %v8914_v56  ;;  %v2627_v13 = vand.u32 2147483647, %v2342_v34  ;;  %v2724_v32 = vand.u32 2147483647, %v2113_v35  ;;  %v13032_v60 = vld [vmem:[#allocation343_spill] sm:$0xff] }
 0x40b   :  { %v10326_v4 = vmul.f32 %v3579_v49, %v2622_v8  ;;  %v3581_v51 = vpop.f32.mrb[101].mxu1  ;;  %4593 = vmatmul.mubr.bf16.gmra.mrb[192].mxu0 %v13021_v5  ;;  %v13024_v8 = vld [vmem:[#allocation336_spill] sm:$0xff]  ;;  %v13025_v49 = vld [vmem:[#allocation338_spill] sm:$0xff]  ;;  %v2348_v22 = vadd.f32 %v13026_v27, %v9408_v29 }
 0x40c   :  { %v10335_v40 = vmul.f32 %v3581_v51, %v2623_v28  ;;  %v3583_v26 = vpop.f32.mrb[102].mxu1  ;;  %4600 = vmatprep.mubr.bf16.mxu0 %v13023_v42  ;;  %v2119_v14 = vadd.f32 %v13024_v8, %v8921_v43  ;;  %v2346_v5 = vadd.f32 %v13025_v49, %v9397_v6  ;;  %v2725_v51 = vand.u32 2147483647, %v2115_v58 }
 0x40d   :  { %v10342_v9 = vmul.f32 %v3583_v26, %v2626_v1  ;;  %v3585_v11 = vpop.f32.mrb[103].mxu1  ;;  %v13027_v1 = vpack.c.bf16 %v10082_v2, %v10066_v23  ;;  %v2728_v35 = vand.u32 2147483647, %v2117_v19  ;;  %v13028_v26 = vld [vmem:[#allocation340_spill] sm:$0xff]  ;;  %v13029_v8 = vpack.c.bf16 %v10138_v30, %v10127_v7 }
 0x40e   :  { %v10346_v48 = vmul.f32 %v3585_v11, %v2627_v13  ;;  %v3356_v28 = vpop.f32.mrb[88].mxu0  ;;  %v2350_v42 = vadd.f32 %v13028_v26, %v9397_v6  ;;  %v2729_v11 = vand.u32 2147483647, %v2119_v14  ;;  %v2630_v19 = vand.u32 2147483647, %v2346_v5 }
 0x40f   :  { %v10352_v50 = vmul.f32 %v3356_v28, %v2724_v32  ;;  %v3358_v34 = vpop.f32.mrb[89].mxu0  ;;  %4786 = vmatmul.mubr.bf16.gmra.mrb[208].mxu1 %v13027_v1  ;;  %v13030_v32 = vld [vmem:[#allocation341_spill] sm:$0xff]  ;;  %v13031_v28 = vld [vmem:[#allocation342_spill] sm:$0xff]  ;;  %v2125_v58 = vadd.f32 %v13032_v60, %v8921_v43 }
 0x410   :  { %v10361_v13 = vmul.f32 %v3358_v34, %v2725_v51  ;;  %v3360_v27 = vpop.f32.mrb[90].mxu0  ;;  %4793 = vmatprep.mubr.bf16.mxu1 %v13029_v8  ;;  %v2352_v49 = vadd.f32 %v13030_v32, %v9408_v29  ;;  %v2123_v1 = vadd.f32 %v13031_v28, %v8914_v56  ;;  %v2631_v34 = vand.u32 2147483647, %v2348_v22 }
 0x411   :  { %v10368_v23 = vmul.f32 %v3360_v27, %v2728_v35  ;;  %v3362_v2 = vpop.f32.mrb[91].mxu0  ;;  %v13033_v35 = vpack.c.bf16 %v10108_v21, %v10092_v57  ;;  %v2634_v5 = vand.u32 2147483647, %v2350_v42  ;;  %v13034_v27 = vld [vmem:[#allocation345_spill] sm:$0xff]  ;;  %v13035_v32 = vpack.c.bf16 %v10164_v36, %v10153_v55 }
 0x412   :  { %v10372_v26 = vmul.f32 %v3362_v2, %v2729_v11  ;;  %v3589_v51 = vpop.f32.mrb[104].mxu1  ;;  %v2127_v8 = vadd.f32 %v13034_v27, %v8914_v56  ;;  %v2635_v2 = vand.u32 2147483647, %v2352_v49  ;;  %v2732_v42 = vand.u32 2147483647, %v2123_v1  ;;  %v13037_v56 = vld [vmem:[#allocation347_spill] sm:$0xff] }
 0x413   :  { %v10378_v30 = vmul.f32 %v3589_v51, %v2630_v19  ;;  %v3591_v14 = vpop.f32.mrb[105].mxu1  ;;  %4601 = vmatmul.mubr.bf16.gmra.mrb[196].mxu0 %v13033_v35  ;;  %v13036_v19 = vld [vmem:[#allocation346_spill] sm:$0xff]  ;;  %v2356_v51 = vadd.f32 %v13037_v56, %v9397_v6  ;;  %v13038_v27 = vld [vmem:[#allocation348_spill] sm:$0xff]  ;;  %v13039_v49 = vpack.c.bf16 %v10134_v16, %v10118_v37 }
 0x414   :  { %v4105_v22 = vpack.c.bf16 %v10372_v26, %v10361_v13  ;;  %v10387_v11 = vmul.f32 %v3591_v14, %v2631_v34  ;;  %v3593_v60 = vpop.f32.mrb[106].mxu1  ;;  %4608 = vmatprep.mubr.bf16.mxu0 %v13035_v32  ;;  %v2129_v28 = vadd.f32 %v13036_v19, %v8921_v43  ;;  %v2733_v14 = vand.u32 2147483647, %v2125_v58 }
 0x415   :  { %v10394_v57 = vmul.f32 %v3593_v60, %v2634_v5  ;;  %v3595_v21 = vpop.f32.mrb[107].mxu1  ;;  %v2358_v7 = vadd.f32 %v13038_v27, %v9408_v29  ;;  %v2736_v1 = vand.u32 2147483647, %v2127_v8  ;;  %v13040_v5 = vld [vmem:[#allocation349_spill] sm:$0xff]  ;;  %v13041_v19 = vpack.c.bf16 %v10190_v44, %v10179_v46 }
 0x416   :  { %v10398_v35 = vmul.f32 %v3595_v21, %v2635_v2  ;;  %v3366_v34 = vpop.f32.mrb[92].mxu0  ;;  %v2360_v60 = vadd.f32 %v13040_v5, %v9397_v6  ;;  %v2737_v21 = vand.u32 2147483647, %v2129_v28  ;;  %v2638_v8 = vand.u32 2147483647, %v2356_v51 }
 0x417   :  { %v10404_v36 = vmul.f32 %v3366_v34, %v2732_v42  ;;  %v3368_v43 = vpop.f32.mrb[93].mxu0  ;;  %4794 = vmatmul.mubr.bf16.gmra.mrb[212].mxu1 %v13039_v49  ;;  %v13042_v42 = vld [vmem:[#allocation350_spill] sm:$0xff]  ;;  %v10425_v34 = vld [vmem:[%s12373_s3] sm:$0xf]  ;;  %v2639_v28 = vand.u32 2147483647, %v2358_v7  ;;  %v13045_v5 = vpack.c.bf16 %v10160_v33, %v10144_v47  ;;  %v13046_v7 = vpack.c.bf16 %v10216_v63, %v10205_v12 }
 0x418   :  { %v4059_v58 = vpack.c.bf16 %v10398_v35, %v10387_v11  ;;  %v10413_v32 = vmul.f32 %v3368_v43, %v2733_v14  ;;  %v3370_v2 = vpop.f32.mrb[94].mxu0  ;;  %4801 = vmatprep.mubr.bf16.mxu1 %v13041_v19  ;;  %v2362_v56 = vadd.f32 %v13042_v42, %v9408_v29  ;;  %v13043_v14 = vld [vmem:[#allocation16_spill] sm:$0xff]  ;;  %v13048_v47 = vld [vmem:[#allocation351_spill] sm:$0xff] }
 0x419   :  { %v10420_v37 = vmul.f32 %v3370_v2, %v2736_v1  ;;  %v3372_v16 = vpop.f32.mrb[95].mxu0  ;;  %v13044_v27 = vsub.s32 3, %v13043_v14  ;;  %v2642_v2 = vand.u32 2147483647, %v2360_v60  ;;  %v2366_v33 = vadd.f32 %v13048_v47, %v9397_v6 }
 0x41a   :  { %v10432_v46 = vmul.f32 %v3372_v16, %v2737_v21  ;;  %v3599_v44 = vpop.f32.mrb[108].mxu1  ;;  %v2643_v16 = vand.u32 2147483647, %v2362_v56 }
 0x41b   :  { %v10430_v43 = vrot.slane %v10425_v34, %v13044_v27  ;;  %v10436_v1 = vmul.f32 %v3599_v44, %v2638_v8  ;;  %v3601_v51 = vpop.f32.mrb[109].mxu1  ;;  %4609 = vmatmul.mubr.bf16.gmra.mrb[200].mxu0 %v13045_v5  ;;  %v13047_v44 = vld [vmem:[#allocation35_spill] sm:$0xff] }
 0x41c   :  { %v10443_v42 = vmul.f32 %v3601_v51, %v2639_v28  ;;  %v3603_v21 = vpop.f32.mrb[110].mxu1  ;;  %4616 = vmatprep.mubr.bf16.mxu0 %v13046_v7  ;;  %v13049_v28 = vld [vmem:[#allocation352_spill] sm:$0xff]  ;;  %v13084_v35 = vpack.c.bf16 %v10432_v46, %v10413_v32 }
 0x41d   :  { %v10448_v27 = vmul.f32 %v3603_v21, %v2642_v2  ;;  %v3605_v8 = vpop.f32.mrb[111].mxu1  ;;  %v1024_v49 = vadd.f32 %v13047_v44, %v10430_v43  ;;  %v2368_v51 = vadd.f32 %v13049_v28, %v9408_v29  ;;  %v13050_v2 = vpack.c.bf16 %v10186_v31, %v10170_v20  ;;  %v13051_v21 = vld [vmem:[#allocation37_spill] sm:$0xff] }
 0x41e   :  { %v10454_v60 = vmul.f32 %v3605_v8, %v2643_v16  ;;  %v4402_v5 = vpop.f32.mrb[96].mxu0  ;;  %v1028_v7 = vadd.f32 %v13051_v21, %v10430_v43  ;;  %v13052_v16 = vld [vmem:[#allocation353_spill] sm:$0xff]  ;;  %v13053_v28 = vpack.c.bf16 %v10242_v0, %v10231_v18  ;;  %v2646_v31 = vand.u32 2147483647, %v2366_v33 }
 0x41f   :  { %v10460_v63 = vadd.f32 %v4402_v5, %v1024_v49  ;;  %v4404_v56 = vpop.f32.mrb[97].mxu0  ;;  %4802 = vmatmul.mubr.bf16.gmra.mrb[216].mxu1 %v13050_v2  ;;  %v2370_v8 = vadd.f32 %v13052_v16, %v9397_v6  ;;  %v13054_v49 = vld [vmem:[#allocation354_spill] sm:$0xff]  ;;  %v2647_v21 = vand.u32 2147483647, %v2368_v51  ;;  %v13055_v44 = vpack.c.bf16 %v10212_v38, %v10196_v17  ;;  %v13057_v51 = vld [vmem:[#allocation40_spill] sm:$0xff] }
 0x420   :  { %v4405_v47 = vpop.f32.mrb[98].mxu0  ;;  %4809 = vmatprep.mubr.bf16.mxu1 %v13053_v28  ;;  %v2372_v5 = vadd.f32 %v13054_v49, %v9408_v29  ;;  %v13056_v0 = vpack.c.bf16 %v10268_v24, %v10257_v59  ;;  %v1034_v28 = vadd.f32 %v13057_v51, %v10430_v43  ;;  %v13058_v49 = vld [vmem:[#allocation355_spill] sm:$0xff] }
 0x421   :  { %v10476_v56 = vadd.f32 %v4405_v47, %v1028_v7  ;;  %v4407_v20 = vpop.f32.mrb[99].mxu0  ;;  %v2650_v55 = vand.u32 2147483647, %v2370_v8  ;;  %v13059_v8 = vld [vmem:[#allocation356_spill] sm:$0xff] }
 0x422   :  { %v3609_v2 = vpop.f32.mrb[112].mxu1  ;;  %v2651_v7 = vand.u32 2147483647, %v2372_v5  ;;  %v2376_v20 = vadd.f32 %v13058_v49, %v9397_v6  ;;  %v13060_v5 = vpack.c.bf16 %v10238_v54, %v10222_v39 }
 0x423   :  { %v10478_v12 = vmul.f32 %v3609_v2, %v2646_v31  ;;  %v3611_v16 = vpop.f32.mrb[113].mxu1  ;;  %4617 = vmatmul.mubr.bf16.gmra.mrb[204].mxu0 %v13055_v44  ;;  %v2378_v44 = vadd.f32 %v13059_v8, %v9408_v29  ;;  %v13061_v31 = vld [vmem:[#allocation42_spill] sm:$0xff] }
 0x424   :  { %v10483_v19 = vmul.f32 %v3611_v16, %v2647_v21  ;;  %v3613_v18 = vpop.f32.mrb[114].mxu1  ;;  %4624 = vmatprep.mubr.bf16.mxu0 %v13056_v0  ;;  %v1038_v2 = vadd.f32 %v13061_v31, %v10430_v43  ;;  %v13062_v21 = vld [vmem:[#allocation357_spill] sm:$0xff]  ;;  %v2654_v54 = vand.u32 2147483647, %v2376_v20 }
 0x425   :  { %v10488_v47 = vmul.f32 %v3613_v18, %v2650_v55  ;;  %v3615_v33 = vpop.f32.mrb[115].mxu1  ;;  %v2380_v16 = vadd.f32 %v13062_v21, %v9397_v6 }
 0x426   :  { %v10494_v17 = vmul.f32 %v3615_v33, %v2651_v7  ;;  %v4410_v38 = vpop.f32.mrb[100].mxu0  ;;  %v13063_v7 = vpack.c.bf16 %v10294_v45, %v10283_v25  ;;  %v13064_v33 = vld [vmem:[#allocation358_spill] sm:$0xff]  ;;  %v13066_v45 = vpack.c.bf16 %v10320_v10, %v10309_v53 }
 0x427   :  { %v4066_v59 = vpack.c.bf16 %v10488_v47, %v10478_v12  ;;  %v10500_v24 = vadd.f32 %v4410_v38, %v1034_v28  ;;  %v4412_v55 = vpop.f32.mrb[101].mxu0  ;;  %4810 = vmatmul.mubr.bf16.gmra.mrb[220].mxu1 %v13060_v5  ;;  %v2382_v51 = vadd.f32 %v13064_v33, %v9408_v29  ;;  %v2655_v38 = vand.u32 2147483647, %v2378_v44  ;;  %v13067_v44 = vld [vmem:[#allocation45_spill] sm:$0xff]  ;;  %v13068_v33 = vld [vmem:[#allocation359_spill] sm:$0xff] }
 0x428   :  { %v4067_v18 = vpack.c.bf16 %v10494_v17, %v10483_v19  ;;  %v4413_v0 = vpop.f32.mrb[102].mxu0  ;;  %4817 = vmatprep.mubr.bf16.mxu1 %v13063_v7  ;;  %v13065_v5 = vpack.c.bf16 %v10264_v41, %v10248_v62  ;;  %v2658_v31 = vand.u32 2147483647, %v2380_v16  ;;  %v1044_v7 = vadd.f32 %v13067_v44, %v10430_v43  ;;  %v13069_v16 = vld [vmem:[#allocation360_spill] sm:$0xff]  ;;  %v13103_v19 = vld [vmem:[#allocation22_spill] sm:$0xff] }
 0x429   :  { %v10516_v28 = vadd.f32 %v4413_v0, %v1038_v2  ;;  %v4415_v39 = vpop.f32.mrb[103].mxu0  ;;  %v2659_v2 = vand.u32 2147483647, %v2382_v51 }
 0x42a   :  { %v3619_v49 = vpop.f32.mrb[116].mxu1  ;;  %v2386_v39 = vadd.f32 %v13068_v33, %v9397_v6 }
 0x42b   :  { %v10518_v8 = vmul.f32 %v3619_v49, %v2654_v54  ;;  %v3621_v55 = vpop.f32.mrb[117].mxu1  ;;  %4625 = vmatmul.mubr.bf16.gmra.mrb[208].mxu0 %v13065_v5  ;;  %v2388_v54 = vadd.f32 %v13069_v16, %v9408_v29  ;;  %v13070_v49 = vpack.c.bf16 %v10290_v61, %v10274_v3  ;;  %v13072_v5 = vld [vmem:[#allocation361_spill] sm:$0xff] }
 0x42c   :  { %v10523_v21 = vmul.f32 %v3621_v55, %v2655_v38  ;;  %v3623_v25 = vpop.f32.mrb[118].mxu1  ;;  %4632 = vmatprep.mubr.bf16.mxu0 %v13066_v45  ;;  %v13071_v38 = vld [vmem:[#allocation47_spill] sm:$0xff]  ;;  %v2662_v61 = vand.u32 2147483647, %v2386_v39 }
 0x42d   :  { %v10528_v0 = vmul.f32 %v3623_v25, %v2658_v31  ;;  %v3625_v20 = vpop.f32.mrb[119].mxu1  ;;  %v1048_v55 = vadd.f32 %v13071_v38, %v10430_v43  ;;  %v2390_v31 = vadd.f32 %v13072_v5, %v9397_v6 }
 0x42e   :  { %v10534_v62 = vmul.f32 %v3625_v20, %v2659_v2  ;;  %v4418_v41 = vpop.f32.mrb[104].mxu0  ;;  %v13073_v2 = vpack.c.bf16 %v10346_v48, %v10335_v40  ;;  %v13074_v20 = vld [vmem:[#allocation362_spill] sm:$0xff] }
 0x42f   :  { %v4070_v53 = vpack.c.bf16 %v10528_v0, %v10518_v8  ;;  %v10540_v10 = vadd.f32 %v4418_v41, %v1044_v7  ;;  %v4420_v51 = vpop.f32.mrb[105].mxu0  ;;  %4818 = vmatmul.mubr.bf16.gmra.mrb[224].mxu1 %v13070_v49  ;;  %v2392_v44 = vadd.f32 %v13074_v20, %v9408_v29  ;;  %v2663_v41 = vand.u32 2147483647, %v2388_v54  ;;  %v13076_v54 = vld [vmem:[#allocation50_spill] sm:$0xff] }
 0x430   :  { %v4071_v25 = vpack.c.bf16 %v10534_v62, %v10523_v21  ;;  %v4421_v45 = vpop.f32.mrb[106].mxu0  ;;  %4825 = vmatprep.mubr.bf16.mxu1 %v13073_v2  ;;  %v13075_v49 = vpack.c.bf16 %v10316_v52, %v10300_v15  ;;  %v2666_v38 = vand.u32 2147483647, %v2390_v31  ;;  %v13077_v2 = vld [vmem:[#allocation363_spill] sm:$0xff]  ;;  %v13078_v31 = vld [vmem:[#allocation364_spill] sm:$0xff]  ;;  %v13111_v21 = vld [vmem:[#allocation26_spill] sm:$0xff] }
 0x431   :  { %v10556_v7 = vadd.f32 %v4421_v45, %v1048_v55  ;;  %v4423_v3 = vpop.f32.mrb[107].mxu0  ;;  %v2667_v48 = vand.u32 2147483647, %v2392_v44  ;;  %v1054_v45 = vadd.f32 %v13076_v54, %v10430_v43  ;;  %v2396_v20 = vadd.f32 %v13077_v2, %v9397_v6 }
 0x432   :  { %v3629_v33 = vpop.f32.mrb[120].mxu1  ;;  %v2398_v3 = vadd.f32 %v13078_v31, %v9408_v29  ;;  %v13079_v44 = vpack.c.bf16 %v10342_v9, %v10326_v4  ;;  %v13083_v31 = vpack.c.bf16 %v10368_v23, %v10352_v50 }
 0x433   :  { %v10558_v16 = vmul.f32 %v3629_v33, %v2662_v61  ;;  %v3631_v51 = vpop.f32.mrb[121].mxu1  ;;  %4633 = vmatmul.mubr.bf16.gmra.mrb[212].mxu0 %v13075_v49  ;;  %v13080_v61 = vld [vmem:[#allocation52_spill] sm:$0xff]  ;;  %v2670_v9 = vand.u32 2147483647, %v2396_v20 }
 0x434   :  { %v10563_v5 = vmul.f32 %v3631_v51, %v2663_v41  ;;  %v3633_v40 = vpop.f32.mrb[122].mxu1  ;;  %4640 = vmatprep.mubr.bf16.mxu0 %v4105_v22  ;;  %v1058_v33 = vadd.f32 %v13080_v61, %v10430_v43  ;;  %v13081_v41 = vld [vmem:[#allocation365_spill] sm:$0xff] }
 0x435   :  { %v10568_v55 = vmul.f32 %v3633_v40, %v2666_v38  ;;  %v3635_v39 = vpop.f32.mrb[123].mxu1  ;;  %v2400_v51 = vadd.f32 %v13081_v41, %v9397_v6  ;;  %v13082_v40 = vld [vmem:[#allocation366_spill] sm:$0xff]  ;;  %v13086_v41 = vld [vmem:[#allocation367_spill] sm:$0xff] }
 0x436   :  { %v10574_v15 = vmul.f32 %v3635_v39, %v2667_v48  ;;  %v4426_v52 = vpop.f32.mrb[108].mxu0  ;;  %v2402_v48 = vadd.f32 %v13082_v40, %v9408_v29 }
 0x437   :  { %v4074_v13 = vpack.c.bf16 %v10568_v55, %v10558_v16  ;;  %v10580_v26 = vadd.f32 %v4426_v52, %v1054_v45  ;;  %v4428_v22 = vpop.f32.mrb[109].mxu0  ;;  %4826 = vmatmul.mubr.bf16.gmra.mrb[228].mxu1 %v13079_v44  ;;  %v2671_v45 = vand.u32 2147483647, %v2398_v3  ;;  %v13085_v3 = vld [vmem:[#allocation55_spill] sm:$0xff] }
 0x438   :  { %v4075_v49 = vpack.c.bf16 %v10574_v15, %v10563_v5  ;;  %v4429_v38 = vpop.f32.mrb[110].mxu0  ;;  %4833 = vmatprep.mubr.bf16.mxu1 %v4059_v58  ;;  %v2674_v22 = vand.u32 2147483647, %v2400_v51  ;;  %v2675_v58 = vand.u32 2147483647, %v2402_v48  ;;  %v13087_v51 = vld [vmem:[#allocation368_spill] sm:$0xff] }
 0x439   :  { %v10596_v39 = vadd.f32 %v4429_v38, %v1058_v33  ;;  %v4431_v4 = vpop.f32.mrb[111].mxu0  ;;  %v1064_v33 = vadd.f32 %v13085_v3, %v10430_v43  ;;  %v2406_v38 = vadd.f32 %v13086_v41, %v9397_v6  ;;  %v2408_v40 = vadd.f32 %v13087_v51, %v9408_v29  ;;  %v13119_v5 = vld [vmem:[#allocation30_spill] sm:$0xff] }
 0x43a   :  { %v3639_v54 = vpop.f32.mrb[124].mxu1  ;;  %v13088_v4 = vpack.c.bf16 %v10394_v57, %v10378_v30  ;;  %v13093_v51 = vpack.c.bf16 %v10420_v37, %v10404_v36  ;;  %v13097_v37 = vld [vmem:[#allocation372_spill] sm:$0xff] }
 0x43b   :  { %v10598_v2 = vmul.f32 %v3639_v54, %v2670_v9  ;;  %v3641_v52 = vpop.f32.mrb[125].mxu1  ;;  %4641 = vmatmul.mubr.bf16.gmra.mrb[216].mxu0 %v13083_v31  ;;  %v13089_v9 = vld [vmem:[#allocation57_spill] sm:$0xff]  ;;  %v2678_v57 = vand.u32 2147483647, %v2406_v38  ;;  %v13095_v38 = vld [vmem:[#allocation60_spill] sm:$0xff] }
 0x43c   :  { %v10603_v44 = vmul.f32 %v3641_v52, %v2671_v45  ;;  %v3643_v11 = vpop.f32.mrb[126].mxu1  ;;  %4648 = vmatprep.mubr.bf16.mxu0 %v13084_v35  ;;  %v1068_v54 = vadd.f32 %v13089_v9, %v10430_v43  ;;  %v13090_v45 = vld [vmem:[#allocation369_spill] sm:$0xff]  ;;  %v13092_v35 = vld [vmem:[#allocation370_spill] sm:$0xff] }
 0x43d   :  { %v10608_v61 = vmul.f32 %v3643_v11, %v2674_v22  ;;  %v3645_v20 = vpop.f32.mrb[127].mxu1  ;;  %v2410_v52 = vadd.f32 %v13090_v45, %v9397_v6  ;;  %v13091_v11 = vpack.c.bf16 %v10454_v60, %v10443_v42  ;;  %v13094_v60 = vld [vmem:[#allocation18_spill] sm:$0xff] }
 0x43e   :  { %v10614_v50 = vmul.f32 %v3645_v20, %v2675_v58  ;;  %v4434_v23 = vpop.f32.mrb[112].mxu0  ;;  %v2412_v58 = vadd.f32 %v13092_v35, %v9408_v29 }
 0x43f   :  { %v4078_v32 = vpack.c.bf16 %v10608_v61, %v10598_v2  ;;  %v10620_v46 = vadd.f32 %v4434_v23, %v1064_v33  ;;  %v4436_v48 = vpop.f32.mrb[113].mxu0  ;;  %4834 = vmatmul.mubr.bf16.gmra.mrb[232].mxu1 %v13088_v4  ;;  %v2679_v33 = vand.u32 2147483647, %v2408_v40  ;;  %v1074_v40 = vadd.f32 %v13095_v38, %v10430_v43 }
 0x440   :  { %v4079_v31 = vpack.c.bf16 %v10614_v50, %v10603_v44  ;;  %v4437_v22 = vpop.f32.mrb[114].mxu0  ;;  %4841 = vmatprep.mubr.bf16.mxu1 %v13091_v11  ;;  %v2682_v48 = vand.u32 2147483647, %v2410_v52  ;;  %v2683_v9 = vand.u32 2147483647, %v2412_v58  ;;  %v2418_v52 = vadd.f32 %v13097_v37, %v9408_v29  ;;  %v13127_v44 = vld [vmem:[#allocation39_spill] sm:$0xff] }
 0x441   :  { %v10636_v20 = vadd.f32 %v4437_v22, %v1068_v54  ;;  %v4439_v30 = vpop.f32.mrb[115].mxu0  ;;  %v13096_v22 = vld [vmem:[#allocation371_spill] sm:$0xff] }
 0x442   :  { %v3649_v3 = vpop.f32.mrb[128].mxu1  ;;  %v2416_v11 = vadd.f32 %v13096_v22, %v9397_v6  ;;  %v2687_v22 = vand.u32 2147483647, %v2418_v52  ;;  %v13105_v52 = vld [vmem:[#allocation375_spill] sm:$0xff] }
 0x443   :  { %v10638_v41 = vmul.f32 %v3649_v3, %v2678_v57  ;;  %v3651_v23 = vpop.f32.mrb[129].mxu1  ;;  %4649 = vmatmul.mubr.bf16.gmra.mrb[220].mxu0 %v13093_v51  ;;  %v13098_v3 = vpack.c.bf16 %v10448_v27, %v10436_v1  ;;  %v13100_v51 = vld [vmem:[#allocation373_spill] sm:$0xff] }
 0x444   :  { %v10643_v4 = vmul.f32 %v3651_v23, %v2679_v33  ;;  %v3653_v42 = vpop.f32.mrb[130].mxu1  ;;  %6622 = vmatprep.mubr.bf16.mxu0 %v13094_v60  ;;  %v13099_v33 = vld [vmem:[#allocation62_spill] sm:$0xff]  ;;  %v2686_v27 = vand.u32 2147483647, %v2416_v11 }
 0x445   :  { %v10646_v54 = vmul.f32 %v3653_v42, %v2682_v48  ;;  %v3655_v45 = vpop.f32.mrb[131].mxu1  ;;  %v1078_v23 = vadd.f32 %v13099_v33, %v10430_v43  ;;  %v2420_v48 = vadd.f32 %v13100_v51, %v9397_v6 }
 0x446   :  { %v10652_v35 = vmul.f32 %v3655_v45, %v2683_v9  ;;  %v4442_v36 = vpop.f32.mrb[116].mxu0  ;;  %v13101_v9 = vld [vmem:[#allocation374_spill] sm:$0xff] }
 0x447   :  { %v4082_v30 = vpack.c.bf16 %v10646_v54, %v10638_v41  ;;  %v10658_v57 = vadd.f32 %v4442_v36, %v1074_v40  ;;  %v4444_v58 = vpop.f32.mrb[117].mxu0  ;;  %4842 = vmatmul.mubr.bf16.gmra.mrb[236].mxu1 %v13098_v3  ;;  %v2422_v45 = vadd.f32 %v13101_v9, %v9408_v29  ;;  %v2690_v3 = vand.u32 2147483647, %v2420_v48  ;;  %v13106_v48 = vld [vmem:[#allocation376_spill] sm:$0xff] }
 0x448   :  { %v4083_v42 = vpack.c.bf16 %v10652_v35, %v10643_v4  ;;  %v4445_v60 = vpop.f32.mrb[118].mxu0  ;;  %4849 = vmatprep.mubr.bf16.mxu1 %v4067_v18  ;;  %v13102_v58 = vld [vmem:[#allocation20_spill] sm:$0xff]  ;;  %v2426_v9 = vadd.f32 %v13105_v52, %v9397_v6  ;;  %v13135_v4 = vld [vmem:[#allocation49_spill] sm:$0xff] }
 0x449   :  { %v10674_v38 = vadd.f32 %v4445_v60, %v1078_v23  ;;  %v4447_v1 = vpop.f32.mrb[119].mxu0  ;;  %v2691_v17 = vand.u32 2147483647, %v2422_v45  ;;  %v13104_v60 = vld [vmem:[#allocation65_spill] sm:$0xff] }
 0x44a   :  { %v3659_v40 = vpop.f32.mrb[132].mxu1  ;;  %v1084_v11 = vadd.f32 %v13104_v60, %v10430_v43  ;;  %v13109_v60 = vld [vmem:[#allocation378_spill] sm:$0xff]  ;;  %v2694_v47 = vand.u32 2147483647, %v2426_v9 }
 0x44b   :  { %v10676_v36 = vmul.f32 %v3659_v40, %v2686_v27  ;;  %v3661_v37 = vpop.f32.mrb[133].mxu1  ;;  %6623 = vmatmul.mubr.bf16.vlgmr.msra.gmra.mrb[224].mxu0 %v13102_v58  ;;  %v2428_v40 = vadd.f32 %v13106_v48, %v9408_v29  ;;  %v13107_v58 = vld [vmem:[#allocation67_spill] sm:$0xff] }
 0x44c   :  { %v10679_v33 = vmul.f32 %v3661_v37, %v2687_v22  ;;  %v3663_v51 = vpop.f32.mrb[134].mxu1  ;;  %6626 = vmatprep.mubr.bf16.mxu0 %v13103_v19 }
 0x44d   :  { %v10682_v18 = vmul.f32 %v3663_v51, %v2690_v3  ;;  %v3665_v23 = vpop.f32.mrb[135].mxu1  ;;  %v1088_v3 = vadd.f32 %v13107_v58, %v10430_v43  ;;  %v13108_v51 = vld [vmem:[#allocation377_spill] sm:$0xff]  ;;  %v13110_v58 = vld [vmem:[#allocation24_spill] sm:$0xff] }
 0x44e   :  { %v10688_v1 = vmul.f32 %v3665_v23, %v2691_v17  ;;  %v4450_v27 = vpop.f32.mrb[120].mxu0  ;;  %v2430_v19 = vadd.f32 %v13108_v51, %v9397_v6 }
 0x44f   :  { %v10694_v37 = vadd.f32 %v4450_v27, %v1084_v11  ;;  %v4452_v45 = vpop.f32.mrb[121].mxu0  ;;  %4850 = vmatmul.mubr.bf16.gmra.mrb[240].mxu1 %v4066_v59  ;;  %v2432_v11 = vadd.f32 %v13109_v60, %v9408_v29  ;;  %v2695_v27 = vand.u32 2147483647, %v2428_v40  ;;  %v13113_v40 = vld [vmem:[#allocation379_spill] sm:$0xff] }
 0x450   :  { %v4453_v23 = vpop.f32.mrb[122].mxu0  ;;  %4857 = vmatprep.mubr.bf16.mxu1 %v4071_v25  ;;  %v2698_v51 = vand.u32 2147483647, %v2430_v19  ;;  %v2436_v60 = vadd.f32 %v13113_v40, %v9397_v6  ;;  %v13114_v19 = vld [vmem:[#allocation380_spill] sm:$0xff] }
 0x451   :  { %v10710_v52 = vadd.f32 %v4453_v23, %v1088_v3  ;;  %v4455_v12 = vpop.f32.mrb[123].mxu0  ;;  %v2699_v62 = vand.u32 2147483647, %v2432_v11  ;;  %v13112_v23 = vld [vmem:[#allocation70_spill] sm:$0xff]  ;;  %v13115_v11 = vld [vmem:[#allocation72_spill] sm:$0xff] }
 0x452   :  { %v3669_v59 = vpop.f32.mrb[136].mxu1  ;;  %v1094_v9 = vadd.f32 %v13112_v23, %v10430_v43  ;;  %v13117_v23 = vld [vmem:[#allocation382_spill] sm:$0xff]  ;;  %v2702_v0 = vand.u32 2147483647, %v2436_v60 }
 0x453   :  { %v10712_v48 = vmul.f32 %v3669_v59, %v2694_v47  ;;  %v3671_v45 = vpop.f32.mrb[137].mxu1  ;;  %6627 = vmatmul.mubr.bf16.gmra.mrb[228].mxu0 %v13110_v58  ;;  %v2438_v59 = vadd.f32 %v13114_v19, %v9408_v29  ;;  %v1098_v58 = vadd.f32 %v13115_v11, %v10430_v43  ;;  %v13118_v11 = vld [vmem:[#allocation28_spill] sm:$0xff] }
 0x454   :  { %v10715_v22 = vmul.f32 %v3671_v45, %v2695_v27  ;;  %v3673_v17 = vpop.f32.mrb[138].mxu1  ;;  %6630 = vmatprep.mubr.bf16.mxu0 %v13111_v21 }
 0x455   :  { %v10718_v25 = vmul.f32 %v3673_v17, %v2698_v51  ;;  %v3675_v3 = vpop.f32.mrb[139].mxu1  ;;  %v13116_v51 = vld [vmem:[#allocation381_spill] sm:$0xff] }
 0x456   :  { %v10724_v12 = vmul.f32 %v3675_v3, %v2699_v62  ;;  %v4458_v47 = vpop.f32.mrb[124].mxu0  ;;  %v2440_v21 = vadd.f32 %v13116_v51, %v9397_v6 }
 0x457   :  { %v10730_v45 = vadd.f32 %v4458_v47, %v1094_v9  ;;  %v4460_v17 = vpop.f32.mrb[125].mxu0  ;;  %4858 = vmatmul.mubr.bf16.gmra.mrb[244].mxu1 %v4070_v53  ;;  %v2442_v9 = vadd.f32 %v13117_v23, %v9408_v29  ;;  %v2703_v47 = vand.u32 2147483647, %v2438_v59  ;;  %v13121_v59 = vld [vmem:[#allocation383_spill] sm:$0xff] }
 0x458   :  { %v4461_v3 = vpop.f32.mrb[126].mxu0  ;;  %4865 = vmatprep.mubr.bf16.mxu1 %v4075_v49  ;;  %v2706_v51 = vand.u32 2147483647, %v2440_v21  ;;  %v2446_v23 = vadd.f32 %v13121_v59, %v9397_v6  ;;  %v13122_v21 = vld [vmem:[#allocation384_spill] sm:$0xff] }
 0x459   :  { %v10746_v40 = vadd.f32 %v4461_v3, %v1098_v58  ;;  %v4463_v8 = vpop.f32.mrb[127].mxu0  ;;  %v2707_v15 = vand.u32 2147483647, %v2442_v9  ;;  %v13120_v3 = vld [vmem:[#allocation75_spill] sm:$0xff]  ;;  %v13123_v9 = vld [vmem:[#allocation77_spill] sm:$0xff] }
 0x45a   :  { %v3679_v53 = vpop.f32.mrb[140].mxu1  ;;  %v1104_v60 = vadd.f32 %v13120_v3, %v10430_v43  ;;  %v13125_v3 = vld [vmem:[#allocation385_spill] sm:$0xff]  ;;  %v2710_v55 = vand.u32 2147483647, %v2446_v23 }
 0x45b   :  { %v10748_v19 = vmul.f32 %v3679_v53, %v2702_v0  ;;  %v3681_v17 = vpop.f32.mrb[141].mxu1  ;;  %6631 = vmatmul.mubr.bf16.gmra.mrb[232].mxu0 %v13118_v11  ;;  %v2448_v53 = vadd.f32 %v13122_v21, %v9408_v29  ;;  %v1108_v11 = vadd.f32 %v13123_v9, %v10430_v43  ;;  %v13126_v9 = vld [vmem:[#allocation32_spill] sm:$0xff] }
 0x45c   :  { %v10751_v27 = vmul.f32 %v3681_v17, %v2703_v47  ;;  %v3683_v62 = vpop.f32.mrb[142].mxu1  ;;  %6634 = vmatprep.mubr.bf16.mxu0 %v13119_v5 }
 0x45d   :  { %v10754_v49 = vmul.f32 %v3683_v62, %v2706_v51  ;;  %v3685_v58 = vpop.f32.mrb[143].mxu1  ;;  %v13124_v51 = vld [vmem:[#allocation166_spill] sm:$0xff] }
 0x45e   :  { %v10760_v8 = vmul.f32 %v3685_v58, %v2707_v15  ;;  %v4466_v0 = vpop.f32.mrb[128].mxu0  ;;  %v2450_v5 = vadd.f32 %v13124_v51, %v9397_v6 }
 0x45f   :  { %v10766_v17 = vadd.f32 %v4466_v0, %v1104_v60  ;;  %v4468_v62 = vpop.f32.mrb[129].mxu0  ;;  %4866 = vmatmul.mubr.bf16.gmra.mrb[248].mxu1 %v4074_v13  ;;  %v2452_v60 = vadd.f32 %v13125_v3, %v9408_v29  ;;  %v2711_v0 = vand.u32 2147483647, %v2448_v53  ;;  %v13129_v53 = vld [vmem:[#allocation171_spill] sm:$0xff] }
 0x460   :  { %v4469_v58 = vpop.f32.mrb[130].mxu0  ;;  %4873 = vmatprep.mubr.bf16.mxu1 %v4079_v31  ;;  %v2714_v51 = vand.u32 2147483647, %v2450_v5  ;;  %v2456_v3 = vadd.f32 %v13129_v53, %v9397_v6  ;;  %v13130_v5 = vld [vmem:[#allocation172_spill] sm:$0xff] }
 0x461   :  { %v10782_v59 = vadd.f32 %v4469_v58, %v1108_v11  ;;  %v4471_v16 = vpop.f32.mrb[131].mxu0  ;;  %v2715_v50 = vand.u32 2147483647, %v2452_v60  ;;  %v13128_v58 = vld [vmem:[#allocation80_spill] sm:$0xff]  ;;  %v13131_v60 = vld [vmem:[#allocation82_spill] sm:$0xff] }
 0x462   :  { %v3689_v13 = vpop.f32.mrb[144].mxu1  ;;  %v1114_v23 = vadd.f32 %v13128_v58, %v10430_v43  ;;  %v13133_v58 = vld [vmem:[#allocation174_spill] sm:$0xff]  ;;  %v2718_v61 = vand.u32 2147483647, %v2456_v3 }
 0x463   :  { %v10784_v21 = vmul.f32 %v3689_v13, %v2710_v55  ;;  %v3691_v62 = vpop.f32.mrb[145].mxu1  ;;  %6635 = vmatmul.mubr.bf16.gmra.mrb[236].mxu0 %v13126_v9  ;;  %v2458_v13 = vadd.f32 %v13130_v5, %v9408_v29  ;;  %v1118_v9 = vadd.f32 %v13131_v60, %v10430_v43  ;;  %v13134_v60 = vld [vmem:[#allocation43_spill] sm:$0xff] }
 0x464   :  { %v10787_v47 = vmul.f32 %v3691_v62, %v2711_v0  ;;  %v3693_v15 = vpop.f32.mrb[146].mxu1  ;;  %6638 = vmatprep.mubr.bf16.mxu0 %v13127_v44 }
 0x465   :  { %v10790_v31 = vmul.f32 %v3693_v15, %v2714_v51  ;;  %v3695_v11 = vpop.f32.mrb[147].mxu1  ;;  %v13132_v51 = vld [vmem:[#allocation173_spill] sm:$0xff] }
 0x466   :  { %v10796_v16 = vmul.f32 %v3695_v11, %v2715_v50  ;;  %v4474_v55 = vpop.f32.mrb[132].mxu0  ;;  %v2460_v44 = vadd.f32 %v13132_v51, %v9397_v6 }
 0x467   :  { %v10802_v62 = vadd.f32 %v4474_v55, %v1114_v23  ;;  %v4476_v15 = vpop.f32.mrb[133].mxu0  ;;  %4874 = vmatmul.mubr.bf16.gmra.mrb[252].mxu1 %v4078_v32  ;;  %v2462_v23 = vadd.f32 %v13133_v58, %v9408_v29  ;;  %v2719_v55 = vand.u32 2147483647, %v2458_v13  ;;  %v13137_v13 = vld [vmem:[#allocation325_spill] sm:$0xff] }
 0x468   :  { %v4477_v11 = vpop.f32.mrb[134].mxu0  ;;  %4881 = vmatprep.mubr.bf16.mxu1 %v4083_v42  ;;  %v2722_v51 = vand.u32 2147483647, %v2460_v44  ;;  %v2466_v58 = vadd.f32 %v13137_v13, %v9397_v6  ;;  %v13138_v44 = vld [vmem:[#allocation179_spill] sm:$0xff] }
 0x469   :  { %v10818_v53 = vadd.f32 %v4477_v11, %v1118_v9  ;;  %v4479_v2 = vpop.f32.mrb[135].mxu0  ;;  %v2723_v35 = vand.u32 2147483647, %v2462_v23  ;;  %v13136_v11 = vld [vmem:[#allocation85_spill] sm:$0xff]  ;;  %v13140_v23 = vld [vmem:[#allocation87_spill] sm:$0xff] }
 0x46a   :  { %v3699_v32 = vpop.f32.mrb[148].mxu1  ;;  %v1124_v3 = vadd.f32 %v13136_v11, %v10430_v43  ;;  %v13142_v11 = vpack.c.bf16 %v10688_v1, %v10679_v33  ;;  %v2726_v54 = vand.u32 2147483647, %v2466_v58  ;;  %v13145_v33 = vld [vmem:[#allocation59_spill] sm:$0xff] }
 0x46b   :  { %v10820_v5 = vmul.f32 %v3699_v32, %v2718_v61  ;;  %v3701_v15 = vpop.f32.mrb[149].mxu1  ;;  %6639 = vmatmul.mubr.bf16.gmra.mrb[240].mxu0 %v13134_v60  ;;  %v2468_v32 = vadd.f32 %v13138_v44, %v9408_v29  ;;  %v1128_v60 = vadd.f32 %v13140_v23, %v10430_v43 }
 0x46c   :  { %v10823_v0 = vmul.f32 %v3701_v15, %v2719_v55  ;;  %v3703_v50 = vpop.f32.mrb[150].mxu1  ;;  %6642 = vmatprep.mubr.bf16.mxu0 %v13135_v4 }
 0x46d   :  { %v10826_v42 = vmul.f32 %v3703_v50, %v2722_v51  ;;  %v3705_v9 = vpop.f32.mrb[151].mxu1  ;;  %v13141_v51 = vld [vmem:[#allocation180_spill] sm:$0xff]  ;;  %v2727_v44 = vand.u32 2147483647, %v2468_v32  ;;  %v13147_v32 = vld [vmem:[#allocation182_spill] sm:$0xff] }
 0x46e   :  { %v10832_v2 = vmul.f32 %v3705_v9, %v2723_v35  ;;  %v4482_v61 = vpop.f32.mrb[136].mxu0  ;;  %v2470_v4 = vadd.f32 %v13141_v51, %v9397_v6  ;;  %v13144_v51 = vld [vmem:[#allocation53_spill] sm:$0xff] }
 0x46f   :  { %v10838_v15 = vadd.f32 %v4482_v61, %v1124_v3  ;;  %v4484_v50 = vpop.f32.mrb[137].mxu0  ;;  %4882 = vmatmul.mubr.bf16.gmra.mrb[0].mxu1 %v4082_v30  ;;  %v13143_v3 = vld [vmem:[#allocation181_spill] sm:$0xff] }
 0x470   :  { %v4485_v9 = vpop.f32.mrb[138].mxu0  ;;  %4889 = vmatprep.mubr.bf16.mxu1 %v13142_v11  ;;  %v2472_v13 = vadd.f32 %v13143_v3, %v9408_v29  ;;  %v2730_v55 = vand.u32 2147483647, %v2470_v4  ;;  %v2476_v3 = vadd.f32 %v13147_v32, %v9397_v6  ;;  %v13148_v4 = vld [vmem:[#allocation334_spill] sm:$0xff]  ;;  %v13153_v32 = vpack.c.bf16 %v10724_v12, %v10715_v22  ;;  %v13156_v22 = vld [vmem:[#allocation69_spill] sm:$0xff] }
 0x471   :  { %13139 = vst [vmem:[#allocation188_spill] sm:$0xff] %v10838_v15  ;;  %v10854_v61 = vadd.f32 %v4485_v9, %v1128_v60  ;;  %v4487_v41 = vpop.f32.mrb[139].mxu0  ;;  %v13146_v9 = vld [vmem:[#allocation90_spill] sm:$0xff] }
 0x472   :  { %v3709_v30 = vpop.f32.mrb[152].mxu1  ;;  %v2731_v1 = vand.u32 2147483647, %v2472_v13  ;;  %v1134_v58 = vadd.f32 %v13146_v9, %v10430_v43  ;;  %v13151_v13 = vld [vmem:[#allocation92_spill] sm:$0xff] }
 0x473   :  { %v10856_v50 = vmul.f32 %v3709_v30, %v2726_v54  ;;  %v3711_v23 = vpop.f32.mrb[153].mxu1  ;;  %6643 = vmatmul.mubr.bf16.gmra.mrb[244].mxu0 %v13144_v51  ;;  %v2478_v30 = vadd.f32 %v13148_v4, %v9408_v29  ;;  %v1138_v51 = vadd.f32 %v13151_v13, %v10430_v43 }
 0x474   :  { %v10859_v35 = vmul.f32 %v3711_v23, %v2727_v44  ;;  %v3713_v15 = vpop.f32.mrb[154].mxu1  ;;  %6646 = vmatprep.mubr.bf16.mxu0 %v13145_v33  ;;  %v13152_v33 = vld [vmem:[#allocation187_spill] sm:$0xff] }
 0x475   :  { %v10862_v11 = vmul.f32 %v3713_v15, %v2730_v55  ;;  %v3715_v60 = vpop.f32.mrb[155].mxu1  ;;  %v13150_v15 = vpack.c.bf16 %v10682_v18, %v10676_v36  ;;  %v2734_v18 = vand.u32 2147483647, %v2476_v3 }
 0x476   :  { %v10868_v41 = vmul.f32 %v3715_v60, %v2731_v1  ;;  %v4490_v54 = vpop.f32.mrb[140].mxu0  ;;  %v2480_v1 = vadd.f32 %v13152_v33, %v9397_v6  ;;  %v13155_v33 = vld [vmem:[#allocation63_spill] sm:$0xff] }
 0x477   :  { %v10874_v23 = vadd.f32 %v4490_v54, %v1134_v58  ;;  %v4492_v55 = vpop.f32.mrb[141].mxu0  ;;  %4890 = vmatmul.mubr.bf16.gmra.mrb[4].mxu1 %v13150_v15  ;;  %v13154_v58 = vld [vmem:[#allocation337_spill] sm:$0xff]  ;;  %v2735_v15 = vand.u32 2147483647, %v2478_v30 }
 0x478   :  { %v4493_v9 = vpop.f32.mrb[142].mxu0  ;;  %4897 = vmatprep.mubr.bf16.mxu1 %v13153_v32  ;;  %v2482_v54 = vadd.f32 %v13154_v58, %v9408_v29  ;;  %v2738_v44 = vand.u32 2147483647, %v2480_v1 }
 0x479   :  { %13149 = vst [vmem:[#allocation189_spill] sm:$0xff] %v10874_v23  ;;  %v10890_v4 = vadd.f32 %v4493_v9, %v1138_v51  ;;  %v4495_v36 = vpop.f32.mrb[143].mxu0  ;;  %v13157_v51 = vld [vmem:[#allocation95_spill] sm:$0xff] }
 0x47a   :  { %v3719_v55 = vpop.f32.mrb[156].mxu1  ;;  %v2739_v12 = vand.u32 2147483647, %v2482_v54  ;;  %v1144_v3 = vadd.f32 %v13157_v51, %v10430_v43  ;;  %v13162_v51 = vld [vmem:[#allocation79_spill] sm:$0xff] }
 0x47b   :  { %v10892_v13 = vmul.f32 %v3719_v55, %v2734_v18  ;;  %v3721_v6 = vpop.f32.mrb[157].mxu1  ;;  %6647 = vmatmul.mubr.bf16.gmra.mrb[248].mxu0 %v13155_v33  ;;  %v13158_v18 = vpack.c.bf16 %v10718_v25, %v10712_v48  ;;  %v13161_v25 = vld [vmem:[#allocation73_spill] sm:$0xff] }
 0x47c   :  { %v10895_v60 = vmul.f32 %v3721_v6, %v2735_v15  ;;  %v3723_v23 = vpop.f32.mrb[158].mxu1  ;;  %6650 = vmatprep.mubr.bf16.mxu0 %v13156_v22  ;;  %v13160_v15 = vpack.c.bf16 %v10760_v8, %v10751_v27  ;;  %v13163_v27 = vld [vmem:[#allocation100_spill] sm:$0xff] }
 0x47d   :  { %v10898_v32 = vmul.f32 %v3723_v23, %v2738_v44  ;;  %v3725_v29 = vpop.f32.mrb[159].mxu1  ;;  %v13159_v44 = vld [vmem:[#allocation97_spill] sm:$0xff]  ;;  %v1154_v8 = vadd.f32 %v13163_v27, %v10430_v43 }
 0x47e   :  { %v10902_v9 = vmul.f32 %v3725_v29, %v2739_v12  ;;  %v4498_v30 = vpop.f32.mrb[144].mxu0  ;;  %v1148_v23 = vadd.f32 %v13159_v44, %v10430_v43 }
 0x47f   :  { %v4110_v58 = vpack.c.bf16 %v10898_v32, %v10892_v13  ;;  %v10906_v36 = vadd.f32 %v4498_v30, %v1144_v3  ;;  %v4500_v1 = vpop.f32.mrb[145].mxu0  ;;  %4898 = vmatmul.mubr.bf16.gmra.mrb[8].mxu1 %v13158_v18 }
 0x480   :  { %v4111_v54 = vpack.c.bf16 %v10902_v9, %v10895_v60  ;;  %v4501_v55 = vpop.f32.mrb[146].mxu0  ;;  %4905 = vmatprep.mubr.bf16.mxu1 %v13160_v15  ;;  %v13186_v60 = vld [vmem:[#allocation119_spill] sm:$0xff] }
 0x481   :  { %v10918_v6 = vadd.f32 %v4501_v55, %v1148_v23  ;;  %v4503_v33 = vpop.f32.mrb[147].mxu0  ;;  %v13165_v23 = vld [vmem:[#allocation102_spill] sm:$0xff]  ;;  %v1194_v9 = vadd.f32 %v13186_v60, %v10430_v43  ;;  %v13194_v60 = vld [vmem:[#allocation25_spill] sm:$0xff] }
 0x482   :  { %v4691_v22 = vpop.f32.mrb[160].mxu1  ;;  %v1158_v55 = vadd.f32 %v13165_v23, %v10430_v43 }
 0x483   :  { %v10921_v12 = vadd.f32 %v4691_v22, %v10460_v63  ;;  %v4693_v48 = vpop.f32.mrb[161].mxu1  ;;  %6651 = vmatmul.mubr.bf16.gmra.mrb[252].mxu0 %v13161_v25  ;;  %v13164_v63 = vpack.c.bf16 %v10754_v49, %v10748_v19  ;;  %v13168_v49 = vld [vmem:[#allocation89_spill] sm:$0xff] }
 0x484   :  { %v4694_v29 = vpop.f32.mrb[162].mxu1  ;;  %6654 = vmatprep.mubr.bf16.mxu0 %v13162_v51  ;;  %v13167_v51 = vld [vmem:[#allocation83_spill] sm:$0xff] }
 0x485   :  { %v10926_v3 = vadd.f32 %v4694_v29, %v10476_v56  ;;  %v4696_v30 = vpop.f32.mrb[163].mxu1  ;;  %v13166_v56 = vpack.c.bf16 %v10796_v16, %v10787_v47  ;;  %v13169_v47 = vld [vmem:[#allocation105_spill] sm:$0xff]  ;;  %vm4946_vm2 = vcmp.gt.f32.partialorder %v10921_v12, 0.0 }
 0x486   :  { %v4506_v1 = vpop.f32.mrb[148].mxu0  ;;  %v1164_v16 = vadd.f32 %v13169_v47, %v10430_v43 }
 0x487   :  { %v10930_v18 = vadd.f32 %v4506_v1, %v1154_v8  ;;  %v4508_v44 = vpop.f32.mrb[149].mxu0  ;;  %4906 = vmatmul.mubr.bf16.gmra.mrb[12].mxu1 %v13164_v63  ;;  %v13171_v63 = vld [vmem:[#allocation107_spill] sm:$0xff]  ;;  %vm4947_vm3 = vcmp.gt.f32.partialorder %v10926_v3, 0.0 }
 0x488   :  { %v4509_v15 = vpop.f32.mrb[150].mxu0  ;;  %4913 = vmatprep.mubr.bf16.mxu1 %v13166_v56  ;;  %v1168_v23 = vadd.f32 %v13171_v63, %v10430_v43 }
 0x489   :  { %v10940_v33 = vadd.f32 %v4509_v15, %v1158_v55  ;;  %v4511_v22 = vpop.f32.mrb[151].mxu0 }
 0x48a   :  { %v4699_v48 = vpop.f32.mrb[164].mxu1 }
 0x48b   :  { %v10943_v25 = vadd.f32 %v4699_v48, %v10500_v24  ;;  %v4701_v29 = vpop.f32.mrb[165].mxu1  ;;  %6655 = vmatmul.mubr.bf16.gmra.mrb[0].mxu0 %v13167_v51  ;;  %v13170_v24 = vpack.c.bf16 %v10790_v31, %v10784_v21  ;;  %v13173_v51 = vld [vmem:[#allocation93_spill] sm:$0xff]  ;;  %v13174_v31 = vld [vmem:[#allocation99_spill] sm:$0xff] }
 0x48c   :  { %v4702_v19 = vpop.f32.mrb[166].mxu1  ;;  %6658 = vmatprep.mubr.bf16.mxu0 %v13168_v49 }
 0x48d   :  { %v10948_v30 = vadd.f32 %v4702_v19, %v10516_v28  ;;  %v4704_v27 = vpop.f32.mrb[167].mxu1  ;;  %v13172_v28 = vpack.c.bf16 %v10832_v2, %v10823_v0  ;;  %v13175_v0 = vld [vmem:[#allocation110_spill] sm:$0xff]  ;;  %vm4948_vm4 = vcmp.gt.f32.partialorder %v10943_v25, 0.0 }
 0x48e   :  { %v4514_v8 = vpop.f32.mrb[152].mxu0  ;;  %v1174_v2 = vadd.f32 %v13175_v0, %v10430_v43  ;;  %v13183_v0 = vld [vmem:[#allocation117_spill] sm:$0xff] }
 0x48f   :  { %v10952_v1 = vadd.f32 %v4514_v8, %v1164_v16  ;;  %v4516_v44 = vpop.f32.mrb[153].mxu0  ;;  %4914 = vmatmul.mubr.bf16.gmra.mrb[16].mxu1 %v13170_v24  ;;  %v13177_v8 = vld [vmem:[#allocation112_spill] sm:$0xff]  ;;  %vm4949_vm5 = vcmp.gt.f32.partialorder %v10948_v30, 0.0 }
 0x490   :  { %v4517_v55 = vpop.f32.mrb[154].mxu0  ;;  %4921 = vmatprep.mubr.bf16.mxu1 %v13172_v28  ;;  %v1178_v44 = vadd.f32 %v13177_v8, %v10430_v43 }
 0x491   :  { %v10962_v15 = vadd.f32 %v4517_v55, %v1168_v23  ;;  %v4519_v56 = vpop.f32.mrb[155].mxu0 }
 0x492   :  { %v4707_v22 = vpop.f32.mrb[168].mxu1 }
 0x493   :  { %v10965_v48 = vadd.f32 %v4707_v22, %v10540_v10  ;;  %v4709_v29 = vpop.f32.mrb[169].mxu1  ;;  %6659 = vmatmul.mubr.bf16.gmra.mrb[4].mxu0 %v13173_v51  ;;  %v13176_v10 = vpack.c.bf16 %v10826_v42, %v10820_v5  ;;  %v13179_v22 = vld [vmem:[#allocation103_spill] sm:$0xff]  ;;  %v13180_v42 = vld [vmem:[#allocation109_spill] sm:$0xff] }
 0x494   :  { %v4710_v21 = vpop.f32.mrb[170].mxu1  ;;  %6662 = vmatprep.mubr.bf16.mxu0 %v13174_v31 }
 0x495   :  { %v10970_v19 = vadd.f32 %v4710_v21, %v10556_v7  ;;  %v4712_v49 = vpop.f32.mrb[171].mxu1  ;;  %v13178_v7 = vpack.c.bf16 %v10868_v41, %v10859_v35  ;;  %v13181_v35 = vld [vmem:[#allocation115_spill] sm:$0xff]  ;;  %vm4950_vm6 = vcmp.gt.f32.partialorder %v10965_v48, 0.0 }
 0x496   :  { %v4522_v27 = vpop.f32.mrb[156].mxu0  ;;  %v1184_v41 = vadd.f32 %v13181_v35, %v10430_v43 }
 0x497   :  { %v10974_v47 = vadd.f32 %v4522_v27, %v1174_v2  ;;  %v4524_v16 = vpop.f32.mrb[157].mxu0  ;;  %4922 = vmatmul.mubr.bf16.gmra.mrb[20].mxu1 %v13176_v10  ;;  %v1188_v2 = vadd.f32 %v13183_v0, %v10430_v43  ;;  %vm4951_vm7 = vcmp.gt.f32.partialorder %v10970_v19, 0.0 }
 0x498   :  { %v4525_v24 = vpop.f32.mrb[158].mxu0  ;;  %4929 = vmatprep.mubr.bf16.mxu1 %v13178_v7 }
 0x499   :  { %v10984_v63 = vadd.f32 %v4525_v24, %v1178_v44  ;;  %v4527_v23 = vpop.f32.mrb[159].mxu0  ;;  %v13184_v24 = vld [vmem:[#allocation113_spill] sm:$0xff] }
 0x49a   :  { %v4715_v55 = vpop.f32.mrb[172].mxu1 }
 0x49b   :  { %v10987_v28 = vadd.f32 %v4715_v55, %v10580_v26  ;;  %v4717_v56 = vpop.f32.mrb[173].mxu1  ;;  %6663 = vmatmul.mubr.bf16.gmra.mrb[8].mxu0 %v13179_v22  ;;  %v13182_v26 = vpack.c.bf16 %v10862_v11, %v10856_v50  ;;  %v13185_v11 = vld [vmem:[#allocation19_spill] sm:$0xff] }
 0x49c   :  { %v4718_v5 = vpop.f32.mrb[174].mxu1  ;;  %6666 = vmatprep.mubr.bf16.mxu0 %v13180_v42 }
 0x49d   :  { %v10992_v29 = vadd.f32 %v4718_v5, %v10596_v39  ;;  %v4720_v51 = vpop.f32.mrb[175].mxu1  ;;  %vm4952_vm8 = vcmp.gt.f32.partialorder %v10987_v28, 0.0 }
 0x49e   :  { %v4530_v21 = vpop.f32.mrb[160].mxu0 }
 0x49f   :  { %v10996_v31 = vadd.f32 %v4530_v21, %v1184_v41  ;;  %v4532_v49 = vpop.f32.mrb[161].mxu0  ;;  %4930 = vmatmul.mubr.bf16.gmra.mrb[24].mxu1 %v13182_v26  ;;  %v13188_v21 = vld [vmem:[#allocation21_spill] sm:$0xff]  ;;  %v13189_v26 = vld [vmem:[#allocation23_spill] sm:$0xff]  ;;  %vm4953_vm9 = vcmp.gt.f32.partialorder %v10992_v29, 0.0 }
 0x4a0   :  { %v4533_v27 = vpop.f32.mrb[162].mxu0  ;;  %4937 = vmatprep.mubr.bf16.mxu1 %v4111_v54 }
 0x4a1   :  { %v11006_v39 = vadd.f32 %v4533_v27, %v1188_v2  ;;  %v4535_v16 = vpop.f32.mrb[163].mxu0 }
 0x4a2   :  { %v4723_v10 = vpop.f32.mrb[176].mxu1 }
 0x4a3   :  { %v11009_v8 = vadd.f32 %v4723_v10, %v10620_v46  ;;  %v4725_v44 = vpop.f32.mrb[177].mxu1  ;;  %6667 = vmatmul.mubr.bf16.gmra.mrb[12].mxu0 %v13184_v24  ;;  %v13187_v46 = vld [vmem:[#allocation121_spill] sm:$0xff] }
 0x4a4   :  { %v4726_v50 = vpop.f32.mrb[178].mxu1  ;;  %6670 = vmatprep.mubr.bf16.mxu0 %v13185_v11  ;;  %v1198_v22 = vadd.f32 %v13187_v46, %v10430_v43 }
 0x4a5   :  { %v11014_v7 = vadd.f32 %v4726_v50, %v10636_v20  ;;  %v4728_v23 = vpop.f32.mrb[179].mxu1  ;;  %vm4954_vm10 = vcmp.gt.f32.partialorder %v11009_v8, 0.0 }
 0x4a6   :  { %v4538_v54 = vpop.f32.mrb[164].mxu0 }
 0x4a7   :  { %v11018_v55 = vadd.f32 %v4538_v54, %v1194_v9  ;;  %v4540_v56 = vpop.f32.mrb[165].mxu0  ;;  %4938 = vmatmul.mubr.bf16.gmra.mrb[28].mxu1 %v4110_v58  ;;  %v13190_v58 = vld [vmem:[#allocation123_spill] sm:$0xff]  ;;  %vm4955_vm11 = vcmp.gt.f32.partialorder %v11014_v7, 0.0 }
 0x4a8   :  { %v4541_v5 = vpop.f32.mrb[166].mxu0  ;;  %v1204_v0 = vadd.f32 %v13190_v58, %v10430_v43  ;;  %v13195_v54 = vld [vmem:[#allocation27_spill] sm:$0xff] }
 0x4a9   :  { %v11025_v42 = vadd.f32 %v4541_v5, %v1198_v22  ;;  %v4543_v20 = vpop.f32.mrb[167].mxu0  ;;  %v13196_v22 = vld [vmem:[#allocation127_spill] sm:$0xff] }
 0x4aa   :  { %v4731_v51 = vpop.f32.mrb[180].mxu1  ;;  %v1214_v5 = vadd.f32 %v13196_v22, %v10430_v43 }
 0x4ab   :  { %v11028_v35 = vadd.f32 %v4731_v51, %v10658_v57  ;;  %v4733_v41 = vpop.f32.mrb[181].mxu1  ;;  %6671 = vmatmul.mubr.bf16.gmra.mrb[16].mxu0 %v13188_v21  ;;  %v13192_v57 = vld [vmem:[#allocation125_spill] sm:$0xff] }
 0x4ac   :  { %v4734_v49 = vpop.f32.mrb[182].mxu1  ;;  %6674 = vmatprep.mubr.bf16.mxu0 %v13189_v26  ;;  %v1208_v10 = vadd.f32 %v13192_v57, %v10430_v43  ;;  %v13202_v57 = vld [vmem:[#allocation29_spill] sm:$0xff] }
 0x4ad   :  { %v11033_v13 = vadd.f32 %v4734_v49, %v10674_v38  ;;  %v4736_v32 = vpop.f32.mrb[183].mxu1  ;;  %v13199_v49 = vsub.s32 2, %v13043_v14  ;;  %vm4956_vm12 = vcmp.gt.f32.partialorder %v11028_v35, 0.0 }
 0x4ae   :  { %v4546_v2 = vpop.f32.mrb[168].mxu0 }
 0x4af   :  { %v11037_v27 = vadd.f32 %v4546_v2, %v1204_v0  ;;  %v4548_v16 = vpop.f32.mrb[169].mxu0  ;;  %v11060_v26 = vrot.slane %v10425_v34, %v13199_v49  ;;  %v13205_v34 = vld [vmem:[#allocation31_spill] sm:$0xff]  ;;  %v13210_v49 = vld [vmem:[#allocation133_spill] sm:$0xff]  ;;  %vm4957_vm13 = vcmp.gt.f32.partialorder %v11033_v13, 0.0 }
 0x4b0   :  { %v4549_v44 = vpop.f32.mrb[170].mxu0 }
 0x4b1   :  { %13191 = vst [vmem:[#allocation190_spill] sm:$0xff] %v11037_v27  ;;  %v11041_v24 = vadd.f32 %v4549_v44, %v1208_v10  ;;  %v4551_v50 = vpop.f32.mrb[171].mxu0  ;;  %13200 = vst [vmem:[#allocation344_spill] sm:$0xff] %v11060_v26  ;;  %v13203_v10 = vld [vmem:[#allocation34_spill] sm:$0xff] }
 0x4b2   :  { %v4739_v11 = vpop.f32.mrb[184].mxu1  ;;  %v1022_v44 = vadd.f32 %v13203_v10, %v11060_v26  ;;  %v13204_v50 = vld [vmem:[#allocation36_spill] sm:$0xff] }
 0x4b3   :  { %13193 = vst [vmem:[#allocation191_spill] sm:$0xff] %v11041_v24  ;;  %v11044_v23 = vadd.f32 %v4739_v11, %v10694_v37  ;;  %v4741_v38 = vpop.f32.mrb[185].mxu1  ;;  %6675 = vmatmul.mubr.bf16.gmra.mrb[20].mxu0 %v13194_v60  ;;  %v13198_v37 = vld [vmem:[#allocation129_spill] sm:$0xff]  ;;  %v1026_v11 = vadd.f32 %v13204_v50, %v11060_v26 }
 0x4b4   :  { %v4742_v9 = vpop.f32.mrb[186].mxu1  ;;  %6678 = vmatprep.mubr.bf16.mxu0 %v13195_v54  ;;  %v1218_v21 = vadd.f32 %v13198_v37, %v10430_v43  ;;  %v13206_v54 = vld [vmem:[#allocation131_spill] sm:$0xff] }
 0x4b5   :  { %v11049_v56 = vadd.f32 %v4742_v9, %v10710_v52  ;;  %v4744_v46 = vpop.f32.mrb[187].mxu1  ;;  %vm4958_vm14 = vcmp.gt.f32.partialorder %v11044_v23, 0.0 }
 0x4b6   :  { %v4554_v20 = vpop.f32.mrb[172].mxu0  ;;  %v13207_v46 = vld [vmem:[#allocation38_spill] sm:$0xff] }
 0x4b7   :  { %v11053_v51 = vadd.f32 %v4554_v20, %v1214_v5  ;;  %v4556_v41 = vpop.f32.mrb[173].mxu0  ;;  %v1032_v22 = vadd.f32 %v13207_v46, %v11060_v26  ;;  %v13208_v5 = vld [vmem:[#allocation41_spill] sm:$0xff]  ;;  %vm4959_vm15 = vcmp.gt.f32.partialorder %v11049_v56, 0.0 }
 0x4b8   :  { %v4557_v32 = vpop.f32.mrb[174].mxu0  ;;  %v1036_v20 = vadd.f32 %v13208_v5, %v11060_v26  ;;  %v13215_v5 = vld [vmem:[#allocation51_spill] sm:$0xff] }
 0x4b9   :  { %13197 = vst [vmem:[#allocation192_spill] sm:$0xff] %v11053_v51  ;;  %v11062_v58 = vadd.f32 %v4557_v32, %v1218_v21  ;;  %v4559_v52 = vpop.f32.mrb[175].mxu0  ;;  %v1228_v32 = vadd.f32 %v13210_v49, %v10430_v43 }
 0x4ba   :  { %v4747_v0 = vpop.f32.mrb[188].mxu1  ;;  %v1469_v52 = vmax.f32 %v1026_v11, 0.0  ;;  %v13214_v11 = vld [vmem:[#allocation48_spill] sm:$0xff] }
 0x4bb   :  { %13201 = vst [vmem:[#allocation193_spill] sm:$0xff] %v11062_v58  ;;  %v11065_v2 = vadd.f32 %v4747_v0, %v10730_v45  ;;  %v4749_v16 = vpop.f32.mrb[189].mxu1  ;;  %6679 = vmatmul.mubr.bf16.gmra.mrb[24].mxu0 %v13202_v57  ;;  %v1224_v45 = vadd.f32 %v13206_v54, %v10430_v43  ;;  %v1468_v0 = vmax.f32 %v1022_v44, 0.0  ;;  %v13213_v54 = vld [vmem:[#allocation46_spill] sm:$0xff]  ;;  %v1052_v46 = vadd.f32 %v13214_v11, %v11060_v26 }
 0x4bc   :  { %v4750_v38 = vpop.f32.mrb[190].mxu1  ;;  %6682 = vmatprep.mubr.bf16.mxu0 %v13205_v34  ;;  %v13211_v16 = vld [vmem:[#allocation44_spill] sm:$0xff]  ;;  %v1470_v34 = vmax.f32 %v1032_v22, 0.0 }
 0x4bd   :  { %v11074_v60 = vadd.f32 %v4750_v38, %v10746_v40  ;;  %v4752_v9 = vpop.f32.mrb[191].mxu1  ;;  %v1042_v57 = vadd.f32 %v13211_v16, %v11060_v26  ;;  %v11093_v38 = vld [vmem:[%s12380_s10] ss:$0 sm:$0xff]  ;;  %v13217_v16 = vld [vmem:[#allocation33_spill] sm:$0xff]  ;;  %v13218_v22 = vld [vmem:[#allocation56_spill] sm:$0xff]  ;;  %vm4960_vm0 = vcmp.gt.f32.partialorder %v11065_v2, 0.0 }
 0x4be   :  { %v4562_v41 = vpop.f32.mrb[176].mxu0  ;;  %v1471_v9 = vmax.f32 %v1036_v20, 0.0  ;;  %v1066_v20 = vadd.f32 %v13218_v22, %v11060_v26  ;;  %v11112_v14 = vmul.f32 %v11093_v38, %v1468_v0  ;;  %v13223_v22 = vld [vmem:[#allocation135_spill] sm:$0xff]  ;;  %v11125_v0 = vmul.f32 %v11093_v38, %v1470_v34 }
 0x4bf   :  { %v11082_v37 = vadd.f32 %v4562_v41, %v1224_v45  ;;  %v4564_v21 = vpop.f32.mrb[177].mxu0  ;;  %v1046_v45 = vadd.f32 %v13213_v54, %v11060_v26  ;;  %v1056_v41 = vadd.f32 %v13215_v5, %v11060_v26  ;;  %v11115_v5 = vmul.f32 %v11093_v38, %v1469_v52 }
 0x4c0   :  { %v4565_v40 = vpop.f32.mrb[178].mxu0  ;;  %v13216_v21 = vld [vmem:[#allocation54_spill] sm:$0xff]  ;;  %13220 = vst [vmem:[#allocation196_spill] sm:$0xff] %v11112_v14  ;;  %13224 = vst [vmem:[#allocation198_spill] sm:$0xff] %v11125_v0  ;;  %v11128_v52 = vmul.f32 %v11093_v38, %v1471_v9  ;;  %v13230_v9 = vld [vmem:[#allocation68_spill] sm:$0xff]  ;;  %vm4961_vm1 = vcmp.gt.f32.partialorder %v11074_v60, 0.0 }
 0x4c1   :  { %13209 = vst [vmem:[#allocation194_spill] sm:$0xff] %v11082_v37  ;;  %v11088_v10 = vadd.f32 %v4565_v40, %v1228_v32  ;;  %v4567_v50 = vpop.f32.mrb[179].mxu0  ;;  %v1062_v49 = vadd.f32 %v13216_v21, %v11060_v26  ;;  %13221 = vst [vmem:[#allocation197_spill] sm:$0xff] %v11115_v5  ;;  %v1472_v21 = vmax.f32 %v1042_v57, 0.0  ;;  %v1473_v37 = vmax.f32 %v1046_v45, 0.0  ;;  %v13228_v45 = vld [vmem:[#allocation64_spill] sm:$0xff] }
 0x4c2   :  { %v4755_v44 = vpop.f32.mrb[192].mxu1  ;;  %v13219_v50 = vld [vmem:[#allocation58_spill] sm:$0xff]  ;;  %13225 = vst [vmem:[#allocation199_spill] sm:$0xff] %v11128_v52  ;;  %v1475_v57 = vmax.f32 %v1056_v41, 0.0  ;;  %v1092_v41 = vadd.f32 %v13230_v9, %v11060_v26 }
 0x4c3   :  { %13212 = vst [vmem:[#allocation195_spill] sm:$0xff] %v11088_v10  ;;  %v11104_v32 = vadd.f32 %v4755_v44, %v10766_v17  ;;  %v4757_v40 = vpop.f32.mrb[193].mxu1  ;;  %6683 = vmatmul.mubr.bf16.gmra.mrb[28].mxu0 %v13217_v16  ;;  %v1072_v54 = vadd.f32 %v13219_v50, %v11060_v26  ;;  %v13222_v17 = vld [vmem:[#allocation61_spill] sm:$0xff]  ;;  %v1234_v10 = vadd.f32 %v13223_v22, %v10430_v43  ;;  %v1474_v50 = vmax.f32 %v1052_v46, 0.0  ;;  %v13229_v22 = vld [vmem:[#allocation66_spill] sm:$0xff] }
 0x4c4   :  { %v4758_v11 = vpop.f32.mrb[194].mxu1  ;;  %v1076_v44 = vadd.f32 %v13222_v17, %v11060_v26  ;;  %v1476_v5 = vmax.f32 %v1062_v49, 0.0  ;;  %v1082_v46 = vadd.f32 %v13228_v45, %v11060_v26  ;;  %v1086_v34 = vadd.f32 %v13229_v22, %v11060_v26 }
 0x4c5   :  { %v11120_v40 = vadd.f32 %v4758_v11, %v10782_v59  ;;  %v4760_v16 = vpop.f32.mrb[195].mxu1  ;;  %v13227_v59 = vld [vmem:[#allocation137_spill] sm:$0xff]  ;;  %v1478_v51 = vmax.f32 %v1072_v54, 0.0  ;;  %v11150_v22 = vmul.f32 %v11093_v38, %v1473_v37 }
 0x4c6   :  { %v4570_v58 = vpop.f32.mrb[180].mxu0  ;;  %v1238_v11 = vadd.f32 %v13227_v59, %v10430_v43  ;;  %v1477_v16 = vmax.f32 %v1066_v20, 0.0  ;;  %v1479_v24 = vmax.f32 %v1076_v44, 0.0  ;;  %v13233_v20 = vld [vmem:[#allocation71_spill] sm:$0xff]  ;;  %v11153_v44 = vmul.f32 %v11093_v38, %v1474_v50 }
 0x4c7   :  { %v11130_v14 = vadd.f32 %v4570_v58, %v1234_v10  ;;  %v4572_v17 = vpop.f32.mrb[181].mxu0  ;;  %v11143_v10 = vmul.f32 %v11093_v38, %v1472_v21  ;;  %v1096_v54 = vadd.f32 %v13233_v20, %v11060_v26  ;;  %13235 = vst [vmem:[#allocation203_spill] sm:$0xff] %v11150_v22  ;;  %v11164_v20 = vmul.f32 %v11093_v38, %v1476_v5 }
 0x4c8   :  { %v4573_v0 = vpop.f32.mrb[182].mxu0  ;;  %v13234_v17 = vld [vmem:[#allocation74_spill] sm:$0xff]  ;;  %13236 = vst [vmem:[#allocation204_spill] sm:$0xff] %v11153_v44  ;;  %v11167_v22 = vmul.f32 %v11093_v38, %v1477_v16  ;;  %v11170_v50 = vmul.f32 %v11093_v38, %v1478_v51  ;;  %v11178_v5 = vmul.f32 %v11093_v38, %v1479_v24  ;;  %v13245_v16 = vld [vmem:[#allocation81_spill] sm:$0xff] }
 0x4c9   :  { %13226 = vst [vmem:[#allocation200_spill] sm:$0xff] %v11130_v14  ;;  %v11140_v49 = vadd.f32 %v4573_v0, %v1238_v11  ;;  %v4575_v58 = vpop.f32.mrb[183].mxu0  ;;  %13232 = vst [vmem:[#allocation202_spill] sm:$0xff] %v11143_v10  ;;  %v1102_v59 = vadd.f32 %v13234_v17, %v11060_v26  ;;  %v13237_v0 = vld [vmem:[#allocation76_spill] sm:$0xff]  ;;  %v1480_v17 = vmax.f32 %v1082_v46, 0.0  ;;  %v1481_v10 = vmax.f32 %v1086_v34, 0.0 }
 0x4ca   :  { %v4763_v45 = vpop.f32.mrb[196].mxu1  ;;  %v1106_v11 = vadd.f32 %v13237_v0, %v11060_v26  ;;  %v11161_v58 = vmul.f32 %v11093_v38, %v1475_v57  ;;  %13239 = vst [vmem:[#allocation206_spill] sm:$0xff] %v11164_v20  ;;  %13240 = vst [vmem:[#allocation207_spill] sm:$0xff] %v11167_v22  ;;  %v1482_v0 = vmax.f32 %v1092_v41, 0.0  ;;  %v13242_v57 = vld [vmem:[#allocation139_spill] sm:$0xff]  ;;  %v1483_v46 = vmax.f32 %v1096_v54, 0.0 }
 0x4cb   :  { %13231 = vst [vmem:[#allocation201_spill] sm:$0xff] %v11140_v49  ;;  %v11158_v9 = vadd.f32 %v4763_v45, %v10802_v62  ;;  %v4765_v21 = vpop.f32.mrb[197].mxu1  ;;  %13241 = vst [vmem:[#allocation208_spill] sm:$0xff] %v11170_v50  ;;  %v13244_v34 = vld [vmem:[#allocation78_spill] sm:$0xff]  ;;  %v1116_v22 = vadd.f32 %v13245_v16, %v11060_v26  ;;  %v1484_v50 = vmax.f32 %v1102_v59, 0.0  ;;  %v11195_v16 = vmul.f32 %v11093_v38, %v1480_v17 }
 0x4cc   :  { %13238 = vst [vmem:[#allocation205_spill] sm:$0xff] %v11161_v58  ;;  %v4766_v37 = vpop.f32.mrb[198].mxu1  ;;  %v1244_v21 = vadd.f32 %v13242_v57, %v10430_v43  ;;  %13243 = vst [vmem:[#allocation209_spill] sm:$0xff] %v11178_v5  ;;  %v1112_v20 = vadd.f32 %v13244_v34, %v11060_v26  ;;  %v1485_v41 = vmax.f32 %v1106_v11, 0.0  ;;  %v13248_v57 = vld [vmem:[#allocation141_spill] sm:$0xff]  ;;  %v13249_v54 = vld [vmem:[#allocation86_spill] sm:$0xff]  ;;  %v11198_v59 = vmul.f32 %v11093_v38, %v1481_v10 }
 0x4cd   :  { %v11173_v62 = vadd.f32 %v4766_v37, %v10818_v53  ;;  %v4768_v45 = vpop.f32.mrb[199].mxu1  ;;  %v13246_v53 = vld [vmem:[#allocation84_spill] sm:$0xff]  ;;  %v1248_v24 = vadd.f32 %v13248_v57, %v10430_v43  ;;  %v1126_v5 = vadd.f32 %v13249_v54, %v11060_v26  ;;  %13251 = vst [vmem:[#allocation211_spill] sm:$0xff] %v11195_v16  ;;  %v13253_v11 = vld [vmem:[#allocation91_spill] sm:$0xff]  ;;  %v11207_v54 = vmul.f32 %v11093_v38, %v1482_v0 }
 0x4ce   :  { %v4578_v51 = vpop.f32.mrb[184].mxu0  ;;  %v1122_v37 = vadd.f32 %v13246_v53, %v11060_v26  ;;  %v13250_v34 = vld [vmem:[#allocation88_spill] sm:$0xff]  ;;  %13252 = vst [vmem:[#allocation212_spill] sm:$0xff] %v11198_v59  ;;  %v11210_v17 = vmul.f32 %v11093_v38, %v1484_v50  ;;  %v11213_v10 = vmul.f32 %v11093_v38, %v1483_v46  ;;  %v11221_v0 = vmul.f32 %v11093_v38, %v1485_v41 }
 0x4cf   :  { %v11186_v45 = vadd.f32 %v4578_v51, %v1244_v21  ;;  %v4580_v58 = vpop.f32.mrb[185].mxu0  ;;  %v1132_v44 = vadd.f32 %v13250_v34, %v11060_v26  ;;  %v1136_v21 = vadd.f32 %v13253_v11, %v11060_v26  ;;  %13256 = vst [vmem:[#allocation214_spill] sm:$0xff] %v11207_v54  ;;  %v1486_v34 = vmax.f32 %v1112_v20, 0.0  ;;  %v13259_v11 = vld [vmem:[#allocation96_spill] sm:$0xff] }
 0x4d0   :  { %v4581_v49 = vpop.f32.mrb[186].mxu0  ;;  %v13254_v58 = vld [vmem:[#allocation94_spill] sm:$0xff]  ;;  %13257 = vst [vmem:[#allocation215_spill] sm:$0xff] %v11210_v17  ;;  %13258 = vst [vmem:[#allocation216_spill] sm:$0xff] %v11213_v10  ;;  %v1488_v59 = vmax.f32 %v1122_v37, 0.0  ;;  %v1146_v16 = vadd.f32 %v13259_v11, %v11060_v26  ;;  %v1489_v20 = vmax.f32 %v1126_v5, 0.0 }
 0x4d1   :  { %13247 = vst [vmem:[#allocation210_spill] sm:$0xff] %v11186_v45  ;;  %v1142_v51 = vadd.f32 %v13254_v58, %v11060_v26  ;;  %v11204_v53 = vadd.f32 %v4581_v49, %v1248_v24  ;;  %v4583_v57 = vpop.f32.mrb[187].mxu0  ;;  %v1487_v45 = vmax.f32 %v1116_v22, 0.0  ;;  %v13260_v58 = vld [vmem:[#allocation188_spill] sm:$0xff]  ;;  %13261 = vst [vmem:[#allocation217_spill] sm:$0xff] %v11221_v0  ;;  %v1490_v22 = vmax.f32 %v1132_v44, 0.0 }
 0x4d2   :  { %v4771_v14 = vpop.f32.mrb[200].mxu1  ;;  %v13262_v57 = vld [vmem:[#allocation98_spill] sm:$0xff]  ;;  %v13263_v17 = vld [vmem:[#allocation101_spill] sm:$0xff]  ;;  %v1491_v37 = vmax.f32 %v1136_v21, 0.0  ;;  %v13265_v41 = vld [vmem:[#allocation104_spill] sm:$0xff]  ;;  %v11250_v27 = vmul.f32 %v11093_v38, %v1489_v20 }
 0x4d3   :  { %13255 = vst [vmem:[#allocation213_spill] sm:$0xff] %v11204_v53  ;;  %v11218_v49 = vadd.f32 %v4771_v14, %v13260_v58  ;;  %v4773_v24 = vpop.f32.mrb[201].mxu1  ;;  %v1152_v50 = vadd.f32 %v13262_v57, %v11060_v26  ;;  %v1156_v46 = vadd.f32 %v13263_v17, %v11060_v26  ;;  %v1492_v54 = vmax.f32 %v1142_v51, 0.0  ;;  %v13264_v58 = vld [vmem:[#allocation143_spill] sm:$0xff]  ;;  %v13266_v44 = vld [vmem:[#allocation106_spill] sm:$0xff] }
 0x4d4   :  { %v4774_v10 = vpop.f32.mrb[202].mxu1  ;;  %v1254_v24 = vadd.f32 %v13264_v58, %v10430_v43  ;;  %v1162_v5 = vadd.f32 %v13265_v41, %v11060_v26  ;;  %v1166_v0 = vadd.f32 %v13266_v44, %v11060_v26  ;;  %v11237_v53 = vmul.f32 %v11093_v38, %v1486_v34  ;;  %13272 = vst [vmem:[#allocation222_spill] sm:$0xff] %v11250_v27  ;;  %v13278_v20 = vld [vmem:[#allocation111_spill] sm:$0xff] }
 0x4d5   :  { %v11228_v11 = vadd.f32 %v4774_v10, %v10854_v61  ;;  %v4776_v14 = vpop.f32.mrb[203].mxu1  ;;  %v11240_v21 = vmul.f32 %v11093_v38, %v1487_v45  ;;  %v1493_v51 = vmax.f32 %v1146_v16, 0.0  ;;  %v13270_v10 = vld [vmem:[#allocation145_spill] sm:$0xff]  ;;  %v11247_v58 = vmul.f32 %v11093_v38, %v1488_v59  ;;  %v13274_v45 = vld [vmem:[#allocation108_spill] sm:$0xff] }
 0x4d6   :  { %v4586_v57 = vpop.f32.mrb[188].mxu0  ;;  %13267 = vst [vmem:[#allocation218_spill] sm:$0xff] %v11237_v53  ;;  %v1258_v14 = vadd.f32 %v13270_v10, %v10430_v43  ;;  %v1494_v41 = vmax.f32 %v1152_v50, 0.0  ;;  %v1495_v52 = vmax.f32 %v1156_v46, 0.0  ;;  %v11253_v34 = vmul.f32 %v11093_v38, %v1490_v22  ;;  %v13279_v22 = vld [vmem:[#allocation114_spill] sm:$0xff] }
 0x4d7   :  { %13268 = vst [vmem:[#allocation219_spill] sm:$0xff] %v11240_v21  ;;  %v11242_v61 = vadd.f32 %v4586_v57, %v1254_v24  ;;  %v4588_v17 = vpop.f32.mrb[189].mxu0  ;;  %13271 = vst [vmem:[#allocation221_spill] sm:$0xff] %v11247_v58  ;;  %v1172_v16 = vadd.f32 %v13274_v45, %v11060_v26  ;;  %v11263_v59 = vmul.f32 %v11093_v38, %v1492_v54  ;;  %v1496_v50 = vmax.f32 %v1162_v5, 0.0  ;;  %v13280_v45 = vld [vmem:[#allocation116_spill] sm:$0xff] }
 0x4d8   :  { %v4589_v44 = vpop.f32.mrb[190].mxu0  ;;  %13273 = vst [vmem:[#allocation223_spill] sm:$0xff] %v11253_v34  ;;  %v11260_v17 = vmul.f32 %v11093_v38, %v1491_v37  ;;  %v1497_v46 = vmax.f32 %v1166_v0, 0.0  ;;  %v1176_v10 = vadd.f32 %v13278_v20, %v11060_v26  ;;  %v1182_v27 = vadd.f32 %v13279_v22, %v11060_v26  ;;  %v13282_v37 = vld [vmem:[#allocation189_spill] sm:$0xff]  ;;  %v13284_v0 = vld [vmem:[#allocation120_spill] sm:$0xff] }
 0x4d9   :  { %13269 = vst [vmem:[#allocation220_spill] sm:$0xff] %v11242_v61  ;;  %v11257_v24 = vadd.f32 %v4589_v44, %v1258_v14  ;;  %v4591_v57 = vpop.f32.mrb[191].mxu0  ;;  %13277 = vst [vmem:[#allocation226_spill] sm:$0xff] %v11263_v59  ;;  %v1186_v14 = vadd.f32 %v13280_v45, %v11060_v26  ;;  %v13281_v44 = vld [vmem:[#allocation118_spill] sm:$0xff]  ;;  %v11277_v5 = vmul.f32 %v11093_v38, %v1493_v51 }
 0x4da   :  { %13276 = vst [vmem:[#allocation225_spill] sm:$0xff] %v11260_v17  ;;  %v4779_v34 = vpop.f32.mrb[204].mxu1  ;;  %v1192_v57 = vadd.f32 %v13281_v44, %v11060_v26  ;;  %v1196_v20 = vadd.f32 %v13284_v0, %v11060_v26  ;;  %v13285_v59 = vld [vmem:[#allocation122_spill] sm:$0xff]  ;;  %v11284_v21 = vmul.f32 %v11093_v38, %v1494_v41  ;;  %v11287_v45 = vmul.f32 %v11093_v38, %v1495_v52  ;;  %v13290_v0 = vld [vmem:[#allocation147_spill] sm:$0xff] }
 0x4db   :  { %13275 = vst [vmem:[#allocation224_spill] sm:$0xff] %v11257_v24  ;;  %v11274_v17 = vadd.f32 %v4779_v34, %v13282_v37  ;;  %v4781_v54 = vpop.f32.mrb[205].mxu1  ;;  %13283 = vst [vmem:[#allocation227_spill] sm:$0xff] %v11277_v5  ;;  %v1202_v22 = vadd.f32 %v13285_v59, %v11060_v26  ;;  %v1498_v44 = vmax.f32 %v1172_v16, 0.0  ;;  %v13288_v34 = vld [vmem:[#allocation124_spill] sm:$0xff]  ;;  %v1264_v5 = vadd.f32 %v13290_v0, %v10430_v43 }
 0x4dc   :  { %v4782_v58 = vpop.f32.mrb[206].mxu1  ;;  %13286 = vst [vmem:[#allocation228_spill] sm:$0xff] %v11284_v21  ;;  %13287 = vst [vmem:[#allocation229_spill] sm:$0xff] %v11287_v45  ;;  %v1206_v37 = vadd.f32 %v13288_v34, %v11060_v26  ;;  %v1499_v53 = vmax.f32 %v1176_v10, 0.0  ;;  %v1500_v59 = vmax.f32 %v1182_v27, 0.0  ;;  %v11297_v41 = vmul.f32 %v11093_v38, %v1496_v50  ;;  %v13295_v10 = vld [vmem:[#allocation126_spill] sm:$0xff] }
 0x4dd   :  { %v11292_v51 = vadd.f32 %v4782_v58, %v10890_v4  ;;  %v4784_v54 = vpop.f32.mrb[207].mxu1  ;;  %v11300_v52 = vmul.f32 %v11093_v38, %v1497_v46  ;;  %v1501_v16 = vmax.f32 %v1186_v14, 0.0  ;;  %v1502_v45 = vmax.f32 %v1192_v57, 0.0  ;;  %v13294_v4 = vld [vmem:[#allocation149_spill] sm:$0xff]  ;;  %v13296_v0 = vld [vmem:[#allocation128_spill] sm:$0xff]  ;;  %v13297_v46 = vld [vmem:[#allocation130_spill] sm:$0xff] }
 0x4de   :  { %v4594_v24 = vpop.f32.mrb[192].mxu0  ;;  %13291 = vst [vmem:[#allocation231_spill] sm:$0xff] %v11297_v41  ;;  %v1268_v58 = vadd.f32 %v13294_v4, %v10430_v43  ;;  %v1503_v54 = vmax.f32 %v1196_v20, 0.0  ;;  %v1504_v61 = vmax.f32 %v1202_v22, 0.0  ;;  %v1212_v27 = vadd.f32 %v13295_v10, %v11060_v26  ;;  %v13300_v20 = vld [vmem:[#allocation132_spill] sm:$0xff] }
 0x4df   :  { %13289 = vst [vmem:[#allocation230_spill] sm:$0xff] %v11292_v51  ;;  %13292 = vst [vmem:[#allocation232_spill] sm:$0xff] %v11300_v52  ;;  %v11302_v21 = vadd.f32 %v4594_v24, %v1264_v5  ;;  %v4596_v34 = vpop.f32.mrb[193].mxu0  ;;  %v1216_v50 = vadd.f32 %v13296_v0, %v11060_v26  ;;  %v1505_v51 = vmax.f32 %v1206_v37, 0.0  ;;  %v1222_v14 = vadd.f32 %v13297_v46, %v11060_v26 }
 0x4e0   :  { %v4597_v41 = vpop.f32.mrb[194].mxu0  ;;  %v11315_v5 = vmul.f32 %v11093_v38, %v1498_v44  ;;  %v1226_v22 = vadd.f32 %v13300_v20, %v11060_v26  ;;  %v13301_v34 = vld [vmem:[#allocation134_spill] sm:$0xff]  ;;  %v11322_v0 = vmul.f32 %v11093_v38, %v1500_v59  ;;  %v11325_v37 = vmul.f32 %v11093_v38, %v1499_v53 }
 0x4e1   :  { %13293 = vst [vmem:[#allocation233_spill] sm:$0xff] %v11302_v21  ;;  %v11312_v57 = vadd.f32 %v4597_v41, %v1268_v58  ;;  %v4599_v24 = vpop.f32.mrb[195].mxu0  ;;  %v1232_v4 = vadd.f32 %v13301_v34, %v11060_v26  ;;  %v13304_v41 = vld [vmem:[#allocation136_spill] sm:$0xff]  ;;  %v11336_v20 = vmul.f32 %v11093_v38, %v1502_v45  ;;  %v1506_v34 = vmax.f32 %v1212_v27, 0.0 }
 0x4e2   :  { %13299 = vst [vmem:[#allocation235_spill] sm:$0xff] %v11315_v5  ;;  %v4787_v10 = vpop.f32.mrb[208].mxu1  ;;  %13302 = vst [vmem:[#allocation236_spill] sm:$0xff] %v11322_v0  ;;  %v1236_v58 = vadd.f32 %v13304_v41, %v11060_v26  ;;  %v11333_v24 = vmul.f32 %v11093_v38, %v1501_v16  ;;  %v1507_v5 = vmax.f32 %v1216_v50, 0.0  ;;  %v11339_v0 = vmul.f32 %v11093_v38, %v1503_v54  ;;  %v13309_v16 = vld [vmem:[#allocation151_spill] sm:$0xff] }
 0x4e3   :  { %13298 = vst [vmem:[#allocation234_spill] sm:$0xff] %v11312_v57  ;;  %13303 = vst [vmem:[#allocation237_spill] sm:$0xff] %v11325_v37  ;;  %v11330_v46 = vadd.f32 %v4787_v10, %v10906_v36  ;;  %v4789_v44 = vpop.f32.mrb[209].mxu1  ;;  %v11342_v53 = vmul.f32 %v11093_v38, %v1504_v61  ;;  %v1508_v41 = vmax.f32 %v1222_v14, 0.0  ;;  %v11350_v45 = vmul.f32 %v11093_v38, %v1505_v51 }
 0x4e4   :  { %13305 = vst [vmem:[#allocation238_spill] sm:$0xff] %v11333_v24  ;;  %13306 = vst [vmem:[#allocation239_spill] sm:$0xff] %v11336_v20  ;;  %v4790_v59 = vpop.f32.mrb[210].mxu1  ;;  %v1274_v44 = vadd.f32 %v13309_v16, %v10430_v43  ;;  %v1509_v27 = vmax.f32 %v1226_v22, 0.0  ;;  %v1510_v50 = vmax.f32 %v1232_v4, 0.0  ;;  %v13311_v24 = vld [vmem:[#allocation138_spill] sm:$0xff] }
 0x4e5   :  { %13307 = vst [vmem:[#allocation240_spill] sm:$0xff] %v11339_v0  ;;  %13308 = vst [vmem:[#allocation241_spill] sm:$0xff] %v11342_v53  ;;  %v11345_v36 = vadd.f32 %v4790_v59, %v10918_v6  ;;  %v4792_v10 = vpop.f32.mrb[211].mxu1  ;;  %v1242_v54 = vadd.f32 %v13311_v24, %v11060_v26  ;;  %v13312_v0 = vld [vmem:[#allocation140_spill] sm:$0xff]  ;;  %v1511_v14 = vmax.f32 %v1236_v58, 0.0  ;;  %v13313_v6 = vld [vmem:[#allocation142_spill] sm:$0xff]  ;;  %v11370_v58 = vmul.f32 %v11093_v38, %v1507_v5 }
 0x4e6   :  { %13310 = vst [vmem:[#allocation242_spill] sm:$0xff] %v11350_v45  ;;  %v1246_v61 = vadd.f32 %v13312_v0, %v11060_v26  ;;  %v4602_v53 = vpop.f32.mrb[196].mxu0  ;;  %v1252_v59 = vadd.f32 %v13313_v6, %v11060_v26  ;;  %v13315_v16 = vld [vmem:[#allocation153_spill] sm:$0xff]  ;;  %v13316_v22 = vld [vmem:[#allocation144_spill] sm:$0xff]  ;;  %v13317_v45 = vld [vmem:[#allocation146_spill] sm:$0xff]  ;;  %v11367_v0 = vmul.f32 %v11093_v38, %v1506_v34  ;;  %v11382_v34 = vmul.f32 %v11093_v38, %v1509_v27 }
 0x4e7   :  { %v11358_v10 = vadd.f32 %v4602_v53, %v1274_v44  ;;  %v4604_v20 = vpop.f32.mrb[197].mxu0  ;;  %v1278_v51 = vadd.f32 %v13315_v16, %v10430_v43  ;;  %v1256_v4 = vadd.f32 %v13316_v22, %v11060_v26  ;;  %v1262_v24 = vadd.f32 %v13317_v45, %v11060_v26  ;;  %13319 = vst [vmem:[#allocation245_spill] sm:$0xff] %v11370_v58  ;;  %v13320_v53 = vld [vmem:[#allocation148_spill] sm:$0xff] }
 0x4e8   :  { %v4605_v37 = vpop.f32.mrb[198].mxu0  ;;  %13318 = vst [vmem:[#allocation244_spill] sm:$0xff] %v11367_v0  ;;  %v1266_v44 = vadd.f32 %v13320_v53, %v11060_v26  ;;  %v13321_v20 = vld [vmem:[#allocation150_spill] sm:$0xff]  ;;  %v11379_v22 = vmul.f32 %v11093_v38, %v1508_v41  ;;  %v1512_v45 = vmax.f32 %v1242_v54, 0.0  ;;  %13324 = vst [vmem:[#allocation248_spill] sm:$0xff] %v11382_v34  ;;  %v11385_v5 = vmul.f32 %v11093_v38, %v1510_v50  ;;  %v13326_v53 = vld [vmem:[#allocation152_spill] sm:$0xff] }
 0x4e9   :  { %13314 = vst [vmem:[#allocation243_spill] sm:$0xff] %v11358_v10  ;;  %v1272_v6 = vadd.f32 %v13321_v20, %v11060_v26  ;;  %v11376_v16 = vadd.f32 %v4605_v37, %v1278_v51  ;;  %v4607_v52 = vpop.f32.mrb[199].mxu0  ;;  %v1513_v10 = vmax.f32 %v1246_v61, 0.0  ;;  %v1514_v58 = vmax.f32 %v1252_v59, 0.0  ;;  %v13328_v51 = vld [vmem:[#allocation154_spill] sm:$0xff]  ;;  %v13329_v20 = vld [vmem:[#allocation156_spill] sm:$0xff] }
 0x4ea   :  { %13323 = vst [vmem:[#allocation247_spill] sm:$0xff] %v11379_v22  ;;  %v4795_v57 = vpop.f32.mrb[212].mxu1  ;;  %13325 = vst [vmem:[#allocation249_spill] sm:$0xff] %v11385_v5  ;;  %v1276_v0 = vadd.f32 %v13326_v53, %v11060_v26  ;;  %v11393_v41 = vmul.f32 %v11093_v38, %v1511_v14  ;;  %v1515_v54 = vmax.f32 %v1256_v4, 0.0  ;;  %v1516_v61 = vmax.f32 %v1262_v24, 0.0  ;;  %v13331_v14 = vld [vmem:[#allocation158_spill] sm:$0xff] }
 0x4eb   :  { %13322 = vst [vmem:[#allocation246_spill] sm:$0xff] %v11376_v16  ;;  %v11390_v37 = vadd.f32 %v4795_v57, %v10930_v18  ;;  %v4797_v52 = vpop.f32.mrb[213].mxu1  ;;  %v1282_v27 = vadd.f32 %v13328_v51, %v11060_v26  ;;  %v1286_v50 = vadd.f32 %v13329_v20, %v11060_v26  ;;  %v1517_v59 = vmax.f32 %v1266_v44, 0.0  ;;  %v13330_v57 = vld [vmem:[#allocation155_spill] sm:$0xff]  ;;  %v13332_v24 = vld [vmem:[#allocation160_spill] sm:$0xff] }
 0x4ec   :  { %13327 = vst [vmem:[#allocation250_spill] sm:$0xff] %v11393_v41  ;;  %v4798_v34 = vpop.f32.mrb[214].mxu1  ;;  %v1518_v5 = vmax.f32 %v1272_v6, 0.0  ;;  %v1284_v52 = vadd.f32 %v13330_v57, %v10430_v43  ;;  %v1292_v4 = vadd.f32 %v13331_v14, %v11060_v26  ;;  %v1296_v41 = vadd.f32 %v13332_v24, %v11060_v26 }
 0x4ed   :  { %v11400_v53 = vadd.f32 %v4798_v34, %v10940_v33  ;;  %v4800_v18 = vpop.f32.mrb[215].mxu1  ;;  %v11409_v22 = vmul.f32 %v11093_v38, %v1512_v45  ;;  %v11412_v44 = vmul.f32 %v11093_v38, %v1513_v10  ;;  %v1519_v6 = vmax.f32 %v1276_v0, 0.0 }
 0x4ee   :  { %v4610_v51 = vpop.f32.mrb[200].mxu0  ;;  %v5010_v33 = vmin.f32 %v10921_v12, 0.0  ;;  %v13336_v18 = vld [vmem:[#allocation157_spill] sm:$0xff]  ;;  %v1520_v14 = vmax.f32 %v1282_v27, 0.0  ;;  %v1521_v16 = vmax.f32 %v1286_v50, 0.0  ;;  %v11420_v24 = vmul.f32 %v11093_v38, %v1514_v58  ;;  %v13343_v58 = vld [vmem:[#allocation162_spill] sm:$0xff] }
 0x4ef   :  { %13333 = vst [vmem:[#allocation251_spill] sm:$0xff] %v11409_v22  ;;  %13334 = vst [vmem:[#allocation252_spill] sm:$0xff] %v11412_v44  ;;  %v11415_v34 = vadd.f32 %v4610_v51, %v1284_v52  ;;  %v4612_v20 = vpop.f32.mrb[201].mxu0  ;;  %v1288_v57 = vadd.f32 %v13336_v18, %v10430_v43  ;;  %v11423_v45 = vmul.f32 %v11093_v38, %v1515_v54  ;;  %v1522_v27 = vmax.f32 %v1292_v4, 0.0  ;;  %v13344_v54 = vld [vmem:[#allocation164_spill] sm:$0xff]  ;;  %v13347_v4 = vld [vmem:[#allocation169_spill] sm:$0xff] }
 0x4f0   :  { %v4613_v21 = vpop.f32.mrb[202].mxu0  ;;  %13337 = vst [vmem:[#allocation254_spill] sm:$0xff] %v11420_v24  ;;  %v11428_v44 = vmul.f32 %v11093_v38, %v1516_v61  ;;  %v11431_v52 = vmul.f32 %v11093_v38, %v1517_v59  ;;  %v11434_v51 = vmul.f32 %v11093_v38, %v1518_v5  ;;  %v1523_v50 = vmax.f32 %v1296_v41, 0.0  ;;  %v13346_v5 = vld [vmem:[#allocation167_spill] sm:$0xff] }
 0x4f1   :  { %13335 = vst [vmem:[#allocation253_spill] sm:$0xff] %v11415_v34  ;;  %13338 = vst [vmem:[#allocation255_spill] sm:$0xff] %v11423_v45  ;;  %v11425_v10 = vadd.f32 %v4613_v21, %v1288_v57  ;;  %v4615_v0 = vpop.f32.mrb[203].mxu0  ;;  %v1302_v20 = vadd.f32 %v13343_v58, %v11060_v26  ;;  %v1306_v18 = vadd.f32 %v13344_v54, %v11060_v26  ;;  %v5074_v57 = vmul.f32 1.442695, %v5010_v33 }
 0x4f2   :  { %13340 = vst [vmem:[#allocation257_spill] sm:$0xff] %v11428_v44  ;;  %13341 = vst [vmem:[#allocation258_spill] sm:$0xff] %v11431_v52  ;;  %v4803_v21 = vpop.f32.mrb[216].mxu1  ;;  %v5011_v0 = vmin.f32 %v10926_v3, 0.0  ;;  %v11445_v52 = vmul.f32 %v11093_v38, %v1519_v6  ;;  %v1312_v41 = vadd.f32 %v13346_v5, %v11060_v26  ;;  %v1316_v58 = vadd.f32 %v13347_v4, %v11060_v26  ;;  %v13351_v5 = vld [vmem:[#allocation161_spill] sm:$0xff] }
 0x4f3   :  { %13339 = vst [vmem:[#allocation256_spill] sm:$0xff] %v11425_v10  ;;  %13342 = vst [vmem:[#allocation259_spill] sm:$0xff] %v11434_v51  ;;  %v11442_v61 = vadd.f32 %v4803_v21, %v10952_v1  ;;  %v4805_v59 = vpop.f32.mrb[217].mxu1  ;;  %v11452_v54 = vmul.f32 %v11093_v38, %v1520_v14  ;;  %v11455_v33 = vmul.f32 %v11093_v38, %v1521_v16  ;;  %v5012_v1 = vmin.f32 %v10943_v25, 0.0 }
 0x4f4   :  { %13345 = vst [vmem:[#allocation260_spill] sm:$0xff] %v11445_v52  ;;  %v4806_v44 = vpop.f32.mrb[218].mxu1  ;;  %v13350_v59 = vld [vmem:[#allocation159_spill] sm:$0xff]  ;;  %v1298_v51 = vadd.f32 %v13351_v5, %v10430_v43  ;;  %v1524_v4 = vmax.f32 %v1302_v20, 0.0  ;;  %v1525_v45 = vmax.f32 %v1306_v18, 0.0  ;;  %v11466_v14 = vmul.f32 %v11093_v38, %v1522_v27 }
 0x4f5   :  { %13348 = vst [vmem:[#allocation261_spill] sm:$0xff] %v11452_v54  ;;  %13349 = vst [vmem:[#allocation262_spill] sm:$0xff] %v11455_v33  ;;  %v11459_v21 = vadd.f32 %v4806_v44, %v10962_v15  ;;  %v4808_v6 = vpop.f32.mrb[219].mxu1  ;;  %v1294_v52 = vadd.f32 %v13350_v59, %v10430_v43  ;;  %v11469_v16 = vmul.f32 %v11093_v38, %v1523_v50  ;;  %6918 = vpow2.f32 %v5074_v57  ;;  %v13355_v18 = vld [vmem:[#allocation163_spill] sm:$0xff] }
 0x4f6   :  { %v4618_v24 = vpop.f32.mrb[204].mxu0  ;;  %13352 = vst [vmem:[#allocation263_spill] sm:$0xff] %v11466_v14  ;;  %v5076_v33 = vmul.f32 1.442695, %v5011_v0  ;;  %v5013_v15 = vmin.f32 %v10948_v30, 0.0  ;;  %v1526_v59 = vmax.f32 %v1312_v41, 0.0  ;;  %v1304_v22 = vadd.f32 %v13355_v18, %v10430_v43 }
 0x4f7   :  { %13353 = vst [vmem:[#allocation264_spill] sm:$0xff] %v11469_v16  ;;  %v11472_v44 = vadd.f32 %v4618_v24, %v1294_v52  ;;  %v4620_v6 = vpop.f32.mrb[205].mxu0  ;;  %v1527_v54 = vmax.f32 %v1316_v58, 0.0  ;;  %v5014_v5 = vmin.f32 %v10965_v48, 0.0  ;;  %v5078_v27 = vmul.f32 1.442695, %v5012_v1 }
 0x4f8   :  { %v4621_v20 = vpop.f32.mrb[206].mxu0  ;;  %v5015_v14 = vmin.f32 %v10970_v19, 0.0  ;;  %v13357_v0 = vld [vmem:[#allocation165_spill] sm:$0xff]  ;;  %v5016_v24 = vmin.f32 %v10987_v28, 0.0  ;;  %v13358_v41 = vld [vmem:[#allocation168_spill] sm:$0xff]  ;;  %v11488_v6 = vmul.f32 %v11093_v38, %v1524_v4  ;;  %v11491_v1 = vmul.f32 %v11093_v38, %v1525_v45 }
 0x4f9   :  { %13354 = vst [vmem:[#allocation265_spill] sm:$0xff] %v11472_v44  ;;  %v11478_v50 = vadd.f32 %v4621_v20, %v1298_v51  ;;  %v4623_v57 = vpop.f32.mrb[207].mxu0  ;;  %v1308_v16 = vadd.f32 %v13357_v0, %v10430_v43  ;;  %v11485_v58 = vadd.f32 %v13358_v41, %v10430_v43  ;;  %6920 = vpow2.f32 %v5076_v33  ;;  %v13361_v44 = vld [vmem:[#allocation170_spill] sm:$0xff] }
 0x4fa   :  { %v4811_v52 = vpop.f32.mrb[220].mxu1  ;;  %13359 = vst [vmem:[#allocation267_spill] sm:$0xff] %v11488_v6  ;;  %13360 = vst [vmem:[#allocation268_spill] sm:$0xff] %v11491_v1  ;;  %v5080_v51 = vmul.f32 1.442695, %v5013_v15  ;;  %v5017_v20 = vmin.f32 %v10992_v29, 0.0  ;;  %v11499_v41 = vadd.f32 %v13361_v44, %v10430_v43  ;;  %v11502_v4 = vmul.f32 %v11093_v38, %v1526_v59 }
 0x4fb   :  { %13356 = vst [vmem:[#allocation266_spill] sm:$0xff] %v11478_v50  ;;  %v11495_v18 = vadd.f32 %v4811_v52, %v10974_v47  ;;  %v4813_v57 = vpop.f32.mrb[221].mxu1  ;;  %v5082_v0 = vmul.f32 1.442695, %v5014_v5  ;;  %v11505_v45 = vmul.f32 %v11093_v38, %v1527_v54  ;;  %6922 = vpow2.f32 %v5078_v27  ;;  %v13364_v5 = vld [vmem:[#allocation175_spill] sm:$0xff]  ;;  %v13366_v6 = vld [vmem:[#allocation176_spill] sm:$0xff] }
 0x4fc   :  { %v4814_v50 = vpop.f32.mrb[222].mxu1  ;;  %13362 = vst [vmem:[#allocation269_spill] sm:$0xff] %v11502_v4  ;;  %v5084_v33 = vmul.f32 1.442695, %v5015_v14  ;;  %v5018_v15 = vmin.f32 %v11009_v8, 0.0  ;;  %v11513_v57 = vadd.f32 %v13364_v5, %v11060_v26  ;;  %v5019_v1 = vmin.f32 %v11014_v7, 0.0 }
 0x4fd   :  { %13363 = vst [vmem:[#allocation270_spill] sm:$0xff] %v11505_v45  ;;  %v11509_v47 = vadd.f32 %v4814_v50, %v10984_v63  ;;  %v4816_v52 = vpop.f32.mrb[223].mxu1  ;;  %v5086_v44 = vmul.f32 1.442695, %v5016_v24  ;;  %v11518_v38 = vadd.f32 %v13366_v6, %v10430_v43  ;;  %6924 = vpow2.f32 %v5080_v51  ;;  %v13368_v63 = vld [vmem:[#allocation178_spill] sm:$0xff]  ;;  %v13371_v6 = vld [vmem:[#allocation184_spill] sm:$0xff] }
 0x4fe   :  { %13365 = vst [vmem:[#allocation271_spill] sm:$0xff] %v11513_v57  ;;  %v4626_v59 = vpop.f32.mrb[208].mxu0  ;;  %v5088_v54 = vmul.f32 1.442695, %v5017_v20  ;;  %v11524_v50 = vadd.f32 %v13368_v63, %v10430_v43  ;;  %v13369_v52 = vld [vmem:[#allocation183_spill] sm:$0xff]  ;;  %6926 = vpow2.f32 %v5082_v0  ;;  %v5020_v24 = vmin.f32 %v11028_v35, 0.0 }
 0x4ff   :  { %v11520_v14 = vadd.f32 %v4626_v59, %v1304_v22  ;;  %v4628_v27 = vpop.f32.mrb[209].mxu0  ;;  %v11528_v5 = vadd.f32 %v13369_v52, %v11060_v26  ;;  %v11533_v4 = vadd.f32 %v13371_v6, %v10430_v43  ;;  %v6919_v51 = vpop.eup %6918  ;;  %6928 = vpow2.f32 %v5084_v33 }
 0x500   :  { %v4629_v45 = vpop.f32.mrb[210].mxu0  ;;  %v5090_v22 = vmul.f32 1.442695, %v5018_v15  ;;  %v5021_v20 = vmin.f32 %v11033_v13, 0.0  ;;  %6930 = vpow2.f32 %v5086_v44  ;;  %v5092_v63 = vmul.f32 1.442695, %v5019_v1 }
 0x501   :  { %13367 = vst [vmem:[#allocation272_spill] sm:$0xff] %v11520_v14  ;;  %13370 = vst [vmem:[#allocation273_spill] sm:$0xff] %v11528_v5  ;;  %v11536_v59 = vadd.f32 %v4629_v45, %v1308_v16  ;;  %v4631_v27 = vpop.f32.mrb[211].mxu0  ;;  %v5022_v52 = vmin.f32 %v11044_v23, 0.0  ;;  %v13373_v5 = vld [vmem:[#allocation186_spill] sm:$0xff]  ;;  %6932 = vpow2.f32 %v5088_v54  ;;  %v5023_v33 = vmin.f32 %v11049_v56, 0.0 }
 0x502   :  { %v4819_v0 = vpop.f32.mrb[224].mxu1  ;;  %v11541_v26 = vadd.f32 %v13373_v5, %v10430_v43  ;;  %v5094_v45 = vmul.f32 1.442695, %v5020_v24  ;;  %v5024_v1 = vmin.f32 %v11065_v2, 0.0  ;;  %v6492_v6 = vadd.f32 -1.0, %v6919_v51 }
 0x503   :  { %13372 = vst [vmem:[#allocation274_spill] sm:$0xff] %v11536_v59  ;;  %v11546_v15 = vadd.f32 %v4819_v0, %v10996_v31  ;;  %v4821_v16 = vpop.f32.mrb[225].mxu1  ;;  %v6921_v27 = vpop.eup %6920  ;;  %6934 = vpow2.f32 %v5090_v22  ;;  %v5096_v43 = vmul.f32 1.442695, %v5021_v20  ;;  %v5025_v5 = vmin.f32 %v11074_v60, 0.0 }
 0x504   :  { %v4822_v44 = vpop.f32.mrb[226].mxu1  ;;  %6936 = vpow2.f32 %v5092_v63  ;;  %v5098_v31 = vmul.f32 1.442695, %v5022_v52  ;;  %v5026_v0 = vmin.f32 %v11104_v32, 0.0  ;;  %v5100_v51 = vmul.f32 1.442695, %v5023_v33 }
 0x505   :  { %v11552_v54 = vadd.f32 %v4822_v44, %v11006_v39  ;;  %v4824_v57 = vpop.f32.mrb[227].mxu1  ;;  %v6923_v16 = vpop.eup %6922  ;;  %v5027_v22 = vmin.f32 %v11120_v40, 0.0  ;;  %6938 = vpow2.f32 %v5094_v45  ;;  %v5102_v39 = vmul.f32 1.442695, %v5024_v1 }
 0x506   :  { %v4634_v24 = vpop.f32.mrb[212].mxu0  ;;  %v6493_v63 = vadd.f32 -1.0, %v6921_v27  ;;  %6940 = vpow2.f32 %v5096_v43  ;;  %v5104_v44 = vmul.f32 1.442695, %v5025_v5  ;;  %v11568_v33 = vsel %vm4946_vm2, %v10921_v12, %v6492_v6 }
 0x507   :  { %v11559_v20 = vadd.f32 %v4634_v24, %v11485_v58  ;;  %v4636_v59 = vpop.f32.mrb[213].mxu0  ;;  %v6925_v52 = vpop.eup %6924  ;;  %6942 = vpow2.f32 %v5098_v31  ;;  %v6494_v1 = vadd.f32 -1.0, %v6923_v16  ;;  %v5108_v43 = vmul.f32 1.442695, %v5027_v22 }
 0x508   :  { %v4637_v57 = vpop.f32.mrb[214].mxu0  ;;  %v6927_v58 = vpop.eup %6926  ;;  %v5106_v59 = vmul.f32 1.442695, %v5026_v0  ;;  %6944 = vpow2.f32 %v5100_v51  ;;  %v5028_v5 = vmin.f32 %v11158_v9, 0.0  ;;  %v6495_v6 = vadd.f32 -1.0, %v6925_v52 }
 0x509   :  { %13374 = vst [vmem:[#allocation275_spill] sm:$0xff] %v11559_v20  ;;  %v11563_v14 = vadd.f32 %v4637_v57, %v11499_v41  ;;  %v4639_v10 = vpop.f32.mrb[215].mxu0  ;;  %v6929_v27 = vpop.eup %6928  ;;  %6946 = vpow2.f32 %v5102_v39  ;;  %v11579_v31 = vsel %vm4947_vm3, %v10926_v3, %v6493_v63  ;;  %v5029_v16 = vmin.f32 %v11173_v62, 0.0  ;;  %v13387_v20 = vld [vmem:[#allocation194_spill] sm:$0xff] }
 0x50a   :  { %v4827_v45 = vpop.f32.mrb[228].mxu1  ;;  %v6931_v24 = vpop.eup %6930  ;;  %6948 = vpow2.f32 %v5104_v44  ;;  %v6496_v22 = vadd.f32 -1.0, %v6927_v58  ;;  %v5030_v57 = vmin.f32 %v11218_v49, 0.0  ;;  %v11589_v52 = vsel %vm4948_vm4, %v10943_v25, %v6494_v1 }
 0x50b   :  { %13375 = vst [vmem:[#allocation276_spill] sm:$0xff] %v11563_v14  ;;  %v11573_v41 = vadd.f32 %v4827_v45, %v11018_v55  ;;  %v4829_v10 = vpop.f32.mrb[229].mxu1  ;;  %v6933_v0 = vpop.eup %6932  ;;  %6950 = vpow2.f32 %v5106_v59  ;;  %v6497_v3 = vadd.f32 -1.0, %v6929_v27  ;;  %v5110_v44 = vmul.f32 1.442695, %v5028_v5 }
 0x50c   :  { %v4830_v12 = vpop.f32.mrb[230].mxu1  ;;  %6952 = vpow2.f32 %v5108_v43  ;;  %v11599_v10 = vsel %vm4949_vm5, %v10948_v30, %v6495_v6  ;;  %v6498_v25 = vadd.f32 -1.0, %v6931_v24  ;;  %v6499_v1 = vadd.f32 -1.0, %v6933_v0  ;;  %v13378_v0 = vld [vmem:[#allocation190_spill] sm:$0xff] }
 0x50d   :  { %v11583_v51 = vadd.f32 %v4830_v12, %v11025_v42  ;;  %v4832_v55 = vpop.f32.mrb[231].mxu1  ;;  %v6935_v63 = vpop.eup %6934  ;;  %v5112_v27 = vmul.f32 1.442695, %v5029_v16  ;;  %v11608_v5 = vsel %vm4950_vm6, %v10965_v48, %v6496_v22  ;;  %v5031_v30 = vmin.f32 %v11228_v11, 0.0 }
 0x50e   :  { %v4642_v39 = vpop.f32.mrb[216].mxu0  ;;  %v6937_v58 = vpop.eup %6936  ;;  %v5114_v55 = vmul.f32 1.442695, %v5030_v57  ;;  %v11615_v6 = vsel %vm4951_vm7, %v10970_v19, %v6497_v3  ;;  %6954 = vpow2.f32 %v5110_v44  ;;  %v6500_v48 = vadd.f32 -1.0, %v6935_v63  ;;  %v13379_v63 = vld [vmem:[#allocation230_spill] sm:$0xff] }
 0x50f   :  { %v11593_v42 = vadd.f32 %v4642_v39, %v11518_v38  ;;  %v4644_v45 = vpop.f32.mrb[217].mxu0  ;;  %v6939_v12 = vpop.eup %6938  ;;  %v6501_v22 = vadd.f32 -1.0, %v6937_v58  ;;  %v5032_v57 = vmin.f32 %v11274_v17, 0.0  ;;  %v11630_v19 = vsel %vm4953_vm9, %v10992_v29, %v6499_v1  ;;  %v13380_v58 = vld [vmem:[#allocation191_spill] sm:$0xff] }
 0x510   :  { %v4645_v59 = vpop.f32.mrb[218].mxu0  ;;  %6956 = vpow2.f32 %v5112_v27  ;;  %v5033_v44 = vmin.f32 %v13379_v63, 0.0  ;;  %v11644_v27 = vsel %vm4954_vm10, %v11009_v8, %v6500_v48  ;;  %vm4962_vm2 = vcmp.gt.f32.partialorder %v11104_v32, 0.0 }
 0x511   :  { %13376 = vst [vmem:[#allocation277_spill] sm:$0xff] %v11593_v42  ;;  %v11603_v43 = vadd.f32 %v4645_v59, %v11524_v50  ;;  %v4647_v38 = vpop.f32.mrb[219].mxu0  ;;  %v6941_v50 = vpop.eup %6940  ;;  %6958 = vpow2.f32 %v5114_v55  ;;  %vm4963_vm3 = vcmp.gt.f32.partialorder %v11120_v40, 0.0  ;;  %vm4964_vm4 = vcmp.gt.f32.partialorder %v11158_v9, 0.0 }
 0x512   :  { %v4835_v24 = vpop.f32.mrb[232].mxu1  ;;  %v6943_v45 = vpop.eup %6942  ;;  %v11625_v38 = vsel %vm4952_vm8, %v10987_v28, %v6498_v25  ;;  %v5116_v28 = vmul.f32 1.442695, %v5031_v30  ;;  %v6503_v42 = vadd.f32 -1.0, %v6941_v50  ;;  %v5118_v30 = vmul.f32 1.442695, %v5032_v57 }
 0x513   :  { %13377 = vst [vmem:[#allocation278_spill] sm:$0xff] %v11603_v43  ;;  %v11618_v16 = vadd.f32 %v4835_v24, %v13378_v0  ;;  %v4837_v39 = vpop.f32.mrb[233].mxu1  ;;  %v6945_v3 = vpop.eup %6944  ;;  %v5034_v50 = vmin.f32 %v11330_v46, 0.0  ;;  %vm4965_vm5 = vcmp.gt.f32.partialorder %v11173_v62, 0.0  ;;  %vm4966_vm6 = vcmp.gt.f32.partialorder %v11218_v49, 0.0 }
 0x514   :  { %v4838_v59 = vpop.f32.mrb[234].mxu1  ;;  %v6502_v39 = vadd.f32 -1.0, %v6939_v12  ;;  %v6947_v43 = vpop.eup %6946  ;;  %v11649_v12 = vsel %vm4955_vm11, %v11014_v7, %v6501_v22  ;;  %6960 = vpow2.f32 %v5116_v28  ;;  %v11665_v57 = vsel %vm4957_vm13, %v11033_v13, %v6503_v42  ;;  %v11674_v28 = vld [vmem:[%s12379_s9] ss:$0 sm:$0xff] }
 0x515   :  { %v11634_v24 = vadd.f32 %v4838_v59, %v13380_v58  ;;  %v4840_v0 = vpop.f32.mrb[235].mxu1  ;;  %v6949_v14 = vpop.eup %6948  ;;  %6962 = vpow2.f32 %v5118_v30  ;;  %vm4967_vm7 = vcmp.gt.f32.partialorder %v11228_v11, 0.0  ;;  %vm4968_vm8 = vcmp.gt.f32.partialorder %v11274_v17, 0.0 }
 0x516   :  { %v4650_v25 = vpop.f32.mrb[220].mxu0  ;;  %v6951_v55 = vpop.eup %6950  ;;  %v5120_v0 = vmul.f32 1.442695, %v5033_v44  ;;  %v11660_v7 = vsel %vm4956_vm12, %v11028_v35, %v6502_v39  ;;  %v13383_v44 = vld [vmem:[#allocation192_spill] sm:$0xff]  ;;  %v5122_v35 = vmul.f32 1.442695, %v5034_v50 }
 0x517   :  { %v11639_v29 = vadd.f32 %v4650_v25, %v11533_v4  ;;  %v4652_v1 = vpop.f32.mrb[221].mxu0  ;;  %v6504_v4 = vadd.f32 -1.0, %v6943_v45  ;;  %v6953_v58 = vpop.eup %6952  ;;  %v6506_v45 = vadd.f32 -1.0, %v6947_v43  ;;  %v6505_v25 = vadd.f32 -1.0, %v6945_v3  ;;  %v13384_v3 = vld [vmem:[#allocation193_spill] sm:$0xff] }
 0x518   :  { %v4653_v59 = vpop.f32.mrb[222].mxu0  ;;  %v6509_v42 = vadd.f32 -1.0, %v6953_v58  ;;  %v6955_v43 = vpop.eup %6954  ;;  %6964 = vpow2.f32 %v5120_v0  ;;  %vm4969_vm9 = vcmp.gt.f32.partialorder %v13379_v63, 0.0  ;;  %vm4970_vm10 = vcmp.gt.f32.partialorder %v11330_v46, 0.0 }
 0x519   :  { %13381 = vst [vmem:[#allocation279_spill] sm:$0xff] %v11639_v29  ;;  %v11655_v8 = vadd.f32 %v4653_v59, %v11541_v26  ;;  %v4655_v48 = vpop.f32.mrb[223].mxu0  ;;  %v6507_v59 = vadd.f32 -1.0, %v6949_v14  ;;  %v11679_v13 = vsel %vm4958_vm14, %v11044_v23, %v6504_v4  ;;  %v5035_v14 = vmin.f32 %v11345_v36, 0.0 }
 0x51a   :  { %v4843_v22 = vpop.f32.mrb[236].mxu1  ;;  %v6508_v48 = vadd.f32 -1.0, %v6951_v55  ;;  %v11691_v23 = vsel %vm4960_vm0, %v11065_v2, %v6506_v45  ;;  %v11696_v4 = vsel %vm4959_vm15, %v11049_v56, %v6505_v25  ;;  %v6957_v58 = vpop.eup %6956  ;;  %6966 = vpow2.f32 %v5122_v35 }
 0x51b   :  { %13382 = vst [vmem:[#allocation280_spill] sm:$0xff] %v11655_v8  ;;  %v11669_v26 = vadd.f32 %v4843_v22, %v13383_v44  ;;  %v4845_v1 = vpop.f32.mrb[237].mxu1  ;;  %v11703_v44 = vsel %vm4961_vm1, %v11074_v60, %v6507_v59  ;;  %v6959_v45 = vpop.eup %6958  ;;  %v5036_v60 = vmin.f32 %v11390_v37, 0.0  ;;  %v6511_v8 = vadd.f32 -1.0, %v6957_v58  ;;  %v13388_v58 = vld [vmem:[#allocation195_spill] sm:$0xff] }
 0x51c   :  { %v4846_v39 = vpop.f32.mrb[238].mxu1  ;;  %v11708_v2 = vsel %vm4962_vm2, %v11104_v32, %v6508_v48  ;;  %v6510_v1 = vadd.f32 -1.0, %v6955_v43  ;;  %v5037_v32 = vmin.f32 %v11400_v53, 0.0  ;;  %vm4971_vm11 = vcmp.gt.f32.partialorder %v11345_v36, 0.0 }
 0x51d   :  { %v11684_v55 = vadd.f32 %v4846_v39, %v13384_v3  ;;  %v4848_v30 = vpop.f32.mrb[239].mxu1  ;;  %v11714_v39 = vsel %vm4963_vm3, %v11120_v40, %v6509_v42  ;;  %v5124_v3 = vmul.f32 1.442695, %v5035_v14  ;;  %v6512_v14 = vadd.f32 -1.0, %v6959_v45 }
 0x51e   :  { %v6624_v50 = vpop.f32.mrb[224].mxu0  ;;  %13386 = vst [vmem:[#allocation282_spill] sm:$0xff] %v11714_v39  ;;  %v6961_v34 = vpop.eup %6960  ;;  %vm4972_vm12 = vcmp.gt.f32.partialorder %v11390_v37, 0.0  ;;  %vm4973_vm13 = vcmp.gt.f32.partialorder %v11400_v53, 0.0  ;;  %vm4974_vm14 = vcmp.gt.f32.partialorder %v11442_v61, 0.0  ;;  %vm4975_vm15 = vcmp.gt.f32.partialorder %v11459_v21, 0.0 }
 0x51f   :  { %13385 = vst [vmem:[#allocation281_spill] sm:$0xff] %v11684_v55  ;;  %v5476_v0 = vadd.f32 %v6624_v50, %v11674_v28  ;;  %v5467_v22 = vpop.f32.mrb[225].mxu0  ;;  %6968 = vpow2.f32 %v5124_v3  ;;  %vm4976_vm0 = vcmp.gt.f32.partialorder %v11495_v18, 0.0  ;;  %vm4977_vm1 = vcmp.gt.f32.partialorder %v11509_v47, 0.0 }
 0x520   :  { %v5468_v56 = vadd.f32 %v11674_v28, %v5467_v22  ;;  %v6625_v25 = vpop.f32.mrb[226].mxu0  ;;  %vm4978_vm2 = vcmp.gt.f32.partialorder %v11546_v15, 0.0  ;;  %vm4979_vm3 = vcmp.gt.f32.partialorder %v11552_v54, 0.0 }
 0x521   :  { %v5724_v59 = vand.u32 2147483647, %v5476_v0  ;;  %v5479_v30 = vadd.f32 %v6625_v25, %v11674_v28  ;;  %v5470_v50 = vpop.f32.mrb[227].mxu0  ;;  %v5038_v0 = vmin.f32 %v11442_v61, 0.0 }
 0x522   :  { %v5722_v48 = vand.u32 2147483647, %v5468_v56  ;;  %v5471_v35 = vadd.f32 %v11674_v28, %v5470_v50  ;;  %v4851_v22 = vpop.f32.mrb[240].mxu1  ;;  %v11729_v56 = vsel %vm4964_vm4, %v11158_v9, %v6510_v1  ;;  %v13389_v1 = vld [vmem:[#allocation196_spill] sm:$0xff]  ;;  %vm4980_vm4 = vcmp.gt.f32.partialorder %v11573_v41, 0.0 }
 0x523   :  { %v5788_v43 = vmul.f32 %v5724_v59, %v11589_v52  ;;  %v5725_v29 = vand.u32 2147483647, %v5479_v30  ;;  %v11722_v40 = vadd.f32 %v4851_v22, %v13387_v20  ;;  %v4853_v42 = vpop.f32.mrb[241].mxu1  ;;  %v5126_v52 = vmul.f32 1.442695, %v5036_v60  ;;  %v6963_v30 = vpop.eup %6962 }
 0x524   :  { %v5723_v25 = vand.u32 2147483647, %v5471_v35  ;;  %v4854_v55 = vpop.f32.mrb[242].mxu1  ;;  %v5786_v39 = vmul.f32 %v5722_v48, %v11568_v33  ;;  %v5128_v33 = vmul.f32 1.442695, %v5037_v32  ;;  %v13390_v35 = vld [vmem:[#allocation198_spill] sm:$0xff]  ;;  %v6965_v60 = vpop.eup %6964  ;;  %v11750_v32 = vsel %vm4966_vm6, %v11218_v49, %v6512_v14 }
 0x525   :  { %v5789_v20 = vmul.f32 %v5725_v29, %v11599_v10  ;;  %v11734_v45 = vadd.f32 %v4854_v55, %v13388_v58  ;;  %v4856_v59 = vpop.f32.mrb[243].mxu1  ;;  %v5923_v3 = vadd.f32 %v13390_v35, %v5788_v43  ;;  %v11745_v55 = vsel %vm4965_vm5, %v11173_v62, %v6511_v8  ;;  %v13391_v42 = vld [vmem:[#allocation197_spill] sm:$0xff]  ;;  %v13392_v58 = vld [vmem:[#allocation199_spill] sm:$0xff]  ;;  %v6967_v14 = vpop.eup %6966 }
 0x526   :  { %v5787_v50 = vmul.f32 %v5723_v25, %v11579_v31  ;;  %v6628_v9 = vpop.f32.mrb[228].mxu0  ;;  %v5921_v48 = vadd.f32 %v13389_v1, %v5786_v39  ;;  %v6513_v31 = vadd.f32 -1.0, %v6961_v34  ;;  %v5130_v39 = vmul.f32 1.442695, %v5038_v0 }
 0x527   :  { %v5492_v10 = vadd.f32 %v6628_v9, %v11674_v28  ;;  %v5483_v29 = vpop.f32.mrb[229].mxu0  ;;  %v11756_v59 = vadd.f32 %v13392_v58, %v5789_v20  ;;  %6970 = vpow2.f32 %v5126_v52  ;;  %v6514_v49 = vadd.f32 -1.0, %v6963_v30  ;;  %v13393_v20 = vld [vmem:[#allocation200_spill] sm:$0xff]  ;;  %v13394_v58 = vld [vmem:[#allocation201_spill] sm:$0xff] }
 0x528   :  { %v5484_v22 = vadd.f32 %v11674_v28, %v5483_v29  ;;  %v6629_v43 = vpop.f32.mrb[230].mxu0  ;;  %5985 = vxpose.xlu0.b32.start [1/16] %v5921_v48, 128  ;;  %v5922_v25 = vadd.f32 %v13391_v42, %v5787_v50  ;;  %6972 = vpow2.f32 %v5128_v33  ;;  %v6515_v35 = vadd.f32 -1.0, %v6965_v60 }
 0x529   :  { %v5728_v62 = vand.u32 2147483647, %v5492_v10  ;;  %v5495_v8 = vadd.f32 %v6629_v43, %v11674_v28  ;;  %v5486_v9 = vpop.f32.mrb[231].mxu0  ;;  %v5039_v48 = vmin.f32 %v11459_v21, 0.0  ;;  %6974 = vpow2.f32 %v5130_v39 }
 0x52a   :  { %v5726_v34 = vand.u32 2147483647, %v5484_v22  ;;  %v5487_v0 = vadd.f32 %v11674_v28, %v5486_v9  ;;  %v4859_v1 = vpop.f32.mrb[244].mxu1  ;;  %v5040_v10 = vmin.f32 %v11495_v18, 0.0  ;;  %v5041_v43 = vmin.f32 %v11509_v47, 0.0 }
 0x52b   :  { %v5792_v50 = vmul.f32 %v5728_v62, %v11625_v38  ;;  %v5729_v29 = vand.u32 2147483647, %v5495_v8  ;;  %v11763_v42 = vadd.f32 %v4859_v1, %v13393_v20  ;;  %v4861_v52 = vpop.f32.mrb[245].mxu1  ;;  %v6516_v62 = vadd.f32 -1.0, %v6967_v14  ;;  %v13395_v1 = vld [vmem:[#allocation202_spill] sm:$0xff] }
 0x52c   :  { %v5790_v30 = vmul.f32 %v5726_v34, %v11608_v5  ;;  %v5727_v33 = vand.u32 2147483647, %v5487_v0  ;;  %v4862_v22 = vpop.f32.mrb[246].mxu1  ;;  %5986 = vxpose.xlu0.b32.cont [2/16] %v5922_v25, 128  ;;  %v13396_v5 = vld [vmem:[#allocation204_spill] sm:$0xff]  ;;  %v11781_v25 = vsel %vm4967_vm7, %v11228_v11, %v6513_v31  ;;  %v5132_v0 = vmul.f32 1.442695, %v5039_v48 }
 0x52d   :  { %v5793_v60 = vmul.f32 %v5729_v29, %v11630_v19  ;;  %v11770_v9 = vadd.f32 %v4862_v22, %v13394_v58  ;;  %v4864_v38 = vpop.f32.mrb[247].mxu1  ;;  %v11776_v34 = vadd.f32 %v13396_v5, %v5792_v50  ;;  %v6969_v19 = vpop.eup %6968  ;;  %v11792_v50 = vsel %vm4969_vm9, %v13379_v63, %v6515_v35  ;;  %v13397_v31 = vld [vmem:[#allocation203_spill] sm:$0xff]  ;;  %v13399_v5 = vld [vmem:[#allocation210_spill] sm:$0xff] }
 0x52e   :  { %v5791_v39 = vmul.f32 %v5727_v33, %v11615_v6  ;;  %v6632_v8 = vpop.f32.mrb[232].mxu0  ;;  %v5925_v20 = vadd.f32 %v13395_v1, %v5790_v30  ;;  %v11787_v6 = vsel %vm4968_vm8, %v11274_v17, %v6514_v49  ;;  %v5134_v52 = vmul.f32 1.442695, %v5040_v10  ;;  %v13398_v33 = vld [vmem:[#allocation205_spill] sm:$0xff] }
 0x52f   :  { %v5508_v29 = vadd.f32 %v6632_v8, %v11674_v28  ;;  %v5499_v14 = vpop.f32.mrb[233].mxu0  ;;  %v11799_v22 = vadd.f32 %v13398_v33, %v5793_v60  ;;  %v5136_v58 = vmul.f32 1.442695, %v5041_v43  ;;  %v11805_v63 = vsel %vm4970_vm10, %v11330_v46, %v6516_v62 }
 0x530   :  { %v5500_v30 = vadd.f32 %v11674_v28, %v5499_v14  ;;  %v6633_v11 = vpop.f32.mrb[234].mxu0  ;;  %5987 = vxpose.xlu0.b32.cont [3/16] %v5923_v3, 128  ;;  %v11796_v48 = vadd.f32 %v13397_v31, %v5791_v39  ;;  %v5042_v35 = vmin.f32 %v11546_v15, 0.0  ;;  %v6517_v8 = vadd.f32 -1.0, %v6969_v19  ;;  %v13400_v31 = vld [vmem:[#allocation213_spill] sm:$0xff] }
 0x531   :  { %v5732_v38 = vand.u32 2147483647, %v5508_v29  ;;  %v5511_v17 = vadd.f32 %v6633_v11, %v11674_v28  ;;  %v5502_v49 = vpop.f32.mrb[235].mxu0  ;;  %v6971_v1 = vpop.eup %6970  ;;  %6976 = vpow2.f32 %v5132_v0  ;;  %v5043_v62 = vmin.f32 %v11552_v54, 0.0 }
 0x532   :  { %v5730_v10 = vand.u32 2147483647, %v5500_v30  ;;  %v5503_v3 = vadd.f32 %v11674_v28, %v5502_v49  ;;  %v4867_v39 = vpop.f32.mrb[248].mxu1  ;;  %v6973_v46 = vpop.eup %6972  ;;  %6978 = vpow2.f32 %v5134_v52  ;;  %v5138_v52 = vmul.f32 1.442695, %v5042_v35 }
 0x533   :  { %v5796_v43 = vmul.f32 %v5732_v38, %v11660_v7  ;;  %v5733_v60 = vand.u32 2147483647, %v5511_v17  ;;  %v11812_v29 = vadd.f32 %v4867_v39, %v13399_v5  ;;  %v4869_v14 = vpop.f32.mrb[249].mxu1  ;;  %6980 = vpow2.f32 %v5136_v58  ;;  %v6975_v17 = vpop.eup %6974 }
 0x534   :  { %v5794_v30 = vmul.f32 %v5730_v10, %v11644_v27  ;;  %v5731_v19 = vand.u32 2147483647, %v5503_v3  ;;  %v4870_v11 = vpop.f32.mrb[250].mxu1  ;;  %5988 = vxpose.xlu0.b32.cont [4/16] %v11756_v59, 128  ;;  %v5044_v7 = vmin.f32 %v11573_v41, 0.0  ;;  %v13401_v10 = vld [vmem:[#allocation206_spill] sm:$0xff]  ;;  %v13402_v59 = vld [vmem:[#allocation208_spill] sm:$0xff]  ;;  %v11835_v14 = vsel %vm4971_vm11, %v11345_v36, %v6517_v8 }
 0x535   :  { %v5797_v0 = vmul.f32 %v5733_v60, %v11665_v57  ;;  %v11821_v33 = vadd.f32 %v4870_v11, %v13400_v31  ;;  %v4872_v38 = vpop.f32.mrb[251].mxu1  ;;  %v11829_v58 = vadd.f32 %v13402_v59, %v5796_v43  ;;  %v6518_v60 = vadd.f32 -1.0, %v6971_v1  ;;  %v13404_v43 = vld [vmem:[#allocation209_spill] sm:$0xff] }
 0x536   :  { %v5795_v49 = vmul.f32 %v5731_v19, %v11649_v12  ;;  %v6636_v27 = vpop.f32.mrb[236].mxu0  ;;  %v11826_v3 = vadd.f32 %v13401_v10, %v5794_v30  ;;  %v6519_v5 = vadd.f32 -1.0, %v6973_v46  ;;  %v5140_v35 = vmul.f32 1.442695, %v5043_v62  ;;  %v13403_v30 = vld [vmem:[#allocation207_spill] sm:$0xff] }
 0x537   :  { %v5524_v39 = vadd.f32 %v6636_v27, %v11674_v28  ;;  %v5515_v57 = vpop.f32.mrb[237].mxu0  ;;  %v11842_v31 = vadd.f32 %v13404_v43, %v5797_v0  ;;  %v5142_v38 = vmul.f32 1.442695, %v5044_v7  ;;  %v6520_v10 = vadd.f32 -1.0, %v6975_v17  ;;  %v13405_v0 = vld [vmem:[#allocation220_spill] sm:$0xff] }
 0x538   :  { %v5516_v12 = vadd.f32 %v11674_v28, %v5515_v57  ;;  %v6637_v19 = vpop.f32.mrb[238].mxu0  ;;  %5989 = vxpose.xlu0.b32.cont [5/16] %v5925_v20, 128  ;;  %v11839_v11 = vadd.f32 %v13403_v30, %v5795_v49  ;;  %6982 = vpow2.f32 %v5138_v52  ;;  %v5045_v36 = vmin.f32 %v11583_v51, 0.0  ;;  %v13406_v43 = vld [vmem:[#allocation224_spill] sm:$0xff] }
 0x539   :  { %v5736_v27 = vand.u32 2147483647, %v5524_v39  ;;  %v5527_v1 = vadd.f32 %v6637_v19, %v11674_v28  ;;  %v5518_v46 = vpop.f32.mrb[239].mxu0  ;;  %v5046_v20 = vmin.f32 %v11618_v16, 0.0  ;;  %6984 = vpow2.f32 %v5140_v35 }
 0x53a   :  { %v5734_v8 = vand.u32 2147483647, %v5516_v12  ;;  %v5519_v62 = vadd.f32 %v11674_v28, %v5518_v46  ;;  %v4875_v59 = vpop.f32.mrb[252].mxu1  ;;  %6986 = vpow2.f32 %v5142_v38  ;;  %v13407_v46 = vld [vmem:[#allocation211_spill] sm:$0xff]  ;;  %v13408_v38 = vld [vmem:[#allocation214_spill] sm:$0xff]  ;;  %vm4981_vm5 = vcmp.gt.f32.partialorder %v11583_v51, 0.0 }
 0x53b   :  { %v5800_v49 = vmul.f32 %v5736_v27, %v11691_v23  ;;  %v5737_v57 = vand.u32 2147483647, %v5527_v1  ;;  %v11850_v30 = vadd.f32 %v4875_v59, %v13405_v0  ;;  %v4877_v7 = vpop.f32.mrb[253].mxu1  ;;  %v11859_v23 = vsel %vm4972_vm12, %v11390_v37, %v6518_v60  ;;  %v6977_v12 = vpop.eup %6976 }
 0x53c   :  { %v5798_v17 = vmul.f32 %v5734_v8, %v11679_v13  ;;  %v5735_v52 = vand.u32 2147483647, %v5519_v62  ;;  %v4878_v39 = vpop.f32.mrb[254].mxu1  ;;  %5990 = vxpose.xlu0.b32.cont [6/16] %v11796_v48, 128  ;;  %v11869_v13 = vsel %vm4973_vm13, %v11400_v53, %v6519_v5  ;;  %v6979_v48 = vpop.eup %6978  ;;  %v5144_v1 = vmul.f32 1.442695, %v5045_v36 }
 0x53d   :  { %v5801_v19 = vmul.f32 %v5737_v57, %v11703_v44  ;;  %v11864_v27 = vadd.f32 %v4878_v39, %v13406_v43  ;;  %v4880_v35 = vpop.f32.mrb[255].mxu1  ;;  %v11876_v62 = vadd.f32 %v13408_v38, %v5800_v49  ;;  %v6981_v44 = vpop.eup %6980  ;;  %v5146_v59 = vmul.f32 1.442695, %v5046_v20  ;;  %v13409_v49 = vld [vmem:[#allocation212_spill] sm:$0xff] }
 0x53e   :  { %v5799_v37 = vmul.f32 %v5735_v52, %v11696_v4  ;;  %v6640_v60 = vpop.f32.mrb[240].mxu0  ;;  %v11873_v8 = vadd.f32 %v13407_v46, %v5798_v17  ;;  %v5047_v57 = vmin.f32 %v11634_v24, 0.0  ;;  %v11883_v53 = vsel %vm4974_vm14, %v11442_v61, %v6520_v10  ;;  %v13410_v20 = vld [vmem:[#allocation216_spill] sm:$0xff] }
 0x53f   :  { %v5540_v0 = vadd.f32 %v6640_v60, %v11674_v28  ;;  %v5531_v7 = vpop.f32.mrb[241].mxu0  ;;  %v5048_v4 = vmin.f32 %v11669_v26, 0.0  ;;  %v11892_v52 = vadd.f32 %v13410_v20, %v5801_v19  ;;  %v6522_v60 = vadd.f32 -1.0, %v6979_v48  ;;  %v13412_v19 = vld [vmem:[#allocation233_spill] sm:$0xff] }
 0x540   :  { %v5532_v5 = vadd.f32 %v11674_v28, %v5531_v7  ;;  %v6641_v36 = vpop.f32.mrb[242].mxu0  ;;  %5991 = vxpose.xlu0.b32.cont [7/16] %v11776_v34, 128  ;;  %v11889_v17 = vadd.f32 %v13409_v49, %v5799_v37  ;;  %v6521_v61 = vadd.f32 -1.0, %v6977_v12  ;;  %6988 = vpow2.f32 %v5144_v1 }
 0x541   :  { %13411 = vst [vmem:[#allocation283_spill] sm:$0xff] %v11892_v52  ;;  %v5740_v39 = vand.u32 2147483647, %v5540_v0  ;;  %v5543_v43 = vadd.f32 %v6641_v36, %v11674_v28  ;;  %v5534_v35 = vpop.f32.mrb[243].mxu0  ;;  %v6523_v7 = vadd.f32 -1.0, %v6981_v44  ;;  %6990 = vpow2.f32 %v5146_v59 }
 0x542   :  { %v5738_v10 = vand.u32 2147483647, %v5532_v5  ;;  %v5535_v46 = vadd.f32 %v11674_v28, %v5534_v35  ;;  %v4883_v38 = vpop.f32.mrb[0].mxu1  ;;  %v5148_v34 = vmul.f32 1.442695, %v5047_v57  ;;  %v6983_v36 = vpop.eup %6982  ;;  %v13413_v5 = vld [vmem:[#allocation234_spill] sm:$0xff]  ;;  %v11916_v59 = vsel %vm4975_vm15, %v11459_v21, %v6521_v61 }
 0x543   :  { %v5804_v37 = vmul.f32 %v5740_v39, %v11729_v56  ;;  %v5741_v49 = vand.u32 2147483647, %v5543_v43  ;;  %v11899_v20 = vadd.f32 %v4883_v38, %v13412_v19  ;;  %v4885_v0 = vpop.f32.mrb[1].mxu1  ;;  %v5150_v12 = vmul.f32 1.442695, %v5048_v4  ;;  %v6985_v4 = vpop.eup %6984  ;;  %v13415_v35 = vld [vmem:[#allocation215_spill] sm:$0xff] }
 0x544   :  { %v5739_v48 = vand.u32 2147483647, %v5535_v46  ;;  %v4886_v1 = vpop.f32.mrb[2].mxu1  ;;  %5992 = vxpose.xlu0.b32.cont [8/16] %v11799_v22, 128  ;;  %v5802_v44 = vmul.f32 %v5738_v10, %v11708_v2  ;;  %v11911_v43 = vsel %vm4976_vm0, %v11495_v18, %v6522_v60  ;;  %v13414_v2 = vld [vmem:[#allocation282_spill] sm:$0xff]  ;;  %v11925_v18 = vsel %vm4977_vm1, %v11509_v47, %v6523_v7  ;;  %v6987_v60 = vpop.eup %6986 }
 0x545   :  { %v5805_v57 = vmul.f32 %v5741_v49, %v11745_v55  ;;  %v11906_v56 = vadd.f32 %v4886_v1, %v13413_v5  ;;  %v4888_v39 = vpop.f32.mrb[3].mxu1  ;;  %v13416_v46 = vld [vmem:[#allocation218_spill] sm:$0xff]  ;;  %6992 = vpow2.f32 %v5148_v34  ;;  %v13417_v49 = vld [vmem:[#allocation281_spill] sm:$0xff]  ;;  %v6524_v0 = vadd.f32 -1.0, %v6983_v36  ;;  %v13419_v5 = vld [vmem:[#allocation219_spill] sm:$0xff] }
 0x546   :  { %v5803_v22 = vmul.f32 %v5739_v48, %v13414_v2  ;;  %v6644_v55 = vpop.f32.mrb[244].mxu0  ;;  %v5937_v10 = vadd.f32 %v13415_v35, %v5802_v44  ;;  %v5939_v38 = vadd.f32 %v13416_v46, %v5804_v37  ;;  %v5049_v21 = vmin.f32 %v13417_v49, 0.0  ;;  %v13418_v37 = vld [vmem:[#allocation217_spill] sm:$0xff] }
 0x547   :  { %v5556_v61 = vadd.f32 %v6644_v55, %v11674_v28  ;;  %v5547_v19 = vpop.f32.mrb[245].mxu0  ;;  %6994 = vpow2.f32 %v5150_v12  ;;  %v11933_v47 = vadd.f32 %v13419_v5, %v5805_v57  ;;  %v5050_v7 = vmin.f32 %v11722_v40, 0.0 }
 0x548   :  { %v5548_v48 = vadd.f32 %v11674_v28, %v5547_v19  ;;  %v6645_v1 = vpop.f32.mrb[246].mxu0  ;;  %6017 = vxpose.xlu1.b32.start [1/16] %v5937_v10, 128  ;;  %5993 = vxpose.xlu0.b32.cont [9/16] %v11826_v3, 128  ;;  %v5938_v44 = vadd.f32 %v13418_v37, %v5803_v22  ;;  %v6525_v55 = vadd.f32 -1.0, %v6985_v4  ;;  %v5051_v36 = vmin.f32 %v11734_v45, 0.0  ;;  %v13420_v19 = vld [vmem:[#allocation243_spill] sm:$0xff] }
 0x549   :  { %v5744_v34 = vand.u32 2147483647, %v5556_v61  ;;  %v5559_v39 = vadd.f32 %v6645_v1, %v11674_v28  ;;  %v5550_v2 = vpop.f32.mrb[247].mxu0  ;;  %v6526_v46 = vadd.f32 -1.0, %v6987_v60  ;;  %v5052_v3 = vmin.f32 %v11763_v42, 0.0 }
 0x54a   :  { %v5742_v12 = vand.u32 2147483647, %v5548_v48  ;;  %v5551_v35 = vadd.f32 %v11674_v28, %v5550_v2  ;;  %v4891_v10 = vpop.f32.mrb[4].mxu1  ;;  %v6989_v37 = vpop.eup %6988  ;;  %v5152_v4 = vmul.f32 1.442695, %v5049_v21  ;;  %v11950_v60 = vsel %vm4978_vm2, %v11546_v15, %v6524_v0  ;;  %v13422_v0 = vld [vmem:[#allocation221_spill] sm:$0xff] }
 0x54b   :  { %v5808_v57 = vmul.f32 %v5744_v34, %v11787_v6  ;;  %v5745_v22 = vand.u32 2147483647, %v5559_v39  ;;  %v11943_v61 = vadd.f32 %v4891_v10, %v13420_v19  ;;  %v4893_v1 = vpop.f32.mrb[5].mxu1  ;;  %v5154_v6 = vmul.f32 1.442695, %v5050_v7  ;;  %v13421_v39 = vld [vmem:[#allocation246_spill] sm:$0xff]  ;;  %v6991_v21 = vpop.eup %6990 }
 0x54c   :  { %v5806_v5 = vmul.f32 %v5742_v12, %v11750_v32  ;;  %v5743_v48 = vand.u32 2147483647, %v5551_v35  ;;  %v4894_v52 = vpop.f32.mrb[6].mxu1  ;;  %6018 = vxpose.xlu1.b32.cont [2/16] %v5938_v44, 128  ;;  %5994 = vxpose.xlu0.b32.cont [10/16] %v11839_v11, 128  ;;  %v11959_v32 = vsel %vm4979_vm3, %v11552_v54, %v6525_v55  ;;  %vm4982_vm6 = vcmp.gt.f32.partialorder %v11618_v16, 0.0  ;;  %v13423_v12 = vld [vmem:[#allocation223_spill] sm:$0xff]  ;;  %v13425_v19 = vld [vmem:[#allocation225_spill] sm:$0xff] }
 0x54d   :  { %v5809_v34 = vmul.f32 %v5745_v22, %v11792_v50  ;;  %v11954_v2 = vadd.f32 %v4894_v52, %v13421_v39  ;;  %v4896_v10 = vpop.f32.mrb[7].mxu1  ;;  %v5156_v11 = vmul.f32 1.442695, %v5051_v36  ;;  %v11965_v50 = vadd.f32 %v13423_v12, %v5808_v57  ;;  %v13424_v57 = vld [vmem:[#allocation222_spill] sm:$0xff] }
 0x54e   :  { %v5807_v44 = vmul.f32 %v5743_v48, %v11781_v25  ;;  %v6648_v15 = vpop.f32.mrb[248].mxu0  ;;  %v5941_v7 = vadd.f32 %v13422_v0, %v5806_v5  ;;  %v5158_v52 = vmul.f32 1.442695, %v5052_v3  ;;  %v11971_v54 = vsel %vm4980_vm4, %v11573_v41, %v6526_v46 }
 0x54f   :  { %v5572_v35 = vadd.f32 %v6648_v15, %v11674_v28  ;;  %v5563_v22 = vpop.f32.mrb[249].mxu0  ;;  %v6527_v55 = vadd.f32 -1.0, %v6989_v37  ;;  %vm4983_vm7 = vcmp.gt.f32.partialorder %v11634_v24, 0.0  ;;  %6996 = vpow2.f32 %v5152_v4  ;;  %v6993_v5 = vpop.eup %6992  ;;  %v13426_v15 = vld [vmem:[#allocation253_spill] sm:$0xff] }
 0x550   :  { %v5564_v25 = vadd.f32 %v11674_v28, %v5563_v22  ;;  %v6649_v36 = vpop.f32.mrb[250].mxu0  ;;  %6019 = vxpose.xlu1.b32.cont [3/16] %v5939_v38, 128  ;;  %5995 = vxpose.xlu0.b32.cont [11/16] %v11829_v58, 128  ;;  %v11977_v3 = vadd.f32 %v13424_v57, %v5807_v44  ;;  %v11980_v1 = vadd.f32 %v13425_v19, %v5809_v34  ;;  %vm4984_vm8 = vcmp.gt.f32.partialorder %v11669_v26, 0.0 }
 0x551   :  { %6998 = vpow2.f32 %v5154_v6  ;;  %v5748_v41 = vand.u32 2147483647, %v5572_v35  ;;  %v5575_v46 = vadd.f32 %v6649_v36, %v11674_v28  ;;  %v5566_v37 = vpop.f32.mrb[251].mxu0  ;;  %v6528_v4 = vadd.f32 -1.0, %v6991_v21  ;;  %v6995_v48 = vpop.eup %6994 }
 0x552   :  { %7000 = vpow2.f32 %v5156_v11  ;;  %v5053_v38 = vmin.f32 %v11770_v9, 0.0  ;;  %v5746_v58 = vand.u32 2147483647, %v5564_v25  ;;  %v5567_v39 = vadd.f32 %v11674_v28, %v5566_v37  ;;  %v4899_v10 = vpop.f32.mrb[8].mxu1  ;;  %v13427_v25 = vld [vmem:[#allocation256_spill] sm:$0xff] }
 0x553   :  { %7002 = vpow2.f32 %v5158_v52  ;;  %v5812_v34 = vmul.f32 %v5748_v41, %v11859_v23  ;;  %v5749_v44 = vand.u32 2147483647, %v5575_v46  ;;  %v11988_v0 = vadd.f32 %v4899_v10, %v13426_v15  ;;  %v4901_v6 = vpop.f32.mrb[9].mxu1  ;;  %v13428_v41 = vld [vmem:[#allocation226_spill] sm:$0xff] }
 0x554   :  { %v5810_v12 = vmul.f32 %v5746_v58, %v11805_v63  ;;  %v5747_v35 = vand.u32 2147483647, %v5567_v39  ;;  %v4902_v21 = vpop.f32.mrb[10].mxu1  ;;  %6020 = vxpose.xlu1.b32.cont [4/16] %v11933_v47, 128  ;;  %5996 = vxpose.xlu0.b32.cont [12/16] %v11842_v31, 128  ;;  %v11996_v11 = vsel %vm4981_vm5, %v11583_v51, %v6527_v55  ;;  %v6529_v52 = vadd.f32 -1.0, %v6993_v5  ;;  %v13429_v51 = vld [vmem:[#allocation228_spill] sm:$0xff] }
 0x555   :  { %v5054_v23 = vmin.f32 %v11812_v29, 0.0  ;;  %v5813_v22 = vmul.f32 %v5749_v44, %v11869_v13  ;;  %v12001_v36 = vadd.f32 %v4902_v21, %v13427_v25  ;;  %v4904_v63 = vpop.f32.mrb[11].mxu1  ;;  %v6530_v57 = vadd.f32 -1.0, %v6995_v48  ;;  %v13431_v44 = vld [vmem:[#allocation229_spill] sm:$0xff] }
 0x556   :  { %v5055_v19 = vmin.f32 %v11821_v33, 0.0  ;;  %v5811_v47 = vmul.f32 %v5747_v35, %v11835_v14  ;;  %v6652_v31 = vpop.f32.mrb[252].mxu0  ;;  %v12006_v46 = vadd.f32 %v13428_v41, %v5810_v12  ;;  %v12009_v55 = vadd.f32 %v13429_v51, %v5812_v34  ;;  %v13430_v34 = vld [vmem:[#allocation227_spill] sm:$0xff] }
 0x557   :  { %v5160_v5 = vmul.f32 1.442695, %v5053_v38  ;;  %v5056_v37 = vmin.f32 %v11850_v30, 0.0  ;;  %v5588_v13 = vadd.f32 %v6652_v31, %v11674_v28  ;;  %v5579_v58 = vpop.f32.mrb[253].mxu0  ;;  %v12016_v48 = vsel %vm4982_vm6, %v11618_v16, %v6528_v4 }
 0x558   :  { %v5057_v14 = vmin.f32 %v11864_v27, 0.0  ;;  %v5580_v39 = vadd.f32 %v11674_v28, %v5579_v58  ;;  %v6653_v10 = vpop.f32.mrb[254].mxu0  ;;  %6021 = vxpose.xlu1.b32.cont [5/16] %v5941_v7, 128  ;;  %5997 = vxpose.xlu0.b32.cont [13/16] %v11873_v8, 128  ;;  %v12022_v38 = vadd.f32 %v13430_v34, %v5811_v47  ;;  %v12025_v15 = vadd.f32 %v13431_v44, %v5813_v22 }
 0x559   :  { %v5162_v6 = vmul.f32 1.442695, %v5054_v23  ;;  %v5752_v12 = vand.u32 2147483647, %v5588_v13  ;;  %v5591_v35 = vadd.f32 %v6653_v10, %v11674_v28  ;;  %v5582_v16 = vpop.f32.mrb[255].mxu0  ;;  %v12031_v4 = vsel %vm4983_vm7, %v11634_v24, %v6529_v52  ;;  %v6997_v21 = vpop.eup %6996  ;;  %v13432_v24 = vld [vmem:[#allocation265_spill] sm:$0xff] }
 0x55a   :  { %v5164_v7 = vmul.f32 1.442695, %v5055_v19  ;;  %v5750_v25 = vand.u32 2147483647, %v5580_v39  ;;  %v5583_v8 = vadd.f32 %v11674_v28, %v5582_v16  ;;  %v4907_v63 = vpop.f32.mrb[12].mxu1  ;;  %v12037_v22 = vsel %vm4984_vm8, %v11669_v26, %v6530_v57  ;;  %v13433_v39 = vld [vmem:[#allocation266_spill] sm:$0xff] }
 0x55b   :  { %v6999_v23 = vpop.eup %6998  ;;  %vm4985_vm9 = vcmp.gt.f32.partialorder %v13417_v49, 0.0  ;;  %v5166_v47 = vmul.f32 1.442695, %v5056_v37  ;;  %v5816_v31 = vmul.f32 %v5752_v12, %v11911_v43  ;;  %v5753_v41 = vand.u32 2147483647, %v5591_v35  ;;  %v4909_v19 = vpop.f32.mrb[13].mxu1 }
 0x55c   :  { %v12042_v52 = vadd.f32 %v4907_v63, %v13432_v24  ;;  %v7001_v51 = vpop.eup %7000  ;;  %vm4986_vm10 = vcmp.gt.f32.partialorder %v11722_v40, 0.0  ;;  %7004 = vpow2.f32 %v5160_v5  ;;  %v5168_v13 = vmul.f32 1.442695, %v5057_v14  ;;  %v4910_v57 = vpop.f32.mrb[14].mxu1  ;;  %6022 = vxpose.xlu1.b32.cont [6/16] %v11977_v3, 128  ;;  %5998 = vxpose.xlu0.b32.cont [14/16] %v11889_v17, 128  ;;  %v13434_v14 = vld [vmem:[#allocation231_spill] sm:$0xff] }
 0x55d   :  { %v5814_v58 = vmul.f32 %v5750_v25, %v11883_v53  ;;  %v5751_v26 = vand.u32 2147483647, %v5583_v8  ;;  %v7003_v37 = vpop.eup %7002  ;;  %7006 = vpow2.f32 %v5162_v6  ;;  %v5817_v43 = vmul.f32 %v5753_v41, %v11925_v18  ;;  %v4912_v34 = vpop.f32.mrb[15].mxu1 }
 0x55e   :  { %v12050_v10 = vadd.f32 %v4910_v57, %v13433_v39  ;;  %v6531_v44 = vadd.f32 -1.0, %v6997_v21  ;;  %vm4987_vm11 = vcmp.gt.f32.partialorder %v11734_v45, 0.0  ;;  %vm4988_vm12 = vcmp.gt.f32.partialorder %v11763_v42, 0.0  ;;  %v6656_v5 = vpop.f32.mrb[0].mxu0  ;;  %v13438_v39 = vld [vmem:[#allocation272_spill] sm:$0xff] }
 0x55f   :  { %7008 = vpow2.f32 %v5164_v7  ;;  %v5815_v53 = vmul.f32 %v5751_v26, %v11916_v59  ;;  %v6532_v3 = vadd.f32 -1.0, %v6999_v23  ;;  %v12056_v17 = vadd.f32 %v13434_v14, %v5814_v58  ;;  %v5595_v12 = vpop.f32.mrb[1].mxu0  ;;  %v13435_v7 = vld [vmem:[#allocation232_spill] sm:$0xff] }
 0x560   :  { %7010 = vpow2.f32 %v5166_v47  ;;  %v5058_v18 = vmin.f32 %v11899_v20, 0.0  ;;  %v5604_v6 = vadd.f32 %v6656_v5, %v11674_v28  ;;  %v6533_v35 = vadd.f32 -1.0, %v7001_v51  ;;  %v6657_v21 = vpop.f32.mrb[2].mxu0  ;;  %6023 = vxpose.xlu1.b32.cont [7/16] %v11965_v50, 128  ;;  %5999 = vxpose.xlu0.b32.cont [15/16] %v11876_v62, 128  ;;  %v13437_v62 = vld [vmem:[#allocation237_spill] sm:$0xff] }
 0x561   :  { %7012 = vpow2.f32 %v5168_v13  ;;  %v5596_v16 = vadd.f32 %v11674_v28, %v5595_v12  ;;  %v6534_v59 = vadd.f32 -1.0, %v7003_v37  ;;  %v12064_v25 = vadd.f32 %v13435_v7, %v5815_v53  ;;  %v5598_v41 = vpop.f32.mrb[3].mxu0  ;;  %v13436_v13 = vld [vmem:[#allocation235_spill] sm:$0xff] }
 0x562   :  { %v5059_v8 = vmin.f32 %v11906_v56, 0.0  ;;  %v5060_v63 = vmin.f32 %v11943_v61, 0.0  ;;  %v5756_v23 = vand.u32 2147483647, %v5604_v6  ;;  %v5607_v47 = vadd.f32 %v6657_v21, %v11674_v28  ;;  %v4915_v51 = vpop.f32.mrb[16].mxu1 }
 0x563   :  { %v5754_v24 = vand.u32 2147483647, %v5596_v16  ;;  %v5599_v19 = vadd.f32 %v11674_v28, %v5598_v41  ;;  %v12071_v50 = vadd.f32 %v13436_v13, %v5816_v31  ;;  %v12074_v58 = vadd.f32 %v13437_v62, %v5817_v43  ;;  %v4917_v53 = vpop.f32.mrb[17].mxu1  ;;  %v13439_v43 = vld [vmem:[#allocation283_spill] sm:$0xff]  ;;  %v13440_v16 = vld [vmem:[#allocation274_spill] sm:$0xff] }
 0x564   :  { %v5170_v26 = vmul.f32 1.442695, %v5058_v18  ;;  %v5820_v57 = vmul.f32 %v5756_v23, %v11971_v54  ;;  %v5757_v37 = vand.u32 2147483647, %v5607_v47  ;;  %v12078_v34 = vadd.f32 %v4915_v51, %v13438_v39  ;;  %v4918_v31 = vpop.f32.mrb[18].mxu1  ;;  %6024 = vxpose.xlu1.b32.cont [8/16] %v11980_v1, 128  ;;  %6000 = vxpose.xlu0.b32.end [16/16] %v13439_v43, 128  ;;  %v13442_v47 = vld [vmem:[#allocation239_spill] sm:$0xff] }
 0x565   :  { %vm4989_vm13 = vcmp.gt.f32.partialorder %v11770_v9, 0.0  ;;  %v5061_v5 = vmin.f32 %v11954_v2, 0.0  ;;  %v5818_v14 = vmul.f32 %v5754_v24, %v11950_v60  ;;  %v5755_v6 = vand.u32 2147483647, %v5599_v19  ;;  %v4920_v7 = vpop.f32.mrb[19].mxu1 }
 0x566   :  { %v5305_v54 = vsel %vm4985_vm9, %v13417_v49, %v6531_v44  ;;  %v5172_v18 = vmul.f32 1.442695, %v5059_v8  ;;  %v5821_v12 = vmul.f32 %v5757_v37, %v11996_v11  ;;  %v12090_v21 = vadd.f32 %v4918_v31, %v13440_v16  ;;  %v7005_v23 = vpop.eup %7004  ;;  %v6660_v44 = vpop.f32.mrb[4].mxu0  ;;  %v13441_v8 = vld [vmem:[#allocation236_spill] sm:$0xff]  ;;  %v13445_v16 = vld [vmem:[#allocation275_spill] sm:$0xff] }
 0x567   :  { %v12095_v60 = vsel %vm4986_vm10, %v11722_v40, %v6532_v3  ;;  %vm4990_vm14 = vcmp.gt.f32.partialorder %v11812_v29, 0.0  ;;  %vm4991_vm15 = vcmp.gt.f32.partialorder %v11821_v33, 0.0  ;;  %v5174_v1 = vmul.f32 1.442695, %v5060_v63  ;;  %v7007_v24 = vpop.eup %7006  ;;  %v5611_v51 = vpop.f32.mrb[5].mxu0  ;;  %v13444_v37 = vld [vmem:[#allocation240_spill] sm:$0xff] }
 0x568   :  { %v5819_v49 = vmul.f32 %v5755_v6, %v11959_v32  ;;  %v5953_v11 = vadd.f32 %v13441_v8, %v5818_v14  ;;  %v5955_v41 = vadd.f32 %v13442_v47, %v5820_v57  ;;  %7014 = vpow2.f32 %v5170_v26  ;;  %v6661_v62 = vpop.f32.mrb[6].mxu0  ;;  %6025 = vxpose.xlu1.b32.cont [9/16] %v12006_v46, 128  ;;  %v13443_v26 = vld [vmem:[#allocation238_spill] sm:$0xff]  ;;  %v13446_v47 = vld [vmem:[#allocation276_spill] sm:$0xff] }
 0x569   :  { %v5620_v19 = vadd.f32 %v6660_v44, %v11674_v28  ;;  %v12106_v40 = vsel %vm4988_vm12, %v11763_v42, %v6534_v59  ;;  %v12111_v3 = vsel %vm4987_vm11, %v11734_v45, %v6533_v35  ;;  %v7009_v32 = vpop.eup %7008  ;;  %v5176_v63 = vmul.f32 1.442695, %v5061_v5  ;;  %v5614_v59 = vpop.f32.mrb[7].mxu0 }
 0x56a   :  { %v5612_v13 = vadd.f32 %v11674_v28, %v5611_v51  ;;  %6049 = vxpose.xlu0.b32.start [1/16] %v5953_v11, 128  ;;  %v5954_v57 = vadd.f32 %v13443_v26, %v5819_v49  ;;  %v12117_v39 = vadd.f32 %v13444_v37, %v5821_v12  ;;  %v7011_v42 = vpop.eup %7010  ;;  %vm4992_vm0 = vcmp.gt.f32.partialorder %v11850_v30, 0.0  ;;  %v4923_v6 = vpop.f32.mrb[20].mxu1  ;;  %v13448_v26 = vld [vmem:[#allocation244_spill] sm:$0xff] }
 0x56b   :  { %vm4993_vm1 = vcmp.gt.f32.partialorder %v11864_v27, 0.0  ;;  %7016 = vpow2.f32 %v5172_v18  ;;  %v5760_v45 = vand.u32 2147483647, %v5620_v19  ;;  %v5623_v35 = vadd.f32 %v6661_v62, %v11674_v28  ;;  %v7013_v5 = vpop.eup %7012  ;;  %v4925_v49 = vpop.f32.mrb[21].mxu1 }
 0x56c   :  { %v6535_v53 = vadd.f32 -1.0, %v7005_v23  ;;  %7018 = vpow2.f32 %v5174_v1  ;;  %v5758_v46 = vand.u32 2147483647, %v5612_v13  ;;  %v5615_v14 = vadd.f32 %v11674_v28, %v5614_v59  ;;  %v4926_v1 = vpop.f32.mrb[22].mxu1  ;;  %6026 = vxpose.xlu1.b32.cont [10/16] %v12022_v38, 128  ;;  %v13449_v59 = vld [vmem:[#allocation242_spill] sm:$0xff] }
 0x56d   :  { %v6536_v31 = vadd.f32 -1.0, %v7007_v24  ;;  %v5824_v43 = vmul.f32 %v5760_v45, %v12037_v22  ;;  %v5761_v12 = vand.u32 2147483647, %v5623_v35  ;;  %v12125_v7 = vadd.f32 %v4923_v6, %v13445_v16  ;;  %v4928_v22 = vpop.f32.mrb[23].mxu1 }
 0x56e   :  { %v6537_v18 = vadd.f32 -1.0, %v7009_v32  ;;  %7020 = vpow2.f32 %v5176_v63  ;;  %v5062_v44 = vmin.f32 %v11988_v0, 0.0  ;;  %v5822_v23 = vmul.f32 %v5758_v46, %v12016_v48  ;;  %6050 = vxpose.xlu0.b32.cont [2/16] %v5954_v57, 128  ;;  %v6664_v63 = vpop.f32.mrb[8].mxu0  ;;  %v13447_v48 = vld [vmem:[#allocation241_spill] sm:$0xff] }
 0x56f   :  { %v5759_v8 = vand.u32 2147483647, %v5615_v14  ;;  %v5825_v11 = vmul.f32 %v5761_v12, %v5305_v54  ;;  %v12131_v24 = vadd.f32 %v4926_v1, %v13446_v47  ;;  %v5309_v19 = vsel %vm4989_vm13, %v11770_v9, %v6535_v53  ;;  %v5627_v57 = vpop.f32.mrb[9].mxu0  ;;  %v13451_v1 = vld [vmem:[#allocation277_spill] sm:$0xff] }
 0x570   :  { %v6538_v51 = vadd.f32 -1.0, %v7011_v42  ;;  %v6539_v13 = vadd.f32 -1.0, %v7013_v5  ;;  %v5957_v62 = vadd.f32 %v13447_v48, %v5822_v23  ;;  %v12139_v37 = vadd.f32 %v13448_v26, %v5824_v43  ;;  %v6665_v35 = vpop.f32.mrb[10].mxu0  ;;  %6027 = vxpose.xlu1.b32.cont [11/16] %v12009_v55, 128  ;;  %v13450_v5 = vld [vmem:[#allocation245_spill] sm:$0xff]  ;;  %v13452_v48 = vld [vmem:[#allocation278_spill] sm:$0xff] }
 0x571   :  { %v5823_v32 = vmul.f32 %v5759_v8, %v12031_v4  ;;  %v5063_v38 = vmin.f32 %v12001_v36, 0.0  ;;  %v5636_v54 = vadd.f32 %v6664_v63, %v11674_v28  ;;  %v12146_v45 = vsel %vm4990_vm14, %v11812_v29, %v6536_v31 }
 0x572   :  { %v12151_v9 = vsel %vm4991_vm15, %v11821_v33, %v6537_v18  ;;  %v5178_v4 = vmul.f32 1.442695, %v5062_v44  ;;  %v5628_v42 = vadd.f32 %v11674_v28, %v5627_v57  ;;  %6051 = vxpose.xlu0.b32.cont [3/16] %v5955_v41, 128  ;;  %v12159_v46 = vadd.f32 %v13450_v5, %v5825_v11  ;;  %v7015_v29 = vpop.eup %7014  ;;  %v12166_v28 = vld [vmem:[%s12379_s9] ss:$0 sm:$0xff]  ;;  %v5630_v41 = vpop.f32.mrb[11].mxu0 }
 0x573   :  { %v12156_v53 = vadd.f32 %v13449_v59, %v5823_v32  ;;  %v5064_v14 = vmin.f32 %v12042_v52, 0.0  ;;  %v5065_v6 = vmin.f32 %v12050_v10, 0.0  ;;  %v5764_v33 = vand.u32 2147483647, %v5636_v54  ;;  %v4931_v12 = vpop.f32.mrb[24].mxu1 }
 0x574   :  { %v5639_v55 = vadd.f32 %v12166_v28, %v6665_v35  ;;  %v5762_v31 = vand.u32 2147483647, %v5628_v42  ;;  %v5631_v43 = vadd.f32 %v12166_v28, %v5630_v41  ;;  %v5312_v16 = vsel %vm4992_vm0, %v11850_v30, %v6538_v51  ;;  %v4933_v47 = vpop.f32.mrb[25].mxu1  ;;  %6028 = vxpose.xlu1.b32.cont [12/16] %v12025_v15, 128  ;;  %v13454_v42 = vld [vmem:[#allocation249_spill] sm:$0xff]  ;;  %v13456_v41 = vld [vmem:[#allocation250_spill] sm:$0xff] }
 0x575   :  { %v12176_v49 = vsel %vm4993_vm1, %v11864_v27, %v6539_v13  ;;  %v7017_v18 = vpop.eup %7016  ;;  %v5180_v44 = vmul.f32 1.442695, %v5063_v38  ;;  %v5828_v23 = vmul.f32 %v5764_v33, %v12106_v40  ;;  %v12180_v11 = vadd.f32 %v4931_v12, %v13451_v1  ;;  %v4934_v32 = vpop.f32.mrb[26].mxu1 }
 0x576   :  { %v5765_v8 = vand.u32 2147483647, %v5639_v55  ;;  %v7019_v22 = vpop.eup %7018  ;;  %vm4994_vm2 = vcmp.gt.f32.partialorder %v11899_v20, 0.0  ;;  %7022 = vpow2.f32 %v5178_v4  ;;  %v5826_v30 = vmul.f32 %v5762_v31, %v12095_v60  ;;  %6052 = vxpose.xlu0.b32.cont [4/16] %v12117_v39, 128  ;;  %v4936_v38 = vpop.f32.mrb[27].mxu1  ;;  %v13453_v4 = vld [vmem:[#allocation247_spill] sm:$0xff] }
 0x577   :  { %v5763_v51 = vand.u32 2147483647, %v5631_v43  ;;  %v6540_v27 = vadd.f32 -1.0, %v7015_v29  ;;  %vm4995_vm3 = vcmp.gt.f32.partialorder %v11906_v56, 0.0  ;;  %vm4996_vm4 = vcmp.gt.f32.partialorder %v11943_v61, 0.0  ;;  %v6668_v15 = vpop.f32.mrb[12].mxu0 }
 0x578   :  { %v5182_v40 = vmul.f32 1.442695, %v5064_v14  ;;  %v5184_v63 = vmul.f32 1.442695, %v5065_v6  ;;  %v5829_v13 = vmul.f32 %v5765_v8, %v5309_v19  ;;  %v12189_v26 = vadd.f32 %v4934_v32, %v13452_v48  ;;  %v7021_v54 = vpop.eup %7020  ;;  %v5643_v19 = vpop.f32.mrb[13].mxu0  ;;  %6029 = vxpose.xlu1.b32.cont [13/16] %v12056_v17, 128 }
 0x579   :  { %v5066_v60 = vmin.f32 %v12078_v34, 0.0  ;;  %v5827_v57 = vmul.f32 %v5763_v51, %v12111_v3  ;;  %v12194_v39 = vadd.f32 %v13453_v4, %v5826_v30  ;;  %v12197_v35 = vadd.f32 %v13454_v42, %v5828_v23  ;;  %v6669_v33 = vpop.f32.mrb[14].mxu0  ;;  %v13455_v3 = vld [vmem:[#allocation248_spill] sm:$0xff]  ;;  %v13457_v30 = vld [vmem:[#allocation279_spill] sm:$0xff] }
 0x57a   :  { %7024 = vpow2.f32 %v5180_v44  ;;  %v5652_v59 = vadd.f32 %v12166_v28, %v6668_v15  ;;  %v6542_v5 = vadd.f32 -1.0, %v7019_v22  ;;  %v6541_v29 = vadd.f32 -1.0, %v7017_v18  ;;  %6053 = vxpose.xlu0.b32.cont [5/16] %v5957_v62, 128  ;;  %v5646_v44 = vpop.f32.mrb[15].mxu0  ;;  %v4939_v47 = vpop.f32.mrb[28].mxu1  ;;  %v13459_v42 = vld [vmem:[#allocation251_spill] sm:$0xff] }
 0x57b   :  { %v5068_v14 = vmin.f32 %v12125_v7, 0.0  ;;  %v5644_v6 = vadd.f32 %v12166_v28, %v5643_v19  ;;  %v12204_v55 = vadd.f32 %v13455_v3, %v5827_v57  ;;  %v12207_v31 = vadd.f32 %v13456_v41, %v5829_v13  ;;  %v4941_v32 = vpop.f32.mrb[29].mxu1 }
 0x57c   :  { %7026 = vpow2.f32 %v5182_v40  ;;  %v5768_v43 = vand.u32 2147483647, %v5652_v59  ;;  %v5655_v12 = vadd.f32 %v12166_v28, %v6669_v33  ;;  %v6543_v18 = vadd.f32 -1.0, %v7021_v54  ;;  %6030 = vxpose.xlu1.b32.cont [14/16] %v12064_v25, 128  ;;  %v13458_v54 = vld [vmem:[#allocation280_spill] sm:$0xff] }
 0x57d   :  { %7028 = vpow2.f32 %v5184_v63  ;;  %v5186_v23 = vmul.f32 1.442695, %v5066_v60  ;;  %v5766_v8 = vand.u32 2147483647, %v5644_v6  ;;  %v5647_v1 = vadd.f32 %v12166_v28, %v5646_v44  ;;  %v4942_v63 = vpop.f32.mrb[30].mxu1 }
 0x57e   :  { %v5069_v17 = vmin.f32 %v12131_v24, 0.0  ;;  %v5832_v62 = vmul.f32 %v5768_v43, %v5312_v16  ;;  %v5769_v22 = vand.u32 2147483647, %v5655_v12  ;;  %v12213_v51 = vadd.f32 %v4939_v47, %v13457_v30  ;;  %6054 = vxpose.xlu0.b32.cont [6/16] %v12156_v53, 128  ;;  %v4944_v57 = vpop.f32.mrb[31].mxu1  ;;  %v6672_v53 = vpop.f32.mrb[16].mxu0 }
 0x57f   :  { %v5067_v40 = vmin.f32 %v12090_v21, 0.0  ;;  %v5190_v13 = vmul.f32 1.442695, %v5068_v14  ;;  %v5830_v48 = vmul.f32 %v5766_v8, %v12146_v45  ;;  %v5767_v38 = vand.u32 2147483647, %v5647_v1 }
 0x580   :  { %vm4997_vm5 = vcmp.gt.f32.partialorder %v11954_v2, 0.0  ;;  %v5833_v16 = vmul.f32 %v5769_v22, %v12176_v49  ;;  %v12222_v60 = vadd.f32 %v4942_v63, %v13458_v54  ;;  %v5314_v15 = vsel %vm4994_vm2, %v11899_v20, %v6540_v27  ;;  %v7023_v4 = vpop.eup %7022  ;;  %v5659_v20 = vpop.f32.mrb[17].mxu0  ;;  %6031 = vxpose.xlu1.b32.cont [15/16] %v12071_v50, 128 }
 0x581   :  { %v5831_v45 = vmul.f32 %v5767_v38, %v12151_v9  ;;  %v5316_v25 = vsel %vm4996_vm4, %v11943_v61, %v6542_v5  ;;  %v5315_v49 = vsel %vm4995_vm3, %v11906_v56, %v6541_v29  ;;  %v12235_v59 = vadd.f32 %v13459_v42, %v5830_v48  ;;  %v6673_v61 = vpop.f32.mrb[18].mxu0  ;;  %v13460_v56 = vld [vmem:[#allocation252_spill] sm:$0xff]  ;;  %v13463_v48 = vld [vmem:[#allocation259_spill] sm:$0xff] }
 0x582   :  { %7030 = vpow2.f32 %v5186_v23  ;;  %v5192_v19 = vmul.f32 1.442695, %v5069_v17  ;;  %v5668_v14 = vadd.f32 %v12166_v28, %v6672_v53  ;;  %v5317_v27 = vsel %vm4997_vm5, %v11954_v2, %v6543_v18  ;;  %6055 = vxpose.xlu0.b32.cont [7/16] %v12139_v37, 128  ;;  %v5662_v43 = vpop.f32.mrb[19].mxu0  ;;  %v13461_v37 = vld [vmem:[#allocation254_spill] sm:$0xff]  ;;  %v13462_v18 = vld [vmem:[#allocation255_spill] sm:$0xff] }
 0x583   :  { %v5188_v9 = vmul.f32 1.442695, %v5067_v40  ;;  %7032 = vpow2.f32 %v5190_v13  ;;  %v5660_v6 = vadd.f32 %v12166_v28, %v5659_v20  ;;  %v12243_v5 = vadd.f32 %v13460_v56, %v5831_v45  ;;  %v13464_v45 = vld [vmem:[#allocation257_spill] sm:$0xff] }
 0x584   :  { %v7025_v29 = vpop.eup %7024  ;;  %vm5000_vm6 = vcmp.gt.f32.partialorder %v12042_v52, 0.0  ;;  %v5070_v33 = vmin.f32 %v12180_v11, 0.0  ;;  %v5072_v3 = vmin.f32 %v12213_v51, 0.0  ;;  %v5772_v2 = vand.u32 2147483647, %v5668_v14  ;;  %6032 = vxpose.xlu1.b32.end [16/16] %v12074_v58, 128  ;;  %v13465_v58 = vld [vmem:[#allocation260_spill] sm:$0xff] }
 0x585   :  { %v5671_v41 = vadd.f32 %v12166_v28, %v6673_v61  ;;  %vm4998_vm7 = vcmp.gt.f32.partialorder %v11988_v0, 0.0  ;;  %v5770_v12 = vand.u32 2147483647, %v5660_v6  ;;  %v5663_v50 = vadd.f32 %v12166_v28, %v5662_v43 }
 0x586   :  { %v12252_v44 = vadd.f32 %v13461_v37, %v5832_v62  ;;  %v12255_v23 = vadd.f32 %v13462_v18, %v5833_v16  ;;  %v7027_v8 = vpop.eup %7026  ;;  %7034 = vpow2.f32 %v5192_v19  ;;  %v5073_v1 = vmin.f32 %v12222_v60, 0.0  ;;  %6056 = vxpose.xlu0.b32.cont [8/16] %v12159_v46, 128  ;;  %v6676_v57 = vpop.f32.mrb[20].mxu0 }
 0x587   :  { %v5836_v47 = vmul.f32 %v5772_v2, %v5316_v25  ;;  %v5773_v17 = vand.u32 2147483647, %v5671_v41  ;;  %v7029_v22 = vpop.eup %7028  ;;  %vm4999_vm8 = vcmp.gt.f32.partialorder %v12001_v36, 0.0  ;;  %7036 = vpow2.f32 %v5188_v9  ;;  %v5675_v19 = vpop.f32.mrb[21].mxu0 }
 0x588   :  { %v5071_v30 = vmin.f32 %v12189_v26, 0.0  ;;  %v5834_v32 = vmul.f32 %v5770_v12, %v5314_v15  ;;  %v5771_v40 = vand.u32 2147483647, %v5663_v50  ;;  %vm5001_vm9 = vcmp.gt.f32.partialorder %v12050_v10, 0.0  ;;  %v6677_v9 = vpop.f32.mrb[22].mxu0 }
 0x589   :  { %v5198_v62 = vmul.f32 1.442695, %v5072_v3  ;;  %v5837_v13 = vmul.f32 %v5773_v17, %v5317_v27  ;;  %v5971_v38 = vadd.f32 %v13463_v48, %v5836_v47  ;;  %v5194_v63 = vmul.f32 1.442695, %v5070_v33  ;;  %v5678_v3 = vpop.f32.mrb[23].mxu0 }
 0x58a   :  { %v5835_v16 = vmul.f32 %v5771_v40, %v5315_v49  ;;  %v6546_v54 = vadd.f32 -1.0, %v7027_v8  ;;  %v5969_v25 = vadd.f32 %v13464_v45, %v5834_v32  ;;  %v5200_v53 = vmul.f32 1.442695, %v5073_v1  ;;  %6057 = vxpose.xlu0.b32.cont [9/16] %v12194_v39, 128  ;;  %v13466_v49 = vld [vmem:[#allocation258_spill] sm:$0xff]  ;;  %v13467_v1 = vld [vmem:[#allocation271_spill] sm:$0xff]  ;;  %v13469_v40 = vld [vmem:[#allocation344_spill] sm:$0xff] }
 0x58b   :  { %v5684_v15 = vadd.f32 %v12166_v28, %v6676_v57  ;;  %v6544_v42 = vadd.f32 -1.0, %v7023_v4  ;;  %v12267_v14 = vadd.f32 %v13465_v58, %v5837_v13  ;;  %v5196_v46 = vmul.f32 1.442695, %v5071_v30 }
 0x58c   :  { %v5676_v20 = vadd.f32 %v12166_v28, %v5675_v19  ;;  %v6547_v27 = vadd.f32 -1.0, %v7029_v22  ;;  %6081 = vxpose.xlu1.b32.start [1/16] %v5969_v25, 128  ;;  %v5970_v6 = vadd.f32 %v13466_v49, %v5835_v16  ;;  %v7031_v61 = vpop.eup %7030  ;;  %7038 = vpow2.f32 %v5198_v62  ;;  %v13470_v62 = vld [vmem:[#allocation177_spill] sm:$0xff] }
 0x58d   :  { %v5776_v56 = vand.u32 2147483647, %v5684_v15  ;;  %v5687_v33 = vadd.f32 %v12166_v28, %v6677_v9  ;;  %v6545_v4 = vadd.f32 -1.0, %v7025_v29  ;;  %v7033_v2 = vpop.eup %7032  ;;  %7040 = vpow2.f32 %v5194_v63 }
 0x58e   :  { %v5320_v41 = vsel %vm5000_vm6, %v12042_v52, %v6546_v54  ;;  %v5774_v43 = vand.u32 2147483647, %v5676_v20  ;;  %v5679_v12 = vadd.f32 %v12166_v28, %v5678_v3  ;;  %7042 = vpow2.f32 %v5200_v53  ;;  %6058 = vxpose.xlu0.b32.cont [10/16] %v12204_v55, 128  ;;  %v6680_v63 = vpop.f32.mrb[24].mxu0  ;;  %v13471_v55 = vld [vmem:[#allocation261_spill] sm:$0xff] }
 0x58f   :  { %v5840_v39 = vmul.f32 %v5776_v56, %v5320_v41  ;;  %v5318_v50 = vsel %vm4998_vm7, %v11988_v0, %v6544_v42  ;;  %v5777_v37 = vand.u32 2147483647, %v5687_v33  ;;  %7044 = vpow2.f32 %v5196_v46  ;;  %v13468_v0 = vld [vmem:[#allocation263_spill] sm:$0xff]  ;;  %v13472_v54 = vld [vmem:[#allocation273_spill] sm:$0xff]  ;;  %v5691_v53 = vpop.f32.mrb[25].mxu0 }
 0x590   :  { %v5838_v18 = vmul.f32 %v5774_v43, %v5318_v50  ;;  %v5321_v29 = vsel %vm5001_vm9, %v12050_v10, %v6547_v27  ;;  %v5775_v8 = vand.u32 2147483647, %v5679_v12  ;;  %6082 = vxpose.xlu1.b32.cont [2/16] %v5970_v6, 128  ;;  %v7035_v52 = vpop.eup %7034  ;;  %v1528_v47 = vmax.f32 %v13467_v1, 0.0  ;;  %v13474_v42 = vld [vmem:[#allocation185_spill] sm:$0xff]  ;;  %v6681_v20 = vpop.f32.mrb[26].mxu0  ;;  %v13475_v27 = vld [vmem:[#allocation262_spill] sm:$0xff] }
 0x591   :  { %v5841_v17 = vmul.f32 %v5777_v37, %v5321_v29  ;;  %v5319_v22 = vsel %vm4999_vm8, %v12001_v36, %v6545_v4  ;;  %v12289_v30 = vadd.f32 %v13468_v0, %v5840_v39  ;;  %v7037_v32 = vpop.eup %7036  ;;  %v12293_v13 = vadd.f32 %v13470_v62, %v13469_v40  ;;  %v13473_v36 = vld [vmem:[#allocation264_spill] sm:$0xff]  ;;  %v5694_v56 = vpop.f32.mrb[27].mxu0  ;;  %v13477_v0 = vld [vmem:[#allocation267_spill] sm:$0xff] }
 0x592   :  { %v5839_v10 = vmul.f32 %v5775_v8, %v5319_v22  ;;  %v6550_v48 = vadd.f32 -1.0, %v7033_v2  ;;  %v5973_v16 = vadd.f32 %v13471_v55, %v5838_v18  ;;  %v1530_v57 = vmax.f32 %v13472_v54, 0.0  ;;  %6059 = vxpose.xlu0.b32.cont [11/16] %v12197_v35, 128  ;;  %v13476_v8 = vld [vmem:[#allocation269_spill] sm:$0xff]  ;;  %v13479_v54 = vld [vmem:[#allocation268_spill] sm:$0xff] }
 0x593   :  { %v5700_v45 = vadd.f32 %v12166_v28, %v6680_v63  ;;  %v6548_v25 = vadd.f32 -1.0, %v7031_v61  ;;  %v12299_v15 = vadd.f32 %v13473_v36, %v5841_v17  ;;  %v12303_v19 = vadd.f32 %v13474_v42, %v13469_v40 }
 0x594   :  { %v5692_v58 = vadd.f32 %v12166_v28, %v5691_v53  ;;  %v6551_v46 = vadd.f32 -1.0, %v7035_v52  ;;  %6083 = vxpose.xlu1.b32.cont [3/16] %v5971_v38, 128  ;;  %v12308_v9 = vadd.f32 %v13475_v27, %v5839_v10  ;;  %vm5004_vm10 = vcmp.gt.f32.partialorder %v12125_v7, 0.0 }
 0x595   :  { %v5780_v49 = vand.u32 2147483647, %v5700_v45  ;;  %v5703_v6 = vadd.f32 %v12166_v28, %v6681_v20  ;;  %v6549_v61 = vadd.f32 -1.0, %v7037_v32  ;;  %vm5002_vm11 = vcmp.gt.f32.partialorder %v12078_v34, 0.0 }
 0x596   :  { %v5324_v33 = vsel %vm5004_vm10, %v12125_v7, %v6550_v48  ;;  %v5778_v4 = vand.u32 2147483647, %v5692_v58  ;;  %v5695_v3 = vadd.f32 %v12166_v28, %v5694_v56  ;;  %v7039_v38 = vpop.eup %7038  ;;  %vm5005_vm12 = vcmp.gt.f32.partialorder %v12131_v24, 0.0  ;;  %6060 = vxpose.xlu0.b32.cont [12/16] %v12207_v31, 128  ;;  %v6684_v22 = vpop.f32.mrb[28].mxu0 }
 0x597   :  { %v5844_v35 = vmul.f32 %v5780_v49, %v5324_v33  ;;  %v5322_v2 = vsel %vm5002_vm11, %v12078_v34, %v6548_v25  ;;  %v5781_v41 = vand.u32 2147483647, %v5703_v6  ;;  %v7041_v43 = vpop.eup %7040  ;;  %vm5003_vm13 = vcmp.gt.f32.partialorder %v12090_v21, 0.0 }
 0x598   :  { %v5842_v12 = vmul.f32 %v5778_v4, %v5322_v2  ;;  %v5325_v39 = vsel %vm5005_vm12, %v12131_v24, %v6551_v46  ;;  %v5779_v50 = vand.u32 2147483647, %v5695_v3  ;;  %6084 = vxpose.xlu1.b32.cont [4/16] %v12267_v14, 128  ;;  %v7043_v7 = vpop.eup %7042  ;;  %v1529_v37 = vmax.f32 %v12293_v13, 0.0  ;;  %v7056_v24 = vld [vmem:[%s12380_s10] ss:$0 sm:$0xff]  ;;  %v5707_v13 = vpop.f32.mrb[29].mxu0 }
 0x599   :  { %v5845_v18 = vmul.f32 %v5781_v41, %v5325_v39  ;;  %v5323_v29 = vsel %vm5003_vm13, %v12090_v21, %v6549_v61  ;;  %v5979_v34 = vadd.f32 %v13476_v8, %v5844_v35  ;;  %v7045_v52 = vpop.eup %7044  ;;  %v6554_v17 = vadd.f32 -1.0, %v7039_v38  ;;  %v13478_v21 = vld [vmem:[#allocation270_spill] sm:$0xff]  ;;  %v6685_v55 = vpop.f32.mrb[30].mxu0  ;;  %s7185_s10 = smov [#allocation11]  }
 0x59a   :  { %v5843_v1 = vmul.f32 %v5779_v50, %v5323_v29  ;;  %v5977_v32 = vadd.f32 %v13477_v0, %v5842_v12  ;;  %v5917_v14 = vmul.f32 %v7056_v24, %v1528_v47  ;;  %v1531_v31 = vmax.f32 %v12303_v19, 0.0  ;;  %6061 = vxpose.xlu0.b32.cont [13/16] %v12235_v59, 128  ;;  %v5710_v42 = vpop.f32.mrb[31].mxu0  ;;  %s6251_s27 = sshll.u32 %s7185_s10, 4  ;;  %s6252_s27 = int_to_ptr.vmem [resolvable:$true] %s6251_s27 }
 0x59b   :  { %v5716_v40 = vadd.f32 %v12166_v28, %v6684_v22  ;;  %v6552_v62 = vadd.f32 -1.0, %v7041_v43  ;;  %v5980_v10 = vadd.f32 %v13478_v21, %v5845_v18  ;;  %v5708_v48 = vadd.f32 %v12166_v28, %v5707_v13  ;;  %v6197_v18 = vld [vmem:[#allocation2] sm:$0x1]  ;;  %s7145_s28 = scalar_lea.vmem %s6252_s27, 64  ;;  %p7150_p5 = scmp.lt.s32.totalorder %s6252_s27, %s6252_s27 }
 0x59c   :  { %v6555_v63 = vadd.f32 -1.0, %v7043_v7  ;;  %6085 = vxpose.xlu1.b32.cont [5/16] %v5973_v16, 128  ;;  %v5978_v45 = vadd.f32 %v13479_v54, %v5843_v1  ;;  %v5919_v25 = vmul.f32 %v7056_v24, %v1530_v57  ;;  %vm5008_vm14 = vcmp.gt.f32.partialorder %v12213_v51, 0.0  ;;  %p7146_p4 = scmp.ne.s32.totalorder %s6252_s27, %s7145_s28  ;;  %p7151_p6 = scmp.lt.s32.totalorder %s7145_s28, %s7145_s28 }
 0x59d   :  { %v5784_v47 = vand.u32 2147483647, %v5716_v40  ;;  %v5719_v53 = vadd.f32 %v12166_v28, %v6685_v55  ;;  %v6553_v36 = vadd.f32 -1.0, %v7045_v52  ;;  %vm5006_vm15 = vcmp.gt.f32.partialorder %v12180_v11, 0.0 }
 0x59e   :  { %v5328_v19 = vsel %vm5008_vm14, %v12213_v51, %v6554_v17  ;;  %v5782_v58 = vand.u32 2147483647, %v5708_v48  ;;  %v5711_v46 = vadd.f32 %v12166_v28, %v5710_v42  ;;  %vm5009_vm0 = vcmp.gt.f32.partialorder %v12222_v60, 0.0  ;;  %6062 = vxpose.xlu0.b32.cont [14/16] %v12243_v5, 128  ;;  %p7152_p7 = por %p7151_p6, %p7150_p5 }
 0x59f   :  { %v5848_v59 = vmul.f32 %v5784_v47, %v5328_v19  ;;  %v5326_v16 = vsel %vm5006_vm15, %v12180_v11, %v6552_v62  ;;  %v5785_v57 = vand.u32 2147483647, %v5719_v53  ;;  %vm5007_vm1 = vcmp.gt.f32.partialorder %v12189_v26, 0.0 }
 0x5a0   :  { %v5846_v20 = vmul.f32 %v5782_v58, %v5326_v16  ;;  %v5329_v27 = vsel %vm5009_vm0, %v12222_v60, %v6555_v63  ;;  %v5783_v49 = vand.u32 2147483647, %v5711_v46  ;;  %6086 = vxpose.xlu1.b32.cont [6/16] %v12308_v9, 128  ;;  %v5327_v6 = vsel %vm5007_vm1, %v12189_v26, %v6553_v36  ;;  %p7153_p8 = pnand %p7152_p7, %p7146_p4 }
 0x5a1   :  { %v5849_v51 = vmul.f32 %v5785_v57, %v5329_v27  ;;  %v5983_v28 = vadd.f32 %v5919_v25, %v5848_v59  ;;  %v5920_v61 = vmul.f32 %v7056_v24, %v1531_v31  ;;  %v5918_v4 = vmul.f32 %v7056_v24, %v1529_v37 }
 0x5a2   :  { %v5847_v56 = vmul.f32 %v5783_v49, %v5327_v6  ;;  %v5981_v33 = vadd.f32 %v5917_v14, %v5846_v20  ;;  %6063 = vxpose.xlu0.b32.cont [15/16] %v12252_v44, 128  ;;  %v13480_v1 = vmov 0  }
 0x5a3   :  { %v5984_v11 = vadd.f32 %v5920_v61, %v5849_v51 }
 0x5a4   :  { %6087 = vxpose.xlu1.b32.cont [7/16] %v12289_v30, 128  ;;  %v5982_v3 = vadd.f32 %v5918_v4, %v5847_v56 }
 0x5a6   :  { %6064 = vxpose.xlu0.b32.end [16/16] %v12255_v23, 128 }
 0x5a8   :  { %6088 = vxpose.xlu1.b32.cont [8/16] %v12299_v15, 128  ;;  %v6001_v60 = vpop.trf.xlu0 }
 0x5ac   :  { %6089 = vxpose.xlu1.b32.cont [9/16] %v5977_v32, 128  ;;  %v6002_v5 = vpop.trf.xlu0 }
 0x5ad   :  { %v6113_v26 = vadd.f32 %v6002_v5, %v6001_v60 }
 0x5b0   :  { %6090 = vxpose.xlu1.b32.cont [10/16] %v5978_v45, 128  ;;  %v6003_v9 = vpop.trf.xlu0 }
 0x5b1   :  { %v6114_v38 = vadd.f32 %v6113_v26, %v6003_v9 }
 0x5b4   :  { %6091 = vxpose.xlu1.b32.cont [11/16] %v5979_v34, 128  ;;  %v6004_v35 = vpop.trf.xlu0 }
 0x5b5   :  { %v6115_v2 = vadd.f32 %v6114_v38, %v6004_v35 }
 0x5b8   :  { %6092 = vxpose.xlu1.b32.cont [12/16] %v5980_v10, 128  ;;  %v6005_v30 = vpop.trf.xlu0 }
 0x5b9   :  { %v6116_v41 = vadd.f32 %v6115_v2, %v6005_v30 }
 0x5bc   :  { %6093 = vxpose.xlu1.b32.cont [13/16] %v5981_v33, 128  ;;  %v6006_v44 = vpop.trf.xlu0 }
 0x5bd   :  { %v6117_v43 = vadd.f32 %v6116_v41, %v6006_v44 }
 0x5c0   :  { %6094 = vxpose.xlu1.b32.cont [14/16] %v5982_v3, 128  ;;  %v6007_v15 = vpop.trf.xlu0 }
 0x5c1   :  { %v6118_v23 = vadd.f32 %v6117_v43, %v6007_v15 }
 0x5c4   :  { %6095 = vxpose.xlu1.b32.cont [15/16] %v5983_v28, 128  ;;  %v6008_v12 = vpop.trf.xlu0 }
 0x5c5   :  { %v6119_v39 = vadd.f32 %v6118_v23, %v6008_v12 }
 0x5c8   :  { %6096 = vxpose.xlu1.b32.end [16/16] %v5984_v11, 128  ;;  %v6033_v50 = vpop.trf.xlu1  ;;  %v6009_v7 = vpop.trf.xlu0 }
 0x5c9   :  { %v6120_v37 = vadd.f32 %v6119_v39, %v6009_v7 }
 0x5cc   :  { %v6034_v29 = vpop.trf.xlu1  ;;  %v6010_v8 = vpop.trf.xlu0 }
 0x5cd   :  { %v6134_v34 = vadd.f32 %v6034_v29, %v6033_v50  ;;  %v6121_v52 = vadd.f32 %v6120_v37, %v6010_v8 }
 0x5cf   :  { %6713 = vset.pattern.permute.xlu0 %v13480_v1 }
 0x5d0   :  { %6200 = vperm.xlu0 %6713, %v6197_v18   ;;  %v6035_v17 = vpop.trf.xlu1  ;;  %v6011_v22 = vpop.trf.xlu0 }
 0x5d1   :  { %v6135_v0 = vadd.f32 %v6134_v34, %v6035_v17  ;;  %v6122_v32 = vadd.f32 %v6121_v52, %v6011_v22 }
 0x5d4   :  { %v6036_v24 = vpop.trf.xlu1  ;;  %v6012_v14 = vpop.trf.xlu0 }
 0x5d5   :  { %v6136_v31 = vadd.f32 %v6135_v0, %v6036_v24  ;;  %v6123_v40 = vadd.f32 %v6122_v32, %v6012_v14 }
 0x5d8   :  { %v6037_v62 = vpop.trf.xlu1  ;;  %v6013_v13 = vpop.trf.xlu0 }
 0x5d9   :  { %v6137_v21 = vadd.f32 %v6136_v31, %v6037_v62  ;;  %v6124_v10 = vadd.f32 %v6123_v40, %v6013_v13 }
 0x5dc   :  { %v6038_v48 = vpop.trf.xlu1  ;;  %v6014_v63 = vpop.trf.xlu0 }
 0x5dd   :  { %v6138_v55 = vadd.f32 %v6137_v21, %v6038_v48  ;;  %v6125_v54 = vadd.f32 %v6124_v10, %v6014_v63 }
 0x5e0   :  { %v6039_v45 = vpop.trf.xlu1  ;;  %v6015_v25 = vpop.trf.xlu0 }
 0x5e1   :  { %v6139_v47 = vadd.f32 %v6138_v55, %v6039_v45  ;;  %v6126_v53 = vadd.f32 %v6125_v54, %v6015_v25 }
 0x5e4   :  { %v6040_v36 = vpop.trf.xlu1  ;;  %v6016_v42 = vpop.trf.xlu0 }
 0x5e5   :  { %v6140_v19 = vadd.f32 %v6139_v47, %v6040_v36  ;;  %v12351_v58 = vadd.f32 %v6126_v53, %v6016_v42 }
 0x5e8   :  { %v6041_v46 = vpop.trf.xlu1 }
 0x5e9   :  { %v6141_v16 = vadd.f32 %v6140_v19, %v6041_v46 }
 0x5ea   :  { %v6065_v59 = vpop.trf.xlu0 }
 0x5ec   :  { %v6042_v57 = vpop.trf.xlu1 }
 0x5ed   :  { %v6142_v27 = vadd.f32 %v6141_v16, %v6042_v57 }
 0x5ee   :  { %v6066_v20 = vpop.trf.xlu0 }
 0x5ef   :  { %v6155_v38 = vadd.f32 %v6066_v20, %v6065_v59 }
 0x5f0   :  { %v6043_v49 = vpop.trf.xlu1 }
 0x5f1   :  { %v6143_v6 = vadd.f32 %v6142_v27, %v6043_v49  ;;  %v6128_v49 = vrot.slane %v12351_v58, 4 }
 0x5f2   :  { %v6067_v51 = vpop.trf.xlu0 }
 0x5f3   :  { %v6156_v30 = vadd.f32 %v6155_v38, %v6067_v51 }
 0x5f4   :  { %v6044_v28 = vpop.trf.xlu1 }
 0x5f5   :  { %v6144_v56 = vadd.f32 %v6143_v6, %v6044_v28 }
 0x5f6   :  { %v6068_v61 = vpop.trf.xlu0 }
 0x5f7   :  { %v6157_v15 = vadd.f32 %v6156_v30, %v6068_v61 }
 0x5f8   :  { %v6045_v33 = vpop.trf.xlu1 }
 0x5f9   :  { %v6145_v11 = vadd.f32 %v6144_v56, %v6045_v33  ;;  %v6129_v33 = vadd.f32 %v6128_v49, %v12351_v58  ;;  %v7184_v58 = vmov 1966171168  }
 0x5fa   :  { %v6069_v4 = vpop.trf.xlu0 }
 0x5fb   :  { %v6158_v39 = vadd.f32 %v6157_v15, %v6069_v4 }
 0x5fc   :  { %v6046_v3 = vpop.trf.xlu1 }
 0x5fd   :  { %v6146_v5 = vadd.f32 %v6145_v11, %v6046_v3 }
 0x5fe   :  { %v6070_v60 = vpop.trf.xlu0 }
 0x5ff   :  { %v6159_v7 = vadd.f32 %v6158_v39, %v6070_v60 }
 0x600   :  { %v6047_v26 = vpop.trf.xlu1 }
 0x601   :  { %v6147_v35 = vadd.f32 %v6146_v5, %v6047_v26  ;;  %v6130_v26 = vrot.slane %v6129_v33, 2 }
 0x602   :  { %v6071_v9 = vpop.trf.xlu0 }
 0x603   :  { %v6160_v29 = vadd.f32 %v6159_v7, %v6071_v9 }
 0x604   :  { %v6048_v2 = vpop.trf.xlu1 }
 0x605   :  { %v6148_v41 = vadd.f32 %v6147_v35, %v6048_v2 }
 0x606   :  { %v6072_v44 = vpop.trf.xlu0 }
 0x607   :  { %v6161_v52 = vadd.f32 %v6160_v29, %v6072_v44  ;;  %v6149_v51 = vrot.slane %v6148_v41, 4  ;;  %v6131_v44 = vadd.f32 %v6130_v26, %v6129_v33 }
 0x609   :  { %v6150_v4 = vadd.f32 %v6149_v51, %v6148_v41  ;;  %v6132_v39 = vrot.slane %v6131_v44, 1  ;;  %v6218_v41 = vunpack.c.l.s4 %v7184_v58 }
 0x60a   :  { %v6073_v23 = vpop.trf.xlu0 }
 0x60b   :  { %v6162_v17 = vadd.f32 %v6161_v52, %v6073_v23  ;;  %v6151_v9 = vrot.slane %v6150_v4, 2  ;;  %v13481_v52 = vld [vmem:[#allocation17_spill] sm:$0xff] }
 0x60c   :  { %v6097_v43 = vpop.trf.xlu1 }
 0x60e   :  { %v6074_v37 = vpop.trf.xlu0 }
 0x60f   :  { %v6163_v32 = vadd.f32 %v6162_v17, %v6074_v37 }
 0x610   :  { %v6098_v12 = vpop.trf.xlu1 }
 0x611   :  { %v6176_v62 = vadd.f32 %v6098_v12, %v6097_v43  ;;  %v6152_v43 = vadd.f32 %v6151_v9, %v6150_v4 }
 0x612   :  { %v6075_v8 = vpop.trf.xlu0 }
 0x613   :  { %v6164_v31 = vadd.f32 %v6163_v32, %v6075_v8  ;;  %v6133_v8 = vadd.f32 %v6132_v39, %v6131_v44 }
 0x614   :  { %v6099_v50 = vpop.trf.xlu1 }
 0x615   :  { %v6177_v10 = vadd.f32 %v6176_v62, %v6099_v50  ;;  %v6153_v50 = vrot.slane %v6152_v43, 1 }
 0x616   :  { %v6076_v22 = vpop.trf.xlu0 }
 0x617   :  { %v6165_v13 = vadd.f32 %v6164_v31, %v6076_v22  ;;  %v6219_v22 = vunpack.c.0.s8 %v6218_v41 }
 0x618   :  { %v6100_v18 = vpop.trf.xlu1 }
 0x619   :  { %v6178_v63 = vadd.f32 %v6177_v10, %v6100_v18 }
 0x61a   :  { %v6077_v24 = vpop.trf.xlu0 }
 0x61b   :  { %v6166_v55 = vadd.f32 %v6165_v13, %v6077_v24  ;;  %v13482_v13 = vld [vmem:[#allocation16_spill] sm:$0xff] }
 0x61c   :  { %v6101_v34 = vpop.trf.xlu1 }
 0x61d   :  { %v6179_v54 = vadd.f32 %v6178_v63, %v6101_v34  ;;  %v6154_v34 = vadd.f32 %v6153_v50, %v6152_v43 }
 0x61e   :  { %v6078_v21 = vpop.trf.xlu0 }
 0x61f   :  { %v6167_v53 = vadd.f32 %v6166_v55, %v6078_v21  ;;  %v6222_v21 = vsub.s32 %v6219_v22, %v13482_v13 }
 0x620   :  { %v6102_v1 = vpop.trf.xlu1 }
 0x621   :  { %v6180_v47 = vadd.f32 %v6179_v54, %v6102_v1  ;;  %v13483_v54 = vlaneseq }
 0x622   :  { %v6079_v45 = vpop.trf.xlu0 }
 0x623   :  { %v6168_v19 = vadd.f32 %v6167_v53, %v6079_v45  ;;  %vm6242_vm2 = vcmp.lt.s32.totalorder %v13483_v54, 512 }
 0x624   :  { %v6103_v0 = vpop.trf.xlu1 }
 0x625   :  { %v6181_v36 = vadd.f32 %v6180_v47, %v6103_v0 }
 0x626   :  { %v6080_v59 = vpop.trf.xlu0 }
 0x627   :  { %v6169_v20 = vadd.f32 %v6168_v19, %v6080_v59 }
 0x628   :  { %v6104_v14 = vpop.trf.xlu1 }
 0x629   :  { %v6182_v46 = vadd.f32 %v6181_v36, %v6104_v14  ;;  %v6170_v61 = vrot.slane %v6169_v20, 4 }
 0x62b   :  { %v6171_v60 = vadd.f32 %v6170_v61, %v6169_v20 }
 0x62c   :  { %v6105_v40 = vpop.trf.xlu1 }
 0x62d   :  { %v6183_v16 = vadd.f32 %v6182_v46, %v6105_v40  ;;  %v6172_v2 = vrot.slane %v6171_v60, 2 }
 0x62f   :  { %v6173_v23 = vadd.f32 %v6172_v2, %v6171_v60 }
 0x630   :  { %v6106_v48 = vpop.trf.xlu1 }
 0x631   :  { %v6184_v27 = vadd.f32 %v6183_v16, %v6106_v48  ;;  %v6174_v37 = vrot.slane %v6173_v23, 1 }
 0x633   :  { %v6175_v24 = vadd.f32 %v6174_v37, %v6173_v23 }
 0x634   :  { %v6107_v25 = vpop.trf.xlu1 }
 0x635   :  { %v6185_v6 = vadd.f32 %v6184_v27, %v6107_v25 }
 0x638   :  { %v6108_v42 = vpop.trf.xlu1 }
 0x639   :  { %v6186_v56 = vadd.f32 %v6185_v6, %v6108_v42 }
 0x63c   :  { %v6109_v57 = vpop.trf.xlu1 }
 0x63d   :  { %v6187_v11 = vadd.f32 %v6186_v56, %v6109_v57 }
 0x640   :  { %v6110_v28 = vpop.trf.xlu1 }
 0x641   :  { %v6188_v5 = vadd.f32 %v6187_v11, %v6110_v28 }
 0x644   :  { %v6111_v3 = vpop.trf.xlu1 }
 0x645   :  { %v6189_v38 = vadd.f32 %v6188_v5, %v6111_v3 }
 0x648   :  { %v6112_v35 = vpop.trf.xlu1 }
 0x649   :  { %v6190_v30 = vadd.f32 %v6189_v38, %v6112_v35 }
 0x64b   :  { %v6191_v15 = vrot.slane %v6190_v30, 4 }
 0x64d   :  { %v6192_v12 = vadd.f32 %v6191_v15, %v6190_v30 }
 0x64f   :  { %v6193_v7 = vrot.slane %v6192_v12, 2  ;;  %v6201_v29 = vpop.permute.xlu0 %6200 }
 0x650   :  { %v6206_v1 = vrot.slane %v6201_v29, %v13481_v52 }
 0x651   :  { %v6194_v18 = vadd.f32 %v6193_v7, %v6192_v12 }
 0x652   :  { %v6207_v0 = vadd.f32 %v6206_v1, %v6133_v8  ;;  %v6208_v32 = vadd.f32 %v6206_v1, %v6154_v34  ;;  %v6209_v40 = vadd.f32 %v6206_v1, %v6175_v24 }
 0x653   :  { %v6195_v17 = vrot.slane %v6194_v18, 1 }
 0x654   :  { %v6215_v31 = vcombine.low %v6207_v0, %v6208_v32 }
 0x655   :  { %v6196_v14 = vadd.f32 %v6195_v17, %v6194_v18 }
 0x656   :  { %v6223_v48 = vrot.slane %v6215_v31, %v6222_v21 }
 0x657   :  { %v6210_v62 = vadd.f32 %v6206_v1, %v6196_v14 }
 0x659   :  { %v6216_v10 = vcombine.low %v6209_v40, %v6210_v62 }
 0x65b   :  { %v6230_v63 = vrot.slane %v6216_v10, %v6222_v21 }
 0x65d   :  { %v6231_v55 = vcombine.low %v6223_v48, %v6230_v63 }
 0x65f   :  { %v6238_v45 = vrot.slane %v6231_v55, %v6222_v21 }
 0x661   :  { %6244 = vst.msk [vmem:[#allocation11] sm:$0xf] %vm6242_vm2, %v6238_v45 }
 0x662   :  { %7156 = shalt.err (!%p7153_p8)
}
 0x663   :  { %s7157_s4 = scalar_lea.hbm %s12382_s12, 64 }
 0x664   :  { %p7158_p9 = scmp.ne.s32.totalorder %s12382_s12, %s7157_s4  ;;  %p7161_p10 = scmp.lt.u32.totalorder %s7157_s4, %s12382_s12 }
 0x666   :  { %p7163_p11 = pnand %p7161_p10, %p7158_p9 }
 0x668   :  { %7166 = shalt.err (!%p7163_p11)
}
 0x669   :  { %6254 = dma.vmem_to_hbm [thread:$0]  %s6252_s27, 64, %s12382_s12, [#allocation5]  }
 0x66a   :  { %7173 = dma.done.wait [#allocation5], 64  }
 0x66b   :  { %7174 = vsyncadd [#allocation5], 4294967232 }
 0x66c   :  { %6258 = vsyncpa [#allocation4], 1 }
 0x66d   :  { %6259 = vsyncpa [#allocation7], 1 }
 0x66e   :  { %6260 = vsyncpa [#allocation10], 1 }
 0x66f   :  { %6261 = vsyncpa [#allocation5], 1 }

</bundles_post_ra>
